<compile_context>
chip_gen: v7x
topology: tpu7x:2x2x1
jax: 0.10.0
libtpu: 0.0.40
codegen_flags: <defaults>
</compile_context>

<pallas_src>
import jax
import jax.numpy as jnp
import numpy as np
from jax.experimental import pallas as pl
from jax.experimental.pallas import tpu as pltpu

NEMB = 158
NHEAD = 4
HEADSIZ = NEMB // NHEAD      # 39
NHD = NHEAD * HEADSIZ        # 156
LN_EPS = 1e-5
NEG_INF = -1e30
# dropout = 0.2 in the PyTorch module; identity here (inference semantics).


def _layernorm(h, g, b):
    mu = jnp.mean(h, axis=-1, keepdims=True)
    var = jnp.mean((h - mu) ** 2, axis=-1, keepdims=True)
    return (h - mu) * jax.lax.rsqrt(var + LN_EPS) * g + b


def block_kernel(x_ref, g1_ref, b1_ref,
                 wq_ref, wk_ref, wv_ref,
                 wproj_ref, bproj_ref,
                 g2_ref, b2_ref,
                 w1_ref, bias1_ref, w2_ref, bias2_ref,
                 o_ref):
    BB, T, C = x_ref.shape
    x2d = x_ref[...].reshape(BB * T, C)                       # (BB*T, C) f32

    # --- ln_1 ---
    xn = _layernorm(x2d, g1_ref[0], b1_ref[0])
    xn_b = xn.astype(jnp.bfloat16)

    # --- fused Q/K/V projections for all heads (1/sqrt(H) folded into wq) ---
    q = jnp.dot(xn_b, wq_ref[...], preferred_element_type=jnp.float32)   # (BB*T, 156)
    k = jnp.dot(xn_b, wk_ref[...], preferred_element_type=jnp.float32)
    v = jnp.dot(xn_b, wv_ref[...], preferred_element_type=jnp.float32)
    q3 = q.reshape(BB, T, NHD)
    k3 = k.reshape(BB, T, NHD)
    v3 = v.reshape(BB, T, NHD)

    # causal mask (equivalent to tril buffer in Head)
    row = jax.lax.broadcasted_iota(jnp.int32, (T, T), 0)
    col = jax.lax.broadcasted_iota(jnp.int32, (T, T), 1)
    causal = (col <= row)[None]                                # (1, T, T)

    head_outs = []
    for h in range(NHEAD):                                     # static loop, 4 heads
        sl = slice(h * HEADSIZ, (h + 1) * HEADSIZ)
        qh = q3[:, :, sl].astype(jnp.bfloat16)                 # (BB, T, H)
        kh = k3[:, :, sl].astype(jnp.bfloat16)
        vh = v3[:, :, sl].astype(jnp.bfloat16)
        s = jnp.einsum('bqd,bkd->bqk', qh, kh,
                       preferred_element_type=jnp.float32)     # (BB, T, T)
        s = jnp.where(causal, s, NEG_INF)
        s = s - jnp.max(s, axis=-1, keepdims=True)
        p = jnp.exp(s)
        p = p * pl.reciprocal(jnp.sum(p, axis=-1, keepdims=True), approx=True)
        # TODO(synk): attention/proj dropout (p=0.2) is identity in inference mode.
        oh = jnp.einsum('bqk,bkd->bqd', p.astype(jnp.bfloat16), vh,
                        preferred_element_type=jnp.float32)    # (BB, T, H)
        head_outs.append(oh)

    heads = jnp.concatenate(head_outs, axis=-1).reshape(BB * T, NHD)
    attn = jnp.dot(heads.astype(jnp.bfloat16), wproj_ref[...],
                   preferred_element_type=jnp.float32) + bproj_ref[0]

    # --- first residual ---
    x1 = x2d + attn

    # --- ln_2 + FFN ---
    xn2 = _layernorm(x1, g2_ref[0], b2_ref[0]).astype(jnp.bfloat16)
    h1 = jnp.maximum(
        jnp.dot(xn2, w1_ref[...], preferred_element_type=jnp.float32) + bias1_ref[0],
        0.0)
    h2 = jnp.dot(h1.astype(jnp.bfloat16), w2_ref[...],
                 preferred_element_type=jnp.float32) + bias2_ref[0]

    # --- second residual ---
    o_ref[...] = (x1 + h2).reshape(BB, T, C)


def _pack_params(params):
    """Pack per-head weights into fused lane-dense layouts, fold scale, cast to bf16."""
    (g1, b1, wq, wk, wv, wproj, bproj, g2, b2, w1, bias1, w2, bias2) = params
    scale = HEADSIZ ** -0.5
    wq_cat = (jnp.transpose(wq, (1, 0, 2)).reshape(NEMB, NHD) * scale).astype(jnp.bfloat16)
    wk_cat = jnp.transpose(wk, (1, 0, 2)).reshape(NEMB, NHD).astype(jnp.bfloat16)
    wv_cat = jnp.transpose(wv, (1, 0, 2)).reshape(NEMB, NHD).astype(jnp.bfloat16)
    wproj_cat = wproj.reshape(NHD, NEMB).astype(jnp.bfloat16)
    return (g1, b1, wq_cat, wk_cat, wv_cat, wproj_cat, bproj, g2, b2,
            w1.astype(jnp.bfloat16), bias1, w2.astype(jnp.bfloat16), bias2)


def _pick_bb(B, T, max_rows=1024):
    """Largest divisor of B with BB*T <= max_rows (keeps VMEM comfortably small)."""
    bb = 1
    for cand in range(1, B + 1):
        if B % cand == 0 and cand * T <= max_rows:
            bb = cand
    return bb


def block_forward(x, params):
    B, T, C = x.shape
    assert C == NEMB
    BB = _pick_bb(B, T)
    packed = _pack_params(params)

    def full(shape):
        n = len(shape)
        return pl.BlockSpec(shape, lambda b, _n=n: (0,) * _n)

    in_specs = [
        pl.BlockSpec((BB, T, C), lambda b: (b, 0, 0)),        # x
        full((1, C)), full((1, C)),                           # ln1 gamma, beta
        full((C, NHD)), full((C, NHD)), full((C, NHD)),       # fused Wq, Wk, Wv (bf16)
        full((NHD, C)),                                        # fused Wproj (bf16)
        full((1, C)),                                          # proj bias
        full((1, C)), full((1, C)),                            # ln2 gamma, beta
        full((C, 4 * C)), full((1, 4 * C)),                    # FFN layer 1 (W bf16)
        full((4 * C, C)), full((1, C)),                        # FFN layer 2 (W bf16)
    ]

    return pl.pallas_call(
        block_kernel,
        out_shape=jax.ShapeDtypeStruct((B, T, C), jnp.float32),
        grid_spec=pltpu.PrefetchScalarGridSpec(
            num_scalar_prefetch=0,
            grid=(B // BB,),
            in_specs=in_specs,
            out_specs=pl.BlockSpec((BB, T, C), lambda b: (b, 0, 0)),
        ),
        compiler_params=pltpu.CompilerParams(
            dimension_semantics=("parallel",)),
    )(x, *packed)


def init_params(key):
    ks = jax.random.split(key, 10)
    sc = 0.02
    g1 = jnp.ones((1, NEMB), jnp.float32)
    b1 = jnp.zeros((1, NEMB), jnp.float32)
    wq = sc * jax.random.normal(ks[0], (NHEAD, NEMB, HEADSIZ), jnp.float32)
    wk = sc * jax.random.normal(ks[1], (NHEAD, NEMB, HEADSIZ), jnp.float32)
    wv = sc * jax.random.normal(ks[2], (NHEAD, NEMB, HEADSIZ), jnp.float32)
    # proj: Linear(nhead*headsiz -> nemb), stored split per head: (NHEAD, HEADSIZ, NEMB)
    wproj = sc * jax.random.normal(ks[3], (NHEAD, HEADSIZ, NEMB), jnp.float32)
    bproj = sc * jax.random.normal(ks[4], (1, NEMB), jnp.float32)
    g2 = jnp.ones((1, NEMB), jnp.float32)
    b2 = jnp.zeros((1, NEMB), jnp.float32)
    w1 = sc * jax.random.normal(ks[5], (NEMB, 4 * NEMB), jnp.float32)
    bias1 = sc * jax.random.normal(ks[6], (1, 4 * NEMB), jnp.float32)
    w2 = sc * jax.random.normal(ks[7], (4 * NEMB, NEMB), jnp.float32)
    bias2 = sc * jax.random.normal(ks[8], (1, NEMB), jnp.float32)
    return (g1, b1, wq, wk, wv, wproj, bproj, g2, b2, w1, bias1, w2, bias2)


def block_reference(x, params):
    """Pure-JAX f32 reference mirroring the PyTorch forward (eval mode)."""
    (g1, b1, wq, wk, wv, wproj, bproj, g2, b2, w1, bias1, w2, bias2) = params
    B, T, C = x.shape
    xn = _layernorm(x, g1[0], b1[0])
    causal = jnp.tril(jnp.ones((T, T), bool))
    scale = HEADSIZ ** -0.5
    attn = jnp.zeros_like(x)
    for h in range(NHEAD):
        q = xn @ wq[h]
        k = xn @ wk[h]
        v = xn @ wv[h]
        s = jnp.einsum("btd,bsd->bts", q, k,
                       precision=jax.lax.Precision.HIGHEST) * scale
        s = jnp.where(causal[None], s, -jnp.inf)
        p = jax.nn.softmax(s, axis=-1)
        attn = attn + jnp.einsum("bts,bsd->btd", p, v,
                                 precision=jax.lax.Precision.HIGHEST) @ wproj[h]
    x1 = x + attn + bproj[0]
    xn2 = _layernorm(x1, g2[0], b2[0])
    h1 = jnp.maximum(xn2 @ w1 + bias1[0], 0.0)
    return x1 + h1 @ w2 + bias2[0]


if __name__ == "__main__":
    key = jax.random.PRNGKey(0)
    kx, kp = jax.random.split(key)
    B, T = 8, 16                              # seq T <= blocksiz (128)
    x = jax.random.normal(kx, (B, T, NEMB), jnp.float32)
    params = init_params(kp)

    out = block_forward(x, params)
    out = jax.block_until_ready(out)

    ref = jax.block_until_ready(block_reference(x, params))
    # bf16 MXU inputs with f32 accumulation -> slightly looser tolerance than f32.
    np.testing.assert_allclose(np.asarray(out), np.asarray(ref),
                               rtol=2e-2, atol=2e-2)
    print("KERNEL_OK")
</pallas_src>

<mosaic_0001>
module attributes {stable_mosaic.version = 11 : i64} {
  func.func @block_kernel(%arg0: i32, %arg1: memref<8x16x158xf32, #tpu.memory_space<vmem>>, %arg2: memref<1x158xf32, #tpu.memory_space<vmem>>, %arg3: memref<1x158xf32, #tpu.memory_space<vmem>>, %arg4: memref<158x156xbf16, #tpu.memory_space<vmem>>, %arg5: memref<158x156xbf16, #tpu.memory_space<vmem>>, %arg6: memref<158x156xbf16, #tpu.memory_space<vmem>>, %arg7: memref<156x158xbf16, #tpu.memory_space<vmem>>, %arg8: memref<1x158xf32, #tpu.memory_space<vmem>>, %arg9: memref<1x158xf32, #tpu.memory_space<vmem>>, %arg10: memref<1x158xf32, #tpu.memory_space<vmem>>, %arg11: memref<158x632xbf16, #tpu.memory_space<vmem>>, %arg12: memref<1x632xf32, #tpu.memory_space<vmem>>, %arg13: memref<632x158xbf16, #tpu.memory_space<vmem>>, %arg14: memref<1x158xf32, #tpu.memory_space<vmem>>, %arg15: memref<8x16x158xf32, #tpu.memory_space<vmem>>) attributes {dimension_semantics = [#tpu.dimension_semantics<parallel>], iteration_bounds = array<i64: 1>, scalar_prefetch = 0 : i64, scratch_operands = 0 : i64, tpu.core_type = #tpu.core_type<tc>, window_params = [{transform_indices = @transform_0, window_bounds = array<i64: 8, 16, 158>}, {pipeline_mode = #tpu.pipeline_mode<synchronous>, transform_indices = @transform_1, window_bounds = array<i64: 1, 158>}, {pipeline_mode = #tpu.pipeline_mode<synchronous>, transform_indices = @transform_2, window_bounds = array<i64: 1, 158>}, {pipeline_mode = #tpu.pipeline_mode<synchronous>, transform_indices = @transform_3, window_bounds = array<i64: 158, 156>}, {pipeline_mode = #tpu.pipeline_mode<synchronous>, transform_indices = @transform_4, window_bounds = array<i64: 158, 156>}, {pipeline_mode = #tpu.pipeline_mode<synchronous>, transform_indices = @transform_5, window_bounds = array<i64: 158, 156>}, {pipeline_mode = #tpu.pipeline_mode<synchronous>, transform_indices = @transform_6, window_bounds = array<i64: 156, 158>}, {pipeline_mode = #tpu.pipeline_mode<synchronous>, transform_indices = @transform_7, window_bounds = array<i64: 1, 158>}, {pipeline_mode = #tpu.pipeline_mode<synchronous>, transform_indices = @transform_8, window_bounds = array<i64: 1, 158>}, {pipeline_mode = #tpu.pipeline_mode<synchronous>, transform_indices = @transform_9, window_bounds = array<i64: 1, 158>}, {pipeline_mode = #tpu.pipeline_mode<synchronous>, transform_indices = @transform_10, window_bounds = array<i64: 158, 632>}, {pipeline_mode = #tpu.pipeline_mode<synchronous>, transform_indices = @transform_11, window_bounds = array<i64: 1, 632>}, {pipeline_mode = #tpu.pipeline_mode<synchronous>, transform_indices = @transform_12, window_bounds = array<i64: 632, 158>}, {pipeline_mode = #tpu.pipeline_mode<synchronous>, transform_indices = @transform_13, window_bounds = array<i64: 1, 158>}, {transform_indices = @transform_14, window_bounds = array<i64: 8, 16, 158>}]} {
    %c0 = arith.constant 0 : index
    %c0_0 = arith.constant 0 : index
    %c0_1 = arith.constant 0 : index
    %0 = vector.load %arg1[%c0, %c0_0, %c0_1] : memref<8x16x158xf32, #tpu.memory_space<vmem>>, vector<8x16x158xf32>
    %1 = vector.shape_cast %0 : vector<8x16x158xf32> to vector<128x158xf32>
    %c0_2 = arith.constant 0 : index
    %c0_3 = arith.constant 0 : index
    %2 = vector.load %arg2[%c0_2, %c0_3] : memref<1x158xf32, #tpu.memory_space<vmem>>, vector<1x158xf32>
    %3 = vector.shape_cast %2 : vector<1x158xf32> to vector<158xf32>
    %c0_4 = arith.constant 0 : index
    %c0_5 = arith.constant 0 : index
    %4 = vector.load %arg3[%c0_4, %c0_5] : memref<1x158xf32, #tpu.memory_space<vmem>>, vector<1x158xf32>
    %5 = vector.shape_cast %4 : vector<1x158xf32> to vector<158xf32>
    %cst = arith.constant dense<0.000000e+00> : vector<128xf32>
    %6 = vector.multi_reduction <add>, %1, %cst [1] : vector<128x158xf32> to vector<128xf32>
    %7 = vector.shape_cast %6 : vector<128xf32> to vector<128x1xf32>
    %cst_6 = arith.constant 1.580000e+02 : f32
    %8 = vector.broadcast %cst_6 : f32 to vector<128x1xf32>
    %9 = arith.divf %7, %8 : vector<128x1xf32>
    %10 = vector.broadcast %9 : vector<128x1xf32> to vector<128x158xf32>
    %11 = arith.subf %1, %10 : vector<128x158xf32>
    %12 = arith.mulf %11, %11 : vector<128x158xf32>
    %cst_7 = arith.constant dense<0.000000e+00> : vector<128xf32>
    %13 = vector.multi_reduction <add>, %12, %cst_7 [1] : vector<128x158xf32> to vector<128xf32>
    %14 = vector.shape_cast %13 : vector<128xf32> to vector<128x1xf32>
    %cst_8 = arith.constant 1.580000e+02 : f32
    %15 = vector.broadcast %cst_8 : f32 to vector<128x1xf32>
    %16 = arith.divf %14, %15 : vector<128x1xf32>
    %17 = vector.broadcast %9 : vector<128x1xf32> to vector<128x158xf32>
    %18 = arith.subf %1, %17 : vector<128x158xf32>
    %cst_9 = arith.constant 9.99999974E-6 : f32
    %19 = vector.broadcast %cst_9 : f32 to vector<128x1xf32>
    %20 = arith.addf %16, %19 : vector<128x1xf32>
    %21 = math.rsqrt %20 : vector<128x1xf32>
    %22 = vector.broadcast %21 : vector<128x1xf32> to vector<128x158xf32>
    %23 = arith.mulf %18, %22 : vector<128x158xf32>
    %24 = vector.shape_cast %3 : vector<158xf32> to vector<1x158xf32>
    %25 = vector.broadcast %24 : vector<1x158xf32> to vector<128x158xf32>
    %26 = arith.mulf %23, %25 : vector<128x158xf32>
    %27 = vector.shape_cast %5 : vector<158xf32> to vector<1x158xf32>
    %28 = vector.broadcast %27 : vector<1x158xf32> to vector<128x158xf32>
    %29 = arith.addf %26, %28 : vector<128x158xf32>
    %30 = arith.truncf %29 : vector<128x158xf32> to vector<128x158xbf16>
    %c0_10 = arith.constant 0 : index
    %c0_11 = arith.constant 0 : index
    %31 = vector.load %arg4[%c0_10, %c0_11] : memref<158x156xbf16, #tpu.memory_space<vmem>>, vector<158x156xbf16>
    %cst_12 = arith.constant dense<0.000000e+00> : vector<128x156xf32>
    %32 = tpu.matmul %30, %31, %cst_12 {dimension_numbers = #tpu.dot_dimension_numbers<[1], [0], [0], [1], [0, 0, 1, 1], [], []>} : vector<128x158xbf16>, vector<158x156xbf16>, vector<128x156xf32> -> vector<128x156xf32>
    %c0_13 = arith.constant 0 : index
    %c0_14 = arith.constant 0 : index
    %33 = vector.load %arg5[%c0_13, %c0_14] : memref<158x156xbf16, #tpu.memory_space<vmem>>, vector<158x156xbf16>
    %cst_15 = arith.constant dense<0.000000e+00> : vector<128x156xf32>
    %34 = tpu.matmul %30, %33, %cst_15 {dimension_numbers = #tpu.dot_dimension_numbers<[1], [0], [0], [1], [0, 0, 1, 1], [], []>} : vector<128x158xbf16>, vector<158x156xbf16>, vector<128x156xf32> -> vector<128x156xf32>
    %c0_16 = arith.constant 0 : index
    %c0_17 = arith.constant 0 : index
    %35 = vector.load %arg6[%c0_16, %c0_17] : memref<158x156xbf16, #tpu.memory_space<vmem>>, vector<158x156xbf16>
    %cst_18 = arith.constant dense<0.000000e+00> : vector<128x156xf32>
    %36 = tpu.matmul %30, %35, %cst_18 {dimension_numbers = #tpu.dot_dimension_numbers<[1], [0], [0], [1], [0, 0, 1, 1], [], []>} : vector<128x158xbf16>, vector<158x156xbf16>, vector<128x156xf32> -> vector<128x156xf32>
    %37 = vector.shape_cast %32 : vector<128x156xf32> to vector<8x16x156xf32>
    %38 = vector.shape_cast %34 : vector<128x156xf32> to vector<8x16x156xf32>
    %39 = vector.shape_cast %36 : vector<128x156xf32> to vector<8x16x156xf32>
    %40 = tpu.iota {dimensions = array<i32: 0>} : vector<16x16xi32>
    %41 = tpu.iota {dimensions = array<i32: 1>} : vector<16x16xi32>
    %42 = arith.cmpi sle, %41, %40 : vector<16x16xi32>
    %43 = vector.shape_cast %42 : vector<16x16xi1> to vector<1x16x16xi1>
    %44 = vector.extract_strided_slice %37 {offsets = [0, 0, 0], sizes = [8, 16, 39], strides = [1, 1, 1]} : vector<8x16x156xf32> to vector<8x16x39xf32>
    %45 = arith.truncf %44 : vector<8x16x39xf32> to vector<8x16x39xbf16>
    %46 = vector.extract_strided_slice %38 {offsets = [0, 0, 0], sizes = [8, 16, 39], strides = [1, 1, 1]} : vector<8x16x156xf32> to vector<8x16x39xf32>
    %47 = arith.truncf %46 : vector<8x16x39xf32> to vector<8x16x39xbf16>
    %48 = vector.extract_strided_slice %39 {offsets = [0, 0, 0], sizes = [8, 16, 39], strides = [1, 1, 1]} : vector<8x16x156xf32> to vector<8x16x39xf32>
    %49 = arith.truncf %48 : vector<8x16x39xf32> to vector<8x16x39xbf16>
    "tpu.trace_start"() <{level = 10 : i32, message = "bqd,bkd->bqk"}> : () -> ()
    %cst_19 = arith.constant dense<0.000000e+00> : vector<8x16x16xf32>
    %50 = tpu.matmul %45, %47, %cst_19 {dimension_numbers = #tpu.dot_dimension_numbers<[2], [2], [1], [1], [0, 0, 0, 1, 1, 1], [0], [0]>} : vector<8x16x39xbf16>, vector<8x16x39xbf16>, vector<8x16x16xf32> -> vector<8x16x16xf32>
    %cst_20 = arith.constant -1.000000e+30 : f32
    "tpu.trace_stop"() : () -> ()
    %51 = vector.shape_cast %43 : vector<1x16x16xi1> to vector<1x16x16xi1>
    %52 = vector.broadcast %51 : vector<1x16x16xi1> to vector<8x16x16xi1>
    %53 = vector.broadcast %cst_20 : f32 to vector<8x16x16xf32>
    %54 = arith.select %52, %50, %53 : vector<8x16x16xi1>, vector<8x16x16xf32>
    %cst_21 = arith.constant dense<0xFF800000> : vector<8x16xf32>
    %55 = vector.multi_reduction <maximumf>, %54, %cst_21 [2] : vector<8x16x16xf32> to vector<8x16xf32>
    %56 = vector.shape_cast %55 : vector<8x16xf32> to vector<8x16x1xf32>
    %57 = vector.broadcast %56 : vector<8x16x1xf32> to vector<8x16x16xf32>
    %58 = arith.subf %54, %57 : vector<8x16x16xf32>
    %59 = math.exp %58 : vector<8x16x16xf32>
    %cst_22 = arith.constant dense<0.000000e+00> : vector<8x16xf32>
    %60 = vector.multi_reduction <add>, %59, %cst_22 [2] : vector<8x16x16xf32> to vector<8x16xf32>
    %61 = vector.shape_cast %60 : vector<8x16xf32> to vector<8x16x1xf32>
    %62 = tpu.reciprocal %61 {approx = true} : vector<8x16x1xf32> -> vector<8x16x1xf32>
    %63 = vector.broadcast %62 : vector<8x16x1xf32> to vector<8x16x16xf32>
    %64 = arith.mulf %59, %63 : vector<8x16x16xf32>
    %65 = arith.truncf %64 : vector<8x16x16xf32> to vector<8x16x16xbf16>
    "tpu.trace_start"() <{level = 10 : i32, message = "bqk,bkd->bqd"}> : () -> ()
    %cst_23 = arith.constant dense<0.000000e+00> : vector<8x16x39xf32>
    %66 = tpu.matmul %65, %49, %cst_23 {dimension_numbers = #tpu.dot_dimension_numbers<[2], [1], [1], [2], [0, 0, 0, 1, 1, 2], [0], [0]>} : vector<8x16x16xbf16>, vector<8x16x39xbf16>, vector<8x16x39xf32> -> vector<8x16x39xf32>
    "tpu.trace_stop"() : () -> ()
    %67 = vector.extract_strided_slice %37 {offsets = [0, 0, 39], sizes = [8, 16, 39], strides = [1, 1, 1]} : vector<8x16x156xf32> to vector<8x16x39xf32>
    %68 = arith.truncf %67 : vector<8x16x39xf32> to vector<8x16x39xbf16>
    %69 = vector.extract_strided_slice %38 {offsets = [0, 0, 39], sizes = [8, 16, 39], strides = [1, 1, 1]} : vector<8x16x156xf32> to vector<8x16x39xf32>
    %70 = arith.truncf %69 : vector<8x16x39xf32> to vector<8x16x39xbf16>
    %71 = vector.extract_strided_slice %39 {offsets = [0, 0, 39], sizes = [8, 16, 39], strides = [1, 1, 1]} : vector<8x16x156xf32> to vector<8x16x39xf32>
    %72 = arith.truncf %71 : vector<8x16x39xf32> to vector<8x16x39xbf16>
    "tpu.trace_start"() <{level = 10 : i32, message = "bqd,bkd->bqk"}> : () -> ()
    %cst_24 = arith.constant dense<0.000000e+00> : vector<8x16x16xf32>
    %73 = tpu.matmul %68, %70, %cst_24 {dimension_numbers = #tpu.dot_dimension_numbers<[2], [2], [1], [1], [0, 0, 0, 1, 1, 1], [0], [0]>} : vector<8x16x39xbf16>, vector<8x16x39xbf16>, vector<8x16x16xf32> -> vector<8x16x16xf32>
    %cst_25 = arith.constant -1.000000e+30 : f32
    "tpu.trace_stop"() : () -> ()
    %74 = vector.shape_cast %43 : vector<1x16x16xi1> to vector<1x16x16xi1>
    %75 = vector.broadcast %74 : vector<1x16x16xi1> to vector<8x16x16xi1>
    %76 = vector.broadcast %cst_25 : f32 to vector<8x16x16xf32>
    %77 = arith.select %75, %73, %76 : vector<8x16x16xi1>, vector<8x16x16xf32>
    %cst_26 = arith.constant dense<0xFF800000> : vector<8x16xf32>
    %78 = vector.multi_reduction <maximumf>, %77, %cst_26 [2] : vector<8x16x16xf32> to vector<8x16xf32>
    %79 = vector.shape_cast %78 : vector<8x16xf32> to vector<8x16x1xf32>
    %80 = vector.broadcast %79 : vector<8x16x1xf32> to vector<8x16x16xf32>
    %81 = arith.subf %77, %80 : vector<8x16x16xf32>
    %82 = math.exp %81 : vector<8x16x16xf32>
    %cst_27 = arith.constant dense<0.000000e+00> : vector<8x16xf32>
    %83 = vector.multi_reduction <add>, %82, %cst_27 [2] : vector<8x16x16xf32> to vector<8x16xf32>
    %84 = vector.shape_cast %83 : vector<8x16xf32> to vector<8x16x1xf32>
    %85 = tpu.reciprocal %84 {approx = true} : vector<8x16x1xf32> -> vector<8x16x1xf32>
    %86 = vector.broadcast %85 : vector<8x16x1xf32> to vector<8x16x16xf32>
    %87 = arith.mulf %82, %86 : vector<8x16x16xf32>
    %88 = arith.truncf %87 : vector<8x16x16xf32> to vector<8x16x16xbf16>
    "tpu.trace_start"() <{level = 10 : i32, message = "bqk,bkd->bqd"}> : () -> ()
    %cst_28 = arith.constant dense<0.000000e+00> : vector<8x16x39xf32>
    %89 = tpu.matmul %88, %72, %cst_28 {dimension_numbers = #tpu.dot_dimension_numbers<[2], [1], [1], [2], [0, 0, 0, 1, 1, 2], [0], [0]>} : vector<8x16x16xbf16>, vector<8x16x39xbf16>, vector<8x16x39xf32> -> vector<8x16x39xf32>
    "tpu.trace_stop"() : () -> ()
    %90 = vector.extract_strided_slice %37 {offsets = [0, 0, 78], sizes = [8, 16, 39], strides = [1, 1, 1]} : vector<8x16x156xf32> to vector<8x16x39xf32>
    %91 = arith.truncf %90 : vector<8x16x39xf32> to vector<8x16x39xbf16>
    %92 = vector.extract_strided_slice %38 {offsets = [0, 0, 78], sizes = [8, 16, 39], strides = [1, 1, 1]} : vector<8x16x156xf32> to vector<8x16x39xf32>
    %93 = arith.truncf %92 : vector<8x16x39xf32> to vector<8x16x39xbf16>
    %94 = vector.extract_strided_slice %39 {offsets = [0, 0, 78], sizes = [8, 16, 39], strides = [1, 1, 1]} : vector<8x16x156xf32> to vector<8x16x39xf32>
    %95 = arith.truncf %94 : vector<8x16x39xf32> to vector<8x16x39xbf16>
    "tpu.trace_start"() <{level = 10 : i32, message = "bqd,bkd->bqk"}> : () -> ()
    %cst_29 = arith.constant dense<0.000000e+00> : vector<8x16x16xf32>
    %96 = tpu.matmul %91, %93, %cst_29 {dimension_numbers = #tpu.dot_dimension_numbers<[2], [2], [1], [1], [0, 0, 0, 1, 1, 1], [0], [0]>} : vector<8x16x39xbf16>, vector<8x16x39xbf16>, vector<8x16x16xf32> -> vector<8x16x16xf32>
    %cst_30 = arith.constant -1.000000e+30 : f32
    "tpu.trace_stop"() : () -> ()
    %97 = vector.shape_cast %43 : vector<1x16x16xi1> to vector<1x16x16xi1>
    %98 = vector.broadcast %97 : vector<1x16x16xi1> to vector<8x16x16xi1>
    %99 = vector.broadcast %cst_30 : f32 to vector<8x16x16xf32>
    %100 = arith.select %98, %96, %99 : vector<8x16x16xi1>, vector<8x16x16xf32>
    %cst_31 = arith.constant dense<0xFF800000> : vector<8x16xf32>
    %101 = vector.multi_reduction <maximumf>, %100, %cst_31 [2] : vector<8x16x16xf32> to vector<8x16xf32>
    %102 = vector.shape_cast %101 : vector<8x16xf32> to vector<8x16x1xf32>
    %103 = vector.broadcast %102 : vector<8x16x1xf32> to vector<8x16x16xf32>
    %104 = arith.subf %100, %103 : vector<8x16x16xf32>
    %105 = math.exp %104 : vector<8x16x16xf32>
    %cst_32 = arith.constant dense<0.000000e+00> : vector<8x16xf32>
    %106 = vector.multi_reduction <add>, %105, %cst_32 [2] : vector<8x16x16xf32> to vector<8x16xf32>
    %107 = vector.shape_cast %106 : vector<8x16xf32> to vector<8x16x1xf32>
    %108 = tpu.reciprocal %107 {approx = true} : vector<8x16x1xf32> -> vector<8x16x1xf32>
    %109 = vector.broadcast %108 : vector<8x16x1xf32> to vector<8x16x16xf32>
    %110 = arith.mulf %105, %109 : vector<8x16x16xf32>
    %111 = arith.truncf %110 : vector<8x16x16xf32> to vector<8x16x16xbf16>
    "tpu.trace_start"() <{level = 10 : i32, message = "bqk,bkd->bqd"}> : () -> ()
    %cst_33 = arith.constant dense<0.000000e+00> : vector<8x16x39xf32>
    %112 = tpu.matmul %111, %95, %cst_33 {dimension_numbers = #tpu.dot_dimension_numbers<[2], [1], [1], [2], [0, 0, 0, 1, 1, 2], [0], [0]>} : vector<8x16x16xbf16>, vector<8x16x39xbf16>, vector<8x16x39xf32> -> vector<8x16x39xf32>
    "tpu.trace_stop"() : () -> ()
    %113 = vector.extract_strided_slice %37 {offsets = [0, 0, 117], sizes = [8, 16, 39], strides = [1, 1, 1]} : vector<8x16x156xf32> to vector<8x16x39xf32>
    %114 = arith.truncf %113 : vector<8x16x39xf32> to vector<8x16x39xbf16>
    %115 = vector.extract_strided_slice %38 {offsets = [0, 0, 117], sizes = [8, 16, 39], strides = [1, 1, 1]} : vector<8x16x156xf32> to vector<8x16x39xf32>
    %116 = arith.truncf %115 : vector<8x16x39xf32> to vector<8x16x39xbf16>
    %117 = vector.extract_strided_slice %39 {offsets = [0, 0, 117], sizes = [8, 16, 39], strides = [1, 1, 1]} : vector<8x16x156xf32> to vector<8x16x39xf32>
    %118 = arith.truncf %117 : vector<8x16x39xf32> to vector<8x16x39xbf16>
    "tpu.trace_start"() <{level = 10 : i32, message = "bqd,bkd->bqk"}> : () -> ()
    %cst_34 = arith.constant dense<0.000000e+00> : vector<8x16x16xf32>
    %119 = tpu.matmul %114, %116, %cst_34 {dimension_numbers = #tpu.dot_dimension_numbers<[2], [2], [1], [1], [0, 0, 0, 1, 1, 1], [0], [0]>} : vector<8x16x39xbf16>, vector<8x16x39xbf16>, vector<8x16x16xf32> -> vector<8x16x16xf32>
    %cst_35 = arith.constant -1.000000e+30 : f32
    "tpu.trace_stop"() : () -> ()
    %120 = vector.shape_cast %43 : vector<1x16x16xi1> to vector<1x16x16xi1>
    %121 = vector.broadcast %120 : vector<1x16x16xi1> to vector<8x16x16xi1>
    %122 = vector.broadcast %cst_35 : f32 to vector<8x16x16xf32>
    %123 = arith.select %121, %119, %122 : vector<8x16x16xi1>, vector<8x16x16xf32>
    %cst_36 = arith.constant dense<0xFF800000> : vector<8x16xf32>
    %124 = vector.multi_reduction <maximumf>, %123, %cst_36 [2] : vector<8x16x16xf32> to vector<8x16xf32>
    %125 = vector.shape_cast %124 : vector<8x16xf32> to vector<8x16x1xf32>
    %126 = vector.broadcast %125 : vector<8x16x1xf32> to vector<8x16x16xf32>
    %127 = arith.subf %123, %126 : vector<8x16x16xf32>
    %128 = math.exp %127 : vector<8x16x16xf32>
    %cst_37 = arith.constant dense<0.000000e+00> : vector<8x16xf32>
    %129 = vector.multi_reduction <add>, %128, %cst_37 [2] : vector<8x16x16xf32> to vector<8x16xf32>
    %130 = vector.shape_cast %129 : vector<8x16xf32> to vector<8x16x1xf32>
    %131 = tpu.reciprocal %130 {approx = true} : vector<8x16x1xf32> -> vector<8x16x1xf32>
    %132 = vector.broadcast %131 : vector<8x16x1xf32> to vector<8x16x16xf32>
    %133 = arith.mulf %128, %132 : vector<8x16x16xf32>
    %134 = arith.truncf %133 : vector<8x16x16xf32> to vector<8x16x16xbf16>
    "tpu.trace_start"() <{level = 10 : i32, message = "bqk,bkd->bqd"}> : () -> ()
    %cst_38 = arith.constant dense<0.000000e+00> : vector<8x16x39xf32>
    %135 = tpu.matmul %134, %118, %cst_38 {dimension_numbers = #tpu.dot_dimension_numbers<[2], [1], [1], [2], [0, 0, 0, 1, 1, 2], [0], [0]>} : vector<8x16x16xbf16>, vector<8x16x39xbf16>, vector<8x16x39xf32> -> vector<8x16x39xf32>
    "tpu.trace_stop"() : () -> ()
    %136 = tpu.concatenate %66, %89, %112, %135 in 2 : vector<8x16x39xf32>, vector<8x16x39xf32>, vector<8x16x39xf32>, vector<8x16x39xf32> -> vector<8x16x156xf32>
    %137 = vector.shape_cast %136 : vector<8x16x156xf32> to vector<128x156xf32>
    %138 = arith.truncf %137 : vector<128x156xf32> to vector<128x156xbf16>
    %c0_39 = arith.constant 0 : index
    %c0_40 = arith.constant 0 : index
    %139 = vector.load %arg7[%c0_39, %c0_40] : memref<156x158xbf16, #tpu.memory_space<vmem>>, vector<156x158xbf16>
    %cst_41 = arith.constant dense<0.000000e+00> : vector<128x158xf32>
    %140 = tpu.matmul %138, %139, %cst_41 {dimension_numbers = #tpu.dot_dimension_numbers<[1], [0], [0], [1], [0, 0, 1, 1], [], []>} : vector<128x156xbf16>, vector<156x158xbf16>, vector<128x158xf32> -> vector<128x158xf32>
    %c0_42 = arith.constant 0 : index
    %c0_43 = arith.constant 0 : index
    %141 = vector.load %arg8[%c0_42, %c0_43] : memref<1x158xf32, #tpu.memory_space<vmem>>, vector<1x158xf32>
    %142 = vector.shape_cast %141 : vector<1x158xf32> to vector<158xf32>
    %143 = vector.shape_cast %142 : vector<158xf32> to vector<1x158xf32>
    %144 = vector.broadcast %143 : vector<1x158xf32> to vector<128x158xf32>
    %145 = arith.addf %140, %144 : vector<128x158xf32>
    %146 = arith.addf %1, %145 : vector<128x158xf32>
    %c0_44 = arith.constant 0 : index
    %c0_45 = arith.constant 0 : index
    %147 = vector.load %arg9[%c0_44, %c0_45] : memref<1x158xf32, #tpu.memory_space<vmem>>, vector<1x158xf32>
    %148 = vector.shape_cast %147 : vector<1x158xf32> to vector<158xf32>
    %c0_46 = arith.constant 0 : index
    %c0_47 = arith.constant 0 : index
    %149 = vector.load %arg10[%c0_46, %c0_47] : memref<1x158xf32, #tpu.memory_space<vmem>>, vector<1x158xf32>
    %150 = vector.shape_cast %149 : vector<1x158xf32> to vector<158xf32>
    %cst_48 = arith.constant dense<0.000000e+00> : vector<128xf32>
    %151 = vector.multi_reduction <add>, %146, %cst_48 [1] : vector<128x158xf32> to vector<128xf32>
    %152 = vector.shape_cast %151 : vector<128xf32> to vector<128x1xf32>
    %cst_49 = arith.constant 1.580000e+02 : f32
    %153 = vector.broadcast %cst_49 : f32 to vector<128x1xf32>
    %154 = arith.divf %152, %153 : vector<128x1xf32>
    %155 = vector.broadcast %154 : vector<128x1xf32> to vector<128x158xf32>
    %156 = arith.subf %146, %155 : vector<128x158xf32>
    %157 = arith.mulf %156, %156 : vector<128x158xf32>
    %cst_50 = arith.constant dense<0.000000e+00> : vector<128xf32>
    %158 = vector.multi_reduction <add>, %157, %cst_50 [1] : vector<128x158xf32> to vector<128xf32>
    %159 = vector.shape_cast %158 : vector<128xf32> to vector<128x1xf32>
    %cst_51 = arith.constant 1.580000e+02 : f32
    %160 = vector.broadcast %cst_51 : f32 to vector<128x1xf32>
    %161 = arith.divf %159, %160 : vector<128x1xf32>
    %162 = vector.broadcast %154 : vector<128x1xf32> to vector<128x158xf32>
    %163 = arith.subf %146, %162 : vector<128x158xf32>
    %cst_52 = arith.constant 9.99999974E-6 : f32
    %164 = vector.broadcast %cst_52 : f32 to vector<128x1xf32>
    %165 = arith.addf %161, %164 : vector<128x1xf32>
    %166 = math.rsqrt %165 : vector<128x1xf32>
    %167 = vector.broadcast %166 : vector<128x1xf32> to vector<128x158xf32>
    %168 = arith.mulf %163, %167 : vector<128x158xf32>
    %169 = vector.shape_cast %148 : vector<158xf32> to vector<1x158xf32>
    %170 = vector.broadcast %169 : vector<1x158xf32> to vector<128x158xf32>
    %171 = arith.mulf %168, %170 : vector<128x158xf32>
    %172 = vector.shape_cast %150 : vector<158xf32> to vector<1x158xf32>
    %173 = vector.broadcast %172 : vector<1x158xf32> to vector<128x158xf32>
    %174 = arith.addf %171, %173 : vector<128x158xf32>
    %175 = arith.truncf %174 : vector<128x158xf32> to vector<128x158xbf16>
    %c0_53 = arith.constant 0 : index
    %c0_54 = arith.constant 0 : index
    %176 = vector.load %arg11[%c0_53, %c0_54] : memref<158x632xbf16, #tpu.memory_space<vmem>>, vector<158x632xbf16>
    %cst_55 = arith.constant dense<0.000000e+00> : vector<128x632xf32>
    %177 = tpu.matmul %175, %176, %cst_55 {dimension_numbers = #tpu.dot_dimension_numbers<[1], [0], [0], [1], [0, 0, 1, 1], [], []>} : vector<128x158xbf16>, vector<158x632xbf16>, vector<128x632xf32> -> vector<128x632xf32>
    %c0_56 = arith.constant 0 : index
    %c0_57 = arith.constant 0 : index
    %178 = vector.load %arg12[%c0_56, %c0_57] : memref<1x632xf32, #tpu.memory_space<vmem>>, vector<1x632xf32>
    %179 = vector.shape_cast %178 : vector<1x632xf32> to vector<632xf32>
    %180 = vector.shape_cast %179 : vector<632xf32> to vector<1x632xf32>
    %181 = vector.broadcast %180 : vector<1x632xf32> to vector<128x632xf32>
    %182 = arith.addf %177, %181 : vector<128x632xf32>
    %cst_58 = arith.constant 0.000000e+00 : f32
    %183 = vector.broadcast %cst_58 : f32 to vector<128x632xf32>
    %184 = arith.maximumf %182, %183 : vector<128x632xf32>
    %185 = arith.truncf %184 : vector<128x632xf32> to vector<128x632xbf16>
    %c0_59 = arith.constant 0 : index
    %c0_60 = arith.constant 0 : index
    %186 = vector.load %arg13[%c0_59, %c0_60] : memref<632x158xbf16, #tpu.memory_space<vmem>>, vector<632x158xbf16>
    %cst_61 = arith.constant dense<0.000000e+00> : vector<128x158xf32>
    %187 = tpu.matmul %185, %186, %cst_61 {dimension_numbers = #tpu.dot_dimension_numbers<[1], [0], [0], [1], [0, 0, 1, 1], [], []>} : vector<128x632xbf16>, vector<632x158xbf16>, vector<128x158xf32> -> vector<128x158xf32>
    %c0_62 = arith.constant 0 : index
    %c0_63 = arith.constant 0 : index
    %188 = vector.load %arg14[%c0_62, %c0_63] : memref<1x158xf32, #tpu.memory_space<vmem>>, vector<1x158xf32>
    %189 = vector.shape_cast %188 : vector<1x158xf32> to vector<158xf32>
    %190 = vector.shape_cast %189 : vector<158xf32> to vector<1x158xf32>
    %191 = vector.broadcast %190 : vector<1x158xf32> to vector<128x158xf32>
    %192 = arith.addf %187, %191 : vector<128x158xf32>
    %193 = arith.addf %146, %192 : vector<128x158xf32>
    %194 = vector.shape_cast %193 : vector<128x158xf32> to vector<8x16x158xf32>
    %c0_64 = arith.constant 0 : index
    %c0_65 = arith.constant 0 : index
    %c0_66 = arith.constant 0 : index
    %195 = vector.load %arg15[%c0_64, %c0_65, %c0_66] : memref<8x16x158xf32, #tpu.memory_space<vmem>>, vector<8x16x158xf32>
    tpu.vector_store %arg15[%c0_64, %c0_65, %c0_66], %194 {strides = array<i32>} : memref<8x16x158xf32, #tpu.memory_space<vmem>>, vector<8x16x158xf32>,
    return
  }
  func.func @transform_0(%arg0: i32) -> (i32, i32, i32) {
    %c0_i32 = arith.constant 0 : i32
    %c0_i32_0 = arith.constant 0 : i32
    %c0_i32_1 = arith.constant 0 : i32
    return %arg0, %c0_i32, %c0_i32_0 : i32, i32, i32
  }
  func.func @transform_1(%arg0: i32) -> (i32, i32) {
    %c0_i32 = arith.constant 0 : i32
    %c0_i32_0 = arith.constant 0 : i32
    %c0_i32_1 = arith.constant 0 : i32
    return %c0_i32, %c0_i32_0 : i32, i32
  }
  func.func @transform_2(%arg0: i32) -> (i32, i32) {
    %c0_i32 = arith.constant 0 : i32
    %c0_i32_0 = arith.constant 0 : i32
    %c0_i32_1 = arith.constant 0 : i32
    return %c0_i32, %c0_i32_0 : i32, i32
  }
  func.func @transform_3(%arg0: i32) -> (i32, i32) {
    %c0_i32 = arith.constant 0 : i32
    %c0_i32_0 = arith.constant 0 : i32
    %c0_i32_1 = arith.constant 0 : i32
    return %c0_i32, %c0_i32_0 : i32, i32
  }
  func.func @transform_4(%arg0: i32) -> (i32, i32) {
    %c0_i32 = arith.constant 0 : i32
    %c0_i32_0 = arith.constant 0 : i32
    %c0_i32_1 = arith.constant 0 : i32
    return %c0_i32, %c0_i32_0 : i32, i32
  }
  func.func @transform_5(%arg0: i32) -> (i32, i32) {
    %c0_i32 = arith.constant 0 : i32
    %c0_i32_0 = arith.constant 0 : i32
    %c0_i32_1 = arith.constant 0 : i32
    return %c0_i32, %c0_i32_0 : i32, i32
  }
  func.func @transform_6(%arg0: i32) -> (i32, i32) {
    %c0_i32 = arith.constant 0 : i32
    %c0_i32_0 = arith.constant 0 : i32
    %c0_i32_1 = arith.constant 0 : i32
    return %c0_i32, %c0_i32_0 : i32, i32
  }
  func.func @transform_7(%arg0: i32) -> (i32, i32) {
    %c0_i32 = arith.constant 0 : i32
    %c0_i32_0 = arith.constant 0 : i32
    %c0_i32_1 = arith.constant 0 : i32
    return %c0_i32, %c0_i32_0 : i32, i32
  }
  func.func @transform_8(%arg0: i32) -> (i32, i32) {
    %c0_i32 = arith.constant 0 : i32
    %c0_i32_0 = arith.constant 0 : i32
    %c0_i32_1 = arith.constant 0 : i32
    return %c0_i32, %c0_i32_0 : i32, i32
  }
  func.func @transform_9(%arg0: i32) -> (i32, i32) {
    %c0_i32 = arith.constant 0 : i32
    %c0_i32_0 = arith.constant 0 : i32
    %c0_i32_1 = arith.constant 0 : i32
    return %c0_i32, %c0_i32_0 : i32, i32
  }
  func.func @transform_10(%arg0: i32) -> (i32, i32) {
    %c0_i32 = arith.constant 0 : i32
    %c0_i32_0 = arith.constant 0 : i32
    %c0_i32_1 = arith.constant 0 : i32
    return %c0_i32, %c0_i32_0 : i32, i32
  }
  func.func @transform_11(%arg0: i32) -> (i32, i32) {
    %c0_i32 = arith.constant 0 : i32
    %c0_i32_0 = arith.constant 0 : i32
    %c0_i32_1 = arith.constant 0 : i32
    return %c0_i32, %c0_i32_0 : i32, i32
  }
  func.func @transform_12(%arg0: i32) -> (i32, i32) {
    %c0_i32 = arith.constant 0 : i32
    %c0_i32_0 = arith.constant 0 : i32
    %c0_i32_1 = arith.constant 0 : i32
    return %c0_i32, %c0_i32_0 : i32, i32
  }
  func.func @transform_13(%arg0: i32) -> (i32, i32) {
    %c0_i32 = arith.constant 0 : i32
    %c0_i32_0 = arith.constant 0 : i32
    %c0_i32_1 = arith.constant 0 : i32
    return %c0_i32, %c0_i32_0 : i32, i32
  }
  func.func @transform_14(%arg0: i32) -> (i32, i32, i32) {
    %c0_i32 = arith.constant 0 : i32
    %c0_i32_0 = arith.constant 0 : i32
    %c0_i32_1 = arith.constant 0 : i32
    return %arg0, %c0_i32, %c0_i32_0 : i32, i32, i32
  }
}

</mosaic_0001>

<bundles_post_ra>
// kernel: tpu_custom_call.1
= control target key start
LH: loop header
LB: loop body
LE: loop exit
PB: predicated region body
PF: predicated region fallthrough
CT: control target
= control target key end

     0   :  { %19 = vsyncpa [#allocation3], 0  ;;  %s13932_s0 = inlined_call_operand.vmem [shape: f32[8,16,158], index: 0, kind: input, shape index: {}]   ;;  %s13933_s1 = inlined_call_operand.vmem [shape: f32[1,158], index: 1, kind: input, shape index: {}]   ;;  %s13934_s2 = inlined_call_operand.vmem [shape: f32[1,158], index: 2, kind: input, shape index: {}]   ;;  %s13935_s3 = inlined_call_operand.vmem [shape: bf16[158,156], index: 3, kind: input, shape index: {}]   ;;  %s13936_s4 = inlined_call_operand.vmem [shape: bf16[158,156], index: 4, kind: input, shape index: {}]   ;;  %s13937_s5 = inlined_call_operand.hbm [shape: bf16[158,156], index: 5, kind: input, shape index: {}]   ;;  %s13938_s6 = inlined_call_operand.hbm [shape: bf16[156,158], index: 6, kind: input, shape index: {}]   ;;  %s13939_s7 = inlined_call_operand.vmem [shape: f32[1,158], index: 7, kind: input, shape index: {}]   ;;  %s13940_s8 = inlined_call_operand.vmem [shape: f32[1,158], index: 8, kind: input, shape index: {}]   ;;  %s13941_s9 = inlined_call_operand.vmem [shape: f32[1,158], index: 9, kind: input, shape index: {}]   ;;  %s13942_s10 = inlined_call_operand.vmem [shape: bf16[158,632], index: 10, kind: input, shape index: {}]   ;;  %s13943_s11 = inlined_call_operand.vmem [shape: f32[1,632], index: 11, kind: input, shape index: {}]   ;;  %s13944_s12 = inlined_call_operand.vmem [shape: bf16[632,158], index: 12, kind: input, shape index: {}]   ;;  %s13945_s13 = inlined_call_operand.vmem [shape: f32[1,158], index: 13, kind: input, shape index: {}]   ;;  %s13946_s14 = inlined_call_operand.hbm [shape: f32[8,16,158], index: 14, kind: output, shape index: {}]  }
   0x1   :  { %20 = vsyncpa [#allocation6], 0 }
   0x2   :  { %21 = vsyncpa [#allocation4], 0  ;;  %s9869_s29 = smov [#allocation2]   ;;  %s9797_s17 = scalar_lea.hbm %s13937_s5, 2560 }
   0x3   :  { %s37_s30 = sshll.u32 %s9869_s29, 4  ;;  %p9798_p0 = scmp.ne.s32.totalorder %s13937_s5, %s9797_s17  ;;  %s38_s30 = int_to_ptr.vmem [resolvable:$true] %s37_s30 }
   0x4   :  { %p9801_p1 = scmp.lt.u32.totalorder %s9797_s17, %s13937_s5 }
   0x6   :  { %p9803_p2 = pnand %p9801_p1, %p9798_p0 }
   0x8   :  { %9806 = shalt.err (!%p9803_p2)
}
   0x9   :  { %s9807_s22 = scalar_lea.vmem %s38_s30, 2560  ;;  %p9812_p4 = scmp.lt.s32.totalorder %s38_s30, %s38_s30 }
   0xa   :  { %p9808_p3 = scmp.ne.s32.totalorder %s38_s30, %s9807_s22  ;;  %p9813_p5 = scmp.lt.s32.totalorder %s9807_s22, %s9807_s22 }
   0xc   :  { %p9814_p6 = por %p9813_p5, %p9812_p4 }
   0xe   :  { %p9815_p7 = pnand %p9814_p6, %p9808_p3 }
  0x10   :  { %9818 = shalt.err (!%p9815_p7)
}
  0x11   :  { %s9870_s23 = smov 128   ;;  %s9871_s24 = smov 8  }
  0x12   :  { %43 = dma.hbm_to_vmem [thread:$0]  %s13937_s5, 2560, %s38_s30, [#allocation3], %s9870_s23, %s9870_s23, %s9871_s24  }
  0x13   :  { %s9872_s27 = smov [#allocation5]   ;;  %s9819_s16 = scalar_lea.hbm %s13938_s6, 2560 }
  0x14   :  { %s49_s28 = sshll.u32 %s9872_s27, 4  ;;  %p9820_p8 = scmp.ne.s32.totalorder %s13938_s6, %s9819_s16  ;;  %s50_s28 = int_to_ptr.vmem [resolvable:$true] %s49_s28 }
  0x15   :  { %p9823_p9 = scmp.lt.u32.totalorder %s9819_s16, %s13938_s6 }
  0x17   :  { %p9825_p10 = pnand %p9823_p9, %p9820_p8 }
  0x19   :  { %9828 = shalt.err (!%p9825_p10)
}
  0x1a   :  { %s9829_s21 = scalar_lea.vmem %s50_s28, 2560  ;;  %p9834_p12 = scmp.lt.s32.totalorder %s50_s28, %s50_s28 }
  0x1b   :  { %p9830_p11 = scmp.ne.s32.totalorder %s50_s28, %s9829_s21  ;;  %p9835_p13 = scmp.lt.s32.totalorder %s9829_s21, %s9829_s21 }
  0x1d   :  { %p9836_p0 = por %p9835_p13, %p9834_p12 }
  0x1f   :  { %p9837_p1 = pnand %p9836_p0, %p9830_p11 }
  0x21   :  { %9840 = shalt.err (!%p9837_p1)
}
  0x22   :  { %55 = dma.hbm_to_vmem [thread:$0]  %s13938_s6, 2560, %s50_s28, [#allocation6], %s9870_s23, %s9870_s23, %s9871_s24  }
  0x23   :  { %9863 = dma.done.wait [#allocation3], 2560  }
  0x24   :  { %9864 = vsyncadd [#allocation3], 4294964736 }
  0x25   :  { %9865 = dma.done.wait [#allocation6], 2560  }
  0x26   :  { %9866 = vsyncadd [#allocation6], 4294964736  ;;  %vm111_vm0 = vcmask 244736   ;;  %v9987_v0 = vld [vmem:[%s13932_s0] sm:$0xff]  ;;  %v9992_v1 = vld [vmem:[%s13932_s0 + $0x8] sm:$0xff]  ;;  %vm645_vm1 = vcmask 1046528  }
  0x27   :  { %v9997_v2 = vld [vmem:[%s13932_s0 + $0x20] sm:$0xff]  ;;  %v112_v3 = vsel %vm111_vm0, %v9992_v1, 0.0  ;;  %v10004_v4 = vld [vmem:[%s13932_s0 + $0x28] sm:$0xff]  ;;  %v10009_v5 = vld [vmem:[%s13932_s0 + $0x10] sm:$0xff]  ;;  %vm9874_vm2 = vmmov 0   ;;  %vm1270_vm3 = vcmask 318464  }
  0x28   :  { %v10014_v6 = vld [vmem:[%s13932_s0 + $0x18] sm:$0xff]  ;;  %v113_v7 = vadd.f32 %v112_v3, %v9987_v0  ;;  %v120_v8 = vsel %vm111_vm0, %v10004_v4, 0.0  ;;  %v10024_v10 = vld [vmem:[%s13932_s0 + $0x30] sm:$0xff]  ;;  %v10037_v14 = vld [vmem:[%s13932_s0 + $0x48] sm:$0xff]  ;;  %vm1667_vm5 = vcmask 130048   ;;  %s9877_s5 = smov 11  }
  0x29   :  { %v116_v9 = vsel %vm111_vm0, %v10014_v6, 0.0  ;;  %v10029_v11 = vld [vmem:[%s13932_s0 + $0x38] sm:$0xff]  ;;  %v121_v12 = vadd.f32 %v120_v8, %v9997_v2  ;;  %v10049_v18 = vld [vmem:[%s13932_s0 + $0x40] sm:$0xff]  ;;  %v128_v19 = vsel %vm111_vm0, %v10037_v14, 0.0  ;;  %v10056_v20 = vld [vmem:[%s13932_s0 + $0x50] sm:$0xff]  ;;  %vm4225_vm7 = vcmask 89088  }
  0x2a   :  { %v124_v13 = vsel %vm111_vm0, %v10029_v11, 0.0  ;;  %v10042_v15 = vld [vmem:[%s13932_s0 + $0x58] sm:$0xff]  ;;  %114 = vadd.xlane.f32.xlu0 %v113_v7  ;;  %v117_v16 = vadd.f32 %v116_v9, %v10009_v5  ;;  %v10063_v22 = vld [vmem:[%s13932_s0 + $0x68] sm:$0xff]  ;;  %v129_v24 = vadd.f32 %v128_v19, %v10049_v18  ;;  %v10075_v26 = vld [vmem:[%s13932_s0 + $0x60] sm:$0xff]  ;;  %s9878_s30 = smov 78   ;;  %s9879_s22 = smov 39  }
  0x2b   :  { %122 = vadd.xlane.f32.xlu1 %v121_v12  ;;  %v125_v17 = vadd.f32 %v124_v13, %v10024_v10  ;;  %v132_v21 = vsel %vm111_vm0, %v10042_v15, 0.0  ;;  %v10068_v23 = vld [vmem:[%s13932_s0 + $0x78] sm:$0xff]  ;;  %v136_v27 = vsel %vm111_vm0, %v10063_v22, 0.0  ;;  %v10082_v28 = vld [vmem:[%s13932_s0 + $0x70] sm:$0xff]  ;;  %v10089_v30 = vld [vmem:[%s13932_s0 + $0x88] sm:$0xff]  ;;  %vm5714_vm8 = vcmask 1045504  }
  0x2c   :  { %v133_v25 = vadd.f32 %v132_v21, %v10056_v20  ;;  %v140_v29 = vsel %vm111_vm0, %v10068_v23, 0.0  ;;  %v10094_v31 = vld [vmem:[%s13932_s0 + $0x98] sm:$0xff]  ;;  %v10099_v32 = vld [vmem:[%s13932_s0 + $0x80] sm:$0xff]  ;;  %v137_v33 = vadd.f32 %v136_v27, %v10075_v26  ;;  %v10105_v34 = vld [vmem:[%s13932_s0 + $0x90] sm:$0xff]  ;;  %v144_v37 = vsel %vm111_vm0, %v10089_v30, 0.0 }
  0x2d   :  { %v10110_v35 = vld [vmem:[%s13932_s0 + $0xa8] sm:$0xff]  ;;  %v141_v36 = vadd.f32 %v140_v29, %v10082_v28  ;;  %v10118_v38 = vld [vmem:[%s13932_s0 + $0xb8] sm:$0xff]  ;;  %v148_v39 = vsel %vm111_vm0, %v10094_v31, 0.0  ;;  %v10125_v40 = vld [vmem:[%s13932_s0 + $0xa0] sm:$0xff]  ;;  %v145_v41 = vadd.f32 %v144_v37, %v10099_v32  ;;  %vm5509_vm9 = vcmask 637952  }
  0x2e   :  { %118 = vadd.xlane.f32.xlu0 %v117_v16  ;;  %v10131_v42 = vld [vmem:[%s13932_s0 + $0xb0] sm:$0xff]  ;;  %v10136_v43 = vld [vmem:[%s13932_s0 + $0xc8] sm:$0xff]  ;;  %v149_v44 = vadd.f32 %v148_v39, %v10105_v34  ;;  %v152_v45 = vsel %vm111_vm0, %v10110_v35, 0.0  ;;  %v10144_v46 = vld [vmem:[%s13932_s0 + $0xd8] sm:$0xff]  ;;  %v156_v47 = vsel %vm111_vm0, %v10118_v38, 0.0  ;;  %vm5526_vm10 = vcmask 957440  }
  0x2f   :  { %126 = vadd.xlane.f32.xlu1 %v125_v17  ;;  %v10151_v48 = vld [vmem:[%s13932_s0 + $0xc0] sm:$0xff]  ;;  %v153_v49 = vadd.f32 %v152_v45, %v10125_v40  ;;  %v10157_v50 = vld [vmem:[%s13932_s0 + $0xd0] sm:$0xff]  ;;  %v10162_v51 = vld [vmem:[%s13932_s0 + $0xe8] sm:$0xff]  ;;  %v157_v52 = vadd.f32 %v156_v47, %v10131_v42  ;;  %v160_v53 = vsel %vm111_vm0, %v10136_v43, 0.0  ;;  %v164_v55 = vsel %vm111_vm0, %v10144_v46, 0.0 }
  0x30   :  { %v10170_v54 = vld [vmem:[%s13932_s0 + $0xf8] sm:$0xff]  ;;  %v10177_v56 = vld [vmem:[%s13932_s0 + $0xe0] sm:$0xff]  ;;  %v161_v57 = vadd.f32 %v160_v53, %v10151_v48  ;;  %v10183_v58 = vld [vmem:[%s13932_s0 + $0xf0] sm:$0xff]  ;;  %v165_v59 = vadd.f32 %v164_v55, %v10157_v50  ;;  %v168_v60 = vsel %vm111_vm0, %v10162_v51, 0.0  ;;  %vm5689_vm11 = vcmask 228352  }
  0x31   :  { %v172_v61 = vsel %vm111_vm0, %v10170_v54, 0.0  ;;  %v169_v62 = vadd.f32 %v168_v60, %v10177_v56  ;;  %v9130_v3 = vld [vmem:[%s13935_s3 + $0x4] ss:$8 sps:$4 sm:$0xff]   ;;  %v9134_v8 = vld [vmem:[%s13935_s3] ss:$8 sps:$4 sm:$0xff]   ;;  %vm7593_vm12 = vcmask 1043456  }
  0x32   :  { %130 = vadd.xlane.f32.xlu0 %v129_v24  ;;  %v173_v63 = vadd.f32 %v172_v61, %v10183_v58  ;;  %v9132_v7 = vld [vmem:[#allocation2 + $0x4] ss:$8 sps:$4 sm:$0xff]   ;;  %v9135_v9 = vld [vmem:[#allocation2] ss:$8 sps:$4 sm:$0xff]   ;;  %v9136_v12 = vld [vmem:[%s13935_s3 + $0x14] ss:$8 sps:$4 sm:$0xff]   ;;  %652 = vmatprep.subr.bf16.mxu1 %v9130_v3 }
  0x33   :  { %134 = vadd.xlane.f32.xlu1 %v133_v25  ;;  %v9138_v13 = vld [vmem:[#allocation2 + $0x14] ss:$8 sps:$4 sm:$0xff]   ;;  %1126 = vmatprep.subr.bf16.mxu0 %v9132_v7  ;;  %v9140_v16 = vld [vmem:[%s13935_s3 + $0x10] ss:$8 sps:$4 sm:$0xff]   ;;  %v9142_v19 = vld [vmem:[%s13935_s3 + $0x24] ss:$8 sps:$4 sm:$0xff]  }
  0x34   :  { %653 = vmatpush1.bf16.msra.mxu1 %v9134_v8  ;;  %1127 = vmatpush1.bf16.msra.mxu0 %v9135_v9  ;;  %v9141_v17 = vld [vmem:[#allocation2 + $0x10] ss:$8 sps:$4 sm:$0xff]   ;;  %v9144_v21 = vld [vmem:[#allocation2 + $0x24] ss:$8 sps:$4 sm:$0xff]   ;;  %v9146_v24 = vld [vmem:[%s13935_s3 + $0x20] ss:$8 sps:$4 sm:$0xff]  }
  0x35   :  { %654 = vmatprep.subr.bf16.mxu1 %v9136_v12  ;;  %1128 = vmatprep.subr.bf16.mxu0 %v9138_v13  ;;  %v9147_v25 = vld [vmem:[#allocation2 + $0x20] ss:$8 sps:$4 sm:$0xff]   ;;  %vm7568_vm13 = vcmask 982016  }
  0x36   :  { %138 = vadd.xlane.f32.xlu0 %v137_v33 }
  0x37   :  { %142 = vadd.xlane.f32.xlu1 %v141_v36 }
  0x38   :  { %655 = vmatpush1.bf16.msra.mxu1 %v9140_v16  ;;  %1129 = vmatpush1.bf16.msra.mxu0 %v9141_v17 }
  0x39   :  { %656 = vmatprep.subr.bf16.mxu1 %v9142_v19  ;;  %1130 = vmatprep.subr.bf16.mxu0 %v9144_v21 }
  0x3a   :  { %146 = vadd.xlane.f32.xlu0 %v145_v41 }
  0x3b   :  { %150 = vadd.xlane.f32.xlu1 %v149_v44 }
  0x3c   :  { %657 = vmatpush1.bf16.msra.mxu1 %v9146_v24  ;;  %1131 = vmatpush1.bf16.msra.mxu0 %v9147_v25 }
  0x3e   :  { %154 = vadd.xlane.f32.xlu0 %v153_v49 }
  0x3f   :  { %158 = vadd.xlane.f32.xlu1 %v157_v52 }
  0x42   :  { %162 = vadd.xlane.f32.xlu0 %v161_v57 }
  0x43   :  { %166 = vadd.xlane.f32.xlu1 %v165_v59 }
  0x46   :  { %170 = vadd.xlane.f32.xlu0 %v169_v62 }
  0x47   :  { %174 = vadd.xlane.f32.xlu1 %v173_v63 }
  0xb7   :  { %v115_v27 = vpop.xlane.xlu0 %114 }
  0xb8   :  { %v177_v29 = vmul.f32 0.006329114, %v115_v27  ;;  %v123_v33 = vpop.xlane.xlu1 %122 }
  0xb9   :  { %v179_v36 = vmul.f32 0.006329114, %v123_v33 }
  0xba   :  { %v10211_v37 = vsub.f32 %v9987_v0, %v177_v29  ;;  %v10214_v39 = vsub.f32 %v9992_v1, %v177_v29 }
  0xbb   :  { %v10217_v41 = vsub.f32 %v9997_v2, %v179_v36  ;;  %v10220_v44 = vsub.f32 %v10004_v4, %v179_v36  ;;  %v119_v45 = vpop.xlane.xlu0 %118 }
  0xbc   :  { %v178_v47 = vmul.f32 0.006329114, %v119_v45  ;;  %v127_v49 = vpop.xlane.xlu1 %126  ;;  %v225_v52 = vmul.f32 %v10211_v37, %v10211_v37  ;;  %v226_v53 = vmul.f32 %v10214_v39, %v10214_v39 }
  0xbd   :  { %v180_v0 = vmul.f32 0.006329114, %v127_v49  ;;  %v229_v1 = vmul.f32 %v10217_v41, %v10217_v41  ;;  %v230_v2 = vmul.f32 %v10220_v44, %v10220_v44 }
  0xbe   :  { %v10231_v55 = vsub.f32 %v10009_v5, %v178_v47  ;;  %v10234_v4 = vsub.f32 %v10014_v6, %v178_v47  ;;  %v257_v57 = vsel %vm111_vm0, %v226_v53, 0.0 }
  0xbf   :  { %v10238_v59 = vsub.f32 %v10024_v10, %v180_v0  ;;  %v10241_v60 = vsub.f32 %v10029_v11, %v180_v0  ;;  %v131_v61 = vpop.xlane.xlu0 %130  ;;  %v258_v62 = vadd.f32 %v257_v57, %v225_v52  ;;  %v265_v63 = vsel %vm111_vm0, %v230_v2, 0.0 }
  0xc0   :  { %v181_v3 = vmul.f32 0.006329114, %v131_v61  ;;  %v135_v7 = vpop.xlane.xlu1 %134  ;;  %v227_v5 = vmul.f32 %v10231_v55, %v10231_v55  ;;  %v228_v6 = vmul.f32 %v10234_v4, %v10234_v4  ;;  %v266_v9 = vadd.f32 %v265_v63, %v229_v1 }
  0xc1   :  { %259 = vadd.xlane.f32.xlu0 %v258_v62  ;;  %v182_v8 = vmul.f32 0.006329114, %v135_v7  ;;  %v231_v10 = vmul.f32 %v10238_v59, %v10238_v59  ;;  %v232_v11 = vmul.f32 %v10241_v60, %v10241_v60 }
  0xc2   :  { %v10253_v12 = vsub.f32 %v10049_v18, %v181_v3  ;;  %v10256_v13 = vsub.f32 %v10037_v14, %v181_v3  ;;  %v261_v16 = vsel %vm111_vm0, %v228_v6, 0.0 }
  0xc3   :  { %v10260_v17 = vsub.f32 %v10056_v20, %v182_v8  ;;  %v10263_v19 = vsub.f32 %v10042_v15, %v182_v8  ;;  %v139_v21 = vpop.xlane.xlu0 %138  ;;  %v262_v24 = vadd.f32 %v261_v16, %v227_v5  ;;  %v269_v25 = vsel %vm111_vm0, %v232_v11, 0.0 }
  0xc4   :  { %v183_v27 = vmul.f32 0.006329114, %v139_v21  ;;  %v143_v29 = vpop.xlane.xlu1 %142  ;;  %v233_v18 = vmul.f32 %v10253_v12, %v10253_v12  ;;  %v234_v14 = vmul.f32 %v10256_v13, %v10256_v13  ;;  %v270_v20 = vadd.f32 %v269_v25, %v231_v10 }
  0xc5   :  { %267 = vadd.xlane.f32.xlu0 %v266_v9  ;;  %263 = vadd.xlane.f32.xlu1 %v262_v24  ;;  %v184_v33 = vmul.f32 0.006329114, %v143_v29  ;;  %v235_v15 = vmul.f32 %v10260_v17, %v10260_v17  ;;  %v236_v36 = vmul.f32 %v10263_v19, %v10263_v19  ;;  %v10321_v29 = vld [vmem:[#allocation2 + $0x34] ss:$8 sps:$4 sm:$0xff]  }
  0xc6   :  { %v10275_v45 = vsub.f32 %v10075_v26, %v183_v27  ;;  %v10278_v47 = vsub.f32 %v10063_v22, %v183_v27  ;;  %v273_v49 = vsel %vm111_vm0, %v234_v14, 0.0  ;;  %v9148_v27 = vld [vmem:[%s13935_s3 + $0x34] ss:$8 sps:$4 sm:$0xff]   ;;  %1132 = vmatprep.subr.bf16.mxu0 %v10321_v29 }
  0xc7   :  { %v10282_v52 = vsub.f32 %v10082_v28, %v184_v33  ;;  %v10285_v53 = vsub.f32 %v10068_v23, %v184_v33  ;;  %v147_v0 = vpop.xlane.xlu0 %146  ;;  %v274_v1 = vadd.f32 %v273_v49, %v233_v18  ;;  %v277_v2 = vsel %vm111_vm0, %v236_v36, 0.0  ;;  %658 = vmatprep.subr.bf16.mxu1 %v9148_v27 }
  0xc8   :  { %v185_v57 = vmul.f32 0.006329114, %v147_v0  ;;  %v151_v61 = vpop.xlane.xlu1 %150  ;;  %v237_v26 = vmul.f32 %v10275_v45, %v10275_v45  ;;  %v238_v22 = vmul.f32 %v10278_v47, %v10278_v47  ;;  %v278_v28 = vadd.f32 %v277_v2, %v235_v15  ;;  %v10333_v15 = vld [vmem:[#allocation2 + $0x30] ss:$8 sps:$4 sm:$0xff]  }
  0xc9   :  { %271 = vadd.xlane.f32.xlu1 %v270_v20  ;;  %275 = vadd.xlane.f32.xlu0 %v274_v1  ;;  %v186_v62 = vmul.f32 0.006329114, %v151_v61  ;;  %v239_v23 = vmul.f32 %v10282_v52, %v10282_v52  ;;  %v240_v63 = vmul.f32 %v10285_v53, %v10285_v53  ;;  %v9152_v20 = vld [vmem:[%s13935_s3 + $0x30] ss:$8 sps:$4 sm:$0xff]  }
  0xca   :  { %v10297_v3 = vsub.f32 %v10099_v32, %v185_v57  ;;  %v10300_v7 = vsub.f32 %v10089_v30, %v185_v57  ;;  %v281_v5 = vsel %vm111_vm0, %v238_v22, 0.0  ;;  %659 = vmatpush1.bf16.msra.mxu1 %v9152_v20  ;;  %1133 = vmatpush1.bf16.msra.mxu0 %v10333_v15 }
  0xcb   :  { %v10304_v6 = vsub.f32 %v10105_v34, %v186_v62  ;;  %v10307_v8 = vsub.f32 %v10094_v31, %v186_v62  ;;  %v155_v9 = vpop.xlane.xlu0 %154  ;;  %v282_v10 = vadd.f32 %v281_v5, %v237_v26  ;;  %v285_v11 = vsel %vm111_vm0, %v240_v63, 0.0  ;;  %v9154_v63 = vld [vmem:[%s13935_s3 + $0x44] ss:$8 sps:$4 sm:$0xff]  }
  0xcc   :  { %v187_v16 = vmul.f32 0.006329114, %v155_v9  ;;  %v159_v21 = vpop.xlane.xlu1 %158  ;;  %v241_v32 = vmul.f32 %v10297_v3, %v10297_v3  ;;  %v242_v30 = vmul.f32 %v10300_v7, %v10300_v7  ;;  %v286_v34 = vadd.f32 %v285_v11, %v239_v23  ;;  %v10362_v5 = vld [vmem:[#allocation2 + $0x44] ss:$8 sps:$4 sm:$0xff]   ;;  %660 = vmatprep.subr.bf16.mxu1 %v9154_v63 }
  0xcd   :  { %279 = vadd.xlane.f32.xlu1 %v278_v28  ;;  %283 = vadd.xlane.f32.xlu0 %v282_v10  ;;  %v188_v24 = vmul.f32 0.006329114, %v159_v21  ;;  %v243_v31 = vmul.f32 %v10304_v6, %v10304_v6  ;;  %v244_v25 = vmul.f32 %v10307_v8, %v10307_v8  ;;  %v10374_v21 = vld [vmem:[#allocation2 + $0x40] ss:$8 sps:$4 sm:$0xff]  }
  0xce   :  { %v10324_v18 = vsub.f32 %v10125_v40, %v187_v16  ;;  %v10327_v14 = vsub.f32 %v10110_v35, %v187_v16  ;;  %v289_v33 = vsel %vm111_vm0, %v242_v30, 0.0  ;;  %1134 = vmatprep.subr.bf16.mxu0 %v10362_v5 }
  0xcf   :  { %v10336_v36 = vsub.f32 %v10131_v42, %v188_v24  ;;  %v10339_v49 = vsub.f32 %v10118_v38, %v188_v24  ;;  %v163_v0 = vpop.xlane.xlu0 %162  ;;  %v290_v40 = vadd.f32 %v289_v33, %v241_v32  ;;  %v293_v1 = vsel %vm111_vm0, %v244_v25, 0.0  ;;  %1135 = vmatpush1.bf16.msra.mxu0 %v10374_v21 }
  0xd0   :  { %v189_v35 = vmul.f32 0.006329114, %v163_v0  ;;  %v167_v2 = vpop.xlane.xlu1 %166  ;;  %v245_v57 = vmul.f32 %v10324_v18, %v10324_v18  ;;  %v246_v61 = vmul.f32 %v10327_v14, %v10327_v14  ;;  %v294_v42 = vadd.f32 %v293_v1, %v243_v31  ;;  %v9160_v0 = vld [vmem:[%s13935_s3 + $0x54] ss:$8 sps:$4 sm:$0xff]  }
  0xd1   :  { %287 = vadd.xlane.f32.xlu1 %v286_v34  ;;  %291 = vadd.xlane.f32.xlu0 %v290_v40  ;;  %v190_v38 = vmul.f32 0.006329114, %v167_v2  ;;  %v247_v26 = vmul.f32 %v10336_v36, %v10336_v36  ;;  %v248_v22 = vmul.f32 %v10339_v49, %v10339_v49  ;;  %v10396_v40 = vld [vmem:[#allocation2 + $0x54] ss:$8 sps:$4 sm:$0xff]   ;;  %v9164_v2 = vld [vmem:[%s13935_s3 + $0x50] ss:$8 sps:$4 sm:$0xff]  }
  0xd2   :  { %v10353_v62 = vsub.f32 %v10151_v48, %v189_v35  ;;  %v10356_v28 = vsub.f32 %v10136_v43, %v189_v35  ;;  %v297_v23 = vsel %vm111_vm0, %v246_v61, 0.0  ;;  %v9158_v43 = vld [vmem:[%s13935_s3 + $0x40] ss:$8 sps:$4 sm:$0xff]   ;;  %1136 = vmatprep.subr.bf16.mxu0 %v10396_v40 }
  0xd3   :  { %v10365_v9 = vsub.f32 %v10157_v50, %v190_v38  ;;  %v10368_v10 = vsub.f32 %v10144_v46, %v190_v38  ;;  %v171_v11 = vpop.xlane.xlu0 %170  ;;  %v298_v48 = vadd.f32 %v297_v23, %v245_v57  ;;  %v301_v16 = vsel %vm111_vm0, %v248_v22, 0.0  ;;  %661 = vmatpush1.bf16.msra.mxu1 %v9158_v43  ;;  %v10408_v57 = vld [vmem:[#allocation2 + $0x50] ss:$8 sps:$4 sm:$0xff]   ;;  %v9166_v22 = vld [vmem:[%s13935_s3 + $0x64] ss:$8 sps:$4 sm:$0xff]  }
  0xd4   :  { %v191_v32 = vmul.f32 0.006329114, %v171_v11  ;;  %v175_v30 = vpop.xlane.xlu1 %174  ;;  %v249_v24 = vmul.f32 %v10353_v62, %v10353_v62  ;;  %v250_v50 = vmul.f32 %v10356_v28, %v10356_v28  ;;  %v302_v34 = vadd.f32 %v301_v16, %v247_v26  ;;  %662 = vmatprep.subr.bf16.mxu1 %v9160_v0  ;;  %1137 = vmatpush1.bf16.msra.mxu0 %v10408_v57  ;;  %v10424_v23 = vld [vmem:[#allocation2 + $0x64] ss:$8 sps:$4 sm:$0xff]   ;;  %v10430_v16 = vld [vmem:[#allocation2 + $0x60] ss:$8 sps:$4 sm:$0xff]  }
  0xd5   :  { %295 = vadd.xlane.f32.xlu1 %v294_v42  ;;  %299 = vadd.xlane.f32.xlu0 %v298_v48  ;;  %v192_v46 = vmul.f32 0.006329114, %v175_v30  ;;  %v251_v31 = vmul.f32 %v10365_v9, %v10365_v9  ;;  %v252_v25 = vmul.f32 %v10368_v10, %v10368_v10  ;;  %v9170_v48 = vld [vmem:[%s13935_s3 + $0x60] ss:$8 sps:$4 sm:$0xff]   ;;  %v10437_v30 = vld [vmem:[#allocation2 + $0x74] ss:$8 sps:$4 sm:$0xff]  }
  0xd6   :  { %v10386_v27 = vsub.f32 %v10177_v56, %v191_v32  ;;  %v10389_v33 = vsub.f32 %v10162_v51, %v191_v32  ;;  %v305_v20 = vsel %vm111_vm0, %v250_v50, 0.0  ;;  %1138 = vmatprep.subr.bf16.mxu0 %v10424_v23  ;;  %v9172_v32 = vld [vmem:[%s13935_s3 + $0x74] ss:$8 sps:$4 sm:$0xff]   ;;  %v10442_v50 = vld [vmem:[#allocation2 + $0x70] ss:$8 sps:$4 sm:$0xff]  }
  0xd7   :  { %v10399_v1 = vsub.f32 %v10183_v58, %v192_v46  ;;  %v10402_v56 = vsub.f32 %v10170_v54, %v192_v46  ;;  %v306_v35 = vadd.f32 %v305_v20, %v249_v24  ;;  %v309_v51 = vsel %vm111_vm0, %v252_v25, 0.0  ;;  %663 = vmatpush1.bf16.msra.mxu1 %v9164_v2  ;;  %v9176_v24 = vld [vmem:[%s13935_s3 + $0x70] ss:$8 sps:$4 sm:$0xff]   ;;  %v9178_v46 = vld [vmem:[%s13935_s3 + $0x84] ss:$8 sps:$4 sm:$0xff]  }
  0xd8   :  { %v253_v61 = vmul.f32 %v10386_v27, %v10386_v27  ;;  %v254_v38 = vmul.f32 %v10389_v33, %v10389_v33  ;;  %v310_v54 = vadd.f32 %v309_v51, %v251_v31  ;;  %664 = vmatprep.subr.bf16.mxu1 %v9166_v22  ;;  %1139 = vmatpush1.bf16.msra.mxu0 %v10430_v16  ;;  %v9182_v31 = vld [vmem:[%s13935_s3 + $0x80] ss:$8 sps:$4 sm:$0xff]   ;;  %v9184_v20 = vld [vmem:[%s13935_s3 + $0x94] ss:$8 sps:$4 sm:$0x7f]  }
  0xd9   :  { %303 = vadd.xlane.f32.xlu1 %v302_v34  ;;  %307 = vadd.xlane.f32.xlu0 %v306_v35  ;;  %v255_v58 = vmul.f32 %v10399_v1, %v10399_v1  ;;  %v256_v42 = vmul.f32 %v10402_v56, %v10402_v56  ;;  %v10449_v34 = vld [vmem:[#allocation2 + $0x84] ss:$8 sps:$4 sm:$0xff]   ;;  %v10454_v25 = vld [vmem:[#allocation2 + $0x80] ss:$8 sps:$4 sm:$0xff]  }
  0xda   :  { %v313_v26 = vsel %vm111_vm0, %v254_v38, 0.0  ;;  %1140 = vmatprep.subr.bf16.mxu0 %v10437_v30  ;;  %14041 = vst [vmem:[#allocation11_spill] sm:$0xff] %v10454_v25  ;;  %v10461_v0 = vld [vmem:[#allocation2 + $0x94] ss:$8 sps:$4 sm:$0x7f]  }
  0xdb   :  { %v314_v63 = vadd.f32 %v313_v26, %v253_v61  ;;  %v317_v11 = vsel %vm111_vm0, %v256_v42, 0.0  ;;  %665 = vmatpush1.bf16.msra.mxu1 %v9170_v48  ;;  %14042 = vst [vmem:[#allocation12_spill] sm:$0xff] %v10461_v0  ;;  %v9188_v35 = vld [vmem:[%s13935_s3 + $0x90] ss:$8 sps:$4 sm:$0x7f]   ;;  %v13947_v26 = vlaneseq  ;;  %s9876_s3 = smov 50  }
  0xdc   :  { %v318_v43 = vadd.f32 %v317_v11, %v255_v58  ;;  %666 = vmatprep.subr.bf16.mxu1 %v9172_v32  ;;  %1141 = vmatpush1.bf16.msra.mxu0 %v10442_v50  ;;  %v9189_v51 = vld [vmem:[#allocation2 + $0x90] ss:$8 sps:$4 sm:$0x7f]   ;;  %v647_v2 = vsel %vm645_vm1, %v9188_v35, 0  ;;  %v9192_v38 = vld [vmem:[%s13936_s4 + $0x4] ss:$8 sps:$4 sm:$0xff]  }
  0xdd   :  { %311 = vadd.xlane.f32.xlu1 %v310_v54  ;;  %315 = vadd.xlane.f32.xlu0 %v314_v63  ;;  %v10471_v61 = vsel %vm645_vm1, %v9189_v51, 0 }
  0xde   :  { %1142 = vmatprep.subr.bf16.mxu0 %v10449_v34  ;;  %14043 = vst [vmem:[#allocation13_spill] sm:$0xff] %v10471_v61 }
  0xdf   :  { %667 = vmatpush1.bf16.msra.mxu1 %v9176_v24  ;;  %v10478_v24 = vshrl.u32 %v13947_v26, 7 }
  0xe0   :  { %668 = vmatprep.subr.bf16.mxu1 %v9178_v46  ;;  %1143 = vmatpush1.bf16.msra.mxu0 %v10454_v25 }
  0xe1   :  { %319 = vadd.xlane.f32.xlu1 %v318_v43  ;;  %8099 = vmatprep.subr.msk.bf16.mxu0 %vm645_vm1, %v10461_v0  ;;  %14044 = vst [vmem:[#allocation14_spill] sm:$0xff] %v10478_v24 }
  0xe3   :  { %669 = vmatpush1.bf16.msra.mxu1 %v9182_v31 }
  0xe4   :  { %8041 = vmatprep.subr.msk.bf16.mxu1 %vm645_vm1, %v9184_v20  ;;  %1145 = vmatpush1.bf16.msra.mxu0 %v10471_v61 }
  0xe7   :  { %671 = vmatpush1.bf16.msra.mxu1 %v647_v2 }
  0xe8   :  { %889 = vmatprep.subr.bf16.mxu1 %v9192_v38  ;;  %v10481_v38 = vsub.s32 1, %v10478_v24 }
  0xea   :  { %14045 = vst [vmem:[#allocation15_spill] sm:$0xff] %v10481_v38 }
 0x14e   :  { %v260_v54 = vpop.xlane.xlu0 %259 }
 0x14f   :  { %v321_v58 = vmul.f32 0.006329114, %v260_v54  ;;  %v10484_v54 = vsub.s32 0, %v10478_v24 }
 0x151   :  { %v337_v42 = vadd.f32 1e-05, %v321_v58  ;;  %14046 = vst [vmem:[#allocation16_spill] sm:$0xff] %v10484_v54 }
 0x152   :  { %v264_v22 = vpop.xlane.xlu1 %263  ;;  %v268_v63 = vpop.xlane.xlu0 %267 }
 0x153   :  { %9439 = vrsqrt.f32 %v337_v42  ;;  %v322_v11 = vmul.f32 0.006329114, %v264_v22  ;;  %v323_v48 = vmul.f32 0.006329114, %v268_v63  ;;  %v109_v22 = vld [vmem:[%s13933_s1] sm:$0x3] }
 0x154   :  { %s9880_s1 = smov 117  }
 0x155   :  { %v338_v43 = vadd.f32 1e-05, %v322_v11  ;;  %v339_v32 = vadd.f32 1e-05, %v323_v48 }
 0x156   :  { %v272_v46 = vpop.xlane.xlu1 %271  ;;  %v276_v31 = vpop.xlane.xlu0 %275 }
 0x157   :  { %9441 = vrsqrt.f32 %v338_v43  ;;  %v324_v20 = vmul.f32 0.006329114, %v272_v46  ;;  %v325_v35 = vmul.f32 0.006329114, %v276_v31  ;;  %v10493_v46 = vrot.slane %v109_v22, %v10481_v38 }
 0x158   :  { %9443 = vrsqrt.f32 %v339_v32  ;;  %v110_v32 = vld [vmem:[%s13934_s2] sm:$0x3]  ;;  %v10496_v31 = vrot.slane %v109_v22, %v10484_v54 }
 0x159   :  { %v340_v51 = vadd.f32 1e-05, %v324_v20  ;;  %v341_v2 = vadd.f32 1e-05, %v325_v35  ;;  %v10506_v22 = vrot.slane %v110_v32, %v10484_v54 }
 0x15a   :  { %v280_v58 = vpop.xlane.xlu1 %279  ;;  %v284_v42 = vpop.xlane.xlu0 %283 }
 0x15b   :  { %9445 = vrsqrt.f32 %v340_v51  ;;  %v326_v63 = vmul.f32 0.006329114, %v280_v58  ;;  %v327_v11 = vmul.f32 0.006329114, %v284_v42  ;;  %v10501_v42 = vrot.slane %v110_v32, %v10481_v38 }
 0x15c   :  { %9447 = vrsqrt.f32 %v341_v2 }
 0x15d   :  { %v9440_v48 = vpop.eup %9439  ;;  %v342_v43 = vadd.f32 1e-05, %v326_v63  ;;  %v343_v20 = vadd.f32 1e-05, %v327_v11 }
 0x15e   :  { %v288_v35 = vpop.xlane.xlu1 %287  ;;  %v370_v26 = vmul.f32 %v9440_v48, %v10214_v39  ;;  %v369_v51 = vmul.f32 %v9440_v48, %v10211_v37  ;;  %v292_v2 = vpop.xlane.xlu0 %291 }
 0x15f   :  { %9449 = vrsqrt.f32 %v342_v43  ;;  %v328_v58 = vmul.f32 0.006329114, %v288_v35  ;;  %v329_v43 = vmul.f32 0.006329114, %v292_v2 }
 0x160   :  { %v413_v61 = vmul.f32 %v10493_v46, %v370_v26  ;;  %v412_v0 = vmul.f32 %v10496_v31, %v369_v51  ;;  %9451 = vrsqrt.f32 %v343_v20 }
 0x161   :  { %v9442_v63 = vpop.eup %9441  ;;  %v344_v24 = vadd.f32 1e-05, %v328_v58 }
 0x162   :  { %v9444_v11 = vpop.eup %9443  ;;  %v296_v39 = vpop.xlane.xlu1 %295  ;;  %v372_v37 = vmul.f32 %v9442_v63, %v10234_v4  ;;  %v371_v48 = vmul.f32 %v9442_v63, %v10231_v55  ;;  %v456_v32 = vadd.f32 %v10501_v42, %v413_v61  ;;  %v455_v20 = vadd.f32 %v10506_v22, %v412_v0 }
 0x163   :  { %9453 = vrsqrt.f32 %v344_v24  ;;  %v330_v35 = vmul.f32 0.006329114, %v296_v39  ;;  %v374_v38 = vmul.f32 %v9444_v11, %v10220_v44  ;;  %v345_v39 = vadd.f32 1e-05, %v329_v43 }
 0x164   :  { %v415_v58 = vmul.f32 %v10493_v46, %v372_v37  ;;  %v414_v26 = vmul.f32 %v10496_v31, %v371_v48  ;;  %v373_v37 = vmul.f32 %v9444_v11, %v10217_v41  ;;  %v300_v48 = vpop.xlane.xlu0 %299  ;;  %v9195_v41 = vld [vmem:[%s13936_s4 + $0x14] ss:$8 sps:$4 sm:$0xff]  }
 0x165   :  { %v9446_v51 = vpop.eup %9445  ;;  %v346_v25 = vadd.f32 1e-05, %v330_v35  ;;  %v417_v54 = vmul.f32 %v10493_v46, %v374_v38  ;;  %v9190_v38 = vld [vmem:[%s13936_s4] ss:$8 sps:$4 sm:$0xff]  }
 0x166   :  { %v304_v4 = vpop.xlane.xlu1 %303  ;;  %v458_v55 = vadd.f32 %v10501_v42, %v415_v58  ;;  %v457_v24 = vadd.f32 %v10506_v22, %v414_v26  ;;  %v376_v2 = vmul.f32 %v9446_v51, %v10241_v60  ;;  %v375_v44 = vmul.f32 %v9446_v51, %v10238_v59  ;;  %v9448_v63 = vpop.eup %9447 }
 0x167   :  { %9455 = vrsqrt.f32 %v346_v25  ;;  %v332_v60 = vmul.f32 0.006329114, %v304_v4  ;;  %v460_v59 = vadd.f32 %v10501_v42, %v417_v54  ;;  %v378_v26 = vmul.f32 %v9448_v63, %v10256_v13  ;;  %v9193_v13 = vld [vmem:[%s13936_s4 + $0x10] ss:$8 sps:$4 sm:$0xff]  }
 0x168   :  { %v10521_v35 = vpack.c.bf16 %v458_v55, %v456_v32  ;;  %v10523_v61 = vpack.c.bf16 %v457_v24, %v455_v20  ;;  %v419_v0 = vmul.f32 %v10493_v46, %v376_v2  ;;  %v418_v43 = vmul.f32 %v10496_v31, %v375_v44  ;;  %v9198_v44 = vld [vmem:[%s13936_s4 + $0x24] ss:$8 sps:$4 sm:$0xff]  }
 0x169   :  { %v9450_v58 = vpop.eup %9449  ;;  %9457 = vrsqrt.f32 %v345_v39  ;;  %v331_v54 = vmul.f32 0.006329114, %v300_v48  ;;  %v416_v51 = vmul.f32 %v10496_v31, %v373_v37  ;;  %v421_v4 = vmul.f32 %v10493_v46, %v378_v26 }
 0x16a   :  { %8042 = vmatprep.mubr.msk.bf16.mxu1 %vm111_vm0, %v10521_v35  ;;  %8100 = vmatprep.mubr.msk.bf16.mxu0 %vm111_vm0, %v10521_v35  ;;  %v462_v11 = vadd.f32 %v10501_v42, %v419_v0  ;;  %v380_v25 = vmul.f32 %v9450_v58, %v10263_v19  ;;  %v9452_v32 = vpop.eup %9451  ;;  %v348_v19 = vadd.f32 1e-05, %v332_v60  ;;  %v461_v24 = vadd.f32 %v10506_v22, %v418_v43  ;;  %v312_v39 = vpop.xlane.xlu1 %311 }
 0x16b   :  { %685 = vmatmul.mubr.bf16.vlgmr.msra.gmra.mrb[0].mxu1 %v10523_v61  ;;  %1159 = vmatmul.mubr.bf16.vlgmr.msra.gmra.mrb[0].mxu0 %v10523_v61  ;;  %v379_v37 = vmul.f32 %v9450_v58, %v10260_v17  ;;  %v347_v48 = vadd.f32 1e-05, %v331_v54  ;;  %v459_v0 = vadd.f32 %v10506_v22, %v416_v51  ;;  %v377_v60 = vmul.f32 %v9448_v63, %v10253_v12  ;;  %v9196_v58 = vld [vmem:[%s13936_s4 + $0x20] ss:$8 sps:$4 sm:$0xff]  }
 0x16c   :  { %v10544_v20 = vpack.c.bf16 %v462_v11, %v460_v59  ;;  %890 = vmatpush1.bf16.msra.mxu1 %v9190_v38  ;;  %v423_v2 = vmul.f32 %v10493_v46, %v380_v25  ;;  %v308_v59 = vpop.xlane.xlu0 %307  ;;  %v464_v43 = vadd.f32 %v10501_v42, %v421_v4  ;;  %9459 = vrsqrt.f32 %v348_v19 }
 0x16d   :  { %v9454_v55 = vpop.eup %9453  ;;  %891 = vmatprep.subr.bf16.mxu1 %v9195_v41  ;;  %v382_v41 = vmul.f32 %v9452_v32, %v10278_v47  ;;  %v334_v26 = vmul.f32 0.006329114, %v312_v39  ;;  %v10566_v25 = vpack.c.bf16 %v461_v24, %v459_v0  ;;  %v422_v17 = vmul.f32 %v10496_v31, %v379_v37  ;;  %v9201_v47 = vld [vmem:[%s13936_s4 + $0x34] ss:$8 sps:$4 sm:$0xff]   ;;  %v9204_v0 = vld [vmem:[%s13936_s4 + $0x44] ss:$8 sps:$4 sm:$0xff]  }
 0x16e   :  { %8043 = vmatprep.mubr.msk.bf16.mxu1 %vm111_vm0, %v10544_v20  ;;  %8101 = vmatprep.mubr.msk.bf16.mxu0 %vm111_vm0, %v10544_v20  ;;  %v466_v38 = vadd.f32 %v10501_v42, %v423_v2  ;;  %v384_v11 = vmul.f32 %v9454_v55, %v10285_v53  ;;  %9461 = vrsqrt.f32 %v347_v48  ;;  %v333_v54 = vmul.f32 0.006329114, %v308_v59  ;;  %v320_v39 = vpop.xlane.xlu1 %319 }
 0x16f   :  { %v420_v51 = vmul.f32 %v10496_v31, %v377_v60  ;;  %v425_v4 = vmul.f32 %v10493_v46, %v382_v41  ;;  %v350_v19 = vadd.f32 1e-05, %v334_v26  ;;  %v465_v24 = vadd.f32 %v10506_v22, %v422_v17  ;;  %v9202_v26 = vld [vmem:[%s13936_s4 + $0x40] ss:$8 sps:$4 sm:$0xff]  }
 0x170   :  { %892 = vmatpush1.bf16.msra.mxu1 %v9193_v13  ;;  %v10572_v12 = vpack.c.bf16 %v466_v38, %v464_v43  ;;  %v427_v63 = vmul.f32 %v10493_v46, %v384_v11  ;;  %v383_v2 = vmul.f32 %v9454_v55, %v10282_v52  ;;  %v349_v38 = vadd.f32 1e-05, %v333_v54  ;;  %v316_v55 = vpop.xlane.xlu0 %315 }
 0x171   :  { %893 = vmatprep.subr.bf16.mxu1 %v9198_v44  ;;  %v9456_v53 = vpop.eup %9455  ;;  %v9199_v44 = vld [vmem:[%s13936_s4 + $0x30] ss:$8 sps:$4 sm:$0xff]   ;;  %v463_v60 = vadd.f32 %v10506_v22, %v420_v51  ;;  %v381_v52 = vmul.f32 %v9452_v32, %v10275_v45  ;;  %v468_v59 = vadd.f32 %v10501_v42, %v425_v4  ;;  %9463 = vrsqrt.f32 %v350_v19 }
 0x172   :  { %v470_v37 = vadd.f32 %v10501_v42, %v427_v63  ;;  %v388_v48 = vmul.f32 %v9456_v53, %v10307_v8  ;;  %v336_v41 = vmul.f32 0.006329114, %v320_v39  ;;  %v426_v8 = vmul.f32 %v10496_v31, %v383_v2  ;;  %v9210_v39 = vld [vmem:[%s13936_s4 + $0x64] ss:$8 sps:$4 sm:$0xff]  }
 0x173   :  { %695 = vmatmul.mubr.bf16.gmra.mrb[4].mxu1 %v10566_v25  ;;  %1169 = vmatmul.mubr.bf16.gmra.mrb[4].mxu0 %v10566_v25  ;;  %v9458_v13 = vpop.eup %9457  ;;  %v10600_v11 = vpack.c.bf16 %v465_v24, %v463_v60  ;;  %9465 = vrsqrt.f32 %v349_v38  ;;  %v424_v63 = vmul.f32 %v10496_v31, %v381_v52  ;;  %v387_v19 = vmul.f32 %v9456_v53, %v10304_v6  ;;  %v9205_v24 = vld [vmem:[%s13936_s4 + $0x50] ss:$8 sps:$4 sm:$0xff]  }
 0x174   :  { %8044 = vmatprep.mubr.msk.bf16.mxu1 %vm111_vm0, %v10572_v12  ;;  %8102 = vmatprep.mubr.msk.bf16.mxu0 %vm111_vm0, %v10572_v12  ;;  %v386_v43 = vmul.f32 %v9458_v13, %v10300_v7  ;;  %v10606_v17 = vpack.c.bf16 %v470_v37, %v468_v59  ;;  %v431_v45 = vmul.f32 %v10493_v46, %v388_v48  ;;  %v9207_v7 = vld [vmem:[%s13936_s4 + $0x54] ss:$8 sps:$4 sm:$0xff]   ;;  %v352_v51 = vadd.f32 1e-05, %v336_v41 }
 0x175   :  { %894 = vmatpush1.bf16.msra.mxu1 %v9196_v58  ;;  %v335_v58 = vmul.f32 0.006329114, %v316_v55  ;;  %v469_v4 = vadd.f32 %v10506_v22, %v426_v8  ;;  %v467_v48 = vadd.f32 %v10506_v22, %v424_v63  ;;  %v430_v60 = vmul.f32 %v10496_v31, %v387_v19 }
 0x176   :  { %895 = vmatprep.subr.bf16.mxu1 %v9201_v47  ;;  %v9460_v32 = vpop.eup %9459  ;;  %v429_v47 = vmul.f32 %v10493_v46, %v386_v43  ;;  %v474_v2 = vadd.f32 %v10501_v42, %v431_v45  ;;  %9467 = vrsqrt.f32 %v352_v51 }
 0x177   :  { %v351_v37 = vadd.f32 1e-05, %v335_v58  ;;  %v10634_v38 = vpack.c.bf16 %v469_v4, %v467_v48  ;;  %v473_v41 = vadd.f32 %v10506_v22, %v430_v60  ;;  %v391_v8 = vmul.f32 %v9460_v32, %v10336_v36  ;;  %v9216_v58 = vld [vmem:[%s13936_s4 + $0x84] ss:$8 sps:$4 sm:$0xff]  }
 0x178   :  { %v9462_v54 = vpop.eup %9461  ;;  %v472_v6 = vadd.f32 %v10501_v42, %v429_v47 }
 0x179   :  { %896 = vmatpush1.bf16.msra.mxu1 %v9199_v44  ;;  %v392_v44 = vmul.f32 %v9460_v32, %v10339_v49  ;;  %v390_v53 = vmul.f32 %v9462_v54, %v10327_v14  ;;  %v9208_v49 = vld [vmem:[%s13936_s4 + $0x60] ss:$8 sps:$4 sm:$0xff]   ;;  %9469 = vrsqrt.f32 %v351_v37  ;;  %v389_v47 = vmul.f32 %v9462_v54, %v10324_v18  ;;  %v9217_v18 = vld [vmem:[%s13936_s4 + $0x94] ss:$8 sps:$4 sm:$0x7f]  }
 0x17a   :  { %897 = vmatprep.subr.bf16.mxu1 %v9204_v0  ;;  %v385_v0 = vmul.f32 %v9458_v13, %v10297_v3  ;;  %v10640_v52 = vpack.c.bf16 %v474_v2, %v472_v6  ;;  %v9213_v3 = vld [vmem:[%s13936_s4 + $0x74] ss:$8 sps:$4 sm:$0xff]   ;;  %v434_v4 = vmul.f32 %v10496_v31, %v391_v8 }
 0x17b   :  { %705 = vmatmul.mubr.bf16.gmra.mrb[8].mxu1 %v10600_v11  ;;  %1179 = vmatmul.mubr.bf16.gmra.mrb[8].mxu0 %v10600_v11  ;;  %v435_v55 = vmul.f32 %v10493_v46, %v392_v44  ;;  %v9464_v14 = vpop.eup %9463  ;;  %v433_v59 = vmul.f32 %v10493_v46, %v390_v53  ;;  %v432_v2 = vmul.f32 %v10496_v31, %v389_v47 }
 0x17c   :  { %8045 = vmatprep.mubr.msk.bf16.mxu1 %vm111_vm0, %v10606_v17  ;;  %8103 = vmatprep.mubr.msk.bf16.mxu0 %vm111_vm0, %v10606_v17  ;;  %v428_v13 = vmul.f32 %v10496_v31, %v385_v0  ;;  %v477_v37 = vadd.f32 %v10506_v22, %v434_v4  ;;  %v395_v48 = vmul.f32 %v9464_v14, %v10365_v9  ;;  %v9763_v4 = vld [vmem:[#allocation2 + $0x24] ss:$8 sps:$4 sm:$0xff]  }
 0x17d   :  { %898 = vmatpush1.bf16.msra.mxu1 %v9202_v26  ;;  %v9466_v43 = vpop.eup %9465  ;;  %v9211_v26 = vld [vmem:[%s13936_s4 + $0x70] ss:$8 sps:$4 sm:$0xff]   ;;  %v478_v45 = vadd.f32 %v10501_v42, %v435_v55  ;;  %v476_v36 = vadd.f32 %v10501_v42, %v433_v59  ;;  %v475_v60 = vadd.f32 %v10506_v22, %v432_v2  ;;  %v9759_v59 = vld [vmem:[#allocation2 + $0x4] ss:$8 sps:$4 sm:$0xff]  }
 0x17e   :  { %899 = vmatprep.subr.bf16.mxu1 %v9207_v7  ;;  %v396_v7 = vmul.f32 %v9464_v14, %v10368_v10  ;;  %v471_v63 = vadd.f32 %v10506_v22, %v428_v13  ;;  %v394_v32 = vmul.f32 %v9466_v43, %v10356_v28  ;;  %v9214_v10 = vld [vmem:[%s13936_s4 + $0x80] ss:$8 sps:$4 sm:$0xff]   ;;  %v9219_v28 = vld [vmem:[%s13936_s4 + $0x90] ss:$8 sps:$4 sm:$0x7f]   ;;  %v438_v9 = vmul.f32 %v10496_v31, %v395_v48  ;;  %s9875_s4 = smov 89  }
 0x17f   :  { %v10672_v19 = vpack.c.bf16 %v478_v45, %v476_v36  ;;  %v884_v53 = vsel %vm645_vm1, %v9219_v28, 0  ;;  %v10696_v13 = vpack.c.bf16 %v477_v37, %v475_v60 }
 0x180   :  { %v10666_v51 = vpack.c.bf16 %v473_v41, %v471_v63  ;;  %v9468_v54 = vpop.eup %9467  ;;  %v437_v44 = vmul.f32 %v10493_v46, %v394_v32 }
 0x181   :  { %900 = vmatpush1.bf16.msra.mxu1 %v9205_v24  ;;  %v439_v24 = vmul.f32 %v10493_v46, %v396_v7  ;;  %v400_v6 = vmul.f32 %v9468_v54, %v10402_v56 }
 0x182   :  { %901 = vmatprep.subr.bf16.mxu1 %v9210_v39  ;;  %v480_v55 = vadd.f32 %v10501_v42, %v437_v44 }
 0x183   :  { %715 = vmatmul.mubr.bf16.gmra.mrb[12].mxu1 %v10634_v38  ;;  %1189 = vmatmul.mubr.bf16.gmra.mrb[12].mxu0 %v10634_v38  ;;  %v9470_v39 = vpop.eup %9469  ;;  %v482_v0 = vadd.f32 %v10501_v42, %v439_v24  ;;  %v443_v56 = vmul.f32 %v10493_v46, %v400_v6 }
 0x184   :  { %8046 = vmatprep.mubr.msk.bf16.mxu1 %vm111_vm0, %v10640_v52  ;;  %v397_v45 = vmul.f32 %v9470_v39, %v10386_v27  ;;  %v9760_v27 = vld [vmem:[#allocation2] ss:$8 sps:$4 sm:$0xff]  }
 0x185   :  { %902 = vmatpush1.bf16.msra.mxu1 %v9208_v49  ;;  %v393_v49 = vmul.f32 %v9466_v43, %v10353_v62  ;;  %v10699_v14 = vpack.c.bf16 %v482_v0, %v480_v55  ;;  %v399_v43 = vmul.f32 %v9468_v54, %v10399_v1  ;;  %v486_v8 = vadd.f32 %v10501_v42, %v443_v56 }
 0x186   :  { %903 = vmatprep.subr.bf16.mxu1 %v9213_v3  ;;  %v398_v3 = vmul.f32 %v9470_v39, %v10389_v33  ;;  %v481_v33 = vadd.f32 %v10506_v22, %v438_v9  ;;  %v440_v36 = vmul.f32 %v10496_v31, %v397_v45 }
 0x187   :  { %v436_v41 = vmul.f32 %v10496_v31, %v393_v49  ;;  %v442_v63 = vmul.f32 %v10496_v31, %v399_v43  ;;  %v9762_v31 = vld [vmem:[#allocation2 + $0x10] ss:$8 sps:$4 sm:$0xff]  }
 0x188   :  { %v441_v62 = vmul.f32 %v10493_v46, %v398_v3  ;;  %v483_v1 = vadd.f32 %v10506_v22, %v440_v36 }
 0x189   :  { %904 = vmatpush1.bf16.msra.mxu1 %v9211_v26  ;;  %v479_v26 = vadd.f32 %v10506_v22, %v436_v41  ;;  %v485_v46 = vadd.f32 %v10506_v22, %v442_v63  ;;  %v9764_v22 = vld [vmem:[#allocation2 + $0x20] ss:$8 sps:$4 sm:$0xff]  }
 0x18a   :  { %905 = vmatprep.subr.bf16.mxu1 %v9216_v58  ;;  %v484_v7 = vadd.f32 %v10501_v42, %v441_v62  ;;  %v9761_v42 = vld [vmem:[#allocation2 + $0x14] ss:$8 sps:$4 sm:$0xff]  }
 0x18b   :  { %725 = vmatmul.mubr.bf16.gmra.mrb[16].mxu1 %v10666_v51  ;;  %v499_v58 = vpack.c.bf16 %v481_v33, %v479_v26  ;;  %v501_v32 = vpack.c.bf16 %v485_v46, %v483_v1 }
 0x18c   :  { %8047 = vmatprep.mubr.msk.bf16.mxu1 %vm111_vm0, %v10672_v19  ;;  %v502_v47 = vpack.c.bf16 %v486_v8, %v484_v7 }
 0x18d   :  { %906 = vmatpush1.bf16.msra.mxu1 %v9214_v10 }
 0x18e   :  { %8070 = vmatprep.subr.msk.bf16.mxu1 %vm645_vm1, %v9217_v18 }
 0x191   :  { %908 = vmatpush1.bf16.msra.mxu1 %v884_v53 }
 0x192   :  { %8878 = vmatprep.subr.bf16.mxu1 %v9759_v59 }
 0x193   :  { %735 = vmatmul.mubr.bf16.gmra.mrb[20].mxu1 %v10696_v13 }
 0x194   :  { %8048 = vmatprep.mubr.msk.bf16.mxu1 %vm111_vm0, %v10699_v14 }
 0x19b   :  { %745 = vmatmul.mubr.bf16.gmra.mrb[24].mxu1 %v499_v58 }
 0x19c   :  { %8049 = vmatprep.mubr.msk.bf16.mxu1 %vm111_vm0, %v502_v47 }
 0x1a3   :  { %755 = vmatmul.mubr.bf16.gmra.mrb[28].mxu1 %v501_v32 }
 0x1a4   :  { %8071 = vmatprep.mubr.msk.bf16.mxu1 %vm111_vm0, %v10521_v35 }
 0x1ab   :  { %922 = vmatmul.mubr.bf16.vlgmr.msra.gmra.mrb[32].mxu1 %v10523_v61 }
 0x1ac   :  { %8072 = vmatprep.mubr.msk.bf16.mxu1 %vm111_vm0, %v10544_v20  ;;  %8888 = vmatpush1.bf16.msra.mxu1 %v9760_v27 }
 0x1ad   :  { %8879 = vmatprep.subr.bf16.mxu1 %v9761_v42 }
 0x1b0   :  { %8889 = vmatpush1.bf16.msra.mxu1 %v9762_v31 }
 0x1b1   :  { %8880 = vmatprep.subr.bf16.mxu1 %v9763_v4 }
 0x1b3   :  { %932 = vmatmul.mubr.bf16.gmra.mrb[36].mxu1 %v10566_v25 }
 0x1b4   :  { %8073 = vmatprep.mubr.msk.bf16.mxu1 %vm111_vm0, %v10572_v12  ;;  %8890 = vmatpush1.bf16.msra.mxu1 %v9764_v22 }
 0x1b5   :  { %8881 = vmatprep.subr.bf16.mxu1 %v10321_v29  ;;  %v13968_v29 = vmov 0.0  }
 0x1b6   :  { %8542 = vmatprep.subr.bf16.mxu0 %v13968_v29  ;;  %8544 = vmatprep.mubr.msk.bf16.mxu0 %vm9874_vm2, %v13968_v29 }
 0x1b8   :  { %8891 = vmatpush1.bf16.msra.mxu1 %v10333_v15  ;;  %v14047_v15 = vld [vmem:[#allocation11_spill] sm:$0xff] }
 0x1b9   :  { %8882 = vmatprep.subr.bf16.mxu1 %v10362_v5  ;;  %v14048_v5 = vld [vmem:[#allocation12_spill] sm:$0xff] }
 0x1bb   :  { %942 = vmatmul.mubr.bf16.gmra.mrb[40].mxu1 %v10600_v11 }
 0x1bc   :  { %8074 = vmatprep.mubr.msk.bf16.mxu1 %vm111_vm0, %v10606_v17  ;;  %8892 = vmatpush1.bf16.msra.mxu1 %v10374_v21  ;;  %v14049_v21 = vld [vmem:[#allocation13_spill] sm:$0xff] }
 0x1bd   :  { %8883 = vmatprep.subr.bf16.mxu1 %v10396_v40 }
 0x1c0   :  { %8893 = vmatpush1.bf16.msra.mxu1 %v10408_v57 }
 0x1c1   :  { %8884 = vmatprep.subr.bf16.mxu1 %v10424_v23 }
 0x1c3   :  { %952 = vmatmul.mubr.bf16.gmra.mrb[44].mxu1 %v10634_v38 }
 0x1c4   :  { %8075 = vmatprep.mubr.msk.bf16.mxu1 %vm111_vm0, %v10640_v52  ;;  %8894 = vmatpush1.bf16.msra.mxu1 %v10430_v16 }
 0x1c5   :  { %8885 = vmatprep.subr.bf16.mxu1 %v10437_v30 }
 0x1c8   :  { %8895 = vmatpush1.bf16.msra.mxu1 %v10442_v50 }
 0x1c9   :  { %8886 = vmatprep.subr.bf16.mxu1 %v10449_v34 }
 0x1cb   :  { %962 = vmatmul.mubr.bf16.gmra.mrb[48].mxu1 %v10666_v51 }
 0x1cc   :  { %8076 = vmatprep.mubr.msk.bf16.mxu1 %vm111_vm0, %v10672_v19  ;;  %8896 = vmatpush1.bf16.msra.mxu1 %v14047_v15 }
 0x1cd   :  { %8887 = vmatprep.subr.msk.bf16.mxu1 %vm645_vm1, %v14048_v5 }
 0x1d0   :  { %8897 = vmatpush1.bf16.msra.mxu1 %v14049_v21 }
 0x1d1   :  { %8494 = vmatprep.subr.bf16.mxu1 %v13968_v29 }
 0x1d3   :  { %972 = vmatmul.mubr.bf16.gmra.mrb[52].mxu1 %v10696_v13 }
 0x1d4   :  { %8077 = vmatprep.mubr.msk.bf16.mxu1 %vm111_vm0, %v10699_v14 }
 0x1db   :  { %982 = vmatmul.mubr.bf16.gmra.mrb[56].mxu1 %v499_v58 }
 0x1dc   :  { %8078 = vmatprep.mubr.msk.bf16.mxu1 %vm111_vm0, %v502_v47 }
 0x1e3   :  { %992 = vmatmul.mubr.bf16.gmra.mrb[60].mxu1 %v501_v32 }
 0x1e4   :  { %8104 = vmatprep.mubr.msk.bf16.mxu1 %vm111_vm0, %v10640_v52 }
 0x1eb   :  { %1199 = vmatmul.mubr.bf16.vlgmr.msra.gmra.mrb[64].mxu1 %v10666_v51 }
 0x1ec   :  { %8105 = vmatprep.mubr.msk.bf16.mxu1 %vm111_vm0, %v10672_v19 }
 0x1f3   :  { %1209 = vmatmul.mubr.bf16.gmra.mrb[68].mxu1 %v10696_v13 }
 0x1f4   :  { %8106 = vmatprep.mubr.msk.bf16.mxu1 %vm111_vm0, %v10699_v14 }
 0x1fb   :  { %1219 = vmatmul.mubr.bf16.gmra.mrb[72].mxu1 %v499_v58 }
 0x1fc   :  { %8107 = vmatprep.mubr.msk.bf16.mxu1 %vm111_vm0, %v502_v47 }
 0x203   :  { %1229 = vmatmul.mubr.bf16.gmra.mrb[76].mxu1 %v501_v32 }
 0x204   :  { %8496 = vmatprep.mubr.msk.bf16.mxu1 %vm9874_vm2, %v13968_v29 }
 0x23e   :  { %v686_v40 = vpop.f32.mrb[0].mxu1  ;;  %v1160_v57 = vpop.f32.mrb[0].mxu0 }
 0x23f   :  { %v10769_v23 = vpop.f32.mrb[1].mxu1  ;;  %v10771_v16 = vpop.f32.mrb[1].mxu0 }
 0x240   :  { %14050 = vst [vmem:[#allocation11_spill] sm:$0xff] %v10771_v16  ;;  %v690_v30 = vpop.f32.mrb[2].mxu1  ;;  %v1164_v50 = vpop.f32.mrb[2].mxu0 }
 0x241   :  { %v10773_v34 = vpack.c.bf16 %v690_v30, %v686_v40  ;;  %v10775_v35 = vpack.c.bf16 %v1164_v50, %v1160_v57  ;;  %v10777_v61 = vpop.f32.mrb[3].mxu1  ;;  %v10779_v20 = vpop.f32.mrb[3].mxu0 }
 0x242   :  { %14051 = vst [vmem:[#allocation12_spill] sm:$0xff] %v10779_v20 }
 0x243   :  { %8543 = vmatpush3.bf16.msra.mxu0 %v10775_v35 }
 0x244   :  { %8554 = vmatprep.subr.bf16.mxu0 %v13968_v29 }
 0x246   :  { %v696_v11 = vpop.f32.mrb[4].mxu1  ;;  %v1170_v17 = vpop.f32.mrb[4].mxu0 }
 0x247   :  { %v10787_v38 = vpop.f32.mrb[5].mxu1  ;;  %v10789_v52 = vpop.f32.mrb[5].mxu0 }
 0x248   :  { %14052 = vst [vmem:[#allocation13_spill] sm:$0xff] %v10787_v38  ;;  %14053 = vst [vmem:[#allocation17_spill] sm:$0xff] %v10789_v52  ;;  %v700_v51 = vpop.f32.mrb[6].mxu1  ;;  %v1174_v10 = vpop.f32.mrb[6].mxu0 }
 0x249   :  { %v10791_v19 = vpack.c.bf16 %v700_v51, %v696_v11  ;;  %v10793_v24 = vpack.c.bf16 %v1174_v10, %v1170_v17  ;;  %v10795_v18 = vpop.f32.mrb[7].mxu1  ;;  %v10797_v28 = vpop.f32.mrb[7].mxu0 }
 0x24a   :  { %14054 = vst [vmem:[#allocation18_spill] sm:$0xff] %v10795_v18  ;;  %14055 = vst [vmem:[#allocation19_spill] sm:$0xff] %v10797_v28 }
 0x24e   :  { %v706_v44 = vpop.f32.mrb[8].mxu1  ;;  %v1180_v39 = vpop.f32.mrb[8].mxu0 }
 0x24f   :  { %v10803_v37 = vpop.f32.mrb[9].mxu1  ;;  %v10805_v48 = vpop.f32.mrb[9].mxu0 }
 0x250   :  { %14056 = vst [vmem:[#allocation20_spill] sm:$0xff] %v10803_v37  ;;  %14057 = vst [vmem:[#allocation21_spill] sm:$0xff] %v10805_v48  ;;  %v710_v0 = vpop.f32.mrb[10].mxu1  ;;  %v1184_v6 = vpop.f32.mrb[10].mxu0 }
 0x251   :  { %v10807_v53 = vpack.c.bf16 %v710_v0, %v706_v44  ;;  %v10809_v60 = vpack.c.bf16 %v1184_v6, %v1180_v39  ;;  %v10811_v49 = vpop.f32.mrb[11].mxu1  ;;  %v10813_v55 = vpop.f32.mrb[11].mxu0 }
 0x252   :  { %14059 = vst [vmem:[#allocation23_spill] sm:$0xff] %v10811_v49  ;;  %14060 = vst [vmem:[#allocation24_spill] sm:$0xff] %v10813_v55 }
 0x253   :  { %14058 = vst [vmem:[#allocation22_spill] sm:$0xff] %v10809_v60 }
 0x256   :  { %v716_v9 = vpop.f32.mrb[12].mxu1  ;;  %v1190_v14 = vpop.f32.mrb[12].mxu0 }
 0x257   :  { %v10819_v56 = vpop.f32.mrb[13].mxu1  ;;  %v10821_v59 = vpop.f32.mrb[13].mxu0 }
 0x258   :  { %14061 = vst [vmem:[#allocation25_spill] sm:$0xff] %v10819_v56  ;;  %14062 = vst [vmem:[#allocation26_spill] sm:$0xff] %v10821_v59  ;;  %v720_v41 = vpop.f32.mrb[14].mxu1  ;;  %v1194_v62 = vpop.f32.mrb[14].mxu0 }
 0x259   :  { %v10823_v33 = vpack.c.bf16 %v720_v41, %v716_v9  ;;  %v10825_v43 = vpack.c.bf16 %v1194_v62, %v1190_v14  ;;  %v10827_v8 = vpop.f32.mrb[15].mxu1  ;;  %v10829_v26 = vpop.f32.mrb[15].mxu0 }
 0x25a   :  { %14063 = vst [vmem:[#allocation27_spill] sm:$0xff] %v10827_v8  ;;  %14064 = vst [vmem:[#allocation28_spill] sm:$0xff] %v10829_v26 }
 0x25e   :  { %v726_v58 = vpop.f32.mrb[16].mxu1 }
 0x25f   :  { %v10835_v63 = vpop.f32.mrb[17].mxu1 }
 0x260   :  { %14065 = vst [vmem:[#allocation29_spill] sm:$0xff] %v10835_v63  ;;  %v730_v47 = vpop.f32.mrb[18].mxu1 }
 0x261   :  { %v10837_v36 = vpack.c.bf16 %v730_v47, %v726_v58  ;;  %v10839_v46 = vpop.f32.mrb[19].mxu1 }
 0x262   :  { %14066 = vst [vmem:[#allocation30_spill] sm:$0xff] %v10839_v46 }
 0x266   :  { %v736_v32 = vpop.f32.mrb[20].mxu1 }
 0x267   :  { %v10843_v27 = vpop.f32.mrb[21].mxu1 }
 0x268   :  { %14067 = vst [vmem:[#allocation31_spill] sm:$0xff] %v10843_v27  ;;  %v740_v42 = vpop.f32.mrb[22].mxu1 }
 0x269   :  { %v10845_v31 = vpack.c.bf16 %v740_v42, %v736_v32  ;;  %v10847_v4 = vpop.f32.mrb[23].mxu1 }
 0x26a   :  { %14068 = vst [vmem:[#allocation32_spill] sm:$0xff] %v10847_v4 }
 0x26e   :  { %v746_v15 = vpop.f32.mrb[24].mxu1 }
 0x26f   :  { %v10851_v5 = vpop.f32.mrb[25].mxu1 }
 0x270   :  { %14069 = vst [vmem:[#allocation33_spill] sm:$0xff] %v10851_v5  ;;  %v750_v21 = vpop.f32.mrb[26].mxu1 }
 0x271   :  { %v10853_v40 = vpack.c.bf16 %v750_v21, %v746_v15  ;;  %v10855_v57 = vpop.f32.mrb[27].mxu1 }
 0x272   :  { %14070 = vst [vmem:[#allocation34_spill] sm:$0xff] %v10855_v57 }
 0x276   :  { %v756_v50 = vpop.f32.mrb[28].mxu1 }
 0x277   :  { %v10859_v11 = vpop.f32.mrb[29].mxu1 }
 0x278   :  { %14071 = vst [vmem:[#allocation35_spill] sm:$0xff] %v10859_v11  ;;  %v760_v17 = vpop.f32.mrb[30].mxu1 }
 0x279   :  { %v10861_v51 = vpack.c.bf16 %v760_v17, %v756_v50  ;;  %v10863_v10 = vpop.f32.mrb[31].mxu1 }
 0x27a   :  { %14072 = vst [vmem:[#allocation36_spill] sm:$0xff] %v10863_v10 }
 0x27e   :  { %v923_v39 = vpop.f32.mrb[32].mxu1 }
 0x27f   :  { %v10867_v0 = vpop.f32.mrb[33].mxu1 }
 0x280   :  { %v927_v6 = vpop.f32.mrb[34].mxu1 }
 0x281   :  { %v10869_v9 = vpack.c.bf16 %v927_v6, %v923_v39  ;;  %v10871_v14 = vpop.f32.mrb[35].mxu1 }
 0x283   :  { %v1275_v62 = vsel %vm1270_vm3, %v10869_v9, 0 }
 0x284   :  { %8495 = vmatpush3.bf16.xpose.msra.mxu1 %v1275_v62 }
 0x285   :  { %8500 = vmatprep.subr.bf16.mxu1 %v13968_v29 }
 0x286   :  { %v933_v58 = vpop.f32.mrb[36].mxu1 }
 0x287   :  { %v10878_v47 = vpop.f32.mrb[37].mxu1 }
 0x288   :  { %v937_v32 = vpop.f32.mrb[38].mxu1 }
 0x289   :  { %v10880_v42 = vpack.c.bf16 %v937_v32, %v933_v58  ;;  %v10882_v15 = vpop.f32.mrb[39].mxu1 }
 0x28b   :  { %8497 = vmatmul.mubr.msk.bf16.vlgmr.msra.gmra.mrb[80].mxu1 %vm1270_vm3, %v10773_v34  ;;  %v1322_v50 = vsel %vm1270_vm3, %v10880_v42, 0 }
 0x28c   :  { %8501 = vmatpush3.bf16.xpose.msra.mxu1 %v1322_v50  ;;  %8502 = vmatprep.mubr.msk.bf16.mxu1 %vm9874_vm2, %v13968_v29 }
 0x28d   :  { %8506 = vmatprep.subr.bf16.mxu1 %v13968_v29 }
 0x28e   :  { %v943_v17 = vpop.f32.mrb[40].mxu1 }
 0x28f   :  { %v10893_v39 = vpop.f32.mrb[41].mxu1 }
 0x290   :  { %14073 = vst [vmem:[#allocation37_spill] sm:$0xff] %v10893_v39  ;;  %v947_v6 = vpop.f32.mrb[42].mxu1 }
 0x291   :  { %v10895_v62 = vpack.c.bf16 %v947_v6, %v943_v17  ;;  %v10897_v58 = vpop.f32.mrb[43].mxu1 }
 0x292   :  { %14074 = vst [vmem:[#allocation38_spill] sm:$0xff] %v10897_v58 }
 0x293   :  { %8503 = vmatmul.mubr.msk.bf16.vlgmr.msra.gmra.mrb[84].mxu1 %vm1270_vm3, %v10791_v19  ;;  %v1369_v50 = vsel %vm1270_vm3, %v10895_v62, 0 }
 0x294   :  { %8507 = vmatpush3.bf16.xpose.msra.mxu1 %v1369_v50  ;;  %8508 = vmatprep.mubr.msk.bf16.mxu1 %vm9874_vm2, %v13968_v29 }
 0x295   :  { %8512 = vmatprep.subr.bf16.mxu1 %v13968_v29 }
 0x296   :  { %v953_v7 = vpop.f32.mrb[44].mxu1 }
 0x297   :  { %v10908_v17 = vpop.f32.mrb[45].mxu1 }
 0x298   :  { %14075 = vst [vmem:[#allocation39_spill] sm:$0xff] %v10908_v17  ;;  %v957_v6 = vpop.f32.mrb[46].mxu1 }
 0x299   :  { %v10910_v13 = vpack.c.bf16 %v957_v6, %v953_v7  ;;  %v10912_v2 = vpop.f32.mrb[47].mxu1 }
 0x29a   :  { %14076 = vst [vmem:[#allocation40_spill] sm:$0xff] %v10912_v2 }
 0x29b   :  { %8509 = vmatmul.mubr.msk.bf16.vlgmr.msra.gmra.mrb[88].mxu1 %vm1270_vm3, %v10807_v53  ;;  %v1416_v50 = vsel %vm1270_vm3, %v10910_v13, 0 }
 0x29c   :  { %8513 = vmatpush3.bf16.xpose.msra.mxu1 %v1416_v50  ;;  %8514 = vmatprep.mubr.msk.bf16.mxu1 %vm9874_vm2, %v13968_v29 }
 0x29d   :  { %8518 = vmatprep.subr.bf16.mxu1 %v13968_v29 }
 0x29e   :  { %v963_v44 = vpop.f32.mrb[48].mxu1 }
 0x29f   :  { %v10923_v7 = vpop.f32.mrb[49].mxu1 }
 0x2a0   :  { %14077 = vst [vmem:[#allocation41_spill] sm:$0xff] %v10923_v7  ;;  %v967_v6 = vpop.f32.mrb[50].mxu1 }
 0x2a1   :  { %v10925_v30 = vpack.c.bf16 %v967_v6, %v963_v44  ;;  %v10927_v22 = vpop.f32.mrb[51].mxu1 }
 0x2a2   :  { %14078 = vst [vmem:[#allocation42_spill] sm:$0xff] %v10927_v22 }
 0x2a3   :  { %8515 = vmatmul.mubr.msk.bf16.vlgmr.msra.gmra.mrb[92].mxu1 %vm1270_vm3, %v10823_v33  ;;  %v1463_v50 = vsel %vm1270_vm3, %v10925_v30, 0 }
 0x2a4   :  { %8519 = vmatpush3.bf16.xpose.msra.mxu1 %v1463_v50  ;;  %8520 = vmatprep.mubr.msk.bf16.mxu1 %vm9874_vm2, %v13968_v29 }
 0x2a5   :  { %8524 = vmatprep.subr.bf16.mxu1 %v13968_v29 }
 0x2a6   :  { %v973_v45 = vpop.f32.mrb[52].mxu1 }
 0x2a7   :  { %v10938_v44 = vpop.f32.mrb[53].mxu1 }
 0x2a8   :  { %14079 = vst [vmem:[#allocation43_spill] sm:$0xff] %v10938_v44  ;;  %v977_v6 = vpop.f32.mrb[54].mxu1 }
 0x2a9   :  { %v10940_v12 = vpack.c.bf16 %v977_v6, %v973_v45  ;;  %v10942_v3 = vpop.f32.mrb[55].mxu1 }
 0x2aa   :  { %14080 = vst [vmem:[#allocation44_spill] sm:$0xff] %v10942_v3 }
 0x2ab   :  { %8521 = vmatmul.mubr.msk.bf16.vlgmr.msra.gmra.mrb[96].mxu1 %vm1270_vm3, %v10837_v36  ;;  %v1510_v50 = vsel %vm1270_vm3, %v10940_v12, 0 }
 0x2ac   :  { %8525 = vmatpush3.bf16.xpose.msra.mxu1 %v1510_v50  ;;  %8526 = vmatprep.mubr.msk.bf16.mxu1 %vm9874_vm2, %v13968_v29 }
 0x2ad   :  { %8530 = vmatprep.subr.bf16.mxu1 %v13968_v29 }
 0x2ae   :  { %v983_v32 = vpop.f32.mrb[56].mxu1 }
 0x2af   :  { %v10953_v45 = vpop.f32.mrb[57].mxu1 }
 0x2b0   :  { %14081 = vst [vmem:[#allocation45_spill] sm:$0xff] %v10953_v45  ;;  %v987_v6 = vpop.f32.mrb[58].mxu1 }
 0x2b1   :  { %v10955_v54 = vpack.c.bf16 %v987_v6, %v983_v32  ;;  %v10957_v41 = vpop.f32.mrb[59].mxu1 }
 0x2b2   :  { %14082 = vst [vmem:[#allocation46_spill] sm:$0xff] %v10957_v41 }
 0x2b3   :  { %8527 = vmatmul.mubr.msk.bf16.vlgmr.msra.gmra.mrb[100].mxu1 %vm1270_vm3, %v10845_v31  ;;  %v1557_v50 = vsel %vm1270_vm3, %v10955_v54, 0 }
 0x2b4   :  { %8531 = vmatpush3.bf16.xpose.msra.mxu1 %v1557_v50  ;;  %8532 = vmatprep.mubr.msk.bf16.mxu1 %vm9874_vm2, %v13968_v29 }
 0x2b5   :  { %8536 = vmatprep.subr.bf16.mxu1 %v13968_v29 }
 0x2b6   :  { %v993_v21 = vpop.f32.mrb[60].mxu1 }
 0x2b7   :  { %v10968_v32 = vpop.f32.mrb[61].mxu1 }
 0x2b8   :  { %14083 = vst [vmem:[#allocation47_spill] sm:$0xff] %v10968_v32  ;;  %v997_v6 = vpop.f32.mrb[62].mxu1 }
 0x2b9   :  { %v10970_v25 = vpack.c.bf16 %v997_v6, %v993_v21  ;;  %v10972_v59 = vpop.f32.mrb[63].mxu1 }
 0x2ba   :  { %14084 = vst [vmem:[#allocation48_spill] sm:$0xff] %v10972_v59 }
 0x2bb   :  { %8533 = vmatmul.mubr.msk.bf16.vlgmr.msra.gmra.mrb[104].mxu1 %vm1270_vm3, %v10853_v40  ;;  %v1604_v50 = vsel %vm1270_vm3, %v10970_v25, 0 }
 0x2bc   :  { %8537 = vmatpush3.bf16.xpose.msra.mxu1 %v1604_v50  ;;  %8538 = vmatprep.mubr.msk.bf16.mxu1 %vm9874_vm2, %v13968_v29 }
 0x2bd   :  { %8548 = vmatprep.subr.bf16.mxu1 %v13968_v29 }
 0x2be   :  { %v1200_v26 = vpop.f32.mrb[64].mxu1 }
 0x2bf   :  { %v10983_v21 = vpop.f32.mrb[65].mxu1 }
 0x2c0   :  { %14085 = vst [vmem:[#allocation49_spill] sm:$0xff] %v10983_v21  ;;  %v1204_v6 = vpop.f32.mrb[66].mxu1 }
 0x2c1   :  { %v10985_v48 = vpack.c.bf16 %v1204_v6, %v1200_v26  ;;  %v10987_v55 = vpop.f32.mrb[67].mxu1 }
 0x2c2   :  { %14086 = vst [vmem:[#allocation50_spill] sm:$0xff] %v10987_v55 }
 0x2c3   :  { %8539 = vmatmul.mubr.msk.bf16.vlgmr.msra.gmra.mrb[108].mxu1 %vm1270_vm3, %v10861_v51 }
 0x2c4   :  { %8549 = vmatpush3.bf16.msra.mxu1 %v10793_v24  ;;  %8550 = vmatprep.mubr.msk.bf16.mxu1 %vm9874_vm2, %v13968_v29 }
 0x2c5   :  { %8560 = vmatprep.subr.bf16.mxu1 %v13968_v29 }
 0x2c6   :  { %v1210_v50 = vpop.f32.mrb[68].mxu1 }
 0x2c7   :  { %v10997_v52 = vpop.f32.mrb[69].mxu1 }
 0x2c8   :  { %14087 = vst [vmem:[#allocation51_spill] sm:$0xff] %v10997_v52  ;;  %v1214_v26 = vpop.f32.mrb[70].mxu1  ;;  %v14093_v52 = vlaneseq }
 0x2c9   :  { %v10999_v6 = vpack.c.bf16 %v1214_v26, %v1210_v50  ;;  %v11001_v28 = vpop.f32.mrb[71].mxu1 }
 0x2ca   :  { %14088 = vst [vmem:[#allocation52_spill] sm:$0xff] %v11001_v28  ;;  %v1243_v28 = vand.u32 127, %v14093_v52 }
 0x2ce   :  { %v1220_v21 = vpop.f32.mrb[72].mxu1 }
 0x2cf   :  { %v11005_v55 = vpop.f32.mrb[73].mxu1  ;;  %v14191_v5 = vld [vmem:[#allocation51_spill] sm:$0xff] }
 0x2d0   :  { %14089 = vst [vmem:[#allocation53_spill] sm:$0xff] %v11005_v55  ;;  %v1224_v16 = vpop.f32.mrb[74].mxu1 }
 0x2d1   :  { %v11007_v20 = vpack.c.bf16 %v1224_v16, %v1220_v21  ;;  %v11009_v11 = vpop.f32.mrb[75].mxu1  ;;  %v14094_v16 = vld [vmem:[#allocation14_spill] sm:$0xff] }
 0x2d2   :  { %14090 = vst [vmem:[#allocation54_spill] sm:$0xff] %v11009_v11  ;;  %v1241_v21 = vadd.s32 8, %v14094_v16  ;;  %vm11024_vm4 = vcmp.le.s32.totalorder %v1243_v28, %v14094_v16 }
 0x2d4   :  { %vm11028_vm6 = vcmp.le.s32.totalorder %v1243_v28, %v1241_v21 }
 0x2d6   :  { %v1230_v10 = vpop.f32.mrb[76].mxu1 }
 0x2d7   :  { %v11013_v32 = vpop.f32.mrb[77].mxu1 }
 0x2d8   :  { %14091 = vst [vmem:[#allocation55_spill] sm:$0xff] %v11013_v32  ;;  %v1234_v50 = vpop.f32.mrb[78].mxu1 }
 0x2d9   :  { %v11015_v26 = vpack.c.bf16 %v1234_v50, %v1230_v10  ;;  %v11017_v59 = vpop.f32.mrb[79].mxu1 }
 0x2da   :  { %14092 = vst [vmem:[#allocation56_spill] sm:$0xff] %v11017_v59 }
 0x35e   :  { %v1311_v10 = vpop.f32.mrb[80].mxu1 }
 0x35f   :  { %v11034_v50 = vsel %vm11024_vm4, %v1311_v10, -1e+30  ;;  %v8498_v1 = vpop.f32.mrb[81].mxu1 }
 0x360   :  { %v1314_v32 = vpop.f32.mrb[82].mxu1  ;;  %v1668_v52 = vsel %vm1667_vm5, %v11034_v50, -inf }
 0x361   :  { %v11040_v16 = vsel %vm11028_vm6, %v1314_v32, -1e+30  ;;  %1669 = vmax.xlane.f32.xlu0 %v1668_v52  ;;  %v8499_v59 = vpop.f32.mrb[83].mxu1 }
 0x362   :  { %v1671_v28 = vsel %vm1667_vm5, %v11040_v16, -inf }
 0x363   :  { %1672 = vmax.xlane.f32.xlu1 %v1671_v28 }
 0x366   :  { %v1358_v21 = vpop.f32.mrb[84].mxu1 }
 0x367   :  { %v11046_v10 = vsel %vm11024_vm4, %v1358_v21, -1e+30  ;;  %v8504_v1 = vpop.f32.mrb[85].mxu1 }
 0x368   :  { %v1361_v55 = vpop.f32.mrb[86].mxu1  ;;  %v1674_v11 = vsel %vm1667_vm5, %v11046_v10, -inf }
 0x369   :  { %v11052_v32 = vsel %vm11028_vm6, %v1361_v55, -1e+30  ;;  %1675 = vmax.xlane.f32.xlu0 %v1674_v11  ;;  %v8505_v59 = vpop.f32.mrb[87].mxu1 }
 0x36a   :  { %v1677_v52 = vsel %vm1667_vm5, %v11052_v32, -inf }
 0x36b   :  { %1678 = vmax.xlane.f32.xlu1 %v1677_v52 }
 0x36e   :  { %v1405_v28 = vpop.f32.mrb[88].mxu1 }
 0x36f   :  { %v11058_v21 = vsel %vm11024_vm4, %v1405_v28, -1e+30  ;;  %v8510_v1 = vpop.f32.mrb[89].mxu1 }
 0x370   :  { %v1408_v57 = vpop.f32.mrb[90].mxu1  ;;  %v1680_v45 = vsel %vm1667_vm5, %v11058_v21, -inf }
 0x371   :  { %v11064_v55 = vsel %vm11028_vm6, %v1408_v57, -1e+30  ;;  %1681 = vmax.xlane.f32.xlu0 %v1680_v45  ;;  %v8511_v11 = vpop.f32.mrb[91].mxu1 }
 0x372   :  { %v1683_v59 = vsel %vm1667_vm5, %v11064_v55, -inf }
 0x373   :  { %1684 = vmax.xlane.f32.xlu1 %v1683_v59 }
 0x376   :  { %v1452_v52 = vpop.f32.mrb[92].mxu1 }
 0x377   :  { %v11070_v28 = vsel %vm11024_vm4, %v1452_v52, -1e+30  ;;  %v8516_v1 = vpop.f32.mrb[93].mxu1 }
 0x378   :  { %v1455_v41 = vpop.f32.mrb[94].mxu1  ;;  %v1686_v27 = vsel %vm1667_vm5, %v11070_v28, -inf }
 0x379   :  { %v11076_v57 = vsel %vm11028_vm6, %v1455_v41, -1e+30  ;;  %1687 = vmax.xlane.f32.xlu0 %v1686_v27  ;;  %v8517_v45 = vpop.f32.mrb[95].mxu1 }
 0x37a   :  { %v1689_v11 = vsel %vm1667_vm5, %v11076_v57, -inf }
 0x37b   :  { %1690 = vmax.xlane.f32.xlu1 %v1689_v11 }
 0x37e   :  { %v1499_v59 = vpop.f32.mrb[96].mxu1 }
 0x37f   :  { %v11082_v52 = vsel %vm11024_vm4, %v1499_v59, -1e+30  ;;  %v8522_v1 = vpop.f32.mrb[97].mxu1 }
 0x380   :  { %v1502_v4 = vpop.f32.mrb[98].mxu1  ;;  %v1692_v44 = vsel %vm1667_vm5, %v11082_v52, -inf }
 0x381   :  { %v11088_v41 = vsel %vm11028_vm6, %v1502_v4, -1e+30  ;;  %1693 = vmax.xlane.f32.xlu0 %v1692_v44  ;;  %v8523_v27 = vpop.f32.mrb[99].mxu1 }
 0x382   :  { %v1695_v45 = vsel %vm1667_vm5, %v11088_v41, -inf }
 0x383   :  { %1696 = vmax.xlane.f32.xlu1 %v1695_v45 }
 0x386   :  { %v1546_v11 = vpop.f32.mrb[100].mxu1 }
 0x387   :  { %v11094_v59 = vsel %vm11024_vm4, %v1546_v11, -1e+30  ;;  %v8528_v1 = vpop.f32.mrb[101].mxu1 }
 0x388   :  { %v1549_v3 = vpop.f32.mrb[102].mxu1  ;;  %v1698_v63 = vsel %vm1667_vm5, %v11094_v59, -inf }
 0x389   :  { %v11100_v4 = vsel %vm11028_vm6, %v1549_v3, -1e+30  ;;  %1699 = vmax.xlane.f32.xlu0 %v1698_v63  ;;  %v8529_v44 = vpop.f32.mrb[103].mxu1 }
 0x38a   :  { %v1701_v27 = vsel %vm1667_vm5, %v11100_v4, -inf }
 0x38b   :  { %1702 = vmax.xlane.f32.xlu1 %v1701_v27 }
 0x38e   :  { %v1593_v45 = vpop.f32.mrb[104].mxu1 }
 0x38f   :  { %v11106_v11 = vsel %vm11024_vm4, %v1593_v45, -1e+30  ;;  %v8534_v1 = vpop.f32.mrb[105].mxu1 }
 0x390   :  { %v1596_v46 = vpop.f32.mrb[106].mxu1  ;;  %v1704_v7 = vsel %vm1667_vm5, %v11106_v11, -inf }
 0x391   :  { %v11112_v3 = vsel %vm11028_vm6, %v1596_v46, -1e+30  ;;  %1705 = vmax.xlane.f32.xlu0 %v1704_v7  ;;  %v8535_v63 = vpop.f32.mrb[107].mxu1 }
 0x392   :  { %v1707_v44 = vsel %vm1667_vm5, %v11112_v3, -inf }
 0x393   :  { %1708 = vmax.xlane.f32.xlu1 %v1707_v44 }
 0x396   :  { %v1640_v27 = vpop.f32.mrb[108].mxu1 }
 0x397   :  { %v11118_v45 = vsel %vm11024_vm4, %v1640_v27, -1e+30  ;;  %v8540_v1 = vpop.f32.mrb[109].mxu1 }
 0x398   :  { %v1643_v22 = vpop.f32.mrb[110].mxu1  ;;  %v1710_v56 = vsel %vm1667_vm5, %v11118_v45, -inf }
 0x399   :  { %v11124_v46 = vsel %vm11028_vm6, %v1643_v22, -1e+30  ;;  %1711 = vmax.xlane.f32.xlu0 %v1710_v56  ;;  %v8541_v7 = vpop.f32.mrb[111].mxu1 }
 0x39a   :  { %v1713_v63 = vsel %vm1667_vm5, %v11124_v46, -inf }
 0x39b   :  { %1714 = vmax.xlane.f32.xlu1 %v1713_v63 }
 0x3ee   :  { %v1670_v44 = vpop.xlane.xlu0 %1669 }
 0x3ef   :  { %v1716_v8 = vsub.f32 %v11034_v50, %v1670_v44 }
 0x3f0   :  { %v1673_v27 = vpop.xlane.xlu1 %1672 }
 0x3f1   :  { %v1732_v17 = vmul.f32 1.442695, %v1716_v8  ;;  %v1717_v1 = vsub.f32 %v11040_v16, %v1673_v27 }
 0x3f3   :  { %9471 = vpow2.f32 %v1732_v17  ;;  %v1734_v2 = vmul.f32 1.442695, %v1717_v1 }
 0x3f5   :  { %9473 = vpow2.f32 %v1734_v2 }
 0x3f6   :  { %v1676_v37 = vpop.xlane.xlu0 %1675 }
 0x3f7   :  { %v1718_v22 = vsub.f32 %v11046_v10, %v1676_v37 }
 0x3f8   :  { %v1679_v49 = vpop.xlane.xlu1 %1678 }
 0x3f9   :  { %v1736_v56 = vmul.f32 1.442695, %v1718_v22  ;;  %v1719_v7 = vsub.f32 %v11052_v32, %v1679_v49 }
 0x3fb   :  { %9475 = vpow2.f32 %v1736_v56  ;;  %v1738_v39 = vmul.f32 1.442695, %v1719_v7 }
 0x3fd   :  { %v11132_v63 = vpop.eup %9471  ;;  %9477 = vpow2.f32 %v1738_v39 }
 0x3fe   :  { %v1682_v50 = vpop.xlane.xlu0 %1681  ;;  %v1764_v8 = vsel %vm1667_vm5, %v11132_v63, 0.0 }
 0x3ff   :  { %v11136_v16 = vpop.eup %9473  ;;  %v1720_v2 = vsub.f32 %v11058_v21, %v1682_v50  ;;  %1765 = vadd.xlane.f32.xlu0 %v1764_v8 }
 0x400   :  { %v1685_v17 = vpop.xlane.xlu1 %1684  ;;  %v1767_v37 = vsel %vm1667_vm5, %v11136_v16, 0.0 }
 0x401   :  { %v1740_v10 = vmul.f32 1.442695, %v1720_v2  ;;  %v1721_v49 = vsub.f32 %v11064_v55, %v1685_v17  ;;  %1768 = vadd.xlane.f32.xlu1 %v1767_v37 }
 0x403   :  { %9479 = vpow2.f32 %v1740_v10  ;;  %v1742_v32 = vmul.f32 1.442695, %v1721_v49 }
 0x405   :  { %v11142_v39 = vpop.eup %9475  ;;  %9481 = vpow2.f32 %v1742_v32 }
 0x406   :  { %v1688_v44 = vpop.xlane.xlu0 %1687  ;;  %v1770_v27 = vsel %vm1667_vm5, %v11142_v39, 0.0 }
 0x407   :  { %v11146_v1 = vpop.eup %9477  ;;  %v1722_v21 = vsub.f32 %v11070_v28, %v1688_v44  ;;  %1771 = vadd.xlane.f32.xlu0 %v1770_v27 }
 0x408   :  { %v1691_v22 = vpop.xlane.xlu1 %1690  ;;  %v1773_v56 = vsel %vm1667_vm5, %v11146_v1, 0.0 }
 0x409   :  { %v1744_v55 = vmul.f32 1.442695, %v1722_v21  ;;  %v1723_v7 = vsub.f32 %v11076_v57, %v1691_v22  ;;  %1774 = vadd.xlane.f32.xlu1 %v1773_v56 }
 0x40b   :  { %9483 = vpow2.f32 %v1744_v55  ;;  %v1746_v50 = vmul.f32 1.442695, %v1723_v7 }
 0x40d   :  { %v11152_v8 = vpop.eup %9479  ;;  %9485 = vpow2.f32 %v1746_v50 }
 0x40e   :  { %v1694_v2 = vpop.xlane.xlu0 %1693  ;;  %v1776_v17 = vsel %vm1667_vm5, %v11152_v8, 0.0 }
 0x40f   :  { %v11156_v37 = vpop.eup %9481  ;;  %v1724_v28 = vsub.f32 %v11082_v52, %v1694_v2  ;;  %1777 = vadd.xlane.f32.xlu0 %v1776_v17 }
 0x410   :  { %v1697_v10 = vpop.xlane.xlu1 %1696  ;;  %v1779_v49 = vsel %vm1667_vm5, %v11156_v37, 0.0 }
 0x411   :  { %v1748_v57 = vmul.f32 1.442695, %v1724_v28  ;;  %v1725_v32 = vsub.f32 %v11088_v41, %v1697_v10  ;;  %1780 = vadd.xlane.f32.xlu1 %v1779_v49 }
 0x413   :  { %9487 = vpow2.f32 %v1748_v57  ;;  %v1750_v44 = vmul.f32 1.442695, %v1725_v32 }
 0x415   :  { %v11162_v27 = vpop.eup %9483  ;;  %9489 = vpow2.f32 %v1750_v44 }
 0x416   :  { %v1700_v21 = vpop.xlane.xlu0 %1699  ;;  %v1782_v22 = vsel %vm1667_vm5, %v11162_v27, 0.0 }
 0x417   :  { %v11166_v56 = vpop.eup %9485  ;;  %v1726_v52 = vsub.f32 %v11094_v59, %v1700_v21  ;;  %1783 = vadd.xlane.f32.xlu0 %v1782_v22 }
 0x418   :  { %v1703_v55 = vpop.xlane.xlu1 %1702  ;;  %v1785_v7 = vsel %vm1667_vm5, %v11166_v56, 0.0 }
 0x419   :  { %v1752_v41 = vmul.f32 1.442695, %v1726_v52  ;;  %v1727_v50 = vsub.f32 %v11100_v4, %v1703_v55  ;;  %1786 = vadd.xlane.f32.xlu1 %v1785_v7 }
 0x41b   :  { %9491 = vpow2.f32 %v1752_v41  ;;  %v1754_v2 = vmul.f32 1.442695, %v1727_v50 }
 0x41d   :  { %v11172_v17 = vpop.eup %9487  ;;  %9493 = vpow2.f32 %v1754_v2 }
 0x41e   :  { %v1706_v28 = vpop.xlane.xlu0 %1705  ;;  %v1788_v10 = vsel %vm1667_vm5, %v11172_v17, 0.0 }
 0x41f   :  { %v11176_v49 = vpop.eup %9489  ;;  %v1728_v59 = vsub.f32 %v11106_v11, %v1706_v28  ;;  %1789 = vadd.xlane.f32.xlu0 %v1788_v10 }
 0x420   :  { %v1709_v57 = vpop.xlane.xlu1 %1708  ;;  %v1791_v32 = vsel %vm1667_vm5, %v11176_v49, 0.0 }
 0x421   :  { %v1756_v4 = vmul.f32 1.442695, %v1728_v59  ;;  %v1729_v44 = vsub.f32 %v11112_v3, %v1709_v57  ;;  %1792 = vadd.xlane.f32.xlu1 %v1791_v32 }
 0x423   :  { %9495 = vpow2.f32 %v1756_v4  ;;  %v1758_v21 = vmul.f32 1.442695, %v1729_v44 }
 0x425   :  { %v11182_v22 = vpop.eup %9491  ;;  %9497 = vpow2.f32 %v1758_v21 }
 0x426   :  { %v1712_v52 = vpop.xlane.xlu0 %1711  ;;  %v1794_v55 = vsel %vm1667_vm5, %v11182_v22, 0.0 }
 0x427   :  { %v11186_v7 = vpop.eup %9493  ;;  %v1730_v11 = vsub.f32 %v11118_v45, %v1712_v52  ;;  %1795 = vadd.xlane.f32.xlu0 %v1794_v55 }
 0x428   :  { %v1797_v41 = vsel %vm1667_vm5, %v11186_v7, 0.0  ;;  %v1715_v57 = vpop.xlane.xlu1 %1714 }
 0x429   :  { %v1760_v50 = vmul.f32 1.442695, %v1730_v11  ;;  %1798 = vadd.xlane.f32.xlu1 %v1797_v41  ;;  %v1731_v32 = vsub.f32 %v11124_v46, %v1715_v57 }
 0x42b   :  { %9499 = vpow2.f32 %v1760_v50  ;;  %v1762_v4 = vmul.f32 1.442695, %v1731_v32 }
 0x42d   :  { %v11191_v3 = vpop.eup %9495  ;;  %9501 = vpow2.f32 %v1762_v4 }
 0x42e   :  { %v1800_v2 = vsel %vm1667_vm5, %v11191_v3, 0.0 }
 0x42f   :  { %v11195_v28 = vpop.eup %9497  ;;  %1801 = vadd.xlane.f32.xlu0 %v1800_v2 }
 0x430   :  { %v1803_v10 = vsel %vm1667_vm5, %v11195_v28, 0.0 }
 0x431   :  { %1804 = vadd.xlane.f32.xlu1 %v1803_v10 }
 0x435   :  { %v11199_v45 = vpop.eup %9499 }
 0x436   :  { %v1806_v59 = vsel %vm1667_vm5, %v11199_v45, 0.0 }
 0x437   :  { %1807 = vadd.xlane.f32.xlu0 %v1806_v59  ;;  %v11226_v44 = vpop.eup %9501 }
 0x438   :  { %v1809_v46 = vsel %vm1667_vm5, %v11226_v44, 0.0 }
 0x442   :  { %2205 = vrot.lane.b32.xlu1 %v10773_v34, %s9875_s4 }
 0x446   :  { %2261 = vrot.lane.b32.xlu1 %v10880_v42, %s9875_s4 }
 0x44a   :  { %2314 = vrot.lane.b32.xlu1 %v10895_v62, %s9875_s4 }
 0x44d   :  { %2208 = vrot.lane.b32.xlu0 %v10869_v9, %s9875_s4 }
 0x451   :  { %2258 = vrot.lane.b32.xlu0 %v10791_v19, %s9875_s4 }
 0x455   :  { %2367 = vrot.lane.b32.xlu0 %v10910_v13, %s9875_s4 }
 0x459   :  { %2364 = vrot.lane.b32.xlu0 %v10823_v33, %s9875_s4 }
 0x45d   :  { %2473 = vrot.lane.b32.xlu0 %v10940_v12, %s9875_s4 }
 0x461   :  { %2470 = vrot.lane.b32.xlu0 %v10845_v31, %s9875_s4 }
 0x465   :  { %2579 = vrot.lane.b32.xlu0 %v10970_v25, %s9875_s4 }
 0x469   :  { %2829 = vrot.lane.b32.xlu0 %v10775_v35, %s9875_s4 }
 0x46e   :  { %1810 = vadd.xlane.f32.xlu1 %v1809_v46  ;;  %v14099_v46 = vmov 0.0  }
 0x47f   :  { %2311 = vrot.lane.b32.xlu1 %v10807_v53, %s9875_s4 }
 0x483   :  { %2420 = vrot.lane.b32.xlu1 %v10925_v30, %s9875_s4 }
 0x487   :  { %2417 = vrot.lane.b32.xlu1 %v10837_v36, %s9875_s4 }
 0x48b   :  { %2526 = vrot.lane.b32.xlu1 %v10955_v54, %s9875_s4 }
 0x48c   :  { %v1766_v21 = vpop.xlane.xlu0 %1765 }
 0x48d   :  { %9503 = vrcp.f32 %v1766_v21 }
 0x48e   :  { %v1769_v52 = vpop.xlane.xlu1 %1768 }
 0x48f   :  { %9505 = vrcp.f32 %v1769_v52  ;;  %2523 = vrot.lane.b32.xlu1 %v10853_v40, %s9875_s4 }
 0x493   :  { %2576 = vrot.lane.b32.xlu1 %v10861_v51, %s9875_s4 }
 0x494   :  { %v1772_v55 = vpop.xlane.xlu0 %1771 }
 0x495   :  { %9507 = vrcp.f32 %v1772_v55 }
 0x496   :  { %v1775_v11 = vpop.xlane.xlu1 %1774 }
 0x497   :  { %v9504_v41 = vpop.eup %9503  ;;  %9509 = vrcp.f32 %v1775_v11  ;;  %2877 = vrot.lane.b32.xlu1 %v10793_v24, %s9875_s4 }
 0x498   :  { %v1828_v2 = vmul.f32 %v9504_v41, %v11132_v63 }
 0x499   :  { %v9506_v50 = vpop.eup %9505 }
 0x49a   :  { %v1829_v10 = vmul.f32 %v9506_v50, %v11136_v16 }
 0x49c   :  { %v1844_v59 = vpack.c.bf16 %v1829_v10, %v1828_v2  ;;  %v1778_v57 = vpop.xlane.xlu0 %1777 }
 0x49d   :  { %9511 = vrcp.f32 %v1778_v57 }
 0x49e   :  { %8545 = vmatmul.mubr.msk.bf16.vlgmr.msra.gmra.mrb[16].mxu0 %vm1667_vm5, %v1844_v59  ;;  %v1781_v32 = vpop.xlane.xlu1 %1780 }
 0x49f   :  { %v9508_v4 = vpop.eup %9507  ;;  %8555 = vmatpush3.bf16.msra.mxu0 %v10809_v60  ;;  %9513 = vrcp.f32 %v1781_v32  ;;  %8556 = vmatprep.mubr.msk.bf16.mxu0 %vm9874_vm2, %v14099_v46 }
 0x4a0   :  { %8566 = vmatprep.subr.bf16.mxu0 %v14099_v46  ;;  %v1830_v63 = vmul.f32 %v9508_v4, %v11142_v39 }
 0x4a1   :  { %v9510_v21 = vpop.eup %9509 }
 0x4a2   :  { %v1831_v16 = vmul.f32 %v9510_v21, %v11146_v1 }
 0x4a4   :  { %v1784_v52 = vpop.xlane.xlu0 %1783  ;;  %v1845_v55 = vpack.c.bf16 %v1831_v16, %v1830_v63 }
 0x4a5   :  { %9515 = vrcp.f32 %v1784_v52 }
 0x4a6   :  { %8551 = vmatmul.mubr.msk.bf16.vlgmr.msra.gmra.mrb[112].mxu1 %vm1667_vm5, %v1845_v55  ;;  %v1787_v11 = vpop.xlane.xlu1 %1786 }
 0x4a7   :  { %v9512_v41 = vpop.eup %9511  ;;  %8561 = vmatpush3.bf16.msra.mxu1 %v10825_v43  ;;  %9517 = vrcp.f32 %v1787_v11  ;;  %8562 = vmatprep.mubr.msk.bf16.mxu1 %vm9874_vm2, %v14099_v46 }
 0x4a8   :  { %8572 = vmatprep.subr.bf16.mxu1 %v14099_v46  ;;  %v1832_v39 = vmul.f32 %v9512_v41, %v11152_v8 }
 0x4a9   :  { %v9514_v50 = vpop.eup %9513 }
 0x4aa   :  { %v1833_v1 = vmul.f32 %v9514_v50, %v11156_v37 }
 0x4ac   :  { %v1790_v2 = vpop.xlane.xlu0 %1789  ;;  %v1846_v10 = vpack.c.bf16 %v1833_v1, %v1832_v39 }
 0x4ad   :  { %9519 = vrcp.f32 %v1790_v2 }
 0x4ae   :  { %8557 = vmatmul.mubr.msk.bf16.vlgmr.msra.gmra.mrb[20].mxu0 %vm1667_vm5, %v1846_v10  ;;  %v1793_v59 = vpop.xlane.xlu1 %1792 }
 0x4af   :  { %v9516_v57 = vpop.eup %9515  ;;  %8567 = vmatpush3.bf16.msra.mxu0 %v10985_v48  ;;  %9521 = vrcp.f32 %v1793_v59  ;;  %8568 = vmatprep.mubr.msk.bf16.mxu0 %vm9874_vm2, %v14099_v46 }
 0x4b0   :  { %8578 = vmatprep.subr.bf16.mxu0 %v14099_v46  ;;  %v1834_v8 = vmul.f32 %v9516_v57, %v11162_v27 }
 0x4b1   :  { %v9518_v32 = vpop.eup %9517 }
 0x4b2   :  { %v1835_v37 = vmul.f32 %v9518_v32, %v11166_v56 }
 0x4b4   :  { %v1796_v4 = vpop.xlane.xlu0 %1795  ;;  %v1847_v21 = vpack.c.bf16 %v1835_v37, %v1834_v8 }
 0x4b5   :  { %9523 = vrcp.f32 %v1796_v4 }
 0x4b6   :  { %8563 = vmatmul.mubr.msk.bf16.vlgmr.msra.gmra.mrb[116].mxu1 %vm1667_vm5, %v1847_v21  ;;  %v1799_v63 = vpop.xlane.xlu1 %1798 }
 0x4b7   :  { %v9520_v16 = vpop.eup %9519  ;;  %8573 = vmatpush3.bf16.msra.mxu1 %v10999_v6  ;;  %9525 = vrcp.f32 %v1799_v63  ;;  %8574 = vmatprep.mubr.msk.bf16.mxu1 %vm9874_vm2, %v14099_v46 }
 0x4b8   :  { %8584 = vmatprep.subr.bf16.mxu1 %v14099_v46  ;;  %v1836_v27 = vmul.f32 %v9520_v16, %v11172_v17 }
 0x4b9   :  { %v9522_v52 = vpop.eup %9521 }
 0x4ba   :  { %v1837_v56 = vmul.f32 %v9522_v52, %v11176_v49 }
 0x4bc   :  { %v1802_v55 = vpop.xlane.xlu0 %1801  ;;  %v1848_v11 = vpack.c.bf16 %v1837_v56, %v1836_v27 }
 0x4bd   :  { %9527 = vrcp.f32 %v1802_v55 }
 0x4be   :  { %8569 = vmatmul.mubr.msk.bf16.vlgmr.msra.gmra.mrb[24].mxu0 %vm1667_vm5, %v1848_v11  ;;  %v1805_v41 = vpop.xlane.xlu1 %1804 }
 0x4bf   :  { %v9524_v50 = vpop.eup %9523  ;;  %8579 = vmatpush3.bf16.msra.mxu0 %v11007_v20  ;;  %9529 = vrcp.f32 %v1805_v41  ;;  %8580 = vmatprep.mubr.msk.bf16.mxu0 %vm9874_vm2, %v14099_v46 }
 0x4c0   :  { %8590 = vmatprep.subr.bf16.mxu0 %v14099_v46  ;;  %v1838_v17 = vmul.f32 %v9524_v50, %v11182_v22 }
 0x4c1   :  { %v9526_v39 = vpop.eup %9525 }
 0x4c2   :  { %v1839_v49 = vmul.f32 %v9526_v39, %v11186_v7  ;;  %v2206_v59 = vpop.permute.xlu1 %2205 }
 0x4c4   :  { %v1849_v1 = vpack.c.bf16 %v1839_v49, %v1838_v17  ;;  %v1808_v2 = vpop.xlane.xlu0 %1807 }
 0x4c5   :  { %9531 = vrcp.f32 %v1808_v2 }
 0x4c6   :  { %8575 = vmatmul.mubr.msk.bf16.vlgmr.msra.gmra.mrb[120].mxu1 %vm1667_vm5, %v1849_v1  ;;  %v2262_v37 = vpop.permute.xlu1 %2261 }
 0x4c7   :  { %v9528_v10 = vpop.eup %9527  ;;  %8585 = vmatpush3.bf16.msra.mxu1 %v11015_v26  ;;  %8586 = vmatprep.mubr.msk.bf16.mxu1 %vm9874_vm2, %v14099_v46 }
 0x4c8   :  { %8596 = vmatprep.subr.bf16.mxu1 %v14099_v46  ;;  %v1840_v32 = vmul.f32 %v9528_v10, %v11191_v3  ;;  %v2209_v8 = vpop.permute.xlu0 %2208  ;;  %v2267_v10 = vsel %vm1270_vm3, %v2262_v37, 0 }
 0x4c9   :  { %v9530_v57 = vpop.eup %9529  ;;  %v2214_v4 = vsel %vm1270_vm3, %v2209_v8, 0 }
 0x4ca   :  { %v1841_v22 = vmul.f32 %v9530_v57, %v11195_v28  ;;  %v2315_v21 = vpop.permute.xlu1 %2314 }
 0x4cb   :  { %v2320_v63 = vsel %vm1270_vm3, %v2315_v21, 0 }
 0x4cc   :  { %v1850_v7 = vpack.c.bf16 %v1841_v22, %v1840_v32  ;;  %v2259_v3 = vpop.permute.xlu0 %2258 }
 0x4ce   :  { %8581 = vmatmul.mubr.msk.bf16.vlgmr.msra.gmra.mrb[28].mxu0 %vm1667_vm5, %v1850_v7 }
 0x4cf   :  { %8591 = vmatpush3.bf16.xpose.msra.mxu0 %v2214_v4  ;;  %8592 = vmatprep.mubr.msk.bf16.mxu0 %vm9874_vm2, %v14099_v46  ;;  %v9532_v11 = vpop.eup %9531 }
 0x4d0   :  { %8602 = vmatprep.subr.bf16.mxu0 %v14099_v46  ;;  %v2368_v28 = vpop.permute.xlu0 %2367  ;;  %v1842_v39 = vmul.f32 %v9532_v11, %v11199_v45 }
 0x4d4   :  { %v2365_v52 = vpop.permute.xlu0 %2364 }
 0x4d6   :  { %8593 = vmatmul.mubr.msk.bf16.vlgmr.msra.gmra.mrb[32].mxu0 %vm1270_vm3, %v2206_v59 }
 0x4d7   :  { %8603 = vmatpush3.bf16.xpose.msra.mxu0 %v2320_v63  ;;  %8604 = vmatprep.mubr.msk.bf16.mxu0 %vm9874_vm2, %v14099_v46 }
 0x4d8   :  { %8614 = vmatprep.subr.bf16.mxu0 %v14099_v46  ;;  %v2474_v56 = vpop.permute.xlu0 %2473 }
 0x4d9   :  { %v2479_v8 = vsel %vm1270_vm3, %v2474_v56, 0 }
 0x4dc   :  { %v2471_v1 = vpop.permute.xlu0 %2470 }
 0x4e0   :  { %v2580_v45 = vpop.permute.xlu0 %2579 }
 0x4e1   :  { %v2585_v7 = vsel %vm1270_vm3, %v2580_v45, 0 }
 0x4e4   :  { %v2830_v22 = vpop.permute.xlu0 %2829 }
 0x4fb   :  { %v1811_v16 = vpop.xlane.xlu1 %1810 }
 0x4fc   :  { %9533 = vrcp.f32 %v1811_v16 }
 0x4ff   :  { %v2312_v27 = vpop.permute.xlu1 %2311 }
 0x500   :  { %8605 = vmatmul.mubr.msk.bf16.vlgmr.msra.gmra.mrb[36].mxu0 %vm1270_vm3, %v2312_v27 }
 0x501   :  { %8616 = vmatprep.mubr.msk.bf16.mxu0 %vm9874_vm2, %v14099_v46 }
 0x503   :  { %v2421_v55 = vpop.permute.xlu1 %2420 }
 0x504   :  { %v2426_v41 = vsel %vm1270_vm3, %v2421_v55, 0 }
 0x505   :  { %8615 = vmatpush3.bf16.xpose.msra.mxu0 %v2426_v41 }
 0x506   :  { %v9534_v50 = vpop.eup %9533  ;;  %8626 = vmatprep.subr.bf16.mxu0 %v14099_v46 }
 0x507   :  { %v1843_v17 = vmul.f32 %v9534_v50, %v11226_v44  ;;  %v2418_v49 = vpop.permute.xlu1 %2417  ;;  %v2373_v44 = vsel %vm1270_vm3, %v2368_v28, 0 }
 0x509   :  { %v1851_v2 = vpack.c.bf16 %v1843_v17, %v1842_v39 }
 0x50b   :  { %8587 = vmatmul.mubr.msk.bf16.vlgmr.msra.gmra.mrb[124].mxu1 %vm1667_vm5, %v1851_v2  ;;  %v2527_v59 = vpop.permute.xlu1 %2526 }
 0x50c   :  { %8597 = vmatpush3.bf16.xpose.msra.mxu1 %v2267_v10  ;;  %v2532_v57 = vsel %vm1270_vm3, %v2527_v59, 0  ;;  %8617 = vmatmul.mubr.msk.bf16.vlgmr.msra.gmra.mrb[40].mxu0 %vm1270_vm3, %v2418_v49 }
 0x50d   :  { %8627 = vmatpush3.bf16.xpose.msra.mxu0 %v2532_v57  ;;  %8598 = vmatprep.mubr.msk.bf16.mxu1 %vm9874_vm2, %v14099_v46 }
 0x50e   :  { %8608 = vmatprep.subr.bf16.mxu1 %v14099_v46  ;;  %8628 = vmatprep.mubr.msk.bf16.mxu0 %vm9874_vm2, %v14099_v46 }
 0x50f   :  { %8638 = vmatprep.subr.bf16.mxu0 %v14099_v46  ;;  %v2524_v32 = vpop.permute.xlu1 %2523 }
 0x513   :  { %8599 = vmatmul.mubr.msk.bf16.vlgmr.msra.gmra.mrb[128].mxu1 %vm1270_vm3, %v2259_v3  ;;  %v2577_v37 = vpop.permute.xlu1 %2576 }
 0x514   :  { %8609 = vmatpush3.bf16.xpose.msra.mxu1 %v2373_v44  ;;  %8629 = vmatmul.mubr.msk.bf16.vlgmr.msra.gmra.mrb[44].mxu0 %vm1270_vm3, %v2524_v32 }
 0x515   :  { %8639 = vmatpush3.bf16.msra.mxu0 %v2830_v22  ;;  %8610 = vmatprep.mubr.msk.bf16.mxu1 %vm9874_vm2, %v14099_v46 }
 0x516   :  { %8620 = vmatprep.subr.bf16.mxu1 %v14099_v46  ;;  %8640 = vmatprep.mubr.msk.bf16.mxu0 %vm9874_vm2, %v14099_v46 }
 0x517   :  { %8650 = vmatprep.subr.bf16.mxu0 %v14099_v46  ;;  %v2878_v4 = vpop.permute.xlu1 %2877 }
 0x51b   :  { %8611 = vmatmul.mubr.msk.bf16.vlgmr.msra.gmra.mrb[132].mxu1 %vm1270_vm3, %v2365_v52 }
 0x51c   :  { %8621 = vmatpush3.bf16.xpose.msra.mxu1 %v2479_v8  ;;  %8622 = vmatprep.mubr.msk.bf16.mxu1 %vm9874_vm2, %v14099_v46 }
 0x51d   :  { %8632 = vmatprep.subr.bf16.mxu1 %v14099_v46 }
 0x523   :  { %8623 = vmatmul.mubr.msk.bf16.vlgmr.msra.gmra.mrb[136].mxu1 %vm1270_vm3, %v2471_v1 }
 0x524   :  { %8633 = vmatpush3.bf16.xpose.msra.mxu1 %v2585_v7  ;;  %8634 = vmatprep.mubr.msk.bf16.mxu1 %vm9874_vm2, %v14099_v46 }
 0x525   :  { %8644 = vmatprep.subr.bf16.mxu1 %v14099_v46 }
 0x52b   :  { %8635 = vmatmul.mubr.msk.bf16.vlgmr.msra.gmra.mrb[140].mxu1 %vm1270_vm3, %v2577_v37 }
 0x52c   :  { %8645 = vmatpush3.bf16.msra.mxu1 %v2878_v4  ;;  %8646 = vmatprep.mubr.msk.bf16.mxu1 %vm9874_vm2, %v14099_v46 }
 0x52d   :  { %8656 = vmatprep.subr.bf16.mxu1 %v14099_v46 }
 0x571   :  { %v11338_v21 = vpop.f32.mrb[16].mxu0 }
 0x572   :  { %14100 = vst [vmem:[#allocation57_spill] sm:$0xff] %v11338_v21  ;;  %v8546_v63 = vpop.f32.mrb[17].mxu0 }
 0x573   :  { %v11340_v3 = vpop.f32.mrb[18].mxu0 }
 0x574   :  { %14101 = vst [vmem:[#allocation58_spill] sm:$0xff] %v11340_v3  ;;  %v8547_v28 = vpop.f32.mrb[19].mxu0 }
 0x579   :  { %v11342_v16 = vpop.f32.mrb[112].mxu1 }
 0x57a   :  { %14102 = vst [vmem:[#allocation59_spill] sm:$0xff] %v11342_v16  ;;  %v8552_v52 = vpop.f32.mrb[113].mxu1 }
 0x57b   :  { %v11344_v27 = vpop.f32.mrb[114].mxu1 }
 0x57c   :  { %14103 = vst [vmem:[#allocation60_spill] sm:$0xff] %v11344_v27  ;;  %v8553_v56 = vpop.f32.mrb[115].mxu1 }
 0x581   :  { %v11346_v55 = vpop.f32.mrb[20].mxu0 }
 0x582   :  { %14104 = vst [vmem:[#allocation61_spill] sm:$0xff] %v11346_v55  ;;  %v8558_v11 = vpop.f32.mrb[21].mxu0 }
 0x583   :  { %v11348_v41 = vpop.f32.mrb[22].mxu0 }
 0x584   :  { %14105 = vst [vmem:[#allocation62_spill] sm:$0xff] %v11348_v41  ;;  %v8559_v50 = vpop.f32.mrb[23].mxu0 }
 0x589   :  { %v11350_v39 = vpop.f32.mrb[116].mxu1 }
 0x58a   :  { %14106 = vst [vmem:[#allocation63_spill] sm:$0xff] %v11350_v39  ;;  %v8564_v17 = vpop.f32.mrb[117].mxu1 }
 0x58b   :  { %v11352_v49 = vpop.f32.mrb[118].mxu1 }
 0x58c   :  { %14107 = vst [vmem:[#allocation64_spill] sm:$0xff] %v11352_v49  ;;  %v8565_v1 = vpop.f32.mrb[119].mxu1 }
 0x591   :  { %v11354_v2 = vpop.f32.mrb[24].mxu0 }
 0x592   :  { %14108 = vst [vmem:[#allocation65_spill] sm:$0xff] %v11354_v2  ;;  %v8570_v10 = vpop.f32.mrb[25].mxu0 }
 0x593   :  { %v11356_v59 = vpop.f32.mrb[26].mxu0 }
 0x594   :  { %14109 = vst [vmem:[#allocation66_spill] sm:$0xff] %v11356_v59  ;;  %v8571_v57 = vpop.f32.mrb[27].mxu0 }
 0x599   :  { %v11358_v45 = vpop.f32.mrb[120].mxu1 }
 0x59a   :  { %14110 = vst [vmem:[#allocation67_spill] sm:$0xff] %v11358_v45  ;;  %v8576_v44 = vpop.f32.mrb[121].mxu1 }
 0x59b   :  { %v11360_v32 = vpop.f32.mrb[122].mxu1 }
 0x59c   :  { %14111 = vst [vmem:[#allocation68_spill] sm:$0xff] %v11360_v32  ;;  %v8577_v22 = vpop.f32.mrb[123].mxu1 }
 0x5a1   :  { %v11362_v8 = vpop.f32.mrb[28].mxu0 }
 0x5a2   :  { %14112 = vst [vmem:[#allocation69_spill] sm:$0xff] %v11362_v8  ;;  %v8582_v7 = vpop.f32.mrb[29].mxu0 }
 0x5a3   :  { %v11364_v37 = vpop.f32.mrb[30].mxu0 }
 0x5a4   :  { %14113 = vst [vmem:[#allocation70_spill] sm:$0xff] %v11364_v37  ;;  %v8583_v4 = vpop.f32.mrb[31].mxu0 }
 0x5a9   :  { %v2250_v63 = vpop.f32.mrb[32].mxu0 }
 0x5aa   :  { %v11368_v28 = vsel %vm11024_vm4, %v2250_v63, -1e+30  ;;  %v8594_v52 = vpop.f32.mrb[33].mxu0 }
 0x5ab   :  { %v2253_v56 = vpop.f32.mrb[34].mxu0  ;;  %v2644_v11 = vsel %vm1667_vm5, %v11368_v28, -inf }
 0x5ac   :  { %v11374_v50 = vsel %vm11028_vm6, %v2253_v56, -1e+30  ;;  %2645 = vmax.xlane.f32.xlu0 %v2644_v11  ;;  %v8595_v17 = vpop.f32.mrb[35].mxu0 }
 0x5ad   :  { %v2647_v1 = vsel %vm1667_vm5, %v11374_v50, -inf }
 0x5ae   :  { %2648 = vmax.xlane.f32.xlu1 %v2647_v1 }
 0x5d3   :  { %v2356_v10 = vpop.f32.mrb[36].mxu0 }
 0x5d4   :  { %v8606_v57 = vpop.f32.mrb[37].mxu0 }
 0x5d5   :  { %v2359_v44 = vpop.f32.mrb[38].mxu0 }
 0x5d6   :  { %v11380_v22 = vsel %vm11028_vm6, %v2359_v44, -1e+30  ;;  %v8607_v7 = vpop.f32.mrb[39].mxu0 }
 0x5d7   :  { %v2659_v4 = vsel %vm1667_vm5, %v11380_v22, -inf }
 0x5d8   :  { %2660 = vmax.xlane.f32.xlu1 %v2659_v4 }
 0x5de   :  { %v11384_v63 = vpop.f32.mrb[124].mxu1 }
 0x5df   :  { %14114 = vst [vmem:[#allocation71_spill] sm:$0xff] %v11384_v63  ;;  %v8588_v52 = vpop.f32.mrb[125].mxu1  ;;  %v2462_v56 = vpop.f32.mrb[40].mxu0 }
 0x5e0   :  { %v11386_v11 = vpop.f32.mrb[126].mxu1  ;;  %v8618_v17 = vpop.f32.mrb[41].mxu0  ;;  %v11396_v52 = vsel %vm11024_vm4, %v2356_v10, -1e+30 }
 0x5e1   :  { %14115 = vst [vmem:[#allocation72_spill] sm:$0xff] %v11386_v11  ;;  %v8589_v1 = vpop.f32.mrb[127].mxu1  ;;  %v2465_v8 = vpop.f32.mrb[42].mxu0  ;;  %v2656_v63 = vsel %vm1667_vm5, %v11396_v52, -inf }
 0x5e2   :  { %v8619_v57 = vpop.f32.mrb[43].mxu0 }
 0x5e6   :  { %v2303_v37 = vpop.f32.mrb[128].mxu1 }
 0x5e7   :  { %v11390_v44 = vsel %vm11024_vm4, %v2303_v37, -1e+30  ;;  %v8600_v7 = vpop.f32.mrb[129].mxu1  ;;  %v2568_v32 = vpop.f32.mrb[44].mxu0 }
 0x5e8   :  { %v2306_v45 = vpop.f32.mrb[130].mxu1  ;;  %v8630_v2 = vpop.f32.mrb[45].mxu0  ;;  %v2650_v4 = vsel %vm1667_vm5, %v11390_v44, -inf }
 0x5e9   :  { %v2571_v17 = vpop.f32.mrb[46].mxu0  ;;  %2651 = vmax.xlane.f32.xlu0 %v2650_v4  ;;  %v8601_v1 = vpop.f32.mrb[131].mxu1  ;;  %v11402_v37 = vsel %vm11028_vm6, %v2306_v45, -1e+30 }
 0x5ea   :  { %v8631_v57 = vpop.f32.mrb[47].mxu0  ;;  %v2653_v59 = vsel %vm1667_vm5, %v11402_v37, -inf }
 0x5ed   :  { %2657 = vmax.xlane.f32.xlu0 %v2656_v63  ;;  %v11418_v63 = vsel %vm11028_vm6, %v2465_v8, -1e+30 }
 0x5ee   :  { %v2409_v2 = vpop.f32.mrb[132].mxu1 }
 0x5ef   :  { %v8612_v7 = vpop.f32.mrb[133].mxu1  ;;  %v11408_v10 = vsel %vm11024_vm4, %v2409_v2, -1e+30  ;;  %v11424_v2 = vsel %vm11024_vm4, %v2462_v56, -1e+30 }
 0x5f0   :  { %v2412_v11 = vpop.f32.mrb[134].mxu1  ;;  %v2662_v57 = vsel %vm1667_vm5, %v11408_v10, -inf  ;;  %v2668_v8 = vsel %vm1667_vm5, %v11424_v2, -inf }
 0x5f1   :  { %v11412_v4 = vsel %vm11028_vm6, %v2412_v11, -1e+30  ;;  %2654 = vmax.xlane.f32.xlu0 %v2653_v59  ;;  %v8613_v1 = vpop.f32.mrb[135].mxu1  ;;  %v2671_v59 = vsel %vm1667_vm5, %v11418_v63, -inf }
 0x5f2   :  { %v2665_v45 = vsel %vm1667_vm5, %v11412_v4, -inf }
 0x5f3   :  { %2666 = vmax.xlane.f32.xlu1 %v2665_v45 }
 0x5f5   :  { %2663 = vmax.xlane.f32.xlu0 %v2662_v57  ;;  %v11438_v57 = vsel %vm11024_vm4, %v2568_v32, -1e+30 }
 0x5f6   :  { %v2515_v11 = vpop.f32.mrb[136].mxu1  ;;  %v2680_v55 = vsel %vm1667_vm5, %v11438_v57, -inf }
 0x5f7   :  { %2672 = vmax.xlane.f32.xlu1 %v2671_v59  ;;  %v8624_v7 = vpop.f32.mrb[137].mxu1  ;;  %v11432_v45 = vsel %vm11024_vm4, %v2515_v11, -1e+30  ;;  %v11454_v11 = vsel %vm11028_vm6, %v2571_v17, -1e+30 }
 0x5f8   :  { %v2518_v1 = vpop.f32.mrb[138].mxu1  ;;  %v2674_v56 = vsel %vm1667_vm5, %v11432_v45, -inf }
 0x5f9   :  { %2669 = vmax.xlane.f32.xlu0 %v2668_v8  ;;  %v8625_v49 = vpop.f32.mrb[139].mxu1 }
 0x5fa   :  { %v11448_v49 = vsel %vm11028_vm6, %v2518_v1, -1e+30 }
 0x5fb   :  { %v2677_v32 = vsel %vm1667_vm5, %v11448_v49, -inf }
 0x5fd   :  { %2675 = vmax.xlane.f32.xlu0 %v2674_v56 }
 0x5fe   :  { %v2621_v59 = vpop.f32.mrb[140].mxu1 }
 0x5ff   :  { %v8636_v7 = vpop.f32.mrb[141].mxu1 }
 0x600   :  { %v2624_v39 = vpop.f32.mrb[142].mxu1 }
 0x601   :  { %2681 = vmax.xlane.f32.xlu0 %v2680_v55  ;;  %v8637_v41 = vpop.f32.mrb[143].mxu1  ;;  %v2683_v55 = vsel %vm1667_vm5, %v11454_v11, -inf }
 0x602   :  { %v11460_v41 = vsel %vm11024_vm4, %v2621_v59, -1e+30 }
 0x603   :  { %v2686_v1 = vsel %vm1667_vm5, %v11460_v41, -inf }
 0x608   :  { %3021 = vrot.lane.b32.xlu1 %v10985_v48, %s9875_s4 }
 0x617   :  { %2925 = vrot.lane.b32.xlu0 %v10809_v60, %s9875_s4 }
 0x62c   :  { %2678 = vmax.xlane.f32.xlu1 %v2677_v32 }
 0x630   :  { %2684 = vmax.xlane.f32.xlu1 %v2683_v55  ;;  %v11476_v55 = vsel %vm11028_vm6, %v2624_v39, -1e+30 }
 0x636   :  { %2687 = vmax.xlane.f32.xlu0 %v2686_v1  ;;  %v2689_v1 = vsel %vm1667_vm5, %v11476_v55, -inf }
 0x639   :  { %v2646_v8 = vpop.xlane.xlu0 %2645 }
 0x63a   :  { %v2692_v59 = vsub.f32 %v11368_v28, %v2646_v8 }
 0x63b   :  { %v2649_v17 = vpop.xlane.xlu1 %2648 }
 0x63c   :  { %v2693_v56 = vsub.f32 %v11374_v50, %v2649_v17  ;;  %v2708_v32 = vmul.f32 1.442695, %v2692_v59 }
 0x63e   :  { %v2710_v7 = vmul.f32 1.442695, %v2693_v56 }
 0x640   :  { %9535 = vpow2.f32 %v2710_v7 }
 0x641   :  { %3117 = vrot.lane.b32.xlu1 %v11007_v20, %s9875_s4  ;;  %9537 = vpow2.f32 %v2708_v32 }
 0x645   :  { %3165 = vrot.lane.b32.xlu1 %v11015_v26, %s9875_s4 }
 0x64a   :  { %v11480_v16 = vpop.eup %9535 }
 0x64b   :  { %v11482_v27 = vpop.eup %9537  ;;  %v2743_v50 = vsel %vm1667_vm5, %v11480_v16, 0.0 }
 0x64c   :  { %2973 = vrot.lane.b32.xlu0 %v10825_v43, %s9875_s4  ;;  %v2740_v28 = vsel %vm1667_vm5, %v11482_v27, 0.0 }
 0x650   :  { %3069 = vrot.lane.b32.xlu0 %v10999_v6, %s9875_s4 }
 0x665   :  { %v2661_v56 = vpop.xlane.xlu1 %2660 }
 0x666   :  { %v2697_v32 = vsub.f32 %v11380_v22, %v2661_v56 }
 0x668   :  { %v2718_v58 = vmul.f32 1.442695, %v2697_v32 }
 0x669   :  { %2690 = vmax.xlane.f32.xlu1 %v2689_v1 }
 0x66d   :  { %2744 = vadd.xlane.f32.xlu1 %v2743_v50 }
 0x66f   :  { %2741 = vadd.xlane.f32.xlu0 %v2740_v28 }
 0x676   :  { %v2652_v17 = vpop.xlane.xlu0 %2651 }
 0x677   :  { %v2694_v39 = vsub.f32 %v11390_v44, %v2652_v17 }
 0x679   :  { %v2712_v8 = vmul.f32 1.442695, %v2694_v39 }
 0x67a   :  { %v2658_v59 = vpop.xlane.xlu0 %2657 }
 0x67b   :  { %9539 = vpow2.f32 %v2712_v8  ;;  %v2696_v7 = vsub.f32 %v11396_v52, %v2658_v59 }
 0x67d   :  { %v2716_v1 = vmul.f32 1.442695, %v2696_v7 }
 0x67e   :  { %v2655_v21 = vpop.xlane.xlu0 %2654 }
 0x67f   :  { %9541 = vpow2.f32 %v2716_v1  ;;  %v2695_v50 = vsub.f32 %v11402_v37, %v2655_v21 }
 0x680   :  { %v2667_v3 = vpop.xlane.xlu1 %2666 }
 0x681   :  { %v2714_v38 = vmul.f32 1.442695, %v2695_v50  ;;  %v2699_v28 = vsub.f32 %v11412_v4, %v2667_v3 }
 0x682   :  { %v2664_v18 = vpop.xlane.xlu0 %2663 }
 0x683   :  { %9543 = vpow2.f32 %v2714_v38  ;;  %v2698_v44 = vsub.f32 %v11408_v10, %v2664_v18  ;;  %v2722_v52 = vmul.f32 1.442695, %v2699_v28 }
 0x684   :  { %v2673_v17 = vpop.xlane.xlu1 %2672  ;;  %9545 = vpow2.f32 %v2718_v58 }
 0x685   :  { %v11494_v39 = vpop.eup %9539  ;;  %v2720_v22 = vmul.f32 1.442695, %v2698_v44  ;;  %v2701_v8 = vsub.f32 %v11418_v63, %v2673_v17 }
 0x686   :  { %v2670_v56 = vpop.xlane.xlu0 %2669  ;;  %v2746_v21 = vsel %vm1667_vm5, %v11494_v39, 0.0 }
 0x687   :  { %9547 = vpow2.f32 %v2720_v22  ;;  %v2700_v37 = vsub.f32 %v11424_v2, %v2670_v56  ;;  %2747 = vadd.xlane.f32.xlu0 %v2746_v21  ;;  %v2726_v38 = vmul.f32 1.442695, %v2701_v8 }
 0x688   :  { %9549 = vpow2.f32 %v2722_v52 }
 0x689   :  { %v11500_v3 = vpop.eup %9541  ;;  %v2724_v18 = vmul.f32 1.442695, %v2700_v37 }
 0x68a   :  { %v2676_v10 = vpop.xlane.xlu0 %2675  ;;  %v2752_v58 = vsel %vm1667_vm5, %v11500_v3, 0.0 }
 0x68b   :  { %9551 = vpow2.f32 %v2724_v18  ;;  %v2702_v4 = vsub.f32 %v11432_v45, %v2676_v10  ;;  %2753 = vadd.xlane.f32.xlu0 %v2752_v58  ;;  %v11542_v10 = vpop.permute.xlu1 %3021 }
 0x68c   :  { %9553 = vpow2.f32 %v2726_v38 }
 0x68d   :  { %v11505_v63 = vpop.eup %9543  ;;  %v2728_v59 = vmul.f32 1.442695, %v2702_v4 }
 0x68e   :  { %v2682_v7 = vpop.xlane.xlu0 %2681  ;;  %v2749_v2 = vsel %vm1667_vm5, %v11505_v63, 0.0  ;;  %v11509_v32 = vpop.eup %9545 }
 0x68f   :  { %9555 = vpow2.f32 %v2728_v59  ;;  %v2704_v1 = vsub.f32 %v11438_v57, %v2682_v7  ;;  %2750 = vadd.xlane.f32.xlu1 %v2749_v2  ;;  %v2755_v44 = vsel %vm1667_vm5, %v11509_v32, 0.0 }
 0x691   :  { %v11512_v50 = vpop.eup %9547  ;;  %v2732_v28 = vmul.f32 1.442695, %v2704_v1 }
 0x692   :  { %v2758_v45 = vsel %vm1667_vm5, %v11512_v50, 0.0  ;;  %v11518_v17 = vpop.eup %9549  ;;  %v2926_v59 = vpop.permute.xlu0 %2925 }
 0x693   :  { %9557 = vpow2.f32 %v2732_v28  ;;  %2759 = vadd.xlane.f32.xlu0 %v2758_v45  ;;  %2756 = vadd.xlane.f32.xlu1 %v2755_v44  ;;  %v2761_v22 = vsel %vm1667_vm5, %v11518_v17, 0.0 }
 0x695   :  { %v11520_v52 = vpop.eup %9551 }
 0x696   :  { %v2764_v57 = vsel %vm1667_vm5, %v11520_v52, 0.0  ;;  %v11526_v8 = vpop.eup %9553 }
 0x697   :  { %2765 = vadd.xlane.f32.xlu0 %v2764_v57  ;;  %2762 = vadd.xlane.f32.xlu1 %v2761_v22  ;;  %v2767_v37 = vsel %vm1667_vm5, %v11526_v8, 0.0 }
 0x699   :  { %v11528_v56 = vpop.eup %9555 }
 0x69a   :  { %v2770_v21 = vsel %vm1667_vm5, %v11528_v56, 0.0 }
 0x69b   :  { %2771 = vadd.xlane.f32.xlu0 %v2770_v21  ;;  %2768 = vadd.xlane.f32.xlu1 %v2767_v37 }
 0x69d   :  { %v11534_v38 = vpop.eup %9557 }
 0x69e   :  { %v2776_v18 = vsel %vm1667_vm5, %v11534_v38, 0.0 }
 0x69f   :  { %2777 = vadd.xlane.f32.xlu0 %v2776_v18 }
 0x6ac   :  { %3212 = vrot.lane.b32.xlu1 %v10773_v34, %s9876_s3 }
 0x6b0   :  { %3316 = vrot.lane.b32.xlu1 %v10895_v62, %s9876_s3 }
 0x6b5   :  { %3214 = vrot.lane.b32.xlu0 %v10869_v9, %s9876_s3 }
 0x6b9   :  { %v2679_v58 = vpop.xlane.xlu1 %2678  ;;  %3265 = vrot.lane.b32.xlu0 %v10880_v42, %s9876_s3 }
 0x6ba   :  { %v2703_v4 = vsub.f32 %v11448_v49, %v2679_v58 }
 0x6bc   :  { %v2730_v2 = vmul.f32 1.442695, %v2703_v4 }
 0x6bd   :  { %3263 = vrot.lane.b32.xlu0 %v10791_v19, %s9876_s3  ;;  %v2685_v7 = vpop.xlane.xlu1 %2684 }
 0x6be   :  { %v2705_v1 = vsub.f32 %v11454_v11, %v2685_v7  ;;  %9559 = vpow2.f32 %v2730_v2 }
 0x6c0   :  { %v2734_v45 = vmul.f32 1.442695, %v2705_v1 }
 0x6c1   :  { %3367 = vrot.lane.b32.xlu0 %v10910_v13, %s9876_s3  ;;  %v11579_v18 = vpop.permute.xlu1 %3117 }
 0x6c2   :  { %9561 = vpow2.f32 %v2734_v45 }
 0x6c3   :  { %v2688_v28 = vpop.xlane.xlu0 %2687 }
 0x6c4   :  { %v2706_v44 = vsub.f32 %v11460_v41, %v2688_v28 }
 0x6c5   :  { %3365 = vrot.lane.b32.xlu0 %v10823_v33, %s9876_s3  ;;  %v11581_v58 = vpop.permute.xlu1 %3165 }
 0x6c6   :  { %v2736_v49 = vmul.f32 1.442695, %v2706_v44 }
 0x6c7   :  { %v2974_v4 = vpop.permute.xlu0 %2973 }
 0x6c8   :  { %9563 = vpow2.f32 %v2736_v49  ;;  %v11561_v57 = vpop.eup %9559 }
 0x6c9   :  { %3469 = vrot.lane.b32.xlu0 %v10940_v12, %s9876_s3  ;;  %v2773_v11 = vsel %vm1667_vm5, %v11561_v57, 0.0 }
 0x6cb   :  { %v11584_v1 = vpop.permute.xlu0 %3069 }
 0x6cc   :  { %v11567_v22 = vpop.eup %9561 }
 0x6cd   :  { %3467 = vrot.lane.b32.xlu0 %v10845_v31, %s9876_s3  ;;  %v2779_v41 = vsel %vm1667_vm5, %v11567_v22, 0.0 }
 0x6d1   :  { %3571 = vrot.lane.b32.xlu0 %v10970_v25, %s9876_s3 }
 0x6d2   :  { %v11573_v21 = vpop.eup %9563 }
 0x6d3   :  { %v2782_v37 = vsel %vm1667_vm5, %v11573_v21, 0.0 }
 0x6d4   :  { %2774 = vadd.xlane.f32.xlu1 %v2773_v11 }
 0x6d5   :  { %3820 = vrot.lane.b32.xlu0 %v10775_v35, %s9876_s3 }
 0x6d8   :  { %2780 = vadd.xlane.f32.xlu1 %v2779_v41 }
 0x6d9   :  { %3914 = vrot.lane.b32.xlu0 %v10809_v60, %s9876_s3 }
 0x6dc   :  { %2783 = vadd.xlane.f32.xlu1 %v2782_v37 }
 0x6f6   :  { %v2691_v7 = vpop.xlane.xlu1 %2690 }
 0x6f7   :  { %v2707_v2 = vsub.f32 %v11476_v55, %v2691_v7 }
 0x6f9   :  { %v2738_v28 = vmul.f32 1.442695, %v2707_v2 }
 0x6fa   :  { %v2745_v45 = vpop.xlane.xlu1 %2744 }
 0x6fb   :  { %9565 = vpow2.f32 %v2738_v28 }
 0x6fc   :  { %9567 = vrcp.f32 %v2745_v45  ;;  %v2742_v44 = vpop.xlane.xlu0 %2741 }
 0x6fd   :  { %9569 = vrcp.f32 %v2742_v44 }
 0x705   :  { %v11586_v49 = vpop.eup %9565 }
 0x706   :  { %v9568_v11 = vpop.eup %9567  ;;  %v2785_v41 = vsel %vm1667_vm5, %v11586_v49, 0.0 }
 0x707   :  { %v9570_v37 = vpop.eup %9569  ;;  %2786 = vadd.xlane.f32.xlu1 %v2785_v41  ;;  %v2805_v60 = vmul.f32 %v9568_v11, %v11480_v16 }
 0x708   :  { %v2804_v55 = vmul.f32 %v9570_v37, %v11482_v27 }
 0x70a   :  { %v2820_v7 = vpack.c.bf16 %v2805_v60, %v2804_v55 }
 0x70c   :  { %8641 = vmatmul.mubr.msk.bf16.vlgmr.msra.gmra.mrb[48].mxu0 %vm1667_vm5, %v2820_v7 }
 0x70d   :  { %8651 = vmatpush3.bf16.msra.mxu0 %v2926_v59  ;;  %8652 = vmatprep.mubr.msk.bf16.mxu0 %vm9874_vm2, %v14099_v46 }
 0x70e   :  { %8662 = vmatprep.subr.bf16.mxu0 %v14099_v46 }
 0x714   :  { %v2748_v2 = vpop.xlane.xlu0 %2747 }
 0x715   :  { %9571 = vrcp.f32 %v2748_v2 }
 0x718   :  { %3314 = vrot.lane.b32.xlu1 %v10807_v53, %s9876_s3  ;;  %v2754_v28 = vpop.xlane.xlu0 %2753 }
 0x71c   :  { %3418 = vrot.lane.b32.xlu1 %v10925_v30, %s9876_s3  ;;  %v2751_v16 = vpop.xlane.xlu1 %2750 }
 0x71d   :  { %9573 = vrcp.f32 %v2751_v16 }
 0x71e   :  { %9575 = vrcp.f32 %v2754_v28 }
 0x71f   :  { %v9572_v45 = vpop.eup %9571 }
 0x720   :  { %v2760_v60 = vpop.xlane.xlu0 %2759  ;;  %3416 = vrot.lane.b32.xlu1 %v10837_v36, %s9876_s3  ;;  %v2757_v27 = vpop.xlane.xlu1 %2756  ;;  %v2806_v41 = vmul.f32 %v9572_v45, %v11494_v39 }
 0x721   :  { %9577 = vrcp.f32 %v2757_v27 }
 0x722   :  { %9579 = vrcp.f32 %v2760_v60 }
 0x724   :  { %3520 = vrot.lane.b32.xlu1 %v10955_v54, %s9876_s3  ;;  %v2763_v59 = vpop.xlane.xlu1 %2762  ;;  %v2766_v44 = vpop.xlane.xlu0 %2765 }
 0x725   :  { %9581 = vrcp.f32 %v2763_v59 }
 0x726   :  { %9583 = vrcp.f32 %v2766_v44 }
 0x727   :  { %v9574_v11 = vpop.eup %9573 }
 0x728   :  { %v2807_v37 = vmul.f32 %v9574_v11, %v11505_v63  ;;  %3518 = vrot.lane.b32.xlu1 %v10853_v40, %s9876_s3  ;;  %v2769_v55 = vpop.xlane.xlu1 %2768  ;;  %v9576_v7 = vpop.eup %9575 }
 0x729   :  { %9585 = vrcp.f32 %v2769_v55  ;;  %v2808_v16 = vmul.f32 %v9576_v7, %v11500_v3 }
 0x72a   :  { %v2821_v2 = vpack.c.bf16 %v2807_v37, %v2806_v41 }
 0x72b   :  { %v9578_v28 = vpop.eup %9577 }
 0x72c   :  { %3569 = vrot.lane.b32.xlu1 %v10861_v51, %s9876_s3  ;;  %8647 = vmatmul.mubr.msk.bf16.vlgmr.msra.gmra.mrb[144].mxu1 %vm1667_vm5, %v2821_v2  ;;  %v2809_v39 = vmul.f32 %v9578_v28, %v11509_v32  ;;  %v9580_v63 = vpop.eup %9579 }
 0x72d   :  { %8657 = vmatpush3.bf16.msra.mxu1 %v2974_v4  ;;  %8658 = vmatprep.mubr.msk.bf16.mxu1 %vm9874_vm2, %v14099_v46  ;;  %v2810_v59 = vmul.f32 %v9580_v63, %v11512_v50 }
 0x72e   :  { %8668 = vmatprep.subr.bf16.mxu1 %v14099_v46  ;;  %v2822_v60 = vpack.c.bf16 %v2809_v39, %v2808_v16 }
 0x72f   :  { %v9582_v27 = vpop.eup %9581 }
 0x730   :  { %3867 = vrot.lane.b32.xlu1 %v10793_v24, %s9876_s3  ;;  %v2811_v45 = vmul.f32 %v9582_v27, %v11518_v17  ;;  %8653 = vmatmul.mubr.msk.bf16.vlgmr.msra.gmra.mrb[52].mxu0 %vm1667_vm5, %v2822_v60  ;;  %v9584_v3 = vpop.eup %9583 }
 0x731   :  { %8663 = vmatpush3.bf16.msra.mxu0 %v11542_v10  ;;  %8664 = vmatprep.mubr.msk.bf16.mxu0 %vm9874_vm2, %v14099_v46  ;;  %v2812_v44 = vmul.f32 %v9584_v3, %v11520_v52  ;;  %v3213_v52 = vpop.permute.xlu1 %3212 }
 0x732   :  { %v2823_v32 = vpack.c.bf16 %v2811_v45, %v2810_v59  ;;  %8674 = vmatprep.subr.bf16.mxu0 %v14099_v46 }
 0x733   :  { %v9586_v4 = vpop.eup %9585 }
 0x734   :  { %4008 = vrot.lane.b32.xlu1 %v10985_v48, %s9876_s3  ;;  %v2813_v50 = vmul.f32 %v9586_v4, %v11526_v8  ;;  %8659 = vmatmul.mubr.msk.bf16.vlgmr.msra.gmra.mrb[148].mxu1 %vm1667_vm5, %v2823_v32  ;;  %v2772_v8 = vpop.xlane.xlu0 %2771 }
 0x735   :  { %8669 = vmatpush3.bf16.msra.mxu1 %v11584_v1  ;;  %8670 = vmatprep.mubr.msk.bf16.mxu1 %vm9874_vm2, %v14099_v46  ;;  %v3317_v10 = vpop.permute.xlu1 %3316  ;;  %9587 = vrcp.f32 %v2772_v8 }
 0x736   :  { %v2824_v17 = vpack.c.bf16 %v2813_v50, %v2812_v44  ;;  %8680 = vmatprep.subr.bf16.mxu1 %v14099_v46 }
 0x738   :  { %8665 = vmatmul.mubr.msk.bf16.vlgmr.msra.gmra.mrb[56].mxu0 %vm1667_vm5, %v2824_v17  ;;  %v2778_v1 = vpop.xlane.xlu0 %2777 }
 0x739   :  { %8675 = vmatpush3.bf16.msra.mxu0 %v11579_v18  ;;  %8676 = vmatprep.mubr.msk.bf16.mxu0 %vm9874_vm2, %v14099_v46 }
 0x73a   :  { %8686 = vmatprep.subr.bf16.mxu0 %v14099_v46 }
 0x73c   :  { %v3215_v60 = vpop.permute.xlu0 %3214 }
 0x73f   :  { %v9588_v37 = vpop.eup %9587 }
 0x740   :  { %v2814_v7 = vmul.f32 %v9588_v37, %v11528_v56  ;;  %v3220_v56 = vsel %vm1270_vm3, %v3215_v60, 0 }
 0x761   :  { %v2775_v11 = vpop.xlane.xlu1 %2774 }
 0x762   :  { %9589 = vrcp.f32 %v2775_v11 }
 0x763   :  { %9591 = vrcp.f32 %v2778_v1 }
 0x765   :  { %v2781_v41 = vpop.xlane.xlu1 %2780 }
 0x766   :  { %9593 = vrcp.f32 %v2781_v41 }
 0x769   :  { %v2784_v59 = vpop.xlane.xlu1 %2783 }
 0x76a   :  { %9595 = vrcp.f32 %v2784_v59 }
 0x76c   :  { %v9590_v55 = vpop.eup %9589 }
 0x76d   :  { %v2815_v18 = vmul.f32 %v9590_v55, %v11561_v57  ;;  %v9592_v2 = vpop.eup %9591  ;;  %v3266_v57 = vpop.permute.xlu0 %3265 }
 0x76e   :  { %v2816_v39 = vmul.f32 %v9592_v2, %v11534_v38  ;;  %v3322_v38 = vsel %vm1270_vm3, %v3317_v10, 0  ;;  %v3271_v37 = vsel %vm1270_vm3, %v3266_v57, 0 }
 0x76f   :  { %v2825_v28 = vpack.c.bf16 %v2815_v18, %v2814_v7 }
 0x770   :  { %v9594_v16 = vpop.eup %9593 }
 0x771   :  { %v2817_v63 = vmul.f32 %v9594_v16, %v11567_v22  ;;  %8671 = vmatmul.mubr.msk.bf16.vlgmr.msra.gmra.mrb[152].mxu1 %vm1667_vm5, %v2825_v28  ;;  %v3264_v22 = vpop.permute.xlu0 %3263 }
 0x772   :  { %8681 = vmatpush3.bf16.msra.mxu1 %v11581_v58  ;;  %8682 = vmatprep.mubr.msk.bf16.mxu1 %vm9874_vm2, %v14099_v46 }
 0x773   :  { %v2826_v27 = vpack.c.bf16 %v2817_v63, %v2816_v39  ;;  %8692 = vmatprep.subr.bf16.mxu1 %v14099_v46 }
 0x774   :  { %v9596_v50 = vpop.eup %9595 }
 0x775   :  { %8677 = vmatmul.mubr.msk.bf16.vlgmr.msra.gmra.mrb[60].mxu0 %vm1667_vm5, %v2826_v27  ;;  %v3368_v58 = vpop.permute.xlu0 %3367  ;;  %v2818_v8 = vmul.f32 %v9596_v50, %v11573_v21 }
 0x776   :  { %8687 = vmatpush3.bf16.xpose.msra.mxu0 %v3220_v56  ;;  %8688 = vmatprep.mubr.msk.bf16.mxu0 %vm9874_vm2, %v14099_v46 }
 0x777   :  { %8698 = vmatprep.subr.bf16.mxu0 %v14099_v46 }
 0x779   :  { %v3366_v3 = vpop.permute.xlu0 %3365 }
 0x77d   :  { %8689 = vmatmul.mubr.msk.bf16.vlgmr.msra.gmra.mrb[64].mxu0 %vm1270_vm3, %v3213_v52  ;;  %v3470_v4 = vpop.permute.xlu0 %3469 }
 0x77e   :  { %8699 = vmatpush3.bf16.xpose.msra.mxu0 %v3322_v38  ;;  %8700 = vmatprep.mubr.msk.bf16.mxu0 %vm9874_vm2, %v14099_v46  ;;  %v3475_v28 = vsel %vm1270_vm3, %v3470_v4, 0 }
 0x77f   :  { %8710 = vmatprep.subr.bf16.mxu0 %v14099_v46 }
 0x781   :  { %v3468_v11 = vpop.permute.xlu0 %3467 }
 0x785   :  { %v3572_v21 = vpop.permute.xlu0 %3571 }
 0x786   :  { %v3577_v16 = vsel %vm1270_vm3, %v3572_v21, 0 }
 0x789   :  { %v3821_v2 = vpop.permute.xlu0 %3820 }
 0x794   :  { %v2787_v45 = vpop.xlane.xlu1 %2786 }
 0x795   :  { %9597 = vrcp.f32 %v2787_v45 }
 0x798   :  { %v3315_v32 = vpop.permute.xlu1 %3314 }
 0x799   :  { %8701 = vmatmul.mubr.msk.bf16.vlgmr.msra.gmra.mrb[68].mxu0 %vm1270_vm3, %v3315_v32 }
 0x79a   :  { %8712 = vmatprep.mubr.msk.bf16.mxu0 %vm9874_vm2, %v14099_v46 }
 0x79c   :  { %v3419_v44 = vpop.permute.xlu1 %3418 }
 0x79d   :  { %v3424_v17 = vsel %vm1270_vm3, %v3419_v44, 0 }
 0x79e   :  { %8711 = vmatpush3.bf16.xpose.msra.mxu0 %v3424_v17 }
 0x79f   :  { %v9598_v52 = vpop.eup %9597  ;;  %8722 = vmatprep.subr.bf16.mxu0 %v14099_v46 }
 0x7a0   :  { %v2819_v10 = vmul.f32 %v9598_v52, %v11586_v49  ;;  %v3417_v1 = vpop.permute.xlu1 %3416  ;;  %v3373_v49 = vsel %vm1270_vm3, %v3368_v58, 0 }
 0x7a2   :  { %v2827_v41 = vpack.c.bf16 %v2819_v10, %v2818_v8 }
 0x7a4   :  { %8683 = vmatmul.mubr.msk.bf16.vlgmr.msra.gmra.mrb[156].mxu1 %vm1667_vm5, %v2827_v41  ;;  %v3521_v55 = vpop.permute.xlu1 %3520 }
 0x7a5   :  { %8693 = vmatpush3.bf16.xpose.msra.mxu1 %v3271_v37  ;;  %v3526_v7 = vsel %vm1270_vm3, %v3521_v55, 0  ;;  %8713 = vmatmul.mubr.msk.bf16.vlgmr.msra.gmra.mrb[72].mxu0 %vm1270_vm3, %v3417_v1 }
 0x7a6   :  { %8723 = vmatpush3.bf16.xpose.msra.mxu0 %v3526_v7  ;;  %8694 = vmatprep.mubr.msk.bf16.mxu1 %vm9874_vm2, %v14099_v46 }
 0x7a7   :  { %8704 = vmatprep.subr.bf16.mxu1 %v14099_v46  ;;  %8724 = vmatprep.mubr.msk.bf16.mxu0 %vm9874_vm2, %v14099_v46 }
 0x7a8   :  { %8734 = vmatprep.subr.bf16.mxu0 %v14099_v46  ;;  %v3519_v18 = vpop.permute.xlu1 %3518 }
 0x7ac   :  { %8695 = vmatmul.mubr.msk.bf16.vlgmr.msra.gmra.mrb[160].mxu1 %vm1270_vm3, %v3264_v22  ;;  %v3570_v39 = vpop.permute.xlu1 %3569 }
 0x7ad   :  { %8705 = vmatpush3.bf16.xpose.msra.mxu1 %v3373_v49  ;;  %8725 = vmatmul.mubr.msk.bf16.vlgmr.msra.gmra.mrb[76].mxu0 %vm1270_vm3, %v3519_v18 }
 0x7ae   :  { %8735 = vmatpush3.bf16.msra.mxu0 %v3821_v2  ;;  %8706 = vmatprep.mubr.msk.bf16.mxu1 %vm9874_vm2, %v14099_v46 }
 0x7af   :  { %8716 = vmatprep.subr.bf16.mxu1 %v14099_v46  ;;  %8736 = vmatprep.mubr.msk.bf16.mxu0 %vm9874_vm2, %v14099_v46 }
 0x7b0   :  { %8746 = vmatprep.subr.bf16.mxu0 %v14099_v46  ;;  %v3868_v63 = vpop.permute.xlu1 %3867 }
 0x7b4   :  { %8707 = vmatmul.mubr.msk.bf16.vlgmr.msra.gmra.mrb[164].mxu1 %vm1270_vm3, %v3366_v3 }
 0x7b5   :  { %8717 = vmatpush3.bf16.xpose.msra.mxu1 %v3475_v28  ;;  %8718 = vmatprep.mubr.msk.bf16.mxu1 %vm9874_vm2, %v14099_v46 }
 0x7b6   :  { %8728 = vmatprep.subr.bf16.mxu1 %v14099_v46 }
 0x7bc   :  { %8719 = vmatmul.mubr.msk.bf16.vlgmr.msra.gmra.mrb[168].mxu1 %vm1270_vm3, %v3468_v11 }
 0x7bd   :  { %8729 = vmatpush3.bf16.xpose.msra.mxu1 %v3577_v16  ;;  %8730 = vmatprep.mubr.msk.bf16.mxu1 %vm9874_vm2, %v14099_v46 }
 0x7be   :  { %8740 = vmatprep.subr.bf16.mxu1 %v14099_v46 }
 0x7c4   :  { %8731 = vmatmul.mubr.msk.bf16.vlgmr.msra.gmra.mrb[172].mxu1 %vm1270_vm3, %v3570_v39 }
 0x7c5   :  { %8741 = vmatpush3.bf16.msra.mxu1 %v3868_v63  ;;  %8742 = vmatprep.mubr.msk.bf16.mxu1 %vm9874_vm2, %v14099_v46 }
 0x7c6   :  { %8752 = vmatprep.subr.bf16.mxu1 %v14099_v46 }
 0x7df   :  { %v11698_v60 = vpop.f32.mrb[48].mxu0 }
 0x7e0   :  { %14116 = vst [vmem:[#allocation73_spill] sm:$0xff] %v11698_v60  ;;  %v8642_v27 = vpop.f32.mrb[49].mxu0 }
 0x7e1   :  { %v11700_v56 = vpop.f32.mrb[50].mxu0 }
 0x7e2   :  { %14117 = vst [vmem:[#allocation74_spill] sm:$0xff] %v11700_v56  ;;  %v8643_v57 = vpop.f32.mrb[51].mxu0 }
 0x7ff   :  { %v11704_v22 = vpop.f32.mrb[144].mxu1 }
 0x800   :  { %14118 = vst [vmem:[#allocation75_spill] sm:$0xff] %v11704_v22  ;;  %v8648_v58 = vpop.f32.mrb[145].mxu1 }
 0x801   :  { %v11706_v59 = vpop.f32.mrb[146].mxu1 }
 0x802   :  { %14119 = vst [vmem:[#allocation76_spill] sm:$0xff] %v11706_v59  ;;  %v8649_v3 = vpop.f32.mrb[147].mxu1 }
 0x803   :  { %v11710_v32 = vpop.f32.mrb[52].mxu0 }
 0x804   :  { %14120 = vst [vmem:[#allocation77_spill] sm:$0xff] %v11710_v32  ;;  %v8654_v4 = vpop.f32.mrb[53].mxu0 }
 0x805   :  { %v11712_v44 = vpop.f32.mrb[54].mxu0 }
 0x806   :  { %14121 = vst [vmem:[#allocation78_spill] sm:$0xff] %v11712_v44  ;;  %v8655_v17 = vpop.f32.mrb[55].mxu0 }
 0x807   :  { %v11716_v52 = vpop.f32.mrb[148].mxu1 }
 0x808   :  { %14122 = vst [vmem:[#allocation79_spill] sm:$0xff] %v11716_v52  ;;  %v8660_v8 = vpop.f32.mrb[149].mxu1 }
 0x809   :  { %v11718_v10 = vpop.f32.mrb[150].mxu1 }
 0x80a   :  { %14123 = vst [vmem:[#allocation80_spill] sm:$0xff] %v11718_v10  ;;  %v8661_v11 = vpop.f32.mrb[151].mxu1 }
 0x80b   :  { %v11722_v41 = vpop.f32.mrb[56].mxu0 }
 0x80c   :  { %14124 = vst [vmem:[#allocation81_spill] sm:$0xff] %v11722_v41  ;;  %v8666_v37 = vpop.f32.mrb[57].mxu0 }
 0x80d   :  { %v11724_v55 = vpop.f32.mrb[58].mxu0 }
 0x80e   :  { %14125 = vst [vmem:[#allocation82_spill] sm:$0xff] %v11724_v55  ;;  %v8667_v21 = vpop.f32.mrb[59].mxu0 }
 0x844   :  { %v11728_v49 = vpop.f32.mrb[152].mxu1 }
 0x845   :  { %14126 = vst [vmem:[#allocation83_spill] sm:$0xff] %v11728_v49  ;;  %v8672_v18 = vpop.f32.mrb[153].mxu1 }
 0x846   :  { %v11730_v2 = vpop.f32.mrb[154].mxu1 }
 0x847   :  { %14127 = vst [vmem:[#allocation84_spill] sm:$0xff] %v11730_v2  ;;  %v8673_v16 = vpop.f32.mrb[155].mxu1 }
 0x848   :  { %v11734_v39 = vpop.f32.mrb[60].mxu0 }
 0x849   :  { %14128 = vst [vmem:[#allocation85_spill] sm:$0xff] %v11734_v39  ;;  %v8678_v63 = vpop.f32.mrb[61].mxu0 }
 0x84a   :  { %v11736_v27 = vpop.f32.mrb[62].mxu0 }
 0x84b   :  { %14129 = vst [vmem:[#allocation86_spill] sm:$0xff] %v11736_v27  ;;  %v8679_v58 = vpop.f32.mrb[63].mxu0 }
 0x850   :  { %v3256_v3 = vpop.f32.mrb[64].mxu0 }
 0x851   :  { %v11742_v4 = vsel %vm11024_vm4, %v3256_v3, -1e+30  ;;  %v8690_v17 = vpop.f32.mrb[65].mxu0 }
 0x852   :  { %v3636_v8 = vsel %vm1667_vm5, %v11742_v4, -inf  ;;  %v3259_v11 = vpop.f32.mrb[66].mxu0 }
 0x853   :  { %v11748_v37 = vsel %vm11028_vm6, %v3259_v11, -1e+30  ;;  %3637 = vmax.xlane.f32.xlu0 %v3636_v8  ;;  %v8691_v21 = vpop.f32.mrb[67].mxu0 }
 0x854   :  { %v3639_v18 = vsel %vm1667_vm5, %v11748_v37, -inf }
 0x855   :  { %3640 = vmax.xlane.f32.xlu1 %v3639_v18 }
 0x86c   :  { %v3358_v16 = vpop.f32.mrb[68].mxu0 }
 0x86d   :  { %v8702_v63 = vpop.f32.mrb[69].mxu0 }
 0x86e   :  { %v3361_v58 = vpop.f32.mrb[70].mxu0 }
 0x86f   :  { %v11754_v3 = vsel %vm11028_vm6, %v3361_v58, -1e+30  ;;  %v8703_v17 = vpop.f32.mrb[71].mxu0 }
 0x870   :  { %v3651_v57 = vsel %vm1667_vm5, %v11754_v3, -inf }
 0x871   :  { %3652 = vmax.xlane.f32.xlu1 %v3651_v57 }
 0x877   :  { %v11758_v11 = vpop.f32.mrb[156].mxu1 }
 0x878   :  { %14130 = vst [vmem:[#allocation87_spill] sm:$0xff] %v11758_v11  ;;  %v8684_v8 = vpop.f32.mrb[157].mxu1  ;;  %v3460_v21 = vpop.f32.mrb[72].mxu0 }
 0x879   :  { %v11760_v28 = vpop.f32.mrb[158].mxu1  ;;  %v8714_v7 = vpop.f32.mrb[73].mxu0 }
 0x87a   :  { %14131 = vst [vmem:[#allocation88_spill] sm:$0xff] %v11760_v28  ;;  %v8685_v63 = vpop.f32.mrb[159].mxu1  ;;  %v3463_v1 = vpop.f32.mrb[74].mxu0  ;;  %v11772_v7 = vsel %vm11024_vm4, %v3358_v16, -1e+30 }
 0x87b   :  { %v8715_v50 = vpop.f32.mrb[75].mxu0  ;;  %v3648_v11 = vsel %vm1667_vm5, %v11772_v7, -inf }
 0x87f   :  { %v3307_v58 = vpop.f32.mrb[160].mxu1 }
 0x880   :  { %v11766_v17 = vsel %vm11024_vm4, %v3307_v58, -1e+30  ;;  %v8696_v38 = vpop.f32.mrb[161].mxu1  ;;  %v3562_v57 = vpop.f32.mrb[76].mxu0 }
 0x881   :  { %v3642_v8 = vsel %vm1667_vm5, %v11766_v17, -inf  ;;  %v3310_v45 = vpop.f32.mrb[162].mxu1  ;;  %v8726_v39 = vpop.f32.mrb[77].mxu0 }
 0x882   :  { %v3565_v18 = vpop.f32.mrb[78].mxu0  ;;  %3643 = vmax.xlane.f32.xlu0 %v3642_v8  ;;  %v8697_v63 = vpop.f32.mrb[163].mxu1  ;;  %v11778_v38 = vsel %vm11028_vm6, %v3310_v45, -1e+30 }
 0x883   :  { %v8727_v50 = vpop.f32.mrb[79].mxu0  ;;  %v3645_v39 = vsel %vm1667_vm5, %v11778_v38, -inf }
 0x884   :  { %v11800_v50 = vsel %vm11024_vm4, %v3460_v21, -1e+30 }
 0x886   :  { %3649 = vmax.xlane.f32.xlu0 %v3648_v11 }
 0x887   :  { %v3409_v58 = vpop.f32.mrb[164].mxu1 }
 0x888   :  { %v8708_v28 = vpop.f32.mrb[165].mxu1  ;;  %v11784_v16 = vsel %vm11024_vm4, %v3409_v58, -1e+30 }
 0x889   :  { %v3412_v27 = vpop.f32.mrb[166].mxu1  ;;  %v11794_v28 = vsel %vm11028_vm6, %v3463_v1, -1e+30  ;;  %v3654_v11 = vsel %vm1667_vm5, %v11784_v16, -inf }
 0x88a   :  { %v11788_v8 = vsel %vm11028_vm6, %v3412_v27, -1e+30  ;;  %3646 = vmax.xlane.f32.xlu0 %v3645_v39  ;;  %v8709_v63 = vpop.f32.mrb[167].mxu1  ;;  %v3663_v27 = vsel %vm1667_vm5, %v11794_v28, -inf }
 0x88b   :  { %v3657_v45 = vsel %vm1667_vm5, %v11788_v8, -inf  ;;  %v3660_v63 = vsel %vm1667_vm5, %v11800_v50, -inf }
 0x88c   :  { %3658 = vmax.xlane.f32.xlu1 %v3657_v45 }
 0x88e   :  { %3655 = vmax.xlane.f32.xlu0 %v3654_v11  ;;  %v11814_v11 = vsel %vm11024_vm4, %v3562_v57, -1e+30 }
 0x88f   :  { %v3511_v58 = vpop.f32.mrb[168].mxu1  ;;  %v3672_v2 = vsel %vm1667_vm5, %v11814_v11, -inf }
 0x890   :  { %3664 = vmax.xlane.f32.xlu1 %v3663_v27  ;;  %v8720_v39 = vpop.f32.mrb[169].mxu1  ;;  %v11808_v45 = vsel %vm11024_vm4, %v3511_v58, -1e+30  ;;  %v11830_v58 = vsel %vm11028_vm6, %v3565_v18, -1e+30  ;;  %v11846_v18 = vpop.permute.xlu0 %3914 }
 0x891   :  { %v3514_v1 = vpop.f32.mrb[170].mxu1  ;;  %v3666_v21 = vsel %vm1667_vm5, %v11808_v45, -inf }
 0x892   :  { %3661 = vmax.xlane.f32.xlu0 %v3660_v63  ;;  %v8721_v49 = vpop.f32.mrb[171].mxu1 }
 0x893   :  { %v11824_v49 = vsel %vm11028_vm6, %v3514_v1, -1e+30  ;;  %v11842_v1 = vpop.permute.xlu1 %4008 }
 0x894   :  { %v3669_v57 = vsel %vm1667_vm5, %v11824_v49, -inf }
 0x896   :  { %3667 = vmax.xlane.f32.xlu0 %v3666_v21 }
 0x897   :  { %v3613_v27 = vpop.f32.mrb[172].mxu1 }
 0x898   :  { %v8732_v39 = vpop.f32.mrb[173].mxu1 }
 0x899   :  { %v3616_v41 = vpop.f32.mrb[174].mxu1 }
 0x89a   :  { %3673 = vmax.xlane.f32.xlu0 %v3672_v2  ;;  %v8733_v55 = vpop.f32.mrb[175].mxu1  ;;  %v11836_v2 = vsel %vm11024_vm4, %v3613_v27, -1e+30 }
 0x89b   :  { %v3675_v55 = vsel %vm1667_vm5, %v11830_v58, -inf  ;;  %v3678_v63 = vsel %vm1667_vm5, %v11836_v2, -inf }
 0x8a1   :  { %4102 = vrot.lane.b32.xlu1 %v11007_v20, %s9876_s3 }
 0x8b0   :  { %3961 = vrot.lane.b32.xlu0 %v10825_v43, %s9876_s3 }
 0x8c5   :  { %3670 = vmax.xlane.f32.xlu1 %v3669_v57 }
 0x8c9   :  { %3676 = vmax.xlane.f32.xlu1 %v3675_v55 }
 0x8cf   :  { %3679 = vmax.xlane.f32.xlu0 %v3678_v63 }
 0x8da   :  { %4228 = vrot.lane.b32.xlu1 %v10869_v9, %s9877_s5  ;;  %v11852_v9 = vsel %vm11028_vm6, %v3616_v41, -1e+30 }
 0x8db   :  { %v3681_v63 = vsel %vm1667_vm5, %v11852_v9, -inf }
 0x8e0   :  { %v3638_v39 = vpop.xlane.xlu0 %3637 }
 0x8e1   :  { %v3684_v57 = vsub.f32 %v11742_v4, %v3638_v39 }
 0x8e2   :  { %v3641_v21 = vpop.xlane.xlu1 %3640 }
 0x8e3   :  { %v3685_v27 = vsub.f32 %v11748_v37, %v3641_v21  ;;  %v3700_v52 = vmul.f32 1.442695, %v3684_v57 }
 0x8e5   :  { %4055 = vrot.lane.b32.xlu0 %v10999_v6, %s9876_s3  ;;  %v3702_v55 = vmul.f32 1.442695, %v3685_v27 }
 0x8e7   :  { %9599 = vpow2.f32 %v3702_v55 }
 0x8e8   :  { %9601 = vpow2.f32 %v3700_v52 }
 0x8f1   :  { %v11856_v10 = vpop.eup %9599 }
 0x8f2   :  { %v11858_v32 = vpop.eup %9601  ;;  %v3735_v37 = vsel %vm1667_vm5, %v11856_v10, 0.0 }
 0x8f3   :  { %v3732_v4 = vsel %vm1667_vm5, %v11858_v32, 0.0 }
 0x8fe   :  { %3682 = vmax.xlane.f32.xlu1 %v3681_v63  ;;  %v3653_v39 = vpop.xlane.xlu1 %3652 }
 0x8ff   :  { %v3689_v55 = vsub.f32 %v11754_v3, %v3653_v39 }
 0x901   :  { %v3710_v56 = vmul.f32 1.442695, %v3689_v55 }
 0x902   :  { %3736 = vadd.xlane.f32.xlu1 %v3735_v37 }
 0x904   :  { %3733 = vadd.xlane.f32.xlu0 %v3732_v4 }
 0x90f   :  { %v3644_v52 = vpop.xlane.xlu0 %3643 }
 0x910   :  { %v3686_v41 = vsub.f32 %v11766_v17, %v3644_v52 }
 0x912   :  { %v3704_v21 = vmul.f32 1.442695, %v3686_v41 }
 0x913   :  { %v3650_v27 = vpop.xlane.xlu0 %3649 }
 0x914   :  { %9603 = vpow2.f32 %v3704_v21  ;;  %v3688_v57 = vsub.f32 %v11772_v7, %v3650_v27 }
 0x916   :  { %v3708_v63 = vmul.f32 1.442695, %v3688_v57 }
 0x917   :  { %v3647_v44 = vpop.xlane.xlu0 %3646 }
 0x918   :  { %9605 = vpow2.f32 %v3708_v63  ;;  %v3687_v37 = vsub.f32 %v11778_v38, %v3647_v44 }
 0x919   :  { %v3659_v60 = vpop.xlane.xlu1 %3658 }
 0x91a   :  { %v3706_v22 = vmul.f32 1.442695, %v3687_v37  ;;  %v3691_v4 = vsub.f32 %v11788_v8, %v3659_v60 }
 0x91b   :  { %v3656_v59 = vpop.xlane.xlu0 %3655 }
 0x91c   :  { %9607 = vpow2.f32 %v3706_v22  ;;  %v3690_v17 = vsub.f32 %v11784_v16, %v3656_v59  ;;  %v3714_v7 = vmul.f32 1.442695, %v3691_v4 }
 0x91d   :  { %v3665_v52 = vpop.xlane.xlu1 %3664  ;;  %9609 = vpow2.f32 %v3710_v56 }
 0x91e   :  { %v11870_v41 = vpop.eup %9603  ;;  %v3712_v3 = vmul.f32 1.442695, %v3690_v17  ;;  %v3693_v21 = vsub.f32 %v11794_v28, %v3665_v52 }
 0x91f   :  { %v3662_v39 = vpop.xlane.xlu0 %3661  ;;  %v3738_v44 = vsel %vm1667_vm5, %v11870_v41, 0.0 }
 0x920   :  { %9611 = vpow2.f32 %v3712_v3  ;;  %v3692_v38 = vsub.f32 %v11800_v50, %v3662_v39  ;;  %3739 = vadd.xlane.f32.xlu0 %v3738_v44  ;;  %v3718_v22 = vmul.f32 1.442695, %v3693_v21 }
 0x921   :  { %9613 = vpow2.f32 %v3714_v7 }
 0x922   :  { %v11876_v60 = vpop.eup %9605  ;;  %v3716_v59 = vmul.f32 1.442695, %v3692_v38 }
 0x923   :  { %v3668_v16 = vpop.xlane.xlu0 %3667  ;;  %v3744_v56 = vsel %vm1667_vm5, %v11876_v60, 0.0 }
 0x924   :  { %9615 = vpow2.f32 %v3716_v59  ;;  %v3694_v8 = vsub.f32 %v11808_v45, %v3668_v16  ;;  %3745 = vadd.xlane.f32.xlu0 %v3744_v56  ;;  %v14132_v16 = vpack.c.bf16 %v10777_v61, %v10769_v23  ;;  %v14133_v56 = vpack.c.bf16 %v10882_v15, %v10878_v47  ;;  %v11934_v23 = vpop.permute.xlu1 %4102 }
 0x925   :  { %9617 = vpow2.f32 %v3718_v22 }
 0x926   :  { %v11881_v28 = vpop.eup %9607  ;;  %v3720_v27 = vmul.f32 1.442695, %v3694_v8  ;;  %v14134_v8 = vpack.c.bf16 %v10871_v14, %v10867_v0 }
 0x927   :  { %v3674_v57 = vpop.xlane.xlu0 %3673  ;;  %v3741_v50 = vsel %vm1667_vm5, %v11881_v28, 0.0  ;;  %v11885_v55 = vpop.eup %9609 }
 0x928   :  { %9619 = vpow2.f32 %v3720_v27  ;;  %v3696_v63 = vsub.f32 %v11814_v11, %v3674_v57  ;;  %3742 = vadd.xlane.f32.xlu1 %v3741_v50  ;;  %v3747_v17 = vsel %vm1667_vm5, %v11885_v55, 0.0  ;;  %v14135_v27 = vld [vmem:[#allocation18_spill] sm:$0xff]  ;;  %v14136_v57 = vld [vmem:[#allocation13_spill] sm:$0xff] }
 0x929   :  { %v14137_v50 = vpack.c.bf16 %v14135_v27, %v14136_v57 }
 0x92a   :  { %v11888_v37 = vpop.eup %9611  ;;  %v3724_v4 = vmul.f32 1.442695, %v3696_v63 }
 0x92b   :  { %v3750_v45 = vsel %vm1667_vm5, %v11888_v37, 0.0  ;;  %v11894_v52 = vpop.eup %9613  ;;  %v11943_v14 = vpop.permute.xlu0 %3961 }
 0x92c   :  { %9621 = vpow2.f32 %v3724_v4  ;;  %3751 = vadd.xlane.f32.xlu0 %v3750_v45  ;;  %3748 = vadd.xlane.f32.xlu1 %v3747_v17  ;;  %v3753_v3 = vsel %vm1667_vm5, %v11894_v52, 0.0 }
 0x92e   :  { %v11896_v7 = vpop.eup %9615 }
 0x92f   :  { %v3756_v11 = vsel %vm1667_vm5, %v11896_v7, 0.0  ;;  %v11902_v21 = vpop.eup %9617 }
 0x930   :  { %3757 = vadd.xlane.f32.xlu0 %v3756_v11  ;;  %3754 = vadd.xlane.f32.xlu1 %v3753_v3  ;;  %v3759_v38 = vsel %vm1667_vm5, %v11902_v21, 0.0 }
 0x932   :  { %v11904_v39 = vpop.eup %9619 }
 0x933   :  { %v3762_v44 = vsel %vm1667_vm5, %v11904_v39, 0.0 }
 0x934   :  { %3763 = vadd.xlane.f32.xlu0 %v3762_v44  ;;  %3760 = vadd.xlane.f32.xlu1 %v3759_v38 }
 0x936   :  { %v11910_v22 = vpop.eup %9621 }
 0x937   :  { %v3768_v59 = vsel %vm1667_vm5, %v11910_v22, 0.0 }
 0x938   :  { %3769 = vadd.xlane.f32.xlu0 %v3768_v59  ;;  %v14143_v59 = vld [vmem:[#allocation20_spill] sm:$0xff] }
 0x945   :  { %4149 = vrot.lane.b32.xlu1 %v11015_v26, %s9876_s3 }
 0x949   :  { %4223 = vrot.lane.b32.xlu1 %v14132_v16, %s9877_s5 }
 0x94d   :  { %4289 = vrot.lane.b32.xlu1 %v14133_v56, %s9877_s5  ;;  %v14146_v56 = vld [vmem:[#allocation39_spill] sm:$0xff] }
 0x94e   :  { %4230 = vrot.lane.b32.xlu0 %v14134_v8, %s9877_s5 }
 0x951   :  { %4283 = vrot.lane.b32.xlu1 %v14137_v50, %s9877_s5  ;;  %v14148_v50 = vld [vmem:[#allocation27_spill] sm:$0xff] }
 0x952   :  { %4221 = vrot.lane.b32.xlu0 %v10773_v34, %s9877_s5  ;;  %v3671_v61 = vpop.xlane.xlu1 %3670 }
 0x953   :  { %v3695_v0 = vsub.f32 %v11824_v49, %v3671_v61  ;;  %v14149_v61 = vld [vmem:[#allocation25_spill] sm:$0xff] }
 0x955   :  { %v3722_v34 = vmul.f32 1.442695, %v3695_v0  ;;  %v14150_v0 = vpack.c.bf16 %v14148_v50, %v14149_v61  ;;  %v14173_v50 = vld [vmem:[#allocation35_spill] sm:$0xff] }
 0x956   :  { %4287 = vrot.lane.b32.xlu0 %v10880_v42, %s9877_s5  ;;  %v3677_v47 = vpop.xlane.xlu1 %3676 }
 0x957   :  { %v3697_v15 = vsub.f32 %v11830_v58, %v3677_v47  ;;  %9623 = vpow2.f32 %v3722_v34  ;;  %v14151_v34 = vld [vmem:[#allocation42_spill] sm:$0xff] }
 0x95a   :  { %4281 = vrot.lane.b32.xlu0 %v10791_v19, %s9877_s5  ;;  %v3726_v19 = vmul.f32 1.442695, %v3697_v15  ;;  %v14152_v15 = vld [vmem:[#allocation41_spill] sm:$0xff] }
 0x95c   :  { %v3680_v63 = vpop.xlane.xlu0 %3679  ;;  %9625 = vpow2.f32 %v3726_v19 }
 0x95d   :  { %v3698_v42 = vsub.f32 %v11836_v2, %v3680_v63  ;;  %v14153_v63 = vpack.c.bf16 %v14151_v34, %v14152_v15  ;;  %v14179_v15 = vld [vmem:[#allocation17_spill] sm:$0xff] }
 0x95e   :  { %4346 = vrot.lane.b32.xlu0 %v10895_v62, %s9877_s5 }
 0x95f   :  { %v3728_v62 = vmul.f32 1.442695, %v3698_v42 }
 0x960   :  { %v11984_v2 = vpop.permute.xlu0 %4055 }
 0x961   :  { %9627 = vpow2.f32 %v3728_v62 }
 0x962   :  { %4340 = vrot.lane.b32.xlu0 %v10807_v53, %s9877_s5  ;;  %v11955_v53 = vpop.eup %9623 }
 0x966   :  { %4405 = vrot.lane.b32.xlu0 %v10910_v13, %s9877_s5  ;;  %v3765_v13 = vsel %vm1667_vm5, %v11955_v53, 0.0  ;;  %v11961_v49 = vpop.eup %9625 }
 0x96a   :  { %4399 = vrot.lane.b32.xlu0 %v10823_v33, %s9877_s5  ;;  %v3771_v33 = vsel %vm1667_vm5, %v11961_v49, 0.0 }
 0x96b   :  { %v11967_v58 = vpop.eup %9627 }
 0x96e   :  { %4464 = vrot.lane.b32.xlu0 %v10925_v30, %s9877_s5 }
 0x972   :  { %4458 = vrot.lane.b32.xlu0 %v10837_v36, %s9877_s5  ;;  %v3774_v36 = vsel %vm1667_vm5, %v11967_v58, 0.0 }
 0x975   :  { %3766 = vadd.xlane.f32.xlu1 %v3765_v13 }
 0x976   :  { %4523 = vrot.lane.b32.xlu0 %v10940_v12, %s9877_s5  ;;  %v11979_v12 = vpop.permute.xlu1 %4228 }
 0x979   :  { %3772 = vadd.xlane.f32.xlu1 %v3771_v33 }
 0x97a   :  { %4517 = vrot.lane.b32.xlu0 %v10845_v31, %s9877_s5 }
 0x97d   :  { %3775 = vadd.xlane.f32.xlu1 %v3774_v36 }
 0x97e   :  { %4582 = vrot.lane.b32.xlu0 %v10955_v54, %s9877_s5 }
 0x982   :  { %4576 = vrot.lane.b32.xlu0 %v10853_v40, %s9877_s5 }
 0x986   :  { %4641 = vrot.lane.b32.xlu0 %v10970_v25, %s9877_s5  ;;  %v14138_v25 = vld [vmem:[#allocation22_spill] sm:$0xff] }
 0x98a   :  { %4635 = vrot.lane.b32.xlu0 %v10861_v51, %s9877_s5 }
 0x98b   :  { %v3683_v30 = vpop.xlane.xlu1 %3682 }
 0x98c   :  { %v3699_v31 = vsub.f32 %v11852_v9, %v3683_v30  ;;  %v14154_v30 = vld [vmem:[#allocation30_spill] sm:$0xff] }
 0x98e   :  { %v3730_v4 = vmul.f32 1.442695, %v3699_v31  ;;  %4894 = vrot.lane.b32.xlu0 %v10775_v35, %s9877_s5  ;;  %v14155_v31 = vld [vmem:[#allocation29_spill] sm:$0xff] }
 0x98f   :  { %v3737_v54 = vpop.xlane.xlu1 %3736 }
 0x990   :  { %9629 = vpow2.f32 %v3730_v4  ;;  %v14156_v4 = vpack.c.bf16 %v14154_v30, %v14155_v31 }
 0x991   :  { %9631 = vrcp.f32 %v3737_v54  ;;  %v3734_v40 = vpop.xlane.xlu0 %3733 }
 0x992   :  { %9633 = vrcp.f32 %v3734_v40  ;;  %4945 = vrot.lane.b32.xlu0 %v10793_v24, %s9877_s5  ;;  %v14139_v24 = vld [vmem:[#allocation38_spill] sm:$0xff] }
 0x996   :  { %4996 = vrot.lane.b32.xlu0 %v14138_v25, %s9877_s5 }
 0x99a   :  { %v11992_v51 = vpop.eup %9629  ;;  %5047 = vrot.lane.b32.xlu0 %v10825_v43, %s9877_s5  ;;  %v14140_v43 = vld [vmem:[#allocation37_spill] sm:$0xff] }
 0x99b   :  { %v9632_v9 = vpop.eup %9631  ;;  %v3777_v35 = vsel %vm1667_vm5, %v11992_v51, 0.0  ;;  %v14141_v44 = vpack.c.bf16 %v14139_v24, %v14140_v43  ;;  %v14160_v43 = vld [vmem:[#allocation32_spill] sm:$0xff] }
 0x99c   :  { %v9634_v45 = vpop.eup %9633  ;;  %3778 = vadd.xlane.f32.xlu1 %v3777_v35  ;;  %v3797_v17 = vmul.f32 %v9632_v9, %v11856_v10  ;;  %v14142_v10 = vld [vmem:[#allocation23_spill] sm:$0xff]  ;;  %v14157_v35 = vld [vmem:[#allocation44_spill] sm:$0xff] }
 0x99d   :  { %v3796_v11 = vmul.f32 %v9634_v45, %v11858_v32  ;;  %v14144_v32 = vpack.c.bf16 %v14142_v10, %v14143_v59  ;;  %v14158_v45 = vld [vmem:[#allocation43_spill] sm:$0xff] }
 0x99f   :  { %v3812_v3 = vpack.c.bf16 %v3797_v17, %v3796_v11  ;;  %v14159_v17 = vpack.c.bf16 %v14157_v35, %v14158_v45 }
 0x9a1   :  { %8737 = vmatmul.mubr.msk.bf16.vlgmr.msra.gmra.mrb[80].mxu0 %vm1667_vm5, %v3812_v3 }
 0x9a2   :  { %8747 = vmatpush3.bf16.msra.mxu0 %v11846_v18  ;;  %8748 = vmatprep.mubr.msk.bf16.mxu0 %vm9874_vm2, %v14099_v46  ;;  %v14145_v18 = vld [vmem:[#allocation40_spill] sm:$0xff] }
 0x9a3   :  { %8758 = vmatprep.subr.bf16.mxu0 %v14099_v46  ;;  %v14147_v8 = vpack.c.bf16 %v14145_v18, %v14146_v56  ;;  %v14166_v56 = vld [vmem:[#allocation34_spill] sm:$0xff] }
 0x9ad   :  { %4348 = vrot.lane.b32.xlu1 %v14141_v44, %s9877_s5  ;;  %v3740_v38 = vpop.xlane.xlu0 %3739  ;;  %v14161_v44 = vld [vmem:[#allocation31_spill] sm:$0xff] }
 0x9ae   :  { %9635 = vrcp.f32 %v3740_v38  ;;  %v14162_v38 = vpack.c.bf16 %v14160_v43, %v14161_v44 }
 0x9b1   :  { %4342 = vrot.lane.b32.xlu1 %v14144_v32, %s9877_s5  ;;  %v3746_v16 = vpop.xlane.xlu0 %3745  ;;  %v14163_v32 = vld [vmem:[#allocation46_spill] sm:$0xff] }
 0x9b5   :  { %4407 = vrot.lane.b32.xlu1 %v14147_v8, %s9877_s5  ;;  %v3743_v27 = vpop.xlane.xlu1 %3742  ;;  %v14167_v8 = vld [vmem:[#allocation33_spill] sm:$0xff] }
 0x9b6   :  { %9637 = vrcp.f32 %v3743_v27  ;;  %v14168_v27 = vpack.c.bf16 %v14166_v56, %v14167_v8 }
 0x9b7   :  { %9639 = vrcp.f32 %v3746_v16  ;;  %v14164_v16 = vld [vmem:[#allocation45_spill] sm:$0xff] }
 0x9b8   :  { %v9636_v42 = vpop.eup %9635  ;;  %v14165_v18 = vpack.c.bf16 %v14163_v32, %v14164_v16 }
 0x9b9   :  { %v3752_v57 = vpop.xlane.xlu0 %3751  ;;  %4401 = vrot.lane.b32.xlu1 %v14150_v0, %s9877_s5  ;;  %v3749_v47 = vpop.xlane.xlu1 %3748  ;;  %v3798_v33 = vmul.f32 %v9636_v42, %v11870_v41  ;;  %v14175_v0 = vld [vmem:[#allocation12_spill] sm:$0xff]  ;;  %v14182_v42 = vld [vmem:[#allocation21_spill] sm:$0xff] }
 0x9ba   :  { %9641 = vrcp.f32 %v3749_v47  ;;  %v14176_v47 = vld [vmem:[#allocation11_spill] sm:$0xff] }
 0x9bb   :  { %9643 = vrcp.f32 %v3752_v57  ;;  %v14172_v57 = vld [vmem:[#allocation36_spill] sm:$0xff]  ;;  %v14177_v34 = vpack.c.bf16 %v14175_v0, %v14176_v47 }
 0x9bc   :  { %v14174_v61 = vpack.c.bf16 %v14172_v57, %v14173_v50 }
 0x9bd   :  { %4466 = vrot.lane.b32.xlu1 %v14153_v63, %s9877_s5  ;;  %v3755_v19 = vpop.xlane.xlu1 %3754  ;;  %v3758_v62 = vpop.xlane.xlu0 %3757 }
 0x9be   :  { %9645 = vrcp.f32 %v3755_v19  ;;  %v14181_v19 = vld [vmem:[#allocation24_spill] sm:$0xff] }
 0x9bf   :  { %9647 = vrcp.f32 %v3758_v62  ;;  %v14183_v62 = vpack.c.bf16 %v14181_v19, %v14182_v42 }
 0x9c0   :  { %v9638_v13 = vpop.eup %9637 }
 0x9c1   :  { %v3799_v36 = vmul.f32 %v9638_v13, %v11881_v28  ;;  %4460 = vrot.lane.b32.xlu1 %v14156_v4, %s9877_s5  ;;  %v3761_v54 = vpop.xlane.xlu1 %3760  ;;  %v9640_v40 = vpop.eup %9639  ;;  %v14184_v13 = vld [vmem:[#allocation28_spill] sm:$0xff] }
 0x9c2   :  { %9649 = vrcp.f32 %v3761_v54  ;;  %v3800_v41 = vmul.f32 %v9640_v40, %v11876_v60  ;;  %v3764_v31 = vpop.xlane.xlu0 %3763 }
 0x9c3   :  { %v3813_v25 = vpack.c.bf16 %v3799_v36, %v3798_v33  ;;  %v14185_v33 = vld [vmem:[#allocation26_spill] sm:$0xff]  ;;  %9651 = vrcp.f32 %v3764_v31 }
 0x9c4   :  { %v9642_v9 = vpop.eup %9641  ;;  %v14186_v36 = vpack.c.bf16 %v14184_v13, %v14185_v33 }
 0x9c5   :  { %4525 = vrot.lane.b32.xlu1 %v14159_v17, %s9877_s5  ;;  %8743 = vmatmul.mubr.msk.bf16.vlgmr.msra.gmra.mrb[176].mxu1 %vm1667_vm5, %v3813_v25  ;;  %v3801_v28 = vmul.f32 %v9642_v9, %v11885_v55  ;;  %v9644_v11 = vpop.eup %9643  ;;  %v4150_v30 = vpop.permute.xlu1 %4149 }
 0x9c6   :  { %8753 = vmatpush3.bf16.msra.mxu1 %v11943_v14  ;;  %8754 = vmatprep.mubr.msk.bf16.mxu1 %vm9874_vm2, %v14099_v46  ;;  %v3802_v10 = vmul.f32 %v9644_v11, %v11888_v37  ;;  %v3770_v54 = vpop.xlane.xlu0 %3769 }
 0x9c7   :  { %8764 = vmatprep.subr.bf16.mxu1 %v14099_v46  ;;  %v3814_v3 = vpack.c.bf16 %v3801_v28, %v3800_v41 }
 0x9c8   :  { %v9646_v24 = vpop.eup %9645 }
 0x9c9   :  { %4519 = vrot.lane.b32.xlu1 %v14162_v38, %s9877_s5  ;;  %v3803_v60 = vmul.f32 %v9646_v24, %v11894_v52  ;;  %8749 = vmatmul.mubr.msk.bf16.vlgmr.msra.gmra.mrb[84].mxu0 %vm1667_vm5, %v3814_v3  ;;  %v9648_v55 = vpop.eup %9647  ;;  %v4224_v4 = vpop.permute.xlu1 %4223 }
 0x9ca   :  { %8759 = vmatpush3.bf16.msra.mxu0 %v11842_v1  ;;  %8760 = vmatprep.mubr.msk.bf16.mxu0 %vm9874_vm2, %v14099_v46  ;;  %v3804_v37 = vmul.f32 %v9648_v55, %v11896_v7  ;;  %v14169_v7 = vld [vmem:[#allocation48_spill] sm:$0xff]  ;;  %v4231_v25 = vpop.permute.xlu0 %4230 }
 0x9cb   :  { %v3815_v14 = vpack.c.bf16 %v3803_v60, %v3802_v10  ;;  %8770 = vmatprep.subr.bf16.mxu0 %v14099_v46 }
 0x9cc   :  { %v9650_v59 = vpop.eup %9649 }
 0x9cd   :  { %4584 = vrot.lane.b32.xlu1 %v14165_v18, %s9877_s5  ;;  %v3805_v52 = vmul.f32 %v9650_v59, %v11902_v21  ;;  %8755 = vmatmul.mubr.msk.bf16.vlgmr.msra.gmra.mrb[180].mxu1 %vm1667_vm5, %v3815_v14  ;;  %v14170_v21 = vld [vmem:[#allocation47_spill] sm:$0xff]  ;;  %v4290_v40 = vpop.permute.xlu1 %4289  ;;  %v9652_v28 = vpop.eup %9651  ;;  %v4232_v14 = vsel %vm4225_vm7, %v11979_v12, %v4231_v25 }
 0x9ce   :  { %8765 = vmatpush3.bf16.msra.mxu1 %v11984_v2  ;;  %8766 = vmatprep.mubr.msk.bf16.mxu1 %vm9874_vm2, %v14099_v46  ;;  %v14171_v2 = vpack.c.bf16 %v14169_v7, %v14170_v21  ;;  %v4222_v35 = vpop.permute.xlu0 %4221  ;;  %v3806_v24 = vmul.f32 %v9652_v28, %v11904_v39 }
 0x9cf   :  { %v3816_v1 = vpack.c.bf16 %v3805_v52, %v3804_v37  ;;  %8776 = vmatprep.subr.bf16.mxu1 %v14099_v46 }
 0x9d1   :  { %4578 = vrot.lane.b32.xlu1 %v14168_v27, %s9877_s5  ;;  %8761 = vmatmul.mubr.msk.bf16.vlgmr.msra.gmra.mrb[88].mxu0 %vm1667_vm5, %v3816_v1  ;;  %v12097_v9 = vpop.permute.xlu1 %4283 }
 0x9d2   :  { %8771 = vmatpush3.bf16.msra.mxu0 %v11934_v23  ;;  %8772 = vmatprep.mubr.msk.bf16.mxu0 %vm9874_vm2, %v14099_v46  ;;  %v14178_v23 = vld [vmem:[#allocation19_spill] sm:$0xff]  ;;  %v4288_v41 = vpop.permute.xlu0 %4287 }
 0x9d3   :  { %8782 = vmatprep.subr.bf16.mxu0 %v14099_v46  ;;  %v14180_v63 = vpack.c.bf16 %v14178_v23, %v14179_v15 }
 0x9d5   :  { %4643 = vrot.lane.b32.xlu1 %v14171_v2, %s9877_s5 }
 0x9d6   :  { %v4282_v3 = vpop.permute.xlu0 %4281 }
 0x9d9   :  { %4637 = vrot.lane.b32.xlu1 %v14174_v61, %s9877_s5  ;;  %v4291_v61 = vsel %vm4225_vm7, %v4288_v41, %v4290_v40 }
 0x9da   :  { %v4347_v59 = vpop.permute.xlu0 %4346  ;;  %v4296_v23 = vsel %vm1270_vm3, %v4291_v61, 0 }
 0x9dd   :  { %4896 = vrot.lane.b32.xlu1 %v14177_v34, %s9877_s5 }
 0x9e1   :  { %4947 = vrot.lane.b32.xlu1 %v14180_v63, %s9877_s5 }
 0x9e5   :  { %4998 = vrot.lane.b32.xlu1 %v14183_v62, %s9877_s5  ;;  %v4285_v62 = vsel %vm4225_vm7, %v4282_v3, %v12097_v9 }
 0x9e9   :  { %5049 = vrot.lane.b32.xlu1 %v14186_v36, %s9877_s5 }
 0xa02   :  { %v3767_v45 = vpop.xlane.xlu1 %3766 }
 0xa03   :  { %9653 = vrcp.f32 %v3767_v45 }
 0xa04   :  { %9655 = vrcp.f32 %v3770_v54 }
 0xa06   :  { %v3773_v17 = vpop.xlane.xlu1 %3772 }
 0xa07   :  { %9657 = vrcp.f32 %v3773_v17 }
 0xa0a   :  { %v3776_v16 = vpop.xlane.xlu1 %3775 }
 0xa0b   :  { %9659 = vrcp.f32 %v3776_v16 }
 0xa0d   :  { %v9654_v11 = vpop.eup %9653 }
 0xa0e   :  { %v3807_v43 = vmul.f32 %v9654_v11, %v11955_v53  ;;  %v9656_v44 = vpop.eup %9655  ;;  %v4237_v53 = vsel %vm1270_vm3, %v4232_v14, 0 }
 0xa0f   :  { %v3808_v60 = vmul.f32 %v9656_v44, %v11910_v22  ;;  %v4341_v22 = vpop.permute.xlu0 %4340 }
 0xa10   :  { %v3817_v38 = vpack.c.bf16 %v3807_v43, %v3806_v24 }
 0xa11   :  { %v9658_v10 = vpop.eup %9657 }
 0xa12   :  { %v3809_v55 = vmul.f32 %v9658_v10, %v11961_v49  ;;  %8767 = vmatmul.mubr.msk.bf16.vlgmr.msra.gmra.mrb[184].mxu1 %vm1667_vm5, %v3817_v38  ;;  %v4226_v49 = vsel %vm4225_vm7, %v4222_v35, %v4224_v4 }
 0xa13   :  { %8777 = vmatpush3.bf16.msra.mxu1 %v4150_v30  ;;  %8778 = vmatprep.mubr.msk.bf16.mxu1 %vm9874_vm2, %v14099_v46  ;;  %v4406_v12 = vpop.permute.xlu0 %4405 }
 0xa14   :  { %v3818_v39 = vpack.c.bf16 %v3809_v55, %v3808_v60  ;;  %8788 = vmatprep.subr.bf16.mxu1 %v14099_v46 }
 0xa15   :  { %v9660_v7 = vpop.eup %9659 }
 0xa16   :  { %8773 = vmatmul.mubr.msk.bf16.vlgmr.msra.gmra.mrb[92].mxu0 %vm1667_vm5, %v3818_v39  ;;  %v3810_v2 = vmul.f32 %v9660_v7, %v11967_v58 }
 0xa17   :  { %8783 = vmatpush3.bf16.xpose.msra.mxu0 %v4237_v53  ;;  %8784 = vmatprep.mubr.msk.bf16.mxu0 %vm9874_vm2, %v14099_v46  ;;  %v4400_v32 = vpop.permute.xlu0 %4399 }
 0xa18   :  { %8794 = vmatprep.subr.bf16.mxu0 %v14099_v46 }
 0xa1b   :  { %v4465_v37 = vpop.permute.xlu0 %4464 }
 0xa1e   :  { %8785 = vmatmul.mubr.msk.bf16.vlgmr.msra.gmra.mrb[96].mxu0 %vm1270_vm3, %v4226_v49 }
 0xa1f   :  { %8796 = vmatprep.mubr.msk.bf16.mxu0 %vm9874_vm2, %v14099_v46  ;;  %v4459_v8 = vpop.permute.xlu0 %4458 }
 0xa23   :  { %v4524_v47 = vpop.permute.xlu0 %4523 }
 0xa27   :  { %v4518_v58 = vpop.permute.xlu0 %4517 }
 0xa29   :  { %v3779_v18 = vpop.xlane.xlu1 %3778 }
 0xa2a   :  { %9661 = vrcp.f32 %v3779_v18 }
 0xa2b   :  { %v4583_v36 = vpop.permute.xlu0 %4582 }
 0xa2d   :  { %v4349_v52 = vpop.permute.xlu1 %4348 }
 0xa2e   :  { %v4350_v1 = vsel %vm4225_vm7, %v4347_v59, %v4349_v52 }
 0xa2f   :  { %v4355_v56 = vsel %vm1270_vm3, %v4350_v1, 0  ;;  %v4577_v25 = vpop.permute.xlu0 %4576 }
 0xa30   :  { %8795 = vmatpush3.bf16.xpose.msra.mxu0 %v4355_v56 }
 0xa31   :  { %v4343_v27 = vpop.permute.xlu1 %4342  ;;  %8806 = vmatprep.subr.bf16.mxu0 %v14099_v46 }
 0xa32   :  { %v4344_v0 = vsel %vm4225_vm7, %v4341_v22, %v4343_v27 }
 0xa33   :  { %v4642_v17 = vpop.permute.xlu0 %4641 }
 0xa34   :  { %v9662_v21 = vpop.eup %9661 }
 0xa35   :  { %v3811_v57 = vmul.f32 %v9662_v21, %v11992_v51  ;;  %v4408_v50 = vpop.permute.xlu1 %4407 }
 0xa36   :  { %v4409_v63 = vsel %vm4225_vm7, %v4406_v12, %v4408_v50 }
 0xa37   :  { %8797 = vmatmul.mubr.msk.bf16.vlgmr.msra.gmra.mrb[100].mxu0 %vm1270_vm3, %v4344_v0  ;;  %v3819_v34 = vpack.c.bf16 %v3811_v57, %v3810_v2  ;;  %v4414_v13 = vsel %vm1270_vm3, %v4409_v63, 0  ;;  %v4636_v3 = vpop.permute.xlu0 %4635 }
 0xa38   :  { %8808 = vmatprep.mubr.msk.bf16.mxu0 %vm9874_vm2, %v14099_v46 }
 0xa39   :  { %8779 = vmatmul.mubr.msk.bf16.vlgmr.msra.gmra.mrb[188].mxu1 %vm1667_vm5, %v3819_v34  ;;  %v4402_v15 = vpop.permute.xlu1 %4401 }
 0xa3a   :  { %8789 = vmatpush3.bf16.xpose.msra.mxu1 %v4296_v23  ;;  %8790 = vmatprep.mubr.msk.bf16.mxu1 %vm9874_vm2, %v14099_v46  ;;  %v4403_v40 = vsel %vm4225_vm7, %v4400_v32, %v4402_v15 }
 0xa3b   :  { %8800 = vmatprep.subr.bf16.mxu1 %v14099_v46  ;;  %v4895_v60 = vpop.permute.xlu0 %4894 }
 0xa3d   :  { %v4467_v51 = vpop.permute.xlu1 %4466 }
 0xa3e   :  { %v4468_v19 = vsel %vm4225_vm7, %v4465_v37, %v4467_v51 }
 0xa3f   :  { %v4473_v42 = vsel %vm1270_vm3, %v4468_v19, 0  ;;  %v4946_v39 = vpop.permute.xlu0 %4945 }
 0xa40   :  { %8807 = vmatpush3.bf16.xpose.msra.mxu0 %v4473_v42 }
 0xa41   :  { %8791 = vmatmul.mubr.msk.bf16.vlgmr.msra.gmra.mrb[192].mxu1 %vm1270_vm3, %v4285_v62  ;;  %v4461_v33 = vpop.permute.xlu1 %4460  ;;  %8818 = vmatprep.subr.bf16.mxu0 %v14099_v46 }
 0xa42   :  { %8801 = vmatpush3.bf16.xpose.msra.mxu1 %v4414_v13  ;;  %8802 = vmatprep.mubr.msk.bf16.mxu1 %vm9874_vm2, %v14099_v46  ;;  %v4462_v31 = vsel %vm4225_vm7, %v4459_v8, %v4461_v33 }
 0xa43   :  { %8812 = vmatprep.subr.bf16.mxu1 %v14099_v46 }
 0xa45   :  { %v4526_v30 = vpop.permute.xlu1 %4525 }
 0xa46   :  { %v4527_v4 = vsel %vm4225_vm7, %v4524_v47, %v4526_v30 }
 0xa47   :  { %v4532_v54 = vsel %vm1270_vm3, %v4527_v4, 0  ;;  %8809 = vmatmul.mubr.msk.bf16.vlgmr.msra.gmra.mrb[104].mxu0 %vm1270_vm3, %v4462_v31 }
 0xa48   :  { %8820 = vmatprep.mubr.msk.bf16.mxu0 %vm9874_vm2, %v14099_v46 }
 0xa49   :  { %8803 = vmatmul.mubr.msk.bf16.vlgmr.msra.gmra.mrb[196].mxu1 %vm1270_vm3, %v4403_v40  ;;  %v4520_v9 = vpop.permute.xlu1 %4519 }
 0xa4a   :  { %8813 = vmatpush3.bf16.xpose.msra.mxu1 %v4532_v54  ;;  %8814 = vmatprep.mubr.msk.bf16.mxu1 %vm9874_vm2, %v14099_v46  ;;  %v4521_v28 = vsel %vm4225_vm7, %v4518_v58, %v4520_v9 }
 0xa4b   :  { %8824 = vmatprep.subr.bf16.mxu1 %v14099_v46 }
 0xa4d   :  { %v4585_v35 = vpop.permute.xlu1 %4584 }
 0xa4e   :  { %v4586_v45 = vsel %vm4225_vm7, %v4583_v36, %v4585_v35 }
 0xa4f   :  { %v4591_v41 = vsel %vm1270_vm3, %v4586_v45, 0 }
 0xa50   :  { %8819 = vmatpush3.bf16.xpose.msra.mxu0 %v4591_v41 }
 0xa51   :  { %8815 = vmatmul.mubr.msk.bf16.vlgmr.msra.gmra.mrb[200].mxu1 %vm1270_vm3, %v4521_v28  ;;  %v4579_v11 = vpop.permute.xlu1 %4578  ;;  %8830 = vmatprep.subr.bf16.mxu0 %v14099_v46 }
 0xa52   :  { %8826 = vmatprep.mubr.msk.bf16.mxu1 %vm9874_vm2, %v14099_v46  ;;  %v4580_v43 = vsel %vm4225_vm7, %v4577_v25, %v4579_v11 }
 0xa55   :  { %v4644_v24 = vpop.permute.xlu1 %4643 }
 0xa56   :  { %v4645_v44 = vsel %vm4225_vm7, %v4642_v17, %v4644_v24 }
 0xa57   :  { %v4650_v38 = vsel %vm1270_vm3, %v4645_v44, 0  ;;  %8821 = vmatmul.mubr.msk.bf16.vlgmr.msra.gmra.mrb[108].mxu0 %vm1270_vm3, %v4580_v43 }
 0xa58   :  { %8825 = vmatpush3.bf16.xpose.msra.mxu1 %v4650_v38  ;;  %8832 = vmatprep.mubr.msk.bf16.mxu0 %vm9874_vm2, %v14099_v46 }
 0xa59   :  { %v4638_v10 = vpop.permute.xlu1 %4637  ;;  %8836 = vmatprep.subr.bf16.mxu1 %v14099_v46 }
 0xa5a   :  { %v4639_v14 = vsel %vm4225_vm7, %v4636_v3, %v4638_v10 }
 0xa5d   :  { %v4897_v55 = vpop.permute.xlu1 %4896 }
 0xa5e   :  { %v4898_v59 = vsel %vm4225_vm7, %v4895_v60, %v4897_v55 }
 0xa5f   :  { %8827 = vmatmul.mubr.msk.bf16.vlgmr.msra.gmra.mrb[204].mxu1 %vm1270_vm3, %v4639_v14  ;;  %8831 = vmatpush3.bf16.msra.mxu0 %v4898_v59 }
 0xa60   :  { %8842 = vmatprep.subr.bf16.mxu0 %v14099_v46  ;;  %8838 = vmatprep.mubr.msk.bf16.mxu1 %vm9874_vm2, %v14099_v46 }
 0xa61   :  { %v4948_v53 = vpop.permute.xlu1 %4947 }
 0xa62   :  { %v4949_v22 = vsel %vm4225_vm7, %v4946_v39, %v4948_v53 }
 0xa63   :  { %8837 = vmatpush3.bf16.msra.mxu1 %v4949_v22 }
 0xa64   :  { %8848 = vmatprep.subr.bf16.mxu1 %v14099_v46 }
 0xa74   :  { %v12177_v49 = vpop.f32.mrb[80].mxu0 }
 0xa75   :  { %v8738_v12 = vpop.f32.mrb[81].mxu0 }
 0xa76   :  { %v12179_v32 = vpop.f32.mrb[82].mxu0 }
 0xa77   :  { %v9015_v16 = vpack.i.bf16 %v12179_v32, %v12177_v49  ;;  %v8739_v18 = vpop.f32.mrb[83].mxu0 }
 0xa98   :  { %v12183_v37 = vpop.f32.mrb[176].mxu1 }
 0xa99   :  { %v8744_v52 = vpop.f32.mrb[177].mxu1 }
 0xa9a   :  { %v12185_v1 = vpop.f32.mrb[178].mxu1 }
 0xa9b   :  { %v9030_v56 = vpack.i.bf16 %v12185_v1, %v12183_v37  ;;  %v8745_v8 = vpop.f32.mrb[179].mxu1 }
 0xa9c   :  { %v12189_v27 = vpop.f32.mrb[84].mxu0 }
 0xa9d   :  { %v8750_v7 = vpop.f32.mrb[85].mxu0 }
 0xa9e   :  { %v12191_v21 = vpop.f32.mrb[86].mxu0 }
 0xa9f   :  { %v9045_v2 = vpack.i.bf16 %v12191_v21, %v12189_v27  ;;  %v8751_v57 = vpop.f32.mrb[87].mxu0 }
 0xaa0   :  { %v12195_v50 = vpop.f32.mrb[180].mxu1 }
 0xaa1   :  { %v8756_v61 = vpop.f32.mrb[181].mxu1 }
 0xaa2   :  { %v12197_v0 = vpop.f32.mrb[182].mxu1 }
 0xaa3   :  { %v9060_v47 = vpack.i.bf16 %v12197_v0, %v12195_v50  ;;  %v8757_v34 = vpop.f32.mrb[183].mxu1 }
 0xaa4   :  { %v12201_v23 = vpop.f32.mrb[88].mxu0 }
 0xaa5   :  { %v8762_v15 = vpop.f32.mrb[89].mxu0 }
 0xaa6   :  { %v12203_v58 = vpop.f32.mrb[90].mxu0 }
 0xaa7   :  { %v9075_v51 = vpack.i.bf16 %v12203_v58, %v12201_v23  ;;  %v8763_v63 = vpop.f32.mrb[91].mxu0  ;;  %v14220_v23 = vld [vmem:[#allocation88_spill] sm:$0xff]  ;;  %v14221_v58 = vld [vmem:[#allocation87_spill] sm:$0xff] }
 0xae5   :  { %v12207_v19 = vpop.f32.mrb[184].mxu1 }
 0xae6   :  { %v8768_v42 = vpop.f32.mrb[185].mxu1 }
 0xae7   :  { %v12209_v62 = vpop.f32.mrb[186].mxu1 }
 0xae8   :  { %v9090_v13 = vpack.i.bf16 %v12209_v62, %v12207_v19  ;;  %v8769_v33 = vpop.f32.mrb[187].mxu1 }
 0xae9   :  { %v12213_v36 = vpop.f32.mrb[92].mxu0 }
 0xaea   :  { %v8774_v30 = vpop.f32.mrb[93].mxu0 }
 0xaeb   :  { %v12215_v31 = vpop.f32.mrb[94].mxu0 }
 0xaec   :  { %v9105_v4 = vpack.i.bf16 %v12215_v31, %v12213_v36  ;;  %v8775_v54 = vpop.f32.mrb[95].mxu0  ;;  %v14223_v31 = vld [vmem:[#allocation58_spill] sm:$0xff] }
 0xaf1   :  { %v4273_v40 = vpop.f32.mrb[96].mxu0 }
 0xaf2   :  { %v12221_v25 = vsel %vm11024_vm4, %v4273_v40, -1e+30  ;;  %v8786_v9 = vpop.f32.mrb[97].mxu0 }
 0xaf3   :  { %v4709_v35 = vsel %vm1667_vm5, %v12221_v25, -inf  ;;  %v4276_v45 = vpop.f32.mrb[98].mxu0 }
 0xaf4   :  { %v12227_v17 = vsel %vm11028_vm6, %v4276_v45, -1e+30  ;;  %4710 = vmax.xlane.f32.xlu0 %v4709_v35  ;;  %v8787_v41 = vpop.f32.mrb[99].mxu0 }
 0xaf5   :  { %v4712_v28 = vsel %vm1667_vm5, %v12227_v17, -inf }
 0xaf6   :  { %4713 = vmax.xlane.f32.xlu1 %v4712_v28 }
 0xb0a   :  { %v4391_v11 = vpop.f32.mrb[100].mxu0 }
 0xb0b   :  { %v8798_v3 = vpop.f32.mrb[101].mxu0  ;;  %v12251_v52 = vsel %vm11024_vm4, %v4391_v11, -1e+30 }
 0xb0c   :  { %v12231_v24 = vpop.f32.mrb[188].mxu1  ;;  %v4394_v43 = vpop.f32.mrb[102].mxu0  ;;  %v4721_v7 = vsel %vm1667_vm5, %v12251_v52, -inf }
 0xb0d   :  { %v12235_v44 = vsel %vm11028_vm6, %v4394_v43, -1e+30  ;;  %v8780_v38 = vpop.f32.mrb[189].mxu1  ;;  %v8799_v10 = vpop.f32.mrb[103].mxu0 }
 0xb0e   :  { %v4724_v60 = vsel %vm1667_vm5, %v12235_v44, -inf  ;;  %v12239_v55 = vpop.f32.mrb[190].mxu1 }
 0xb0f   :  { %v9120_v14 = vpack.i.bf16 %v12239_v55, %v12231_v24  ;;  %4725 = vmax.xlane.f32.xlu1 %v4724_v60  ;;  %v8781_v59 = vpop.f32.mrb[191].mxu1 }
 0xb14   :  { %v4332_v39 = vpop.f32.mrb[192].mxu1 }
 0xb15   :  { %v12245_v53 = vsel %vm11024_vm4, %v4332_v39, -1e+30  ;;  %v8792_v22 = vpop.f32.mrb[193].mxu1 }
 0xb16   :  { %v4715_v12 = vsel %vm1667_vm5, %v12245_v53, -inf  ;;  %v4335_v18 = vpop.f32.mrb[194].mxu1 }
 0xb17   :  { %4716 = vmax.xlane.f32.xlu0 %v4715_v12  ;;  %v8793_v8 = vpop.f32.mrb[195].mxu1  ;;  %v12257_v61 = vsel %vm11028_vm6, %v4335_v18, -1e+30 }
 0xb18   :  { %v4718_v30 = vsel %vm1667_vm5, %v12257_v61, -inf }
 0xb1a   :  { %v4509_v57 = vpop.f32.mrb[104].mxu0 }
 0xb1b   :  { %v8810_v34 = vpop.f32.mrb[105].mxu0  ;;  %4722 = vmax.xlane.f32.xlu0 %v4721_v7  ;;  %v12279_v11 = vsel %vm11024_vm4, %v4509_v57, -1e+30 }
 0xb1c   :  { %v4450_v15 = vpop.f32.mrb[196].mxu1  ;;  %v4512_v63 = vpop.f32.mrb[106].mxu0  ;;  %v4733_v10 = vsel %vm1667_vm5, %v12279_v11, -inf }
 0xb1d   :  { %v8804_v42 = vpop.f32.mrb[197].mxu1  ;;  %v8811_v33 = vpop.f32.mrb[107].mxu0  ;;  %v12263_v40 = vsel %vm11024_vm4, %v4450_v15, -1e+30  ;;  %v12273_v41 = vsel %vm11028_vm6, %v4512_v63, -1e+30 }
 0xb1e   :  { %v4453_v54 = vpop.f32.mrb[198].mxu1  ;;  %v4727_v28 = vsel %vm1667_vm5, %v12263_v40, -inf  ;;  %v4736_v3 = vsel %vm1667_vm5, %v12273_v41, -inf }
 0xb1f   :  { %v12267_v9 = vsel %vm11028_vm6, %v4453_v54, -1e+30  ;;  %4719 = vmax.xlane.f32.xlu0 %v4718_v30  ;;  %v8805_v35 = vpop.f32.mrb[199].mxu1 }
 0xb20   :  { %v4730_v45 = vsel %vm1667_vm5, %v12267_v9, -inf }
 0xb21   :  { %4731 = vmax.xlane.f32.xlu1 %v4730_v45 }
 0xb23   :  { %4728 = vmax.xlane.f32.xlu0 %v4727_v28 }
 0xb24   :  { %v4568_v43 = vpop.f32.mrb[200].mxu1 }
 0xb25   :  { %4737 = vmax.xlane.f32.xlu1 %v4736_v3  ;;  %v8816_v38 = vpop.f32.mrb[201].mxu1  ;;  %v12287_v59 = vsel %vm11024_vm4, %v4568_v43, -1e+30  ;;  %v14187_v43 = vld [vmem:[#allocation50_spill] sm:$0xff] }
 0xb26   :  { %v4571_v60 = vpop.f32.mrb[202].mxu1  ;;  %v4739_v18 = vsel %vm1667_vm5, %v12287_v59, -inf  ;;  %v14188_v38 = vld [vmem:[#allocation49_spill] sm:$0xff] }
 0xb27   :  { %v12291_v39 = vsel %vm11028_vm6, %v4571_v60, -1e+30  ;;  %4734 = vmax.xlane.f32.xlu0 %v4733_v10  ;;  %v8817_v22 = vpop.f32.mrb[203].mxu1  ;;  %v14189_v10 = vpack.c.bf16 %v14187_v43, %v14188_v38  ;;  %v14190_v60 = vld [vmem:[#allocation52_spill] sm:$0xff] }
 0xb28   :  { %v4742_v12 = vsel %vm1667_vm5, %v12291_v39, -inf  ;;  %v14192_v22 = vpack.c.bf16 %v14190_v60, %v14191_v5 }
 0xb29   :  { %4743 = vmax.xlane.f32.xlu1 %v4742_v12 }
 0xb2a   :  { %v4627_v8 = vpop.f32.mrb[108].mxu0 }
 0xb2b   :  { %v12299_v7 = vsel %vm11024_vm4, %v4627_v8, -1e+30  ;;  %v8822_v57 = vpop.f32.mrb[109].mxu0  ;;  %4740 = vmax.xlane.f32.xlu0 %v4739_v18  ;;  %v12333_v8 = vpop.permute.xlu0 %4996 }
 0xb2c   :  { %v4630_v34 = vpop.f32.mrb[110].mxu0  ;;  %v4745_v42 = vsel %vm1667_vm5, %v12299_v7, -inf  ;;  %v12335_v57 = vpop.permute.xlu1 %4998 }
 0xb2d   :  { %v12303_v15 = vsel %vm11028_vm6, %v4630_v34, -1e+30  ;;  %v8823_v63 = vpop.f32.mrb[111].mxu0 }
 0xb2e   :  { %v4748_v33 = vsel %vm1667_vm5, %v12303_v15, -inf }
 0xb2f   :  { %4746 = vmax.xlane.f32.xlu0 %v4745_v42  ;;  %4749 = vmax.xlane.f32.xlu1 %v4748_v33 }
 0xb30   :  { %v12339_v34 = vpop.permute.xlu1 %5049 }
 0xb32   :  { %v4686_v30 = vpop.f32.mrb[204].mxu1 }
 0xb33   :  { %v12311_v54 = vsel %vm11024_vm4, %v4686_v30, -1e+30  ;;  %v8828_v35 = vpop.f32.mrb[205].mxu1 }
 0xb34   :  { %v4751_v45 = vsel %vm1667_vm5, %v12311_v54, -inf  ;;  %v4689_v28 = vpop.f32.mrb[206].mxu1 }
 0xb35   :  { %4752 = vmax.xlane.f32.xlu0 %v4751_v45  ;;  %v8829_v3 = vpop.f32.mrb[207].mxu1  ;;  %v12329_v12 = vsel %vm11028_vm6, %v4689_v28, -1e+30 }
 0xb36   :  { %v4754_v18 = vsel %vm1667_vm5, %v12329_v12, -inf }
 0xb40   :  { %5100 = vrot.lane.b32.xlu1 %v14189_v10, %s9877_s5 }
 0xb44   :  { %5149 = vrot.lane.b32.xlu1 %v10999_v6, %s9877_s5  ;;  %v12337_v6 = vpop.permute.xlu0 %5047 }
 0xb48   :  { %5151 = vrot.lane.b32.xlu1 %v14192_v22, %s9877_s5 }
 0xb4b   :  { %5098 = vrot.lane.b32.xlu0 %v10985_v48, %s9877_s5 }
 0xb6c   :  { %4755 = vmax.xlane.f32.xlu1 %v4754_v18 }
 0xb81   :  { %v4711_v63 = vpop.xlane.xlu0 %4710 }
 0xb82   :  { %v4757_v42 = vsub.f32 %v12221_v25, %v4711_v63 }
 0xb83   :  { %v4714_v48 = vpop.xlane.xlu1 %4713 }
 0xb84   :  { %v4773_v33 = vmul.f32 1.442695, %v4757_v42  ;;  %v4758_v29 = vsub.f32 %v12227_v17, %v4714_v48 }
 0xb86   :  { %9663 = vpow2.f32 %v4773_v33  ;;  %v4775_v30 = vmul.f32 1.442695, %v4758_v29 }
 0xb88   :  { %9665 = vpow2.f32 %v4775_v30 }
 0xb90   :  { %v12343_v35 = vpop.eup %9663 }
 0xb91   :  { %v4805_v45 = vsel %vm1667_vm5, %v12343_v35, 0.0 }
 0xb92   :  { %v12347_v28 = vpop.eup %9665  ;;  %4806 = vadd.xlane.f32.xlu0 %v4805_v45 }
 0xb93   :  { %v4808_v3 = vsel %vm1667_vm5, %v12347_v28, 0.0 }
 0xb94   :  { %4809 = vadd.xlane.f32.xlu1 %v4808_v3 }
 0xb9c   :  { %v4726_v17 = vpop.xlane.xlu1 %4725 }
 0xb9d   :  { %v4762_v5 = vsub.f32 %v12235_v44, %v4726_v17 }
 0xb9f   :  { %v4783_v48 = vmul.f32 1.442695, %v4762_v5 }
 0xba4   :  { %v4717_v25 = vpop.xlane.xlu0 %4716 }
 0xba5   :  { %v4759_v43 = vsub.f32 %v12245_v53, %v4717_v25 }
 0xba7   :  { %v4777_v38 = vmul.f32 1.442695, %v4759_v43 }
 0xba8   :  { %v4723_v10 = vpop.xlane.xlu0 %4722 }
 0xba9   :  { %9667 = vpow2.f32 %v4777_v38  ;;  %v4761_v60 = vsub.f32 %v12251_v52, %v4723_v10 }
 0xbab   :  { %v4781_v22 = vmul.f32 1.442695, %v4761_v60 }
 0xbac   :  { %v4720_v18 = vpop.xlane.xlu0 %4719 }
 0xbad   :  { %9669 = vpow2.f32 %v4781_v22  ;;  %v4760_v63 = vsub.f32 %v12257_v61, %v4720_v18 }
 0xbae   :  { %v4732_v42 = vpop.xlane.xlu1 %4731 }
 0xbaf   :  { %v4779_v33 = vmul.f32 1.442695, %v4760_v63  ;;  %v4764_v30 = vsub.f32 %v12267_v9, %v4732_v42 }
 0xbb0   :  { %v4729_v29 = vpop.xlane.xlu0 %4728 }
 0xbb1   :  { %9671 = vpow2.f32 %v4779_v33  ;;  %v4763_v53 = vsub.f32 %v12263_v40, %v4729_v29  ;;  %v4787_v17 = vmul.f32 1.442695, %v4764_v30 }
 0xbb2   :  { %v4738_v45 = vpop.xlane.xlu1 %4737  ;;  %9673 = vpow2.f32 %v4783_v48 }
 0xbb3   :  { %v12357_v3 = vpop.eup %9667  ;;  %v4785_v52 = vmul.f32 1.442695, %v4763_v53  ;;  %v4766_v44 = vsub.f32 %v12273_v41, %v4738_v45 }
 0xbb4   :  { %v4735_v25 = vpop.xlane.xlu0 %4734  ;;  %v4811_v61 = vsel %vm1667_vm5, %v12357_v3, 0.0 }
 0xbb5   :  { %9675 = vpow2.f32 %v4785_v52  ;;  %v4791_v43 = vmul.f32 1.442695, %v4766_v44  ;;  %v4765_v38 = vsub.f32 %v12279_v11, %v4735_v25  ;;  %4812 = vadd.xlane.f32.xlu0 %v4811_v61 }
 0xbb6   :  { %v4744_v40 = vpop.xlane.xlu1 %4743 }
 0xbb7   :  { %v12363_v10 = vpop.eup %9669  ;;  %9677 = vpow2.f32 %v4791_v43  ;;  %v4789_v9 = vmul.f32 1.442695, %v4765_v38  ;;  %v4768_v60 = vsub.f32 %v12291_v39, %v4744_v40 }
 0xbb8   :  { %v4741_v5 = vpop.xlane.xlu0 %4740  ;;  %v4817_v41 = vsel %vm1667_vm5, %v12363_v10, 0.0 }
 0xbb9   :  { %9679 = vpow2.f32 %v4789_v9  ;;  %v4795_v22 = vmul.f32 1.442695, %v4768_v60  ;;  %v4767_v18 = vsub.f32 %v12287_v59, %v4741_v5  ;;  %4818 = vadd.xlane.f32.xlu0 %v4817_v41 }
 0xbba   :  { %9681 = vpow2.f32 %v4787_v17 }
 0xbbb   :  { %v12369_v11 = vpop.eup %9671  ;;  %9683 = vpow2.f32 %v4795_v22  ;;  %v4793_v63 = vmul.f32 1.442695, %v4767_v18 }
 0xbbc   :  { %v4747_v42 = vpop.xlane.xlu0 %4746  ;;  %v4750_v48 = vpop.xlane.xlu1 %4749  ;;  %v4814_v33 = vsel %vm1667_vm5, %v12369_v11, 0.0 }
 0xbbd   :  { %v12373_v39 = vpop.eup %9673  ;;  %v4769_v29 = vsub.f32 %v12299_v7, %v4747_v42  ;;  %4815 = vadd.xlane.f32.xlu1 %v4814_v33  ;;  %9685 = vpow2.f32 %v4793_v63 }
 0xbbe   :  { %v4820_v52 = vsel %vm1667_vm5, %v12373_v39, 0.0 }
 0xbbf   :  { %v12376_v53 = vpop.eup %9675  ;;  %v4797_v59 = vmul.f32 1.442695, %v4769_v29 }
 0xbc0   :  { %v5101_v30 = vpop.permute.xlu1 %5100  ;;  %v4823_v45 = vsel %vm1667_vm5, %v12376_v53, 0.0 }
 0xbc1   :  { %v12382_v44 = vpop.eup %9677  ;;  %4824 = vadd.xlane.f32.xlu0 %v4823_v45  ;;  %4821 = vadd.xlane.f32.xlu1 %v4820_v52  ;;  %9687 = vpow2.f32 %v4797_v59  ;;  %v14193_v59 = vld [vmem:[#allocation54_spill] sm:$0xff]  ;;  %v4770_v52 = vsub.f32 %v12303_v15, %v4750_v48 }
 0xbc2   :  { %v4753_v25 = vpop.xlane.xlu0 %4752  ;;  %v4832_v38 = vsel %vm1667_vm5, %v12382_v44, 0.0 }
 0xbc3   :  { %v12384_v61 = vpop.eup %9679 }
 0xbc4   :  { %v12386_v7 = vpop.eup %9681  ;;  %v5150_v43 = vpop.permute.xlu1 %5149  ;;  %v4829_v17 = vsel %vm1667_vm5, %v12384_v61, 0.0 }
 0xbc5   :  { %v12392_v40 = vpop.eup %9683  ;;  %4833 = vadd.xlane.f32.xlu0 %v4832_v38  ;;  %4830 = vadd.xlane.f32.xlu1 %v4829_v17  ;;  %v4826_v22 = vsel %vm1667_vm5, %v12386_v7, 0.0  ;;  %v4771_v38 = vsub.f32 %v12311_v54, %v4753_v25  ;;  %v14197_v25 = vld [vmem:[#allocation55_spill] sm:$0xff] }
 0xbc6   :  { %v5099_v9 = vpop.permute.xlu0 %5098  ;;  %v4838_v41 = vsel %vm1667_vm5, %v12392_v40, 0.0 }
 0xbc7   :  { %v12395_v60 = vsel %vm4225_vm7, %v5099_v9, %v5101_v30  ;;  %v12401_v18 = vpop.eup %9685  ;;  %v14194_v30 = vld [vmem:[#allocation53_spill] sm:$0xff]  ;;  %v4801_v17 = vmul.f32 1.442695, %v4771_v38  ;;  %v14202_v38 = vld [vmem:[#allocation74_spill] sm:$0xff] }
 0xbc8   :  { %v5152_v5 = vpop.permute.xlu1 %5151  ;;  %v4835_v42 = vsel %vm1667_vm5, %v12401_v18, 0.0  ;;  %v14195_v45 = vpack.c.bf16 %v14193_v59, %v14194_v30  ;;  %v14199_v30 = vld [vmem:[#allocation76_spill] sm:$0xff] }
 0xbc9   :  { %v12404_v63 = vsel %vm4225_vm7, %v5150_v43, %v5152_v5  ;;  %4839 = vadd.xlane.f32.xlu0 %v4838_v41  ;;  %4827 = vadd.xlane.f32.xlu1 %v4826_v22  ;;  %v4799_v43 = vmul.f32 1.442695, %v4770_v52 }
 0xbcb   :  { %v12408_v33 = vpop.eup %9687  ;;  %9689 = vpow2.f32 %v4799_v43 }
 0xbcc   :  { %v4841_v29 = vsel %vm1667_vm5, %v12408_v33, 0.0  ;;  %9691 = vpow2.f32 %v4801_v17  ;;  %v14203_v17 = vld [vmem:[#allocation73_spill] sm:$0xff] }
 0xbcd   :  { %4836 = vadd.xlane.f32.xlu1 %v4835_v42 }
 0xbd1   :  { %4842 = vadd.xlane.f32.xlu1 %v4841_v29 }
 0xbd5   :  { %v12420_v5 = vpop.eup %9689 }
 0xbd6   :  { %v12425_v42 = vpop.eup %9691 }
 0xbd7   :  { %v4847_v15 = vsel %vm1667_vm5, %v12425_v42, 0.0 }
 0xbdf   :  { %5200 = vrot.lane.b32.xlu0 %v11007_v20, %s9877_s5  ;;  %v4844_v20 = vsel %vm1667_vm5, %v12420_v5, 0.0 }
 0xbe2   :  { %5202 = vrot.lane.b32.xlu1 %v14195_v45, %s9877_s5  ;;  %v14200_v45 = vld [vmem:[#allocation75_spill] sm:$0xff] }
 0xbe3   :  { %v14201_v52 = vpack.i.bf16 %v14199_v30, %v14200_v45 }
 0xbf9   :  { %v4756_v9 = vpop.xlane.xlu1 %4755 }
 0xbfa   :  { %v4772_v41 = vsub.f32 %v12329_v12, %v4756_v9  ;;  %v14196_v12 = vld [vmem:[#allocation56_spill] sm:$0xff]  ;;  %v14204_v9 = vpack.i.bf16 %v14202_v38, %v14203_v17  ;;  %v5051_v38 = vsel %vm4225_vm7, %v12337_v6, %v12339_v34 }
 0xbfb   :  { %v14198_v29 = vpack.c.bf16 %v14196_v12, %v14197_v25 }
 0xbfc   :  { %v4803_v22 = vmul.f32 1.442695, %v4772_v41 }
 0xbfe   :  { %9693 = vpow2.f32 %v4803_v22  ;;  %4845 = vadd.xlane.f32.xlu0 %v4844_v20  ;;  %v5000_v20 = vsel %vm4225_vm7, %v12333_v8, %v12335_v57 }
 0xc06   :  { %4848 = vadd.xlane.f32.xlu1 %v4847_v15 }
 0xc08   :  { %v12429_v54 = vpop.eup %9693 }
 0xc09   :  { %v4850_v48 = vsel %vm1667_vm5, %v12429_v54, 0.0 }
 0xc0a   :  { %4851 = vadd.xlane.f32.xlu0 %v4850_v48 }
 0xc17   :  { %5253 = vrot.lane.b32.xlu1 %v14198_v29, %s9877_s5 }
 0xc1b   :  { %9016 = vrot.lane.b32.xlu1 %v9015_v16, %s9878_s30 }
 0xc1f   :  { %v4807_v59 = vpop.xlane.xlu0 %4806  ;;  %9026 = vrot.lane.b32.xlu1 %v14201_v52, %s9879_s22 }
 0xc20   :  { %9695 = vrcp.f32 %v4807_v59  ;;  %5251 = vrot.lane.b32.xlu0 %v11015_v26, %s9877_s5 }
 0xc21   :  { %v4810_v43 = vpop.xlane.xlu1 %4809 }
 0xc22   :  { %9697 = vrcp.f32 %v4810_v43 }
 0xc24   :  { %9011 = vrot.lane.b32.xlu0 %v14204_v9, %s9879_s22 }
 0xc2a   :  { %v9696_v49 = vpop.eup %9695 }
 0xc2b   :  { %v4869_v16 = vmul.f32 %v9696_v49, %v12343_v35 }
 0xc2c   :  { %v9698_v32 = vpop.eup %9697 }
 0xc2d   :  { %v4870_v41 = vmul.f32 %v9698_v32, %v12347_v28 }
 0xc2f   :  { %v4885_v22 = vpack.c.bf16 %v4870_v41, %v4869_v16 }
 0xc31   :  { %8833 = vmatmul.mubr.msk.bf16.vlgmr.msra.gmra.mrb[112].mxu0 %vm1667_vm5, %v4885_v22 }
 0xc32   :  { %8843 = vmatpush3.bf16.msra.mxu0 %v5000_v20  ;;  %8844 = vmatprep.mubr.msk.bf16.mxu0 %vm9874_vm2, %v14099_v46 }
 0xc33   :  { %8854 = vmatprep.subr.bf16.mxu0 %v14099_v46 }
 0xc42   :  { %v4813_v26 = vpop.xlane.xlu0 %4812 }
 0xc43   :  { %9699 = vrcp.f32 %v4813_v26 }
 0xc46   :  { %v4819_v15 = vpop.xlane.xlu0 %4818 }
 0xc4a   :  { %v4816_v48 = vpop.xlane.xlu1 %4815 }
 0xc4b   :  { %9701 = vrcp.f32 %v4816_v48 }
 0xc4c   :  { %9703 = vrcp.f32 %v4819_v15 }
 0xc4d   :  { %v9700_v8 = vpop.eup %9699 }
 0xc4e   :  { %v4825_v35 = vpop.xlane.xlu0 %4824  ;;  %v4822_v28 = vpop.xlane.xlu1 %4821  ;;  %v4871_v29 = vmul.f32 %v9700_v8, %v12357_v3 }
 0xc4f   :  { %9705 = vrcp.f32 %v4822_v28 }
 0xc52   :  { %v4834_v12 = vpop.xlane.xlu0 %4833  ;;  %v4831_v25 = vpop.xlane.xlu1 %4830 }
 0xc53   :  { %9707 = vrcp.f32 %v4834_v12 }
 0xc54   :  { %9709 = vrcp.f32 %v4831_v25 }
 0xc55   :  { %v9702_v57 = vpop.eup %9701  ;;  %9711 = vrcp.f32 %v4825_v35 }
 0xc56   :  { %v4872_v59 = vmul.f32 %v9702_v57, %v12369_v11  ;;  %v4828_v30 = vpop.xlane.xlu1 %4827  ;;  %v9704_v45 = vpop.eup %9703 }
 0xc57   :  { %9713 = vrcp.f32 %v4828_v30  ;;  %v4873_v9 = vmul.f32 %v9704_v45, %v12363_v10  ;;  %v4840_v3 = vpop.xlane.xlu0 %4839 }
 0xc58   :  { %v4886_v52 = vpack.c.bf16 %v4872_v59, %v4871_v29 }
 0xc59   :  { %v9706_v43 = vpop.eup %9705 }
 0xc5a   :  { %8839 = vmatmul.mubr.msk.bf16.vlgmr.msra.gmra.mrb[208].mxu1 %vm1667_vm5, %v4886_v52  ;;  %v4837_v17 = vpop.xlane.xlu1 %4836  ;;  %v4874_v49 = vmul.f32 %v9706_v43, %v12373_v39 }
 0xc5b   :  { %8849 = vmatpush3.bf16.msra.mxu1 %v5051_v38  ;;  %8850 = vmatprep.mubr.msk.bf16.mxu1 %vm9874_vm2, %v14099_v46  ;;  %9715 = vrcp.f32 %v4837_v17  ;;  %v5201_v28 = vpop.permute.xlu0 %5200 }
 0xc5c   :  { %8860 = vmatprep.subr.bf16.mxu1 %v14099_v46  ;;  %v4887_v32 = vpack.c.bf16 %v4874_v49, %v4873_v9  ;;  %9717 = vrcp.f32 %v4840_v3  ;;  %v9225_v9 = vld [vmem:[#allocation5 + $0x14] ss:$8 sps:$4 sm:$0xff]   ;;  %v9223_v49 = vld [vmem:[#allocation5 + $0x10] ss:$8 sps:$4 sm:$0xff]   ;;  %v9228_v3 = vld [vmem:[#allocation5 + $0x24] ss:$8 sps:$4 sm:$0xff]  }
 0xc5d   :  { %v9708_v11 = vpop.eup %9707 }
 0xc5e   :  { %v9710_v16 = vpop.eup %9709  ;;  %v4843_v6 = vpop.xlane.xlu1 %4842  ;;  %8845 = vmatmul.mubr.msk.bf16.vlgmr.msra.gmra.mrb[116].mxu0 %vm1667_vm5, %v4887_v32  ;;  %v4878_v10 = vmul.f32 %v9708_v11, %v12382_v44  ;;  %v9226_v11 = vld [vmem:[#allocation5 + $0x20] ss:$8 sps:$4 sm:$0xff]   ;;  %v9231_v32 = vld [vmem:[#allocation5 + $0x34] ss:$8 sps:$4 sm:$0xff]  }
 0xc5f   :  { %v9712_v34 = vpop.eup %9711  ;;  %8855 = vmatpush3.bf16.msra.mxu0 %v12395_v60  ;;  %8856 = vmatprep.mubr.msk.bf16.mxu0 %vm9874_vm2, %v14099_v46  ;;  %v4877_v39 = vmul.f32 %v9710_v16, %v12384_v61  ;;  %9719 = vrcp.f32 %v4843_v6  ;;  %v9229_v16 = vld [vmem:[#allocation5 + $0x30] ss:$8 sps:$4 sm:$0xff]   ;;  %v9237_v6 = vld [vmem:[#allocation5 + $0x54] ss:$8 sps:$4 sm:$0xff]  }
 0xc60   :  { %8866 = vmatprep.subr.bf16.mxu0 %v14099_v46  ;;  %v4875_v22 = vmul.f32 %v9712_v34, %v12376_v53  ;;  %v9235_v34 = vld [vmem:[#allocation5 + $0x50] ss:$8 sps:$4 sm:$0xff]  }
 0xc61   :  { %v9714_v41 = vpop.eup %9713  ;;  %v4889_v48 = vpack.c.bf16 %v4878_v10, %v4877_v39  ;;  %v9238_v10 = vld [vmem:[#allocation5 + $0x60] ss:$8 sps:$4 sm:$0xff]   ;;  %v9240_v39 = vld [vmem:[#allocation5 + $0x64] ss:$8 sps:$4 sm:$0xff]  }
 0xc62   :  { %v4876_v20 = vmul.f32 %v9714_v41, %v12386_v7  ;;  %v5203_v26 = vpop.permute.xlu1 %5202  ;;  %v9243_v41 = vld [vmem:[#allocation5 + $0x74] ss:$8 sps:$4 sm:$0xff]  }
 0xc63   :  { %v5204_v60 = vsel %vm4225_vm7, %v5201_v28, %v5203_v26  ;;  %v9244_v26 = vld [vmem:[#allocation5 + $0x80] ss:$8 sps:$4 sm:$0xff]  }
 0xc64   :  { %v4888_v15 = vpack.c.bf16 %v4876_v20, %v4875_v22  ;;  %v9241_v22 = vld [vmem:[#allocation5 + $0x70] ss:$8 sps:$4 sm:$0xff]   ;;  %v9246_v20 = vld [vmem:[#allocation5 + $0x84] ss:$8 sps:$4 sm:$0xff]  }
 0xc65   :  { %v9716_v35 = vpop.eup %9715 }
 0xc66   :  { %8851 = vmatmul.mubr.msk.bf16.vlgmr.msra.gmra.mrb[212].mxu1 %vm1667_vm5, %v4888_v15  ;;  %8857 = vmatmul.mubr.msk.bf16.vlgmr.msra.gmra.mrb[120].mxu0 %vm1667_vm5, %v4889_v48  ;;  %v9718_v44 = vpop.eup %9717  ;;  %v4879_v61 = vmul.f32 %v9716_v35, %v12401_v18  ;;  %v9247_v15 = vld [vmem:[#allocation5 + $0x94] ss:$8 sps:$4 sm:$0x3f]   ;;  %v9249_v48 = vld [vmem:[#allocation5 + $0x90] ss:$8 sps:$4 sm:$0x3f]  }
 0xc67   :  { %8861 = vmatpush3.bf16.msra.mxu1 %v12404_v63  ;;  %8867 = vmatpush3.bf16.msra.mxu0 %v5204_v60  ;;  %v4880_v53 = vmul.f32 %v9718_v44, %v12392_v40  ;;  %v5716_v35 = vsel %vm5714_vm8, %v9249_v48, 0  ;;  %v14224_v48 = vld [vmem:[#allocation57_spill] sm:$0xff] }
 0xc68   :  { %8862 = vmatprep.mubr.msk.bf16.mxu1 %vm9874_vm2, %v14099_v46  ;;  %8868 = vmatprep.mubr.msk.bf16.mxu0 %vm9874_vm2, %v14099_v46 }
 0xc69   :  { %8872 = vmatprep.subr.bf16.mxu1 %v14099_v46  ;;  %v4890_v7 = vpack.c.bf16 %v4880_v53, %v4879_v61  ;;  %v9720_v12 = vpop.eup %9719 }
 0xc6a   :  { %v4881_v8 = vmul.f32 %v9720_v12, %v12408_v33  ;;  %v9220_v33 = vld [vmem:[#allocation5] ss:$8 sps:$4 sm:$0xff]  }
 0xc6e   :  { %8863 = vmatmul.mubr.msk.bf16.vlgmr.msra.gmra.mrb[216].mxu1 %vm1667_vm5, %v4890_v7  ;;  %v14205_v7 = vld [vmem:[#allocation78_spill] sm:$0xff] }
 0xc6f   :  { %8874 = vmatprep.mubr.msk.bf16.mxu1 %vm9874_vm2, %v14099_v46 }
 0xc8b   :  { %v4846_v63 = vpop.xlane.xlu0 %4845 }
 0xc8c   :  { %9721 = vrcp.f32 %v4846_v63  ;;  %v14206_v63 = vld [vmem:[#allocation77_spill] sm:$0xff] }
 0xc93   :  { %v4849_v18 = vpop.xlane.xlu1 %4848 }
 0xc94   :  { %9723 = vrcp.f32 %v4849_v18  ;;  %v14207_v18 = vpack.i.bf16 %v14205_v7, %v14206_v63 }
 0xc96   :  { %v9722_v25 = vpop.eup %9721 }
 0xc97   :  { %v4882_v57 = vmul.f32 %v9722_v25, %v12420_v5  ;;  %v4852_v29 = vpop.xlane.xlu0 %4851  ;;  %v5254_v59 = vpop.permute.xlu1 %5253  ;;  %v9222_v5 = vld [vmem:[#allocation5 + $0x4] ss:$8 sps:$4 sm:$0xff]  }
 0xc98   :  { %9725 = vrcp.f32 %v4852_v29  ;;  %5721 = vmatprep.subr.bf16.mxu0 %v9222_v5 }
 0xc99   :  { %v4891_v40 = vpack.c.bf16 %v4882_v57, %v4881_v8 }
 0xc9b   :  { %v5252_v30 = vpop.permute.xlu0 %5251  ;;  %8869 = vmatmul.mubr.msk.bf16.vlgmr.msra.gmra.mrb[124].mxu0 %vm1667_vm5, %v4891_v40  ;;  %v9017_v36 = vpop.permute.xlu1 %9016 }
 0xc9c   :  { %v5255_v46 = vsel %vm4225_vm7, %v5252_v30, %v5254_v59  ;;  %5722 = vmatpush1.bf16.msra.mxu0 %v9220_v33 }
 0xc9d   :  { %8873 = vmatpush3.bf16.msra.mxu1 %v5255_v46  ;;  %5723 = vmatprep.subr.bf16.mxu0 %v9225_v9 }
 0xc9e   :  { %v9724_v45 = vpop.eup %9723 }
 0xc9f   :  { %v4883_v43 = vmul.f32 %v9724_v45, %v12425_v42  ;;  %v9234_v42 = vld [vmem:[#allocation5 + $0x44] ss:$8 sps:$4 sm:$0xff]  }
 0xca0   :  { %5724 = vmatpush1.bf16.msra.mxu0 %v9223_v49  ;;  %v14211_v49 = vld [vmem:[#allocation82_spill] sm:$0xff] }
 0xca1   :  { %5725 = vmatprep.subr.bf16.mxu0 %v9228_v3  ;;  %v14212_v3 = vld [vmem:[#allocation81_spill] sm:$0xff] }
 0xca2   :  { %v9726_v52 = vpop.eup %9725 }
 0xca3   :  { %v4884_v38 = vmul.f32 %v9726_v52, %v12429_v54  ;;  %v9232_v54 = vld [vmem:[#allocation5 + $0x40] ss:$8 sps:$4 sm:$0xff]  }
 0xca4   :  { %5726 = vmatpush1.bf16.msra.mxu0 %v9226_v11  ;;  %v14209_v52 = vld [vmem:[#allocation79_spill] sm:$0xff]  ;;  %v14213_v11 = vpack.i.bf16 %v14211_v49, %v14212_v3 }
 0xca5   :  { %v4892_v17 = vpack.c.bf16 %v4884_v38, %v4883_v43  ;;  %5727 = vmatprep.subr.bf16.mxu0 %v9231_v32 }
 0xca7   :  { %8875 = vmatmul.mubr.msk.bf16.vlgmr.msra.gmra.mrb[220].mxu1 %vm1667_vm5, %v4892_v17 }
 0xca8   :  { %5728 = vmatpush1.bf16.msra.mxu0 %v9229_v16 }
 0xca9   :  { %5729 = vmatprep.subr.bf16.mxu0 %v9234_v42  ;;  %v14214_v42 = vld [vmem:[#allocation84_spill] sm:$0xff] }
 0xcac   :  { %5730 = vmatpush1.bf16.msra.mxu0 %v9232_v54  ;;  %v14215_v54 = vld [vmem:[#allocation83_spill] sm:$0xff] }
 0xcad   :  { %5731 = vmatprep.subr.bf16.mxu0 %v9237_v6  ;;  %v14216_v6 = vpack.i.bf16 %v14214_v42, %v14215_v54  ;;  %v14227_v42 = vld [vmem:[#allocation62_spill] sm:$0xff] }
 0xcb0   :  { %5732 = vmatpush1.bf16.msra.mxu0 %v9235_v34  ;;  %v14217_v34 = vld [vmem:[#allocation86_spill] sm:$0xff] }
 0xcb1   :  { %5733 = vmatprep.subr.bf16.mxu0 %v9240_v39 }
 0xcb4   :  { %5734 = vmatpush1.bf16.msra.mxu0 %v9238_v10  ;;  %v14218_v10 = vld [vmem:[#allocation85_spill] sm:$0xff] }
 0xcb5   :  { %5735 = vmatprep.subr.bf16.mxu0 %v9243_v41  ;;  %v14219_v39 = vpack.i.bf16 %v14217_v34, %v14218_v10 }
 0xcb8   :  { %5736 = vmatpush1.bf16.msra.mxu0 %v9241_v22 }
 0xcb9   :  { %5737 = vmatprep.subr.bf16.mxu0 %v9246_v20  ;;  %v9012_v20 = vpop.permute.xlu0 %9011 }
 0xcbc   :  { %5738 = vmatpush1.bf16.msra.mxu0 %v9244_v26  ;;  %v9014_v26 = vunpack.i.h.bf16 %v9012_v20 }
 0xcbd   :  { %8192 = vmatprep.subr.msk.bf16.mxu0 %vm5714_vm8, %v9247_v15  ;;  %v9013_v15 = vunpack.i.l.bf16 %v9012_v20 }
 0xcc0   :  { %5740 = vmatpush1.bf16.msra.mxu0 %v5716_v35  ;;  %v5493_v35 = vsel %vm1270_vm3, %v14224_v48, %v9013_v15  ;;  %v14230_v48 = vld [vmem:[#allocation64_spill] sm:$0xff] }
 0xd04   :  { %v4937_v28 = vpop.f32.mrb[112].mxu0 }
 0xd05   :  { %v8834_v60 = vpop.f32.mrb[113].mxu0 }
 0xd06   :  { %v4940_v44 = vpop.f32.mrb[114].mxu0  ;;  %v9019_v60 = vunpack.i.h.bf16 %v9017_v36 }
 0xd07   :  { %v9020_v61 = vpack.i.bf16 %v4940_v44, %v4937_v28  ;;  %v8835_v53 = vpop.f32.mrb[115].mxu0  ;;  %v9018_v44 = vunpack.i.l.bf16 %v9017_v36 }
 0xd09   :  { %9021 = vrot.lane.b32.xlu0 %v9020_v61, %s9880_s1  ;;  %v5510_v24 = vsel %vm5509_vm9, %v5493_v35, %v9018_v44 }
 0xd0d   :  { %9031 = vrot.lane.b32.xlu0 %v9030_v56, %s9878_s30  ;;  %v14208_v56 = vld [vmem:[#allocation80_spill] sm:$0xff] }
 0xd0e   :  { %v14210_v43 = vpack.i.bf16 %v14208_v56, %v14209_v52  ;;  %v14225_v52 = vld [vmem:[#allocation60_spill] sm:$0xff] }
 0xd11   :  { %9041 = vrot.lane.b32.xlu0 %v14207_v18, %s9879_s22 }
 0xd2d   :  { %v4988_v12 = vpop.f32.mrb[208].mxu1 }
 0xd2e   :  { %v8840_v25 = vpop.f32.mrb[209].mxu1 }
 0xd2f   :  { %v4991_v8 = vpop.f32.mrb[210].mxu1 }
 0xd30   :  { %v9035_v57 = vpack.i.bf16 %v4991_v8, %v4988_v12  ;;  %v8841_v29 = vpop.f32.mrb[211].mxu1 }
 0xd31   :  { %v5039_v40 = vpop.f32.mrb[116].mxu0 }
 0xd32   :  { %9036 = vrot.lane.b32.xlu1 %v9035_v57, %s9880_s1  ;;  %v8846_v59 = vpop.f32.mrb[117].mxu0 }
 0xd33   :  { %v5042_v30 = vpop.f32.mrb[118].mxu0  ;;  %v9027_v59 = vpop.permute.xlu1 %9026 }
 0xd34   :  { %v9050_v46 = vpack.i.bf16 %v5042_v30, %v5039_v40  ;;  %v8847_v45 = vpop.f32.mrb[119].mxu0  ;;  %v9029_v30 = vunpack.i.h.bf16 %v9027_v59 }
 0xd36   :  { %9046 = vrot.lane.b32.xlu1 %v9045_v2, %s9878_s30  ;;  %9051 = vrot.lane.b32.xlu0 %v9050_v46, %s9880_s1  ;;  %v9028_v46 = vunpack.i.l.bf16 %v9027_v59  ;;  %v14231_v59 = vld [vmem:[#allocation66_spill] sm:$0xff] }
 0xd39   :  { %v5090_v37 = vpop.f32.mrb[212].mxu1  ;;  %v5141_v1 = vpop.f32.mrb[120].mxu0 }
 0xd3a   :  { %9056 = vrot.lane.b32.xlu1 %v14210_v43, %s9879_s22  ;;  %9061 = vrot.lane.b32.xlu0 %v9060_v47, %s9878_s30  ;;  %v8858_v38 = vpop.f32.mrb[121].mxu0  ;;  %v8852_v17 = vpop.f32.mrb[213].mxu1  ;;  %v5496_v43 = vsel %vm1270_vm3, %v14225_v52, %v9029_v30 }
 0xd3b   :  { %v5093_v33 = vpop.f32.mrb[214].mxu1  ;;  %v5144_v5 = vpop.f32.mrb[122].mxu0  ;;  %v14226_v38 = vld [vmem:[#allocation59_spill] sm:$0xff] }
 0xd3c   :  { %v9065_v27 = vpack.i.bf16 %v5093_v33, %v5090_v37  ;;  %v9080_v21 = vpack.i.bf16 %v5144_v5, %v5141_v1  ;;  %v8853_v2 = vpop.f32.mrb[215].mxu1  ;;  %v8859_v9 = vpop.f32.mrb[123].mxu0  ;;  %v5495_v17 = vsel %vm1270_vm3, %v14226_v38, %v9028_v46  ;;  %v14232_v46 = vld [vmem:[#allocation65_spill] sm:$0xff] }
 0xd3e   :  { %9071 = vrot.lane.b32.xlu0 %v14213_v11, %s9879_s22  ;;  %9066 = vrot.lane.b32.xlu1 %v9065_v27, %s9880_s1 }
 0xd41   :  { %v5192_v32 = vpop.f32.mrb[216].mxu1 }
 0xd42   :  { %9081 = vrot.lane.b32.xlu0 %v9080_v21, %s9880_s1  ;;  %9076 = vrot.lane.b32.xlu1 %v9075_v51, %s9878_s30  ;;  %v8864_v50 = vpop.f32.mrb[217].mxu1  ;;  %v14222_v51 = vpack.i.bf16 %v14220_v23, %v14221_v58 }
 0xd43   :  { %v5195_v0 = vpop.f32.mrb[218].mxu1 }
 0xd44   :  { %v9095_v47 = vpack.i.bf16 %v5195_v0, %v5192_v32  ;;  %v8865_v16 = vpop.f32.mrb[219].mxu1 }
 0xd46   :  { %9091 = vrot.lane.b32.xlu0 %v9090_v13, %s9878_s30  ;;  %9086 = vrot.lane.b32.xlu1 %v14216_v6, %s9879_s22  ;;  %v14228_v6 = vld [vmem:[#allocation61_spill] sm:$0xff] }
 0xd4a   :  { %9101 = vrot.lane.b32.xlu0 %v14219_v39, %s9879_s22  ;;  %9096 = vrot.lane.b32.xlu1 %v9095_v47, %s9880_s1 }
 0xd4e   :  { %9106 = vrot.lane.b32.xlu1 %v9105_v4, %s9878_s30  ;;  %v5494_v4 = vsel %vm1270_vm3, %v14223_v31, %v9014_v26  ;;  %v14229_v31 = vld [vmem:[#allocation63_spill] sm:$0xff] }
 0xd4f   :  { %v5511_v55 = vsel %vm5509_vm9, %v5494_v4, %v9019_v60 }
 0xd52   :  { %9116 = vrot.lane.b32.xlu1 %v14222_v51, %s9879_s22 }
 0xd6e   :  { %v5243_v19 = vpop.f32.mrb[124].mxu0 }
 0xd6f   :  { %v8870_v62 = vpop.f32.mrb[125].mxu0 }
 0xd70   :  { %v5246_v13 = vpop.f32.mrb[126].mxu0 }
 0xd71   :  { %v9110_v41 = vpack.i.bf16 %v5246_v13, %v5243_v19  ;;  %v8871_v22 = vpop.f32.mrb[127].mxu0 }
 0xd73   :  { %9111 = vrot.lane.b32.xlu0 %v9110_v41, %s9880_s1 }
 0xd77   :  { %9121 = vrot.lane.b32.xlu0 %v9120_v14, %s9878_s30 }
 0xd7a   :  { %v5294_v28 = vpop.f32.mrb[220].mxu1 }
 0xd7b   :  { %v9022_v61 = vpop.permute.xlu0 %9021  ;;  %v8876_v53 = vpop.f32.mrb[221].mxu1 }
 0xd7c   :  { %v9024_v7 = vunpack.i.h.bf16 %v9022_v61  ;;  %v9023_v63 = vunpack.i.l.bf16 %v9022_v61  ;;  %v5297_v18 = vpop.f32.mrb[222].mxu1 }
 0xd7d   :  { %v9125_v14 = vpack.i.bf16 %v5297_v18, %v5294_v28  ;;  %v8877_v12 = vpop.f32.mrb[223].mxu1 }
 0xd7e   :  { %v5527_v25 = vsel %vm5526_vm10, %v5510_v24, %v9023_v63  ;;  %v5528_v8 = vsel %vm5526_vm10, %v5511_v55, %v9024_v7  ;;  %v5544_v57 = vpack.c.bf16 %v9024_v7, %v9023_v63 }
 0xd7f   :  { %v5543_v29 = vpack.c.bf16 %v5528_v8, %v5527_v25  ;;  %9126 = vrot.lane.b32.xlu1 %v9125_v14, %s9880_s1  ;;  %v9032_v40 = vpop.permute.xlu0 %9031 }
 0xd80   :  { %8193 = vmatprep.mubr.msk.bf16.mxu0 %vm5689_vm11, %v5544_v57  ;;  %v9034_v45 = vunpack.i.h.bf16 %v9032_v40  ;;  %v9033_v37 = vunpack.i.l.bf16 %v9032_v40 }
 0xd81   :  { %5754 = vmatmul.mubr.bf16.vlgmr.msra.gmra.mrb[128].mxu0 %v5543_v29 }
 0xd82   :  { %v5512_v27 = vsel %vm5509_vm9, %v5495_v17, %v9033_v37  ;;  %v5513_v21 = vsel %vm5509_vm9, %v5496_v43, %v9034_v45 }
 0xd83   :  { %v9042_v1 = vpop.permute.xlu0 %9041 }
 0xd84   :  { %v9044_v2 = vunpack.i.h.bf16 %v9042_v1  ;;  %v9043_v9 = vunpack.i.l.bf16 %v9042_v1 }
 0xd86   :  { %v5498_v54 = vsel %vm1270_vm3, %v14227_v42, %v9044_v2  ;;  %v5497_v34 = vsel %vm1270_vm3, %v14228_v6, %v9043_v9 }
 0xda4   :  { %v9037_v56 = vpop.permute.xlu1 %9036 }
 0xda5   :  { %v9039_v33 = vunpack.i.h.bf16 %v9037_v56  ;;  %v9038_v5 = vunpack.i.l.bf16 %v9037_v56 }
 0xda7   :  { %v5546_v49 = vpack.c.bf16 %v9039_v33, %v9038_v5  ;;  %v5529_v3 = vsel %vm5526_vm10, %v5512_v27, %v9038_v5  ;;  %v5530_v11 = vsel %vm5526_vm10, %v5513_v21, %v9039_v33 }
 0xda8   :  { %v9047_v32 = vpop.permute.xlu1 %9046  ;;  %v5545_v50 = vpack.c.bf16 %v5530_v11, %v5529_v3  ;;  %v9052_v0 = vpop.permute.xlu0 %9051  ;;  %v14234_v11 = vld [vmem:[#allocation68_spill] sm:$0xff] }
 0xda9   :  { %v9049_v47 = vunpack.i.h.bf16 %v9047_v32  ;;  %v9048_v16 = vunpack.i.l.bf16 %v9047_v32  ;;  %8194 = vmatprep.mubr.msk.bf16.mxu0 %vm5689_vm11, %v5546_v49  ;;  %v9054_v10 = vunpack.i.h.bf16 %v9052_v0  ;;  %v9053_v39 = vunpack.i.l.bf16 %v9052_v0  ;;  %v14233_v49 = vld [vmem:[#allocation67_spill] sm:$0xff] }
 0xdaa   :  { %5764 = vmatmul.mubr.bf16.gmra.mrb[132].mxu0 %v5545_v50 }
 0xdab   :  { %v5515_v23 = vsel %vm5509_vm9, %v5498_v54, %v9049_v47  ;;  %v5514_v58 = vsel %vm5509_vm9, %v5497_v34, %v9048_v16  ;;  %v5548_v51 = vpack.c.bf16 %v9054_v10, %v9053_v39 }
 0xdac   :  { %v9057_v19 = vpop.permute.xlu1 %9056  ;;  %v5531_v62 = vsel %vm5526_vm10, %v5514_v58, %v9053_v39  ;;  %v5532_v13 = vsel %vm5526_vm10, %v5515_v23, %v9054_v10  ;;  %v9062_v41 = vpop.permute.xlu0 %9061 }
 0xdad   :  { %v9059_v22 = vunpack.i.h.bf16 %v9057_v19  ;;  %v9058_v20 = vunpack.i.l.bf16 %v9057_v19  ;;  %v5547_v26 = vpack.c.bf16 %v5532_v13, %v5531_v62  ;;  %8195 = vmatprep.mubr.msk.bf16.mxu0 %vm5689_vm11, %v5548_v51  ;;  %v9063_v15 = vunpack.i.l.bf16 %v9062_v41 }
 0xdae   :  { %v9064_v36 = vunpack.i.h.bf16 %v9062_v41  ;;  %v14235_v41 = vld [vmem:[#allocation70_spill] sm:$0xff] }
 0xdaf   :  { %v5499_v4 = vsel %vm1270_vm3, %v14229_v31, %v9058_v20  ;;  %v5500_v35 = vsel %vm1270_vm3, %v14230_v48, %v9059_v22  ;;  %v14236_v20 = vld [vmem:[#allocation69_spill] sm:$0xff] }
 0xdb0   :  { %v9072_v28 = vpop.permute.xlu0 %9071  ;;  %v9067_v60 = vpop.permute.xlu1 %9066  ;;  %v5516_v63 = vsel %vm5509_vm9, %v5499_v4, %v9063_v15  ;;  %v5517_v24 = vsel %vm5509_vm9, %v5500_v35, %v9064_v36 }
 0xdb1   :  { %v9069_v44 = vunpack.i.h.bf16 %v9067_v60  ;;  %v9068_v61 = vunpack.i.l.bf16 %v9067_v60  ;;  %v9074_v53 = vunpack.i.h.bf16 %v9072_v28  ;;  %v9073_v7 = vunpack.i.l.bf16 %v9072_v28 }
 0xdb2   :  { %5774 = vmatmul.mubr.bf16.gmra.mrb[136].mxu0 %v5547_v26 }
 0xdb3   :  { %v5550_v18 = vpack.c.bf16 %v9069_v44, %v9068_v61  ;;  %v5533_v55 = vsel %vm5526_vm10, %v5516_v63, %v9068_v61  ;;  %v5534_v25 = vsel %vm5526_vm10, %v5517_v24, %v9069_v44  ;;  %v5502_v30 = vsel %vm1270_vm3, %v14231_v59, %v9074_v53 }
 0xdb4   :  { %v9082_v14 = vpop.permute.xlu0 %9081  ;;  %v9077_v12 = vpop.permute.xlu1 %9076  ;;  %v5501_v45 = vsel %vm1270_vm3, %v14232_v46, %v9073_v7  ;;  %v5549_v37 = vpack.c.bf16 %v5534_v25, %v5533_v55  ;;  %v14237_v55 = vld [vmem:[#allocation72_spill] sm:$0xff] }
 0xdb5   :  { %v9084_v8 = vunpack.i.h.bf16 %v9082_v14  ;;  %v9083_v57 = vunpack.i.l.bf16 %v9082_v14  ;;  %v9079_v29 = vunpack.i.h.bf16 %v9077_v12  ;;  %v9078_v40 = vunpack.i.l.bf16 %v9077_v12  ;;  %8196 = vmatprep.mubr.msk.bf16.mxu0 %vm5689_vm11, %v5550_v18  ;;  %v14238_v12 = vld [vmem:[#allocation71_spill] sm:$0xff] }
 0xdb7   :  { %v5519_v1 = vsel %vm5509_vm9, %v5502_v30, %v9079_v29  ;;  %v5518_v56 = vsel %vm5509_vm9, %v5501_v45, %v9078_v40  ;;  %v5552_v52 = vpack.c.bf16 %v9084_v8, %v9083_v57 }
 0xdb8   :  { %v9092_v43 = vpop.permute.xlu0 %9091  ;;  %v9087_v38 = vpop.permute.xlu1 %9086  ;;  %v5535_v17 = vsel %vm5526_vm10, %v5518_v56, %v9083_v57  ;;  %v5536_v33 = vsel %vm5526_vm10, %v5519_v1, %v9084_v8  ;;  %v14239_v1 = vld [vmem:[#allocation16_spill] sm:$0xff] }
 0xdb9   :  { %v9089_v5 = vunpack.i.h.bf16 %v9087_v38  ;;  %v9088_v27 = vunpack.i.l.bf16 %v9087_v38  ;;  %v9093_v21 = vunpack.i.l.bf16 %v9092_v43  ;;  %v5551_v2 = vpack.c.bf16 %v5536_v33, %v5535_v17 }
 0xdba   :  { %5784 = vmatmul.mubr.bf16.gmra.mrb[140].mxu0 %v5549_v37  ;;  %v9094_v9 = vunpack.i.h.bf16 %v9092_v43  ;;  %v5579_v37 = vld [vmem:[%s13939_s7] sm:$0x3] }
 0xdbb   :  { %8197 = vmatprep.mubr.msk.bf16.mxu0 %vm5689_vm11, %v5552_v52  ;;  %v5503_v3 = vsel %vm1270_vm3, %v14233_v49, %v9088_v27  ;;  %v5504_v32 = vsel %vm1270_vm3, %v14234_v11, %v9089_v5  ;;  %v12637_v56 = vrot.slane %v5579_v37, %v14239_v1  ;;  %v14240_v52 = vld [vmem:[#allocation15_spill] sm:$0xff] }
 0xdbc   :  { %v9097_v50 = vpop.permute.xlu1 %9096  ;;  %v5520_v16 = vsel %vm5509_vm9, %v5503_v3, %v9093_v21  ;;  %v5521_v42 = vsel %vm5509_vm9, %v5504_v32, %v9094_v9  ;;  %v9102_v39 = vpop.permute.xlu0 %9101  ;;  %v12640_v43 = vrot.slane %v5579_v37, %v14240_v52  ;;  %v9765_v9 = vld [vmem:[%s13932_s0 + $0x8] sm:$0xff]  ;;  %v9766_v11 = vld [vmem:[%s13932_s0] sm:$0xff] }
 0xdbd   :  { %v9099_v0 = vunpack.i.h.bf16 %v9097_v50  ;;  %v9098_v47 = vunpack.i.l.bf16 %v9097_v50  ;;  %v9104_v58 = vunpack.i.h.bf16 %v9102_v39  ;;  %v9103_v51 = vunpack.i.l.bf16 %v9102_v39  ;;  %v9767_v50 = vld [vmem:[%s13932_s0 + $0x18] sm:$0xff] }
 0xdbf   :  { %v5537_v54 = vsel %vm5526_vm10, %v5520_v16, %v9098_v47  ;;  %v5554_v6 = vpack.c.bf16 %v9099_v0, %v9098_v47  ;;  %v5538_v34 = vsel %vm5526_vm10, %v5521_v42, %v9099_v0  ;;  %v5506_v22 = vsel %vm1270_vm3, %v14235_v41, %v9104_v58  ;;  %v9768_v16 = vld [vmem:[%s13932_s0 + $0x10] sm:$0xff] }
 0xdc0   :  { %v5553_v10 = vpack.c.bf16 %v5538_v34, %v5537_v54  ;;  %v9107_v23 = vpop.permute.xlu1 %9106  ;;  %v5505_v26 = vsel %vm1270_vm3, %v14236_v20, %v9103_v51 }
 0xdc1   :  { %v9109_v19 = vunpack.i.h.bf16 %v9107_v23  ;;  %v9108_v62 = vunpack.i.l.bf16 %v9107_v23 }
 0xdc2   :  { %5794 = vmatmul.mubr.bf16.gmra.mrb[144].mxu0 %v5551_v2 }
 0xdc3   :  { %8198 = vmatprep.mubr.msk.bf16.mxu0 %vm5689_vm11, %v5554_v6  ;;  %v5523_v31 = vsel %vm5509_vm9, %v5506_v22, %v9109_v19  ;;  %v5522_v4 = vsel %vm5509_vm9, %v5505_v26, %v9108_v62  ;;  %v9769_v62 = vld [vmem:[%s13932_s0 + $0x28] sm:$0xff]  ;;  %v9770_v22 = vld [vmem:[%s13932_s0 + $0x20] sm:$0xff] }
 0xdc4   :  { %v9117_v44 = vpop.permute.xlu1 %9116 }
 0xdc5   :  { %v9119_v53 = vunpack.i.h.bf16 %v9117_v44  ;;  %v9118_v7 = vunpack.i.l.bf16 %v9117_v44 }
 0xdc7   :  { %v5508_v14 = vsel %vm1270_vm3, %v14237_v55, %v9119_v53  ;;  %v5507_v25 = vsel %vm1270_vm3, %v14238_v12, %v9118_v7  ;;  %v9773_v55 = vld [vmem:[%s13932_s0 + $0x48] sm:$0xff] }
 0xdca   :  { %5804 = vmatmul.mubr.bf16.gmra.mrb[148].mxu0 %v5553_v10 }
 0xde5   :  { %v9112_v13 = vpop.permute.xlu0 %9111 }
 0xde6   :  { %v9114_v15 = vunpack.i.h.bf16 %v9112_v13  ;;  %v9113_v36 = vunpack.i.l.bf16 %v9112_v13 }
 0xde8   :  { %v5556_v48 = vpack.c.bf16 %v9114_v15, %v9113_v36  ;;  %v5539_v35 = vsel %vm5526_vm10, %v5522_v4, %v9113_v36  ;;  %v5540_v28 = vsel %vm5526_vm10, %v5523_v31, %v9114_v15  ;;  %v9771_v15 = vld [vmem:[%s13932_s0 + $0x38] sm:$0xff] }
 0xde9   :  { %v5555_v60 = vpack.c.bf16 %v5540_v28, %v5539_v35  ;;  %v9122_v61 = vpop.permute.xlu0 %9121  ;;  %v9772_v28 = vld [vmem:[%s13932_s0 + $0x30] sm:$0xff] }
 0xdea   :  { %8199 = vmatprep.mubr.msk.bf16.mxu0 %vm5689_vm11, %v5556_v48  ;;  %v9124_v63 = vunpack.i.h.bf16 %v9122_v61  ;;  %v9123_v18 = vunpack.i.l.bf16 %v9122_v61 }
 0xdeb   :  { %5814 = vmatmul.mubr.bf16.gmra.mrb[152].mxu0 %v5555_v60 }
 0xdec   :  { %v5524_v29 = vsel %vm5509_vm9, %v5507_v25, %v9123_v18  ;;  %v5525_v40 = vsel %vm5509_vm9, %v5508_v14, %v9124_v63  ;;  %v9774_v25 = vld [vmem:[%s13932_s0 + $0x40] sm:$0xff] }
 0xdf1   :  { %v9127_v24 = vpop.permute.xlu1 %9126 }
 0xdf2   :  { %v9129_v8 = vunpack.i.h.bf16 %v9127_v24  ;;  %v9128_v57 = vunpack.i.l.bf16 %v9127_v24 }
 0xdf4   :  { %v5558_v59 = vpack.c.bf16 %v9129_v8, %v9128_v57  ;;  %v5541_v30 = vsel %vm5526_vm10, %v5524_v29, %v9128_v57  ;;  %v5542_v46 = vsel %vm5526_vm10, %v5525_v40, %v9129_v8  ;;  %v9775_v57 = vld [vmem:[%s13932_s0 + $0x58] sm:$0xff] }
 0xdf5   :  { %v5557_v45 = vpack.c.bf16 %v5542_v46, %v5541_v30 }
 0xdf6   :  { %8200 = vmatprep.mubr.msk.bf16.mxu0 %vm5689_vm11, %v5558_v59  ;;  %v9776_v59 = vld [vmem:[%s13932_s0 + $0x50] sm:$0xff] }
 0xdf7   :  { %5824 = vmatmul.mubr.bf16.gmra.mrb[156].mxu0 %v5557_v45 }
 0xe54   :  { %v5755_v38 = vpop.f32.mrb[128].mxu0 }
 0xe55   :  { %v5756_v17 = vadd.f32 %v5755_v38, %v12637_v56  ;;  %v5757_v33 = vpop.f32.mrb[129].mxu0 }
 0xe56   :  { %v5758_v5 = vadd.f32 %v5757_v33, %v12640_v43  ;;  %v5759_v27 = vpop.f32.mrb[130].mxu0 }
 0xe57   :  { %v5760_v21 = vadd.f32 %v5759_v27, %v12637_v56  ;;  %v5761_v2 = vpop.f32.mrb[131].mxu0  ;;  %v12654_v32 = vadd.f32 %v9766_v11, %v5756_v17 }
 0xe58   :  { %v12648_v49 = vadd.f32 %v9765_v9, %v5758_v5  ;;  %v5762_v3 = vadd.f32 %v5761_v2, %v12640_v43  ;;  %v9777_v9 = vld [vmem:[%s13932_s0 + $0x68] sm:$0xff] }
 0xe59   :  { %v12666_v42 = vadd.f32 %v9768_v16, %v5760_v21  ;;  %v9779_v16 = vld [vmem:[%s13932_s0 + $0x78] sm:$0xff] }
 0xe5a   :  { %v12659_v0 = vadd.f32 %v9767_v50, %v5762_v3  ;;  %v5868_v47 = vsel %vm111_vm0, %v12648_v49, 0.0  ;;  %v9778_v50 = vld [vmem:[%s13932_s0 + $0x60] sm:$0xff] }
 0xe5b   :  { %v5869_v54 = vadd.f32 %v5868_v47, %v12654_v32 }
 0xe5c   :  { %v5872_v6 = vsel %vm111_vm0, %v12659_v0, 0.0 }
 0xe5d   :  { %5870 = vadd.xlane.f32.xlu0 %v5869_v54  ;;  %v5873_v34 = vadd.f32 %v5872_v6, %v12666_v42 }
 0xe5f   :  { %5874 = vadd.xlane.f32.xlu1 %v5873_v34  ;;  %v9780_v34 = vld [vmem:[%s13932_s0 + $0x70] sm:$0xff] }
 0xe7d   :  { %v5765_v10 = vpop.f32.mrb[132].mxu0 }
 0xe7e   :  { %v5766_v39 = vadd.f32 %v5765_v10, %v12637_v56  ;;  %v5767_v23 = vpop.f32.mrb[133].mxu0 }
 0xe7f   :  { %v5768_v58 = vadd.f32 %v5767_v23, %v12640_v43  ;;  %v5769_v51 = vpop.f32.mrb[134].mxu0 }
 0xe80   :  { %v5771_v19 = vpop.f32.mrb[135].mxu0  ;;  %v12683_v20 = vadd.f32 %v9770_v22, %v5766_v39  ;;  %v5770_v26 = vadd.f32 %v5769_v51, %v12637_v56 }
 0xe81   :  { %v12677_v13 = vadd.f32 %v9769_v62, %v5768_v58  ;;  %v5772_v41 = vadd.f32 %v5771_v19, %v12640_v43 }
 0xe82   :  { %v12699_v60 = vadd.f32 %v9772_v28, %v5770_v26 }
 0xe83   :  { %v12689_v36 = vadd.f32 %v9771_v15, %v5772_v41  ;;  %v5876_v31 = vsel %vm111_vm0, %v12677_v13, 0.0 }
 0xe84   :  { %v5877_v4 = vadd.f32 %v5876_v31, %v12683_v20  ;;  %v9781_v31 = vld [vmem:[%s13932_s0 + $0x88] sm:$0xff] }
 0xe85   :  { %v5775_v48 = vpop.f32.mrb[136].mxu0  ;;  %v5880_v35 = vsel %vm111_vm0, %v12689_v36, 0.0 }
 0xe86   :  { %v5776_v44 = vadd.f32 %v5775_v48, %v12637_v56  ;;  %v5777_v61 = vpop.f32.mrb[137].mxu0  ;;  %5878 = vadd.xlane.f32.xlu0 %v5877_v4  ;;  %v5881_v24 = vadd.f32 %v5880_v35, %v12699_v60  ;;  %v9782_v35 = vld [vmem:[%s13932_s0 + $0x80] sm:$0xff] }
 0xe87   :  { %v5778_v53 = vadd.f32 %v5777_v61, %v12640_v43  ;;  %v5779_v7 = vpop.f32.mrb[138].mxu0 }
 0xe88   :  { %v5780_v63 = vadd.f32 %v5779_v7, %v12637_v56  ;;  %v5781_v18 = vpop.f32.mrb[139].mxu0  ;;  %v12714_v8 = vadd.f32 %v9774_v25, %v5776_v44  ;;  %v9783_v44 = vld [vmem:[%s13932_s0 + $0x98] sm:$0xff]  ;;  %v9784_v7 = vld [vmem:[%s13932_s0 + $0x90] sm:$0xff] }
 0xe89   :  { %v12708_v14 = vadd.f32 %v9773_v55, %v5778_v53  ;;  %v5782_v12 = vadd.f32 %v5781_v18, %v12640_v43 }
 0xe8a   :  { %5882 = vadd.xlane.f32.xlu0 %v5881_v24  ;;  %v12726_v30 = vadd.f32 %v9776_v59, %v5780_v63 }
 0xe8b   :  { %v12719_v29 = vadd.f32 %v9775_v57, %v5782_v12  ;;  %v5884_v40 = vsel %vm111_vm0, %v12708_v14, 0.0 }
 0xe8c   :  { %v5885_v46 = vadd.f32 %v5884_v40, %v12714_v8 }
 0xe8d   :  { %v5785_v45 = vpop.f32.mrb[140].mxu0  ;;  %v5888_v37 = vsel %vm111_vm0, %v12719_v29, 0.0 }
 0xe8e   :  { %v5786_v38 = vadd.f32 %v5785_v45, %v12637_v56  ;;  %5886 = vadd.xlane.f32.xlu0 %v5885_v46  ;;  %v5787_v17 = vpop.f32.mrb[141].mxu0  ;;  %v5889_v33 = vadd.f32 %v5888_v37, %v12726_v30  ;;  %v9785_v37 = vld [vmem:[%s13932_s0 + $0xa8] sm:$0xff] }
 0xe8f   :  { %v5788_v5 = vadd.f32 %v5787_v17, %v12640_v43  ;;  %v5789_v27 = vpop.f32.mrb[142].mxu0 }
 0xe90   :  { %v5790_v21 = vadd.f32 %v5789_v27, %v12637_v56  ;;  %v5791_v2 = vpop.f32.mrb[143].mxu0  ;;  %5890 = vadd.xlane.f32.xlu1 %v5889_v33  ;;  %v12744_v47 = vadd.f32 %v9778_v50, %v5786_v38  ;;  %v9786_v33 = vld [vmem:[%s13932_s0 + $0xa0] sm:$0xff]  ;;  %v9787_v27 = vld [vmem:[%s13932_s0 + $0xb8] sm:$0xff] }
 0xe91   :  { %v12738_v3 = vadd.f32 %v9777_v9, %v5788_v5  ;;  %v5792_v11 = vadd.f32 %v5791_v2, %v12640_v43  ;;  %v9788_v9 = vld [vmem:[%s13932_s0 + $0xb0] sm:$0xff] }
 0xe92   :  { %14242 = vst [vmem:[#allocation13_spill] sm:$0xff] %v12744_v47  ;;  %v12756_v10 = vadd.f32 %v9780_v34, %v5790_v21 }
 0xe93   :  { %14241 = vst [vmem:[#allocation18_spill] sm:$0xff] %v12738_v3  ;;  %v12749_v54 = vadd.f32 %v9779_v16, %v5792_v11  ;;  %v5892_v6 = vsel %vm111_vm0, %v12738_v3, 0.0 }
 0xe94   :  { %14244 = vst [vmem:[#allocation38_spill] sm:$0xff] %v12756_v10  ;;  %v5893_v39 = vadd.f32 %v5892_v6, %v12744_v47 }
 0xe95   :  { %14243 = vst [vmem:[#allocation22_spill] sm:$0xff] %v12749_v54  ;;  %v5795_v23 = vpop.f32.mrb[144].mxu0  ;;  %v5896_v58 = vsel %vm111_vm0, %v12749_v54, 0.0 }
 0xe96   :  { %v5796_v51 = vadd.f32 %v5795_v23, %v12637_v56  ;;  %v5797_v19 = vpop.f32.mrb[145].mxu0  ;;  %5894 = vadd.xlane.f32.xlu0 %v5893_v39  ;;  %v5897_v62 = vadd.f32 %v5896_v58, %v12756_v10 }
 0xe97   :  { %v5798_v41 = vadd.f32 %v5797_v19, %v12640_v43  ;;  %v5799_v22 = vpop.f32.mrb[146].mxu0 }
 0xe98   :  { %v5800_v26 = vadd.f32 %v5799_v22, %v12637_v56  ;;  %v5801_v15 = vpop.f32.mrb[147].mxu0  ;;  %5898 = vadd.xlane.f32.xlu1 %v5897_v62  ;;  %v12774_v28 = vadd.f32 %v9782_v35, %v5796_v51 }
 0xe99   :  { %v12768_v4 = vadd.f32 %v9781_v31, %v5798_v41  ;;  %v5802_v48 = vadd.f32 %v5801_v15, %v12640_v43  ;;  %v9789_v41 = vld [vmem:[%s13932_s0 + $0xc8] sm:$0xff]  ;;  %v9790_v15 = vld [vmem:[%s13932_s0 + $0xc0] sm:$0xff] }
 0xe9a   :  { %14246 = vst [vmem:[#allocation23_spill] sm:$0xff] %v12774_v28  ;;  %v12786_v63 = vadd.f32 %v9784_v7, %v5800_v26 }
 0xe9b   :  { %14245 = vst [vmem:[#allocation37_spill] sm:$0xff] %v12768_v4  ;;  %v12779_v61 = vadd.f32 %v9783_v44, %v5802_v48  ;;  %v5900_v53 = vsel %vm111_vm0, %v12768_v4, 0.0  ;;  %v9791_v48 = vld [vmem:[%s13932_s0 + $0xd8] sm:$0xff] }
 0xe9c   :  { %14248 = vst [vmem:[#allocation40_spill] sm:$0xff] %v12786_v63  ;;  %v5901_v18 = vadd.f32 %v5900_v53, %v12774_v28  ;;  %v9792_v53 = vld [vmem:[%s13932_s0 + $0xd0] sm:$0xff] }
 0xe9d   :  { %14247 = vst [vmem:[#allocation20_spill] sm:$0xff] %v12779_v61  ;;  %v5805_v24 = vpop.f32.mrb[148].mxu0  ;;  %v5904_v55 = vsel %vm111_vm0, %v12779_v61, 0.0 }
 0xe9e   :  { %v5806_v12 = vadd.f32 %v5805_v24, %v12637_v56  ;;  %5902 = vadd.xlane.f32.xlu0 %v5901_v18  ;;  %v5807_v25 = vpop.f32.mrb[149].mxu0  ;;  %v5905_v57 = vadd.f32 %v5904_v55, %v12786_v63 }
 0xe9f   :  { %v5808_v40 = vadd.f32 %v5807_v25, %v12640_v43  ;;  %v5809_v59 = vpop.f32.mrb[150].mxu0 }
 0xea0   :  { %v5810_v46 = vadd.f32 %v5809_v59, %v12637_v56  ;;  %v5811_v45 = vpop.f32.mrb[151].mxu0  ;;  %5906 = vadd.xlane.f32.xlu1 %v5905_v57  ;;  %v12804_v5 = vadd.f32 %v9786_v33, %v5806_v12 }
 0xea1   :  { %v12798_v38 = vadd.f32 %v9785_v37, %v5808_v40  ;;  %v5812_v17 = vadd.f32 %v5811_v45, %v12640_v43  ;;  %v9793_v37 = vld [vmem:[%s13932_s0 + $0xe8] sm:$0xff] }
 0xea2   :  { %14250 = vst [vmem:[#allocation27_spill] sm:$0xff] %v12804_v5  ;;  %v12816_v11 = vadd.f32 %v9788_v9, %v5810_v46  ;;  %v9795_v9 = vld [vmem:[%s13932_s0 + $0xf8] sm:$0xff] }
 0xea3   :  { %14249 = vst [vmem:[#allocation39_spill] sm:$0xff] %v12798_v38  ;;  %v12809_v21 = vadd.f32 %v9787_v27, %v5812_v17  ;;  %v5908_v2 = vsel %vm111_vm0, %v12798_v38, 0.0  ;;  %v9794_v27 = vld [vmem:[%s13932_s0 + $0xe0] sm:$0xff] }
 0xea4   :  { %14252 = vst [vmem:[#allocation42_spill] sm:$0xff] %v12816_v11  ;;  %v5909_v50 = vadd.f32 %v5908_v2, %v12804_v5 }
 0xea5   :  { %14251 = vst [vmem:[#allocation25_spill] sm:$0xff] %v12809_v21  ;;  %v5912_v16 = vsel %vm111_vm0, %v12809_v21, 0.0 }
 0xea6   :  { %5910 = vadd.xlane.f32.xlu0 %v5909_v50  ;;  %v5913_v6 = vadd.f32 %v5912_v16, %v12816_v11  ;;  %v9796_v16 = vld [vmem:[%s13932_s0 + $0xf0] sm:$0xff] }
 0xea8   :  { %5914 = vadd.xlane.f32.xlu1 %v5913_v6 }
 0xebe   :  { %v5815_v34 = vpop.f32.mrb[152].mxu0 }
 0xebf   :  { %v5816_v39 = vadd.f32 %v5815_v34, %v12637_v56  ;;  %v5817_v23 = vpop.f32.mrb[153].mxu0 }
 0xec0   :  { %v5818_v58 = vadd.f32 %v5817_v23, %v12640_v43  ;;  %v5819_v51 = vpop.f32.mrb[154].mxu0 }
 0xec1   :  { %v5820_v19 = vadd.f32 %v5819_v51, %v12637_v56  ;;  %v5821_v62 = vpop.f32.mrb[155].mxu0  ;;  %v12834_v31 = vadd.f32 %v9790_v15, %v5816_v39 }
 0xec2   :  { %v12828_v22 = vadd.f32 %v9789_v41, %v5818_v58  ;;  %v5822_v26 = vadd.f32 %v5821_v62, %v12640_v43  ;;  %v9252_v62 = vld [vmem:[%s13942_s10 + $0x4] ss:$20 sps:$4 sm:$0xff]   ;;  %v9253_v41 = vld [vmem:[%s13942_s10 + $0x8] ss:$20 sps:$4 sm:$0xff]  }
 0xec3   :  { %14254 = vst [vmem:[#allocation30_spill] sm:$0xff] %v12834_v31  ;;  %v12846_v7 = vadd.f32 %v9792_v53, %v5820_v19  ;;  %v9250_v19 = vld [vmem:[%s13942_s10] ss:$20 sps:$4 sm:$0xff]   ;;  %6639 = vmatprep.subr.bf16.mxu1 %v9252_v62 }
 0xec4   :  { %14253 = vst [vmem:[#allocation41_spill] sm:$0xff] %v12828_v22  ;;  %v12839_v35 = vadd.f32 %v9791_v48, %v5822_v26  ;;  %v5916_v44 = vsel %vm111_vm0, %v12828_v22, 0.0  ;;  %v9258_v53 = vld [vmem:[%s13942_s10 + $0x2c] ss:$20 sps:$4 sm:$0xff]   ;;  %6640 = vmatpush1.bf16.msra.mxu1 %v9250_v19 }
 0xec5   :  { %14256 = vst [vmem:[#allocation44_spill] sm:$0xff] %v12846_v7  ;;  %v5917_v18 = vadd.f32 %v5916_v44, %v12834_v31  ;;  %v9255_v44 = vld [vmem:[%s13942_s10 + $0xc] ss:$20 sps:$4 sm:$0xff]   ;;  %6641 = vmatprep.subr.bf16.mxu1 %v9258_v53  ;;  %v9280_v53 = vld [vmem:[%s13942_s10 + $0xc8] ss:$20 sps:$4 sm:$0xff]  }
 0xec6   :  { %14255 = vst [vmem:[#allocation29_spill] sm:$0xff] %v12839_v35  ;;  %v5920_v24 = vsel %vm111_vm0, %v12839_v35, 0.0  ;;  %6752 = vmatprep.subr.bf16.mxu0 %v9255_v44  ;;  %v9279_v19 = vld [vmem:[%s13942_s10 + $0xac] ss:$20 sps:$4 sm:$0xff]   ;;  %v9285_v44 = vld [vmem:[%s13942_s10 + $0xd4] ss:$20 sps:$4 sm:$0xff]  }
 0xec7   :  { %5918 = vadd.xlane.f32.xlu0 %v5917_v18  ;;  %v5921_v55 = vadd.f32 %v5920_v24, %v12846_v7  ;;  %v9261_v18 = vld [vmem:[%s13942_s10 + $0x34] ss:$20 sps:$4 sm:$0xff]   ;;  %6753 = vmatpush1.bf16.msra.mxu0 %v9253_v41 }
 0xec8   :  { %6754 = vmatprep.subr.bf16.mxu0 %v9261_v18  ;;  %v9274_v62 = vld [vmem:[%s13942_s10 + $0xa0] ss:$20 sps:$4 sm:$0xff]   ;;  %v9277_v41 = vld [vmem:[%s13942_s10 + $0xa8] ss:$20 sps:$4 sm:$0xff]   ;;  %v9283_v18 = vld [vmem:[%s13942_s10 + $0xd0] ss:$20 sps:$4 sm:$0xff]  }
 0xec9   :  { %5922 = vadd.xlane.f32.xlu1 %v5921_v55 }
 0xeca   :  { %v5825_v12 = vpop.f32.mrb[156].mxu0 }
 0xecb   :  { %v5826_v25 = vadd.f32 %v5825_v12, %v12637_v56  ;;  %v5827_v57 = vpop.f32.mrb[157].mxu0 }
 0xecc   :  { %v5828_v40 = vadd.f32 %v5827_v57, %v12640_v43  ;;  %v5829_v59 = vpop.f32.mrb[158].mxu0  ;;  %v9256_v57 = vld [vmem:[%s13942_s10 + $0x28] ss:$20 sps:$4 sm:$0xff]  }
 0xecd   :  { %v5830_v46 = vadd.f32 %v5829_v59, %v12637_v56  ;;  %v5831_v45 = vpop.f32.mrb[159].mxu0  ;;  %v12864_v2 = vadd.f32 %v9794_v27, %v5826_v25  ;;  %v9267_v27 = vld [vmem:[%s13942_s10 + $0x5c] ss:$20 sps:$4 sm:$0xff]   ;;  %6642 = vmatpush1.bf16.msra.mxu1 %v9256_v57 }
 0xece   :  { %v12858_v17 = vadd.f32 %v9793_v37, %v5828_v40  ;;  %v5832_v33 = vadd.f32 %v5831_v45, %v12640_v43  ;;  %v9259_v45 = vld [vmem:[%s13942_s10 + $0x30] ss:$20 sps:$4 sm:$0xff]   ;;  %v9264_v37 = vld [vmem:[%s13942_s10 + $0x54] ss:$20 sps:$4 sm:$0xff]  }
 0xecf   :  { %14258 = vst [vmem:[#allocation32_spill] sm:$0xff] %v12864_v2  ;;  %v12876_v43 = vadd.f32 %v9796_v16, %v5830_v46  ;;  %v9262_v16 = vld [vmem:[%s13942_s10 + $0x50] ss:$20 sps:$4 sm:$0xff]   ;;  %6755 = vmatpush1.bf16.msra.mxu0 %v9259_v45  ;;  %6643 = vmatprep.subr.bf16.mxu1 %v9264_v37  ;;  %v9292_v37 = vld [vmem:[%s13942_s10 + $0x118] ss:$20 sps:$4 sm:$0xff]  }
 0xed0   :  { %14257 = vst [vmem:[#allocation43_spill] sm:$0xff] %v12858_v17  ;;  %v12869_v56 = vadd.f32 %v9795_v9, %v5832_v33  ;;  %v5924_v50 = vsel %vm111_vm0, %v12858_v17, 0.0  ;;  %6756 = vmatprep.subr.bf16.mxu0 %v9267_v27  ;;  %v9294_v45 = vld [vmem:[%s13942_s10 + $0x11c] ss:$20 sps:$4 sm:$0xff]   ;;  %v9297_v27 = vld [vmem:[%s13942_s10 + $0x124] ss:$20 sps:$4 sm:$0xff]  }
 0xed1   :  { %14260 = vst [vmem:[#allocation46_spill] sm:$0xff] %v12876_v43  ;;  %v5925_v6 = vadd.f32 %v5924_v50, %v12864_v2  ;;  %6644 = vmatpush1.bf16.msra.mxu1 %v9262_v16  ;;  %v9300_v16 = vld [vmem:[%s13942_s10 + $0x144] ss:$20 sps:$4 sm:$0xff]  }
 0xed2   :  { %14259 = vst [vmem:[#allocation31_spill] sm:$0xff] %v12869_v56  ;;  %v5928_v34 = vsel %vm111_vm0, %v12869_v56, 0.0 }
 0xed3   :  { %5926 = vadd.xlane.f32.xlu0 %v5925_v6  ;;  %v5929_v39 = vadd.f32 %v5928_v34, %v12876_v43  ;;  %v9265_v6 = vld [vmem:[%s13942_s10 + $0x58] ss:$20 sps:$4 sm:$0xff]   ;;  %v9270_v34 = vld [vmem:[%s13942_s10 + $0x7c] ss:$20 sps:$4 sm:$0xff]  }
 0xed4   :  { %6757 = vmatpush1.bf16.msra.mxu0 %v9265_v6  ;;  %6645 = vmatprep.subr.bf16.mxu1 %v9270_v34  ;;  %v9303_v6 = vld [vmem:[%s13942_s10 + $0x14c] ss:$20 sps:$4 sm:$0xff]  }
 0xed5   :  { %5930 = vadd.xlane.f32.xlu1 %v5929_v39  ;;  %v9273_v39 = vld [vmem:[%s13942_s10 + $0x84] ss:$20 sps:$4 sm:$0xff]  }
 0xed6   :  { %6758 = vmatprep.subr.bf16.mxu0 %v9273_v39 }
 0xeea   :  { %v5871_v23 = vpop.xlane.xlu0 %5870 }
 0xeeb   :  { %v5932_v58 = vmul.f32 0.006329114, %v5871_v23  ;;  %v9268_v23 = vld [vmem:[%s13942_s10 + $0x78] ss:$20 sps:$4 sm:$0xff]  }
 0xeec   :  { %v5875_v51 = vpop.xlane.xlu1 %5874  ;;  %6646 = vmatpush1.bf16.msra.mxu1 %v9268_v23 }
 0xeed   :  { %v12892_v26 = vsub.f32 %v12654_v32, %v5932_v58  ;;  %v12895_v15 = vsub.f32 %v12648_v49, %v5932_v58  ;;  %v5933_v48 = vmul.f32 0.006329114, %v5875_v51  ;;  %v9271_v58 = vld [vmem:[%s13942_s10 + $0x80] ss:$20 sps:$4 sm:$0xff]   ;;  %v9276_v51 = vld [vmem:[%s13942_s10 + $0xa4] ss:$20 sps:$4 sm:$0xff]  }
 0xeee   :  { %6759 = vmatpush1.bf16.msra.mxu0 %v9271_v58  ;;  %6647 = vmatprep.subr.bf16.mxu1 %v9276_v51  ;;  %v9298_v51 = vld [vmem:[%s13942_s10 + $0x140] ss:$20 sps:$4 sm:$0xff]  }
 0xeef   :  { %v5980_v24 = vmul.f32 %v12892_v26, %v12892_v26  ;;  %v5981_v55 = vmul.f32 %v12895_v15, %v12895_v15  ;;  %v12911_v12 = vsub.f32 %v12666_v42, %v5933_v48  ;;  %v12914_v25 = vsub.f32 %v12659_v0, %v5933_v48  ;;  %6760 = vmatprep.subr.bf16.mxu0 %v9279_v19  ;;  %v9282_v48 = vld [vmem:[%s13942_s10 + $0xcc] ss:$20 sps:$4 sm:$0xff]   ;;  %v9308_v19 = vld [vmem:[%s13942_s10 + $0x168] ss:$20 sps:$4 sm:$0x7f]  }
 0xef0   :  { %6648 = vmatpush1.bf16.msra.mxu1 %v9274_v62 }
 0xef1   :  { %v5982_v40 = vmul.f32 %v12911_v12, %v12911_v12  ;;  %v5983_v59 = vmul.f32 %v12914_v25, %v12914_v25  ;;  %v6012_v46 = vsel %vm111_vm0, %v5981_v55, 0.0  ;;  %6649 = vmatprep.subr.bf16.mxu1 %v9282_v48  ;;  %v9291_v55 = vld [vmem:[%s13942_s10 + $0xfc] ss:$20 sps:$4 sm:$0xff]  }
 0xef2   :  { %v6013_v33 = vadd.f32 %v6012_v46, %v5980_v24  ;;  %6761 = vmatpush1.bf16.msra.mxu0 %v9277_v41  ;;  %v9288_v24 = vld [vmem:[%s13942_s10 + $0xf4] ss:$20 sps:$4 sm:$0xff]  }
 0xef3   :  { %v6016_v9 = vsel %vm111_vm0, %v5983_v59, 0.0  ;;  %6762 = vmatprep.subr.bf16.mxu0 %v9285_v44  ;;  %v9289_v59 = vld [vmem:[%s13942_s10 + $0xf8] ss:$20 sps:$4 sm:$0xff]   ;;  %v9301_v44 = vld [vmem:[%s13942_s10 + $0x148] ss:$20 sps:$4 sm:$0xff]  }
 0xef4   :  { %6014 = vadd.xlane.f32.xlu0 %v6013_v33  ;;  %v6017_v50 = vadd.f32 %v6016_v9, %v5982_v40  ;;  %6650 = vmatpush1.bf16.msra.mxu1 %v9280_v53  ;;  %v9286_v40 = vld [vmem:[%s13942_s10 + $0xf0] ss:$20 sps:$4 sm:$0xff]   ;;  %v9295_v33 = vld [vmem:[%s13942_s10 + $0x120] ss:$20 sps:$4 sm:$0xff]  }
 0xef5   :  { %6651 = vmatprep.subr.bf16.mxu1 %v9288_v24  ;;  %v9304_v53 = vld [vmem:[%s13942_s10 + $0x16c] ss:$20 sps:$4 sm:$0x7f]  }
 0xef6   :  { %6018 = vadd.xlane.f32.xlu1 %v6017_v50  ;;  %6763 = vmatpush1.bf16.msra.mxu0 %v9283_v18 }
 0xef7   :  { %6764 = vmatprep.subr.bf16.mxu0 %v9291_v55  ;;  %v9306_v55 = vld [vmem:[%s13942_s10 + $0x174] ss:$20 sps:$4 sm:$0x7f]  }
 0xef8   :  { %6652 = vmatpush1.bf16.msra.mxu1 %v9286_v40 }
 0xef9   :  { %6653 = vmatprep.subr.bf16.mxu1 %v9294_v45 }
 0xefa   :  { %6765 = vmatpush1.bf16.msra.mxu0 %v9289_v59 }
 0xefb   :  { %6766 = vmatprep.subr.bf16.mxu0 %v9297_v27 }
 0xefc   :  { %6654 = vmatpush1.bf16.msra.mxu1 %v9292_v37  ;;  %v6625_v37 = vsel %vm645_vm1, %v9308_v19, 0 }
 0xefd   :  { %6655 = vmatprep.subr.bf16.mxu1 %v9300_v16 }
 0xefe   :  { %6767 = vmatpush1.bf16.msra.mxu0 %v9295_v33 }
 0xeff   :  { %6768 = vmatprep.subr.bf16.mxu0 %v9303_v6 }
 0xf00   :  { %6656 = vmatpush1.bf16.msra.mxu1 %v9298_v51 }
 0xf01   :  { %8251 = vmatprep.subr.msk.bf16.mxu1 %vm645_vm1, %v9304_v53 }
 0xf02   :  { %6769 = vmatpush1.bf16.msra.mxu0 %v9301_v44 }
 0xf03   :  { %8260 = vmatprep.subr.msk.bf16.mxu0 %vm645_vm1, %v9306_v55 }
 0xf04   :  { %6658 = vmatpush1.bf16.msra.mxu1 %v6625_v37 }
 0xf13   :  { %v5879_v57 = vpop.xlane.xlu0 %5878 }
 0xf14   :  { %v5934_v46 = vmul.f32 0.006329114, %v5879_v57  ;;  %v9309_v57 = vld [vmem:[%s13942_s10 + $0x170] ss:$20 sps:$4 sm:$0x7f]  }
 0xf16   :  { %v13001_v9 = vsub.f32 %v12683_v20, %v5934_v46  ;;  %v13004_v50 = vsub.f32 %v12677_v13, %v5934_v46 }
 0xf17   :  { %v5883_v34 = vpop.xlane.xlu0 %5882 }
 0xf18   :  { %v5984_v39 = vmul.f32 %v13001_v9, %v13001_v9  ;;  %v5985_v23 = vmul.f32 %v13004_v50, %v13004_v50  ;;  %v5935_v58 = vmul.f32 0.006329114, %v5883_v34 }
 0xf1a   :  { %v13023_v62 = vsub.f32 %v12699_v60, %v5935_v58  ;;  %v13026_v41 = vsub.f32 %v12689_v36, %v5935_v58  ;;  %v6020_v48 = vsel %vm111_vm0, %v5985_v23, 0.0 }
 0xf1b   :  { %v5887_v18 = vpop.xlane.xlu0 %5886  ;;  %v6021_v24 = vadd.f32 %v6020_v48, %v5984_v39  ;;  %v6631_v39 = vsel %vm645_vm1, %v9309_v57, 0 }
 0xf1c   :  { %v5986_v40 = vmul.f32 %v13023_v62, %v13023_v62  ;;  %v5987_v59 = vmul.f32 %v13026_v41, %v13026_v41  ;;  %v5936_v46 = vmul.f32 0.006329114, %v5887_v18  ;;  %6771 = vmatpush1.bf16.msra.mxu0 %v6631_v39 }
 0xf1d   :  { %v5891_v45 = vpop.xlane.xlu1 %5890  ;;  %6022 = vadd.xlane.f32.xlu0 %v6021_v24 }
 0xf1e   :  { %v13047_v33 = vsub.f32 %v12714_v8, %v5936_v46  ;;  %v13050_v27 = vsub.f32 %v12708_v14, %v5936_v46  ;;  %v5937_v16 = vmul.f32 0.006329114, %v5891_v45  ;;  %v6024_v6 = vsel %vm111_vm0, %v5987_v59, 0.0 }
 0xf1f   :  { %v6025_v34 = vadd.f32 %v6024_v6, %v5986_v40 }
 0xf20   :  { %v5988_v23 = vmul.f32 %v13047_v33, %v13047_v33  ;;  %v5989_v58 = vmul.f32 %v13050_v27, %v13050_v27  ;;  %v13061_v51 = vsub.f32 %v12726_v30, %v5937_v16  ;;  %v13064_v19 = vsub.f32 %v12719_v29, %v5937_v16 }
 0xf21   :  { %6026 = vadd.xlane.f32.xlu1 %v6025_v34 }
 0xf22   :  { %v5990_v48 = vmul.f32 %v13061_v51, %v13061_v51  ;;  %v5991_v44 = vmul.f32 %v13064_v19, %v13064_v19  ;;  %v6028_v53 = vsel %vm111_vm0, %v5989_v58, 0.0 }
 0xf23   :  { %v5895_v18 = vpop.xlane.xlu0 %5894  ;;  %v6029_v24 = vadd.f32 %v6028_v53, %v5988_v23 }
 0xf24   :  { %v5938_v55 = vmul.f32 0.006329114, %v5895_v18  ;;  %v6032_v57 = vsel %vm111_vm0, %v5991_v44, 0.0 }
 0xf25   :  { %v5899_v40 = vpop.xlane.xlu1 %5898  ;;  %6030 = vadd.xlane.f32.xlu0 %v6029_v24  ;;  %v6033_v59 = vadd.f32 %v6032_v57, %v5990_v48 }
 0xf26   :  { %v13073_v46 = vsub.f32 %v12744_v47, %v5938_v55  ;;  %v13076_v45 = vsub.f32 %v12738_v3, %v5938_v55  ;;  %v5939_v37 = vmul.f32 0.006329114, %v5899_v40 }
 0xf27   :  { %6034 = vadd.xlane.f32.xlu1 %v6033_v59 }
 0xf28   :  { %v5992_v16 = vmul.f32 %v13073_v46, %v13073_v46  ;;  %v5993_v6 = vmul.f32 %v13076_v45, %v13076_v45  ;;  %v13083_v34 = vsub.f32 %v12756_v10, %v5939_v37  ;;  %v13086_v39 = vsub.f32 %v12749_v54, %v5939_v37 }
 0xf2a   :  { %v5994_v23 = vmul.f32 %v13083_v34, %v13083_v34  ;;  %v5995_v58 = vmul.f32 %v13086_v39, %v13086_v39  ;;  %v6036_v48 = vsel %vm111_vm0, %v5993_v6, 0.0 }
 0xf2b   :  { %v5903_v44 = vpop.xlane.xlu0 %5902  ;;  %v6037_v53 = vadd.f32 %v6036_v48, %v5992_v16 }
 0xf2c   :  { %v5940_v18 = vmul.f32 0.006329114, %v5903_v44  ;;  %v6040_v24 = vsel %vm111_vm0, %v5995_v58, 0.0 }
 0xf2d   :  { %v5907_v55 = vpop.xlane.xlu1 %5906  ;;  %6038 = vadd.xlane.f32.xlu0 %v6037_v53  ;;  %v6041_v57 = vadd.f32 %v6040_v24, %v5994_v23 }
 0xf2e   :  { %v13095_v40 = vsub.f32 %v12774_v28, %v5940_v18  ;;  %v13098_v59 = vsub.f32 %v12768_v4, %v5940_v18  ;;  %v5941_v37 = vmul.f32 0.006329114, %v5907_v55 }
 0xf2f   :  { %6042 = vadd.xlane.f32.xlu1 %v6041_v57 }
 0xf30   :  { %v5996_v54 = vmul.f32 %v13095_v40, %v13095_v40  ;;  %v5997_v16 = vmul.f32 %v13098_v59, %v13098_v59  ;;  %v13105_v6 = vsub.f32 %v12786_v63, %v5941_v37  ;;  %v13108_v58 = vsub.f32 %v12779_v61, %v5941_v37 }
 0xf32   :  { %v5998_v23 = vmul.f32 %v13105_v6, %v13105_v6  ;;  %v5999_v48 = vmul.f32 %v13108_v58, %v13108_v58  ;;  %v6044_v44 = vsel %vm111_vm0, %v5997_v16, 0.0 }
 0xf33   :  { %v5911_v53 = vpop.xlane.xlu0 %5910  ;;  %v6045_v18 = vadd.f32 %v6044_v44, %v5996_v54 }
 0xf34   :  { %v5942_v24 = vmul.f32 0.006329114, %v5911_v53  ;;  %v6048_v55 = vsel %vm111_vm0, %v5999_v48, 0.0 }
 0xf35   :  { %v5915_v57 = vpop.xlane.xlu1 %5914  ;;  %6046 = vadd.xlane.f32.xlu0 %v6045_v18  ;;  %v6049_v63 = vadd.f32 %v6048_v55, %v5998_v23 }
 0xf36   :  { %v13117_v4 = vsub.f32 %v12804_v5, %v5942_v24  ;;  %v13120_v37 = vsub.f32 %v12798_v38, %v5942_v24  ;;  %v5943_v61 = vmul.f32 0.006329114, %v5915_v57 }
 0xf37   :  { %6050 = vadd.xlane.f32.xlu1 %v6049_v63 }
 0xf38   :  { %v6000_v28 = vmul.f32 %v13117_v4, %v13117_v4  ;;  %v6001_v54 = vmul.f32 %v13120_v37, %v13120_v37  ;;  %v13127_v16 = vsub.f32 %v12816_v11, %v5943_v61  ;;  %v13130_v48 = vsub.f32 %v12809_v21, %v5943_v61 }
 0xf3a   :  { %v6002_v23 = vmul.f32 %v13127_v16, %v13127_v16  ;;  %v6003_v44 = vmul.f32 %v13130_v48, %v13130_v48  ;;  %v6052_v63 = vsel %vm111_vm0, %v6001_v54, 0.0 }
 0xf3b   :  { %v6053_v53 = vadd.f32 %v6052_v63, %v6000_v28 }
 0xf3c   :  { %v6056_v18 = vsel %vm111_vm0, %v6003_v44, 0.0 }
 0xf3d   :  { %6054 = vadd.xlane.f32.xlu0 %v6053_v53  ;;  %v6057_v24 = vadd.f32 %v6056_v18, %v6002_v23 }
 0xf3f   :  { %6058 = vadd.xlane.f32.xlu1 %v6057_v24 }
 0xf54   :  { %v5919_v55 = vpop.xlane.xlu0 %5918 }
 0xf55   :  { %v5944_v57 = vmul.f32 0.006329114, %v5919_v55 }
 0xf56   :  { %v5923_v11 = vpop.xlane.xlu1 %5922 }
 0xf57   :  { %v13139_v61 = vsub.f32 %v12834_v31, %v5944_v57  ;;  %v13142_v21 = vsub.f32 %v12828_v22, %v5944_v57  ;;  %v5945_v38 = vmul.f32 0.006329114, %v5923_v11 }
 0xf59   :  { %v6004_v5 = vmul.f32 %v13139_v61, %v13139_v61  ;;  %v6005_v28 = vmul.f32 %v13142_v21, %v13142_v21  ;;  %v13149_v54 = vsub.f32 %v12846_v7, %v5945_v38  ;;  %v13152_v23 = vsub.f32 %v12839_v35, %v5945_v38 }
 0xf5b   :  { %v6006_v44 = vmul.f32 %v13149_v54, %v13149_v54  ;;  %v6007_v63 = vmul.f32 %v13152_v23, %v13152_v23  ;;  %v6060_v11 = vsel %vm111_vm0, %v6005_v28, 0.0 }
 0xf5c   :  { %v6061_v53 = vadd.f32 %v6060_v11, %v6004_v5 }
 0xf5d   :  { %v6064_v18 = vsel %vm111_vm0, %v6007_v63, 0.0 }
 0xf5e   :  { %6062 = vadd.xlane.f32.xlu0 %v6061_v53  ;;  %v6065_v24 = vadd.f32 %v6064_v18, %v6006_v44 }
 0xf60   :  { %6066 = vadd.xlane.f32.xlu1 %v6065_v24  ;;  %v5927_v55 = vpop.xlane.xlu0 %5926 }
 0xf61   :  { %v5946_v57 = vmul.f32 0.006329114, %v5927_v55  ;;  %v14036_v55 = vmov 0  }
 0xf62   :  { %v5931_v7 = vpop.xlane.xlu1 %5930  ;;  %6865 = vmatprep.subr.bf16.mxu1 %v14036_v55 }
 0xf63   :  { %v13161_v38 = vsub.f32 %v12864_v2, %v5946_v57  ;;  %v13164_v35 = vsub.f32 %v12858_v17, %v5946_v57  ;;  %v5947_v22 = vmul.f32 0.006329114, %v5931_v7 }
 0xf65   :  { %v6008_v31 = vmul.f32 %v13161_v38, %v13161_v38  ;;  %v6009_v5 = vmul.f32 %v13164_v35, %v13164_v35  ;;  %v13171_v28 = vsub.f32 %v12876_v43, %v5947_v22  ;;  %v13174_v44 = vsub.f32 %v12869_v56, %v5947_v22 }
 0xf67   :  { %v6010_v63 = vmul.f32 %v13171_v28, %v13171_v28  ;;  %v6011_v11 = vmul.f32 %v13174_v44, %v13174_v44  ;;  %v6068_v7 = vsel %vm111_vm0, %v6009_v5, 0.0  ;;  %v5867_v5 = vld [vmem:[%s13941_s9] sm:$0x3] }
 0xf68   :  { %v6069_v53 = vadd.f32 %v6068_v7, %v6008_v31  ;;  %v5866_v31 = vld [vmem:[%s13940_s8] sm:$0x3] }
 0xf69   :  { %v6072_v18 = vsel %vm111_vm0, %v6011_v11, 0.0  ;;  %v13193_v11 = vrot.slane %v5866_v31, %v14239_v1 }
 0xf6a   :  { %6070 = vadd.xlane.f32.xlu0 %v6069_v53  ;;  %v6073_v24 = vadd.f32 %v6072_v18, %v6010_v63  ;;  %v13190_v63 = vrot.slane %v5866_v31, %v14240_v52  ;;  %v13201_v53 = vrot.slane %v5867_v5, %v14239_v1 }
 0xf6c   :  { %6074 = vadd.xlane.f32.xlu1 %v6073_v24 }
 0xf81   :  { %v6015_v57 = vpop.xlane.xlu0 %6014 }
 0xf82   :  { %v6076_v22 = vmul.f32 0.006329114, %v6015_v57 }
 0xf83   :  { %v6019_v56 = vpop.xlane.xlu1 %6018 }
 0xf84   :  { %v6092_v43 = vadd.f32 1e-05, %v6076_v22  ;;  %v6077_v17 = vmul.f32 0.006329114, %v6019_v56 }
 0xf86   :  { %9727 = vrsqrt.f32 %v6092_v43  ;;  %v6093_v2 = vadd.f32 1e-05, %v6077_v17  ;;  %v13198_v43 = vrot.slane %v5867_v5, %v14240_v52 }
 0xf88   :  { %9729 = vrsqrt.f32 %v6093_v2 }
 0xf90   :  { %v9728_v7 = vpop.eup %9727 }
 0xf91   :  { %v6124_v56 = vmul.f32 %v9728_v7, %v12892_v26  ;;  %v6125_v17 = vmul.f32 %v9728_v7, %v12895_v15 }
 0xf92   :  { %v9730_v2 = vpop.eup %9729 }
 0xf93   :  { %v6126_v18 = vmul.f32 %v9730_v2, %v12911_v12  ;;  %v6127_v24 = vmul.f32 %v9730_v2, %v12914_v25  ;;  %v6168_v57 = vmul.f32 %v13190_v63, %v6125_v17  ;;  %v6167_v22 = vmul.f32 %v13193_v11, %v6124_v56  ;;  %v9310_v25 = vld [vmem:[%s13942_s10 + $0x10] ss:$20 sps:$4 sm:$0xff]   ;;  %v9312_v17 = vld [vmem:[%s13942_s10 + $0x60] ss:$20 sps:$4 sm:$0xff]   ;;  %v9313_v2 = vld [vmem:[%s13942_s10 + $0x88] ss:$20 sps:$4 sm:$0xff]  }
 0xf94   :  { %v14261_v56 = vmov 0  }
 0xf95   :  { %v6170_v31 = vmul.f32 %v13190_v63, %v6127_v24  ;;  %v6169_v26 = vmul.f32 %v13193_v11, %v6126_v18  ;;  %v6211_v15 = vadd.f32 %v13198_v43, %v6168_v57  ;;  %v6210_v55 = vadd.f32 %v13201_v53, %v6167_v22  ;;  %v9314_v18 = vld [vmem:[%s13942_s10 + $0xb0] ss:$20 sps:$4 sm:$0xff]  }
 0xf97   :  { %v6213_v7 = vadd.f32 %v13198_v43, %v6170_v31  ;;  %v6212_v5 = vadd.f32 %v13201_v53, %v6169_v26  ;;  %v9315_v31 = vld [vmem:[%s13942_s10 + $0xd8] ss:$20 sps:$4 sm:$0xff]  }
 0xf99   :  { %v13213_v10 = vpack.c.bf16 %v6213_v7, %v6211_v15  ;;  %v13215_v12 = vpack.c.bf16 %v6212_v5, %v6210_v55  ;;  %v9311_v55 = vld [vmem:[%s13942_s10 + $0x38] ss:$20 sps:$4 sm:$0xff]   ;;  %v9316_v5 = vld [vmem:[%s13942_s10 + $0x100] ss:$20 sps:$4 sm:$0xff]  }
 0xf9b   :  { %8252 = vmatprep.mubr.msk.bf16.mxu1 %vm111_vm0, %v13213_v10  ;;  %8261 = vmatprep.mubr.msk.bf16.mxu0 %vm111_vm0, %v13213_v10 }
 0xf9c   :  { %6672 = vmatmul.mubr.bf16.vlgmr.msra.gmra.mrb[224].mxu1 %v13215_v12  ;;  %6785 = vmatmul.mubr.bf16.vlgmr.msra.gmra.mrb[160].mxu0 %v13215_v12 }
 0xf9d   :  { %6866 = vmatpush1.bf16.msra.mxu1 %v9310_v25 }
 0xf9e   :  { %6867 = vmatprep.subr.bf16.mxu1 %v14261_v56 }
 0xfa1   :  { %6868 = vmatpush1.bf16.msra.mxu1 %v9311_v55 }
 0xfa2   :  { %6869 = vmatprep.subr.bf16.mxu1 %v14261_v56 }
 0xfa5   :  { %6870 = vmatpush1.bf16.msra.mxu1 %v9312_v17 }
 0xfa6   :  { %6871 = vmatprep.subr.bf16.mxu1 %v14261_v56 }
 0xfa9   :  { %6872 = vmatpush1.bf16.msra.mxu1 %v9313_v2 }
 0xfaa   :  { %v6023_v24 = vpop.xlane.xlu0 %6022  ;;  %6873 = vmatprep.subr.bf16.mxu1 %v14261_v56 }
 0xfab   :  { %v6078_v57 = vmul.f32 0.006329114, %v6023_v24  ;;  %v9317_v24 = vld [vmem:[%s13942_s10 + $0x128] ss:$20 sps:$4 sm:$0xff]  }
 0xfad   :  { %v6094_v22 = vadd.f32 1e-05, %v6078_v57  ;;  %6874 = vmatpush1.bf16.msra.mxu1 %v9314_v18 }
 0xfae   :  { %v6027_v26 = vpop.xlane.xlu1 %6026  ;;  %6875 = vmatprep.subr.bf16.mxu1 %v14261_v56 }
 0xfaf   :  { %9731 = vrsqrt.f32 %v6094_v22  ;;  %v6079_v15 = vmul.f32 0.006329114, %v6027_v26  ;;  %v9319_v26 = vld [vmem:[%s13942_s10 + $0x178] ss:$20 sps:$4 sm:$0x7f]  }
 0xfb1   :  { %v6095_v7 = vadd.f32 1e-05, %v6079_v15  ;;  %6876 = vmatpush1.bf16.msra.mxu1 %v9315_v31  ;;  %v9318_v31 = vld [vmem:[%s13942_s10 + $0x150] ss:$20 sps:$4 sm:$0xff]  }
 0xfb2   :  { %v6031_v25 = vpop.xlane.xlu0 %6030  ;;  %6877 = vmatprep.subr.bf16.mxu1 %v14261_v56 }
 0xfb3   :  { %9733 = vrsqrt.f32 %v6095_v7  ;;  %v6080_v55 = vmul.f32 0.006329114, %v6031_v25  ;;  %v9320_v25 = vld [vmem:[%s13944_s12] ss:$8 sps:$4 sm:$0xff]  }
 0xfb4   :  { %v6035_v17 = vpop.xlane.xlu1 %6034 }
 0xfb5   :  { %v6096_v2 = vadd.f32 1e-05, %v6080_v55  ;;  %v6081_v18 = vmul.f32 0.006329114, %v6035_v17  ;;  %6878 = vmatpush1.bf16.msra.mxu1 %v9316_v5  ;;  %v9322_v55 = vld [vmem:[%s13944_s12 + $0x4] ss:$8 sps:$4 sm:$0xff]  }
 0xfb6   :  { %6879 = vmatprep.subr.bf16.mxu1 %v14261_v56  ;;  %7600 = vmatprep.subr.bf16.mxu0 %v9322_v55  ;;  %v6637_v55 = vsel %vm645_vm1, %v9319_v26, 0 }
 0xfb7   :  { %9735 = vrsqrt.f32 %v6096_v2  ;;  %v6097_v57 = vadd.f32 1e-05, %v6081_v18  ;;  %v9325_v2 = vld [vmem:[%s13944_s12 + $0x14] ss:$8 sps:$4 sm:$0xff]   ;;  %7601 = vmatpush1.bf16.msra.mxu0 %v9320_v25 }
 0xfb8   :  { %7602 = vmatprep.subr.bf16.mxu0 %v9325_v2  ;;  %v9328_v2 = vld [vmem:[%s13944_s12 + $0x24] ss:$8 sps:$4 sm:$0xff]  }
 0xfb9   :  { %v9732_v22 = vpop.eup %9731  ;;  %9737 = vrsqrt.f32 %v6097_v57  ;;  %6880 = vmatpush1.bf16.msra.mxu1 %v9317_v24 }
 0xfba   :  { %v6129_v15 = vmul.f32 %v9732_v22, %v13004_v50  ;;  %v6039_v7 = vpop.xlane.xlu0 %6038  ;;  %v6128_v5 = vmul.f32 %v9732_v22, %v13001_v9  ;;  %6881 = vmatprep.subr.bf16.mxu1 %v14261_v56  ;;  %v9323_v22 = vld [vmem:[%s13944_s12 + $0x10] ss:$8 sps:$4 sm:$0xff]  }
 0xfbb   :  { %v6082_v17 = vmul.f32 0.006329114, %v6039_v7  ;;  %7603 = vmatpush1.bf16.msra.mxu0 %v9323_v22 }
 0xfbc   :  { %v6043_v18 = vpop.xlane.xlu1 %6042  ;;  %v6172_v57 = vmul.f32 %v13190_v63, %v6129_v15  ;;  %v6171_v47 = vmul.f32 %v13193_v11, %v6128_v5  ;;  %7604 = vmatprep.subr.bf16.mxu0 %v9328_v2 }
 0xfbd   :  { %v9734_v50 = vpop.eup %9733  ;;  %v6098_v24 = vadd.f32 1e-05, %v6082_v17  ;;  %v6083_v9 = vmul.f32 0.006329114, %v6043_v18  ;;  %6882 = vmatpush1.bf16.msra.mxu1 %v9318_v31 }
 0xfbe   :  { %v6131_v3 = vmul.f32 %v9734_v50, %v13026_v41  ;;  %v6130_v7 = vmul.f32 %v9734_v50, %v13023_v62  ;;  %6883 = vmatprep.subr.bf16.mxu1 %v14261_v56  ;;  %v6215_v18 = vadd.f32 %v13198_v43, %v6172_v57  ;;  %v6214_v26 = vadd.f32 %v13201_v53, %v6171_v47 }
 0xfbf   :  { %9739 = vrsqrt.f32 %v6098_v24  ;;  %v6099_v17 = vadd.f32 1e-05, %v6083_v9 }
 0xfc0   :  { %v6174_v31 = vmul.f32 %v13190_v63, %v6131_v3  ;;  %v6173_v15 = vmul.f32 %v13193_v11, %v6130_v7  ;;  %v9326_v3 = vld [vmem:[%s13944_s12 + $0x20] ss:$8 sps:$4 sm:$0xff]  }
 0xfc1   :  { %v9736_v25 = vpop.eup %9735  ;;  %9741 = vrsqrt.f32 %v6099_v17  ;;  %6884 = vmatpush1.bf16.msra.mxu1 %v6637_v55  ;;  %v9331_v17 = vld [vmem:[%s13944_s12 + $0x34] ss:$8 sps:$4 sm:$0xff]   ;;  %7605 = vmatpush1.bf16.msra.mxu0 %v9326_v3 }
 0xfc2   :  { %v6133_v62 = vmul.f32 %v9736_v25, %v13050_v27  ;;  %v6047_v41 = vpop.xlane.xlu0 %6046  ;;  %v6217_v5 = vadd.f32 %v13198_v43, %v6174_v31  ;;  %v6216_v50 = vadd.f32 %v13201_v53, %v6173_v15  ;;  %v6132_v57 = vmul.f32 %v9736_v25, %v13047_v33  ;;  %v9329_v33 = vld [vmem:[%s13944_s12 + $0x30] ss:$8 sps:$4 sm:$0xff]   ;;  %7606 = vmatprep.subr.bf16.mxu0 %v9331_v17 }
 0xfc3   :  { %v9738_v24 = vpop.eup %9737  ;;  %v6084_v9 = vmul.f32 0.006329114, %v6047_v41 }
 0xfc4   :  { %v6135_v27 = vmul.f32 %v9738_v24, %v13064_v19  ;;  %v6051_v22 = vpop.xlane.xlu1 %6050  ;;  %v13296_v7 = vpack.c.bf16 %v6217_v5, %v6215_v18  ;;  %v13298_v47 = vpack.c.bf16 %v6216_v50, %v6214_v26  ;;  %v6176_v55 = vmul.f32 %v13190_v63, %v6133_v62 }
 0xfc5   :  { %v6100_v31 = vadd.f32 1e-05, %v6084_v9  ;;  %v6085_v15 = vmul.f32 0.006329114, %v6051_v22  ;;  %v6134_v41 = vmul.f32 %v9738_v24, %v13061_v51  ;;  %v6175_v51 = vmul.f32 %v13193_v11, %v6132_v57  ;;  %7607 = vmatpush1.bf16.msra.mxu0 %v9329_v33  ;;  %v9332_v9 = vld [vmem:[%s13944_s12 + $0x40] ss:$8 sps:$4 sm:$0xff]  }
 0xfc6   :  { %8253 = vmatprep.mubr.msk.bf16.mxu1 %vm111_vm0, %v13296_v7  ;;  %8262 = vmatprep.mubr.msk.bf16.mxu0 %vm111_vm0, %v13296_v7  ;;  %v6178_v19 = vmul.f32 %v13190_v63, %v6135_v27  ;;  %v6219_v62 = vadd.f32 %v13198_v43, %v6176_v55  ;;  %v9334_v57 = vld [vmem:[%s13944_s12 + $0x44] ss:$8 sps:$4 sm:$0xff]   ;;  %v9337_v33 = vld [vmem:[%s13944_s12 + $0x54] ss:$8 sps:$4 sm:$0xff]  }
 0xfc7   :  { %9743 = vrsqrt.f32 %v6100_v31  ;;  %v6101_v25 = vadd.f32 1e-05, %v6085_v15  ;;  %6682 = vmatmul.mubr.bf16.gmra.mrb[228].mxu1 %v13298_v47  ;;  %6795 = vmatmul.mubr.bf16.gmra.mrb[164].mxu0 %v13298_v47  ;;  %v6177_v18 = vmul.f32 %v13193_v11, %v6134_v41  ;;  %v6218_v55 = vadd.f32 %v13201_v53, %v6175_v51 }
 0xfc8   :  { %v6221_v5 = vadd.f32 %v13198_v43, %v6178_v19  ;;  %7608 = vmatprep.subr.bf16.mxu0 %v9334_v57  ;;  %v9338_v57 = vld [vmem:[%s13944_s12 + $0x60] ss:$8 sps:$4 sm:$0xff]  }
 0xfc9   :  { %v9740_v26 = vpop.eup %9739  ;;  %9745 = vrsqrt.f32 %v6101_v25  ;;  %v6220_v50 = vadd.f32 %v13201_v53, %v6177_v18  ;;  %7609 = vmatpush1.bf16.msra.mxu0 %v9332_v9  ;;  %v9335_v18 = vld [vmem:[%s13944_s12 + $0x50] ss:$8 sps:$4 sm:$0xff]  }
 0xfca   :  { %v6137_v3 = vmul.f32 %v9740_v26, %v13076_v45  ;;  %v6055_v2 = vpop.xlane.xlu0 %6054  ;;  %v13321_v24 = vpack.c.bf16 %v6221_v5, %v6219_v62  ;;  %v6136_v17 = vmul.f32 %v9740_v26, %v13073_v46  ;;  %7610 = vmatprep.subr.bf16.mxu0 %v9337_v33  ;;  %v9341_v33 = vld [vmem:[%s13944_s12 + $0x70] ss:$8 sps:$4 sm:$0xff]  }
 0xfcb   :  { %v9742_v27 = vpop.eup %9741  ;;  %v6086_v22 = vmul.f32 0.006329114, %v6055_v2  ;;  %v13341_v46 = vpack.c.bf16 %v6220_v50, %v6218_v55 }
 0xfcc   :  { %v6139_v31 = vmul.f32 %v9742_v27, %v13086_v39  ;;  %v6059_v45 = vpop.xlane.xlu1 %6058  ;;  %8254 = vmatprep.mubr.msk.bf16.mxu1 %vm111_vm0, %v13321_v24  ;;  %8263 = vmatprep.mubr.msk.bf16.mxu0 %vm111_vm0, %v13321_v24  ;;  %v6180_v15 = vmul.f32 %v13190_v63, %v6137_v3  ;;  %v6138_v41 = vmul.f32 %v9742_v27, %v13083_v34  ;;  %v9340_v27 = vld [vmem:[%s13944_s12 + $0x64] ss:$8 sps:$4 sm:$0xff]  }
 0xfcd   :  { %v6102_v19 = vadd.f32 1e-05, %v6086_v22  ;;  %v6087_v25 = vmul.f32 0.006329114, %v6059_v45  ;;  %v6179_v62 = vmul.f32 %v13193_v11, %v6136_v17  ;;  %7611 = vmatpush1.bf16.msra.mxu0 %v9335_v18 }
 0xfce   :  { %v6182_v39 = vmul.f32 %v13190_v63, %v6139_v31  ;;  %v6181_v51 = vmul.f32 %v13193_v11, %v6138_v41  ;;  %v6223_v5 = vadd.f32 %v13198_v43, %v6180_v15  ;;  %v9343_v15 = vld [vmem:[%s13944_s12 + $0x74] ss:$8 sps:$4 sm:$0xff]   ;;  %7612 = vmatprep.subr.bf16.mxu0 %v9340_v27 }
 0xfcf   :  { %9747 = vrsqrt.f32 %v6102_v19  ;;  %v6103_v34 = vadd.f32 1e-05, %v6087_v25  ;;  %6692 = vmatmul.mubr.bf16.gmra.mrb[232].mxu1 %v13341_v46  ;;  %6805 = vmatmul.mubr.bf16.gmra.mrb[168].mxu0 %v13341_v46  ;;  %v6222_v55 = vadd.f32 %v13201_v53, %v6179_v62  ;;  %v9346_v19 = vld [vmem:[%s13944_s12 + $0x84] ss:$8 sps:$4 sm:$0xff]   ;;  %v9349_v27 = vld [vmem:[%s13944_s12 + $0x94] ss:$8 sps:$4 sm:$0xff]  }
 0xfd0   :  { %v6225_v26 = vadd.f32 %v13198_v43, %v6182_v39  ;;  %v6224_v3 = vadd.f32 %v13201_v53, %v6181_v51 }
 0xfd1   :  { %v9744_v50 = vpop.eup %9743  ;;  %9749 = vrsqrt.f32 %v6103_v34  ;;  %7613 = vmatpush1.bf16.msra.mxu0 %v9338_v57 }
 0xfd2   :  { %v6141_v2 = vmul.f32 %v9744_v50, %v13098_v59  ;;  %v13355_v9 = vpack.c.bf16 %v6225_v26, %v6223_v5  ;;  %v6140_v17 = vmul.f32 %v9744_v50, %v13095_v40  ;;  %v13375_v41 = vpack.c.bf16 %v6224_v3, %v6222_v55  ;;  %7614 = vmatprep.subr.bf16.mxu0 %v9343_v15  ;;  %v9344_v5 = vld [vmem:[%s13944_s12 + $0x80] ss:$8 sps:$4 sm:$0xff]   ;;  %v9347_v55 = vld [vmem:[%s13944_s12 + $0x90] ss:$8 sps:$4 sm:$0xff]  }
 0xfd3   :  { %v9746_v22 = vpop.eup %9745 }
 0xfd4   :  { %v6143_v31 = vmul.f32 %v9746_v22, %v13108_v58  ;;  %8255 = vmatprep.mubr.msk.bf16.mxu1 %vm111_vm0, %v13355_v9  ;;  %8264 = vmatprep.mubr.msk.bf16.mxu0 %vm111_vm0, %v13355_v9  ;;  %v6184_v59 = vmul.f32 %v13190_v63, %v6141_v2  ;;  %v6142_v45 = vmul.f32 %v9746_v22, %v13105_v6 }
 0xfd5   :  { %v6183_v6 = vmul.f32 %v13193_v11, %v6140_v17  ;;  %7615 = vmatpush1.bf16.msra.mxu0 %v9341_v33  ;;  %v9352_v17 = vld [vmem:[%s13944_s12 + $0xa4] ss:$8 sps:$4 sm:$0xff]   ;;  %v9355_v33 = vld [vmem:[%s13944_s12 + $0xb4] ss:$8 sps:$4 sm:$0xff]  }
 0xfd6   :  { %v6186_v40 = vmul.f32 %v13190_v63, %v6143_v31  ;;  %v6185_v58 = vmul.f32 %v13193_v11, %v6142_v45  ;;  %v6227_v25 = vadd.f32 %v13198_v43, %v6184_v59  ;;  %7616 = vmatprep.subr.bf16.mxu0 %v9346_v19  ;;  %v9353_v19 = vld [vmem:[%s13944_s12 + $0xb0] ss:$8 sps:$4 sm:$0xff]  }
 0xfd7   :  { %6702 = vmatmul.mubr.bf16.gmra.mrb[236].mxu1 %v13375_v41  ;;  %6815 = vmatmul.mubr.bf16.gmra.mrb[172].mxu0 %v13375_v41  ;;  %v6226_v50 = vadd.f32 %v13201_v53, %v6183_v6 }
 0xfd8   :  { %v6229_v39 = vadd.f32 %v13198_v43, %v6186_v40  ;;  %v6228_v18 = vadd.f32 %v13201_v53, %v6185_v58  ;;  %v9350_v40 = vld [vmem:[%s13944_s12 + $0xa0] ss:$8 sps:$4 sm:$0xff]  }
 0xfd9   :  { %v9748_v51 = vpop.eup %9747  ;;  %7617 = vmatpush1.bf16.msra.mxu0 %v9344_v5 }
 0xfda   :  { %v6145_v34 = vmul.f32 %v9748_v51, %v13120_v37  ;;  %v13392_v62 = vpack.c.bf16 %v6229_v39, %v6227_v25  ;;  %v6144_v3 = vmul.f32 %v9748_v51, %v13117_v4  ;;  %v13409_v22 = vpack.c.bf16 %v6228_v18, %v6226_v50  ;;  %7618 = vmatprep.subr.bf16.mxu0 %v9349_v27  ;;  %v9358_v25 = vld [vmem:[%s13944_s12 + $0xc4] ss:$8 sps:$4 sm:$0xff]   ;;  %v9356_v39 = vld [vmem:[%s13944_s12 + $0xc0] ss:$8 sps:$4 sm:$0xff]   ;;  %v9361_v18 = vld [vmem:[%s13944_s12 + $0xd4] ss:$8 sps:$4 sm:$0xff]  }
 0xfdb   :  { %v9750_v26 = vpop.eup %9749  ;;  %v9364_v27 = vld [vmem:[%s13944_s12 + $0xe4] ss:$8 sps:$4 sm:$0xff]  }
 0xfdc   :  { %v6147_v2 = vmul.f32 %v9750_v26, %v13130_v48  ;;  %8256 = vmatprep.mubr.msk.bf16.mxu1 %vm111_vm0, %v13392_v62  ;;  %8265 = vmatprep.mubr.msk.bf16.mxu0 %vm111_vm0, %v13392_v62  ;;  %v6188_v37 = vmul.f32 %v13190_v63, %v6145_v34  ;;  %v6146_v57 = vmul.f32 %v9750_v26, %v13127_v16 }
 0xfdd   :  { %v6187_v16 = vmul.f32 %v13193_v11, %v6144_v3  ;;  %7619 = vmatpush1.bf16.msra.mxu0 %v9347_v55  ;;  %v9359_v3 = vld [vmem:[%s13944_s12 + $0xd0] ss:$8 sps:$4 sm:$0xff]  }
 0xfde   :  { %v6190_v4 = vmul.f32 %v13190_v63, %v6147_v2  ;;  %v6189_v48 = vmul.f32 %v13193_v11, %v6146_v57  ;;  %v6231_v31 = vadd.f32 %v13198_v43, %v6188_v37  ;;  %7620 = vmatprep.subr.bf16.mxu0 %v9352_v17  ;;  %v9362_v57 = vld [vmem:[%s13944_s12 + $0xe0] ss:$8 sps:$4 sm:$0xff]  }
 0xfdf   :  { %6712 = vmatmul.mubr.bf16.gmra.mrb[240].mxu1 %v13409_v22  ;;  %6825 = vmatmul.mubr.bf16.gmra.mrb[176].mxu0 %v13409_v22  ;;  %v6230_v58 = vadd.f32 %v13201_v53, %v6187_v16 }
 0xfe0   :  { %v6233_v59 = vadd.f32 %v13198_v43, %v6190_v4  ;;  %v6232_v45 = vadd.f32 %v13201_v53, %v6189_v48  ;;  %v9367_v48 = vld [vmem:[%s13944_s12 + $0xf4] ss:$8 sps:$4 sm:$0xff]  }
 0xfe1   :  { %7621 = vmatpush1.bf16.msra.mxu0 %v9350_v40 }
 0xfe2   :  { %v13425_v15 = vpack.c.bf16 %v6233_v59, %v6231_v31  ;;  %v13438_v6 = vpack.c.bf16 %v6232_v45, %v6230_v58  ;;  %7622 = vmatprep.subr.bf16.mxu0 %v9355_v33  ;;  %v9365_v59 = vld [vmem:[%s13944_s12 + $0xf0] ss:$8 sps:$4 sm:$0xff]  }
 0xfe4   :  { %8257 = vmatprep.mubr.msk.bf16.mxu1 %vm111_vm0, %v13425_v15  ;;  %8266 = vmatprep.mubr.msk.bf16.mxu0 %vm111_vm0, %v13425_v15 }
 0xfe5   :  { %7623 = vmatpush1.bf16.msra.mxu0 %v9353_v19 }
 0xfe6   :  { %7624 = vmatprep.subr.bf16.mxu0 %v9358_v25 }
 0xfe7   :  { %6722 = vmatmul.mubr.bf16.gmra.mrb[244].mxu1 %v13438_v6  ;;  %6835 = vmatmul.mubr.bf16.gmra.mrb[180].mxu0 %v13438_v6 }
 0xfe9   :  { %7625 = vmatpush1.bf16.msra.mxu0 %v9356_v39 }
 0xfea   :  { %7626 = vmatprep.subr.bf16.mxu0 %v9361_v18 }
 0xfeb   :  { %v6063_v51 = vpop.xlane.xlu0 %6062 }
 0xfec   :  { %v6088_v34 = vmul.f32 0.006329114, %v6063_v51 }
 0xfed   :  { %v6067_v5 = vpop.xlane.xlu1 %6066  ;;  %7627 = vmatpush1.bf16.msra.mxu0 %v9359_v3 }
 0xfee   :  { %v6104_v26 = vadd.f32 1e-05, %v6088_v34  ;;  %v6089_v50 = vmul.f32 0.006329114, %v6067_v5  ;;  %7628 = vmatprep.subr.bf16.mxu0 %v9364_v27 }
 0xff0   :  { %9751 = vrsqrt.f32 %v6104_v26  ;;  %v6105_v2 = vadd.f32 1e-05, %v6089_v50 }
 0xff1   :  { %7629 = vmatpush1.bf16.msra.mxu0 %v9362_v57 }
 0xff2   :  { %9753 = vrsqrt.f32 %v6105_v2  ;;  %7630 = vmatprep.subr.bf16.mxu0 %v9367_v48 }
 0xff5   :  { %7631 = vmatpush1.bf16.msra.mxu0 %v9365_v59 }
 0xff7   :  { %v6071_v37 = vpop.xlane.xlu0 %6070 }
 0xff8   :  { %v6090_v4 = vmul.f32 0.006329114, %v6071_v37 }
 0xff9   :  { %v6075_v55 = vpop.xlane.xlu1 %6074 }
 0xffa   :  { %v9752_v16 = vpop.eup %9751  ;;  %v6106_v17 = vadd.f32 1e-05, %v6090_v4  ;;  %v6091_v31 = vmul.f32 0.006329114, %v6075_v55 }
 0xffb   :  { %v6149_v45 = vmul.f32 %v9752_v16, %v13142_v21  ;;  %v6148_v40 = vmul.f32 %v9752_v16, %v13139_v61 }
 0xffc   :  { %v9754_v58 = vpop.eup %9753  ;;  %9755 = vrsqrt.f32 %v6106_v17  ;;  %v6107_v33 = vadd.f32 1e-05, %v6091_v31 }
 0xffd   :  { %v6151_v19 = vmul.f32 %v9754_v58, %v13152_v23  ;;  %v6192_v25 = vmul.f32 %v13190_v63, %v6149_v45  ;;  %v6150_v39 = vmul.f32 %v9754_v58, %v13149_v54  ;;  %v6191_v51 = vmul.f32 %v13193_v11, %v6148_v40 }
 0xffe   :  { %9757 = vrsqrt.f32 %v6107_v33 }
 0xfff   :  { %v6194_v18 = vmul.f32 %v13190_v63, %v6151_v19  ;;  %v6193_v21 = vmul.f32 %v13193_v11, %v6150_v39  ;;  %v6235_v61 = vadd.f32 %v13198_v43, %v6192_v25  ;;  %v6234_v5 = vadd.f32 %v13201_v53, %v6191_v51 }
0x1001   :  { %v6237_v34 = vadd.f32 %v13198_v43, %v6194_v18  ;;  %v6236_v23 = vadd.f32 %v13201_v53, %v6193_v21 }
0x1003   :  { %v6255_v26 = vpack.c.bf16 %v6237_v34, %v6235_v61  ;;  %v6254_v50 = vpack.c.bf16 %v6236_v23, %v6234_v5 }
0x1005   :  { %8258 = vmatprep.mubr.msk.bf16.mxu1 %vm111_vm0, %v6255_v26  ;;  %8267 = vmatprep.mubr.msk.bf16.mxu0 %vm111_vm0, %v6255_v26 }
0x1006   :  { %v9756_v54 = vpop.eup %9755  ;;  %6732 = vmatmul.mubr.bf16.gmra.mrb[248].mxu1 %v6254_v50  ;;  %6845 = vmatmul.mubr.bf16.gmra.mrb[184].mxu0 %v6254_v50 }
0x1007   :  { %v6153_v3 = vmul.f32 %v9756_v54, %v13164_v35  ;;  %v6152_v2 = vmul.f32 %v9756_v54, %v13161_v38 }
0x1008   :  { %v9758_v37 = vpop.eup %9757 }
0x1009   :  { %v6155_v57 = vmul.f32 %v9758_v37, %v13174_v44  ;;  %v6196_v27 = vmul.f32 %v13190_v63, %v6153_v3  ;;  %v6154_v4 = vmul.f32 %v9758_v37, %v13171_v28  ;;  %v6195_v48 = vmul.f32 %v13193_v11, %v6152_v2  ;;  %v14262_v28 = vld [vmem:[#allocation14_spill] sm:$0xff] }
0x100b   :  { %v6198_v55 = vmul.f32 %v13190_v63, %v6155_v57  ;;  %v6197_v16 = vmul.f32 %v13193_v11, %v6154_v4  ;;  %v6239_v17 = vadd.f32 %v13198_v43, %v6196_v27  ;;  %v6238_v35 = vadd.f32 %v13201_v53, %v6195_v48  ;;  %v13524_v11 = vld [vmem:[%s13943_s11] sm:$0x1f]  ;;  %v9373_v27 = vld [vmem:[%s13944_s12 + $0x114] ss:$8 sps:$4 sm:$0xff]   ;;  %v9371_v4 = vld [vmem:[%s13944_s12 + $0x110] ss:$8 sps:$4 sm:$0xff]  }
0x100c   :  { %v6330_v63 = vsub.s32 2, %v14262_v28  ;;  %v9368_v57 = vld [vmem:[%s13944_s12 + $0x100] ss:$8 sps:$4 sm:$0xff]   ;;  %v9376_v48 = vld [vmem:[%s13944_s12 + $0x124] ss:$8 sps:$4 sm:$0xff]  }
0x100d   :  { %v6241_v31 = vadd.f32 %v13198_v43, %v6198_v55  ;;  %v6240_v38 = vadd.f32 %v13201_v53, %v6197_v16  ;;  %v6334_v43 = vsub.s32 3, %v14262_v28  ;;  %v13529_v53 = vrot.slane %v13524_v11, %v14239_v1  ;;  %v9374_v55 = vld [vmem:[%s13944_s12 + $0x120] ss:$8 sps:$4 sm:$0xff]   ;;  %v9379_v16 = vld [vmem:[%s13944_s12 + $0x134] ss:$8 sps:$4 sm:$0xff]  }
0x100f   :  { %v6257_v59 = vpack.c.bf16 %v6241_v31, %v6239_v17  ;;  %v6256_v44 = vpack.c.bf16 %v6240_v38, %v6238_v35  ;;  %v9377_v17 = vld [vmem:[%s13944_s12 + $0x130] ss:$8 sps:$4 sm:$0xff]   ;;  %v9382_v31 = vld [vmem:[%s13944_s12 + $0x144] ss:$8 sps:$4 sm:$0xff]   ;;  %v9380_v35 = vld [vmem:[%s13944_s12 + $0x140] ss:$8 sps:$4 sm:$0xff]  }
0x1010   :  { %v9385_v38 = vld [vmem:[%s13944_s12 + $0x154] ss:$8 sps:$4 sm:$0xff]  }
0x1011   :  { %8259 = vmatprep.mubr.msk.bf16.mxu1 %vm111_vm0, %v6257_v59  ;;  %8268 = vmatprep.mubr.msk.bf16.mxu0 %vm111_vm0, %v6257_v59 }
0x1012   :  { %6742 = vmatmul.mubr.bf16.gmra.mrb[252].mxu1 %v6256_v44  ;;  %6855 = vmatmul.mubr.bf16.gmra.mrb[188].mxu0 %v6256_v44 }
0x1013   :  { %8269 = vmatprep.mubr.msk.bf16.mxu1 %vm111_vm0, %v13213_v10  ;;  %v9370_v10 = vld [vmem:[%s13944_s12 + $0x104] ss:$8 sps:$4 sm:$0xff]  }
0x1014   :  { %7713 = vmatprep.subr.bf16.mxu0 %v9370_v10  ;;  %v9386_v10 = vld [vmem:[%s13944_s12 + $0x160] ss:$8 sps:$4 sm:$0xff]  }
0x101a   :  { %6898 = vmatmul.mubr.bf16.vlgmr.msra.gmra.mrb[0].mxu1 %v13215_v12  ;;  %v13532_v12 = vrot.slane %v13524_v11, %v6330_v63  ;;  %v9391_v63 = vld [vmem:[%s13944_s12 + $0x174] ss:$8 sps:$4 sm:$0xff]  }
0x101b   :  { %8270 = vmatprep.mubr.msk.bf16.mxu1 %vm111_vm0, %v13296_v7  ;;  %v13536_v7 = vrot.slane %v13524_v11, %v14240_v52 }
0x1022   :  { %6906 = vmatmul.mubr.bf16.gmra.mrb[4].mxu1 %v13298_v47  ;;  %v13539_v47 = vrot.slane %v13524_v11, %v6334_v43  ;;  %v9389_v43 = vld [vmem:[%s13944_s12 + $0x170] ss:$8 sps:$4 sm:$0xff]  }
0x1023   :  { %8271 = vmatprep.mubr.msk.bf16.mxu1 %vm111_vm0, %v13321_v24 }
0x102a   :  { %6914 = vmatmul.mubr.bf16.gmra.mrb[8].mxu1 %v13341_v46 }
0x102b   :  { %8272 = vmatprep.mubr.msk.bf16.mxu1 %vm111_vm0, %v13355_v9 }
0x1032   :  { %6922 = vmatmul.mubr.bf16.gmra.mrb[12].mxu1 %v13375_v41 }
0x1033   :  { %8273 = vmatprep.mubr.msk.bf16.mxu1 %vm111_vm0, %v13392_v62 }
0x103a   :  { %6930 = vmatmul.mubr.bf16.gmra.mrb[16].mxu1 %v13409_v22 }
0x103b   :  { %8274 = vmatprep.mubr.msk.bf16.mxu1 %vm111_vm0, %v13425_v15 }
0x1042   :  { %6938 = vmatmul.mubr.bf16.gmra.mrb[20].mxu1 %v13438_v6 }
0x1043   :  { %8275 = vmatprep.mubr.msk.bf16.mxu1 %vm111_vm0, %v6255_v26 }
0x104a   :  { %6946 = vmatmul.mubr.bf16.gmra.mrb[24].mxu1 %v6254_v50 }
0x104b   :  { %8276 = vmatprep.mubr.msk.bf16.mxu1 %vm111_vm0, %v6257_v59  ;;  %v9383_v59 = vld [vmem:[%s13944_s12 + $0x150] ss:$8 sps:$4 sm:$0xff]  }
0x1052   :  { %6954 = vmatmul.mubr.bf16.gmra.mrb[28].mxu1 %v6256_v44  ;;  %v9388_v44 = vld [vmem:[%s13944_s12 + $0x164] ss:$8 sps:$4 sm:$0xff]  }
0x106f   :  { %v6673_v24 = vpop.f32.mrb[224].mxu1  ;;  %v6786_v46 = vpop.f32.mrb[160].mxu0 }
0x1070   :  { %v6674_v9 = vadd.f32 %v6673_v24, %v13529_v53  ;;  %v6787_v41 = vadd.f32 %v6786_v46, %v13532_v12  ;;  %v6675_v62 = vpop.f32.mrb[225].mxu1  ;;  %v6788_v22 = vpop.f32.mrb[161].mxu0  ;;  %v9394_v24 = vld [vmem:[%s13944_s12 + $0x184] ss:$8 sps:$4 sm:$0xff]   ;;  %v9392_v46 = vld [vmem:[%s13944_s12 + $0x180] ss:$8 sps:$4 sm:$0xff]  }
0x1071   :  { %v6676_v15 = vadd.f32 %v6675_v62, %v13536_v7  ;;  %v6789_v6 = vadd.f32 %v6788_v22, %v13539_v47  ;;  %v6677_v45 = vpop.f32.mrb[226].mxu1  ;;  %v6790_v40 = vpop.f32.mrb[162].mxu0 }
0x1072   :  { %v6678_v58 = vadd.f32 %v6677_v45, %v13529_v53  ;;  %v6791_v33 = vadd.f32 %v6790_v40, %v13532_v12  ;;  %v6679_v19 = vpop.f32.mrb[227].mxu1  ;;  %v6792_v25 = vpop.f32.mrb[163].mxu0  ;;  %v6962_v18 = vmax.f32 %v6674_v9, 0.0  ;;  %v6964_v21 = vmax.f32 %v6787_v41, 0.0  ;;  %v9397_v9 = vld [vmem:[%s13944_s12 + $0x194] ss:$8 sps:$4 sm:$0xff]  }
0x1073   :  { %v6680_v39 = vadd.f32 %v6679_v19, %v13536_v7  ;;  %v6793_v51 = vadd.f32 %v6792_v25, %v13539_v47  ;;  %v6963_v5 = vmax.f32 %v6676_v15, 0.0  ;;  %v6965_v23 = vmax.f32 %v6789_v6, 0.0  ;;  %v9395_v40 = vld [vmem:[%s13944_s12 + $0x190] ss:$8 sps:$4 sm:$0xff]  }
0x1074   :  { %v6967_v61 = vmax.f32 %v6678_v58, 0.0  ;;  %v6969_v34 = vmax.f32 %v6791_v33, 0.0 }
0x1075   :  { %v6968_v26 = vmax.f32 %v6680_v39, 0.0  ;;  %v6970_v50 = vmax.f32 %v6793_v51, 0.0  ;;  %v9400_v39 = vld [vmem:[%s13944_s12 + $0x1a4] ss:$8 sps:$4 sm:$0xff]  }
0x1076   :  { %v7042_v54 = vpack.c.bf16 %v6967_v61, %v6962_v18  ;;  %v13549_v3 = vpack.c.bf16 %v6969_v34, %v6964_v21 }
0x1077   :  { %v7043_v2 = vpack.c.bf16 %v6968_v26, %v6963_v5  ;;  %v13551_v37 = vpack.c.bf16 %v6970_v50, %v6965_v23 }
0x1079   :  { %7632 = vmatprep.mubr.bf16.mxu0 %v7043_v2  ;;  %v9398_v2 = vld [vmem:[%s13944_s12 + $0x1a0] ss:$8 sps:$4 sm:$0xff]  }
0x107a   :  { %7633 = vmatmul.mubr.bf16.vlgmr.msra.gmra.mrb[192].mxu0 %v7042_v54 }
0x107b   :  { %7714 = vmatpush1.bf16.msra.mxu0 %v9368_v57 }
0x107c   :  { %7715 = vmatprep.subr.bf16.mxu0 %v9373_v27 }
0x107f   :  { %7716 = vmatpush1.bf16.msra.mxu0 %v9371_v4 }
0x1080   :  { %7717 = vmatprep.subr.bf16.mxu0 %v9376_v48 }
0x1083   :  { %7718 = vmatpush1.bf16.msra.mxu0 %v9374_v55  ;;  %v9403_v55 = vld [vmem:[%s13944_s12 + $0x1b4] ss:$8 sps:$4 sm:$0xff]  }
0x1084   :  { %7719 = vmatprep.subr.bf16.mxu0 %v9379_v16 }
0x1087   :  { %7720 = vmatpush1.bf16.msra.mxu0 %v9377_v17 }
0x1088   :  { %7721 = vmatprep.subr.bf16.mxu0 %v9382_v31 }
0x108b   :  { %7722 = vmatpush1.bf16.msra.mxu0 %v9380_v35 }
0x108c   :  { %7723 = vmatprep.subr.bf16.mxu0 %v9385_v38 }
0x108f   :  { %7724 = vmatpush1.bf16.msra.mxu0 %v9383_v59 }
0x1090   :  { %7725 = vmatprep.subr.bf16.mxu0 %v9388_v44 }
0x1093   :  { %7726 = vmatpush1.bf16.msra.mxu0 %v9386_v10 }
0x1094   :  { %7727 = vmatprep.subr.bf16.mxu0 %v9391_v63 }
0x1097   :  { %7728 = vmatpush1.bf16.msra.mxu0 %v9389_v43 }
0x1098   :  { %7729 = vmatprep.subr.bf16.mxu0 %v9394_v24  ;;  %v9401_v24 = vld [vmem:[%s13944_s12 + $0x1b0] ss:$8 sps:$4 sm:$0xff]  }
0x109a   :  { %v6683_v41 = vpop.f32.mrb[228].mxu1  ;;  %v6796_v62 = vpop.f32.mrb[164].mxu0 }
0x109b   :  { %v6684_v22 = vadd.f32 %v6683_v41, %v13529_v53  ;;  %v6797_v15 = vadd.f32 %v6796_v62, %v13532_v12  ;;  %v6685_v6 = vpop.f32.mrb[229].mxu1  ;;  %v6798_v45 = vpop.f32.mrb[165].mxu0  ;;  %7730 = vmatpush1.bf16.msra.mxu0 %v9392_v46 }
0x109c   :  { %v6686_v58 = vadd.f32 %v6685_v6, %v13536_v7  ;;  %v6799_v33 = vadd.f32 %v6798_v45, %v13539_v47  ;;  %v6687_v19 = vpop.f32.mrb[230].mxu1  ;;  %v6800_v25 = vpop.f32.mrb[166].mxu0  ;;  %7731 = vmatprep.subr.bf16.mxu0 %v9397_v9 }
0x109d   :  { %v6688_v51 = vadd.f32 %v6687_v19, %v13529_v53  ;;  %v6801_v18 = vadd.f32 %v6800_v25, %v13532_v12  ;;  %v6689_v21 = vpop.f32.mrb[231].mxu1  ;;  %v6802_v61 = vpop.f32.mrb[167].mxu0  ;;  %v6972_v23 = vmax.f32 %v6684_v22, 0.0  ;;  %v6974_v26 = vmax.f32 %v6797_v15, 0.0  ;;  %v9406_v22 = vld [vmem:[%s13944_s12 + $0x1c4] ss:$8 sps:$4 sm:$0xff]  }
0x109e   :  { %v6690_v34 = vadd.f32 %v6689_v21, %v13536_v7  ;;  %v6803_v5 = vadd.f32 %v6802_v61, %v13539_v47  ;;  %v6973_v57 = vmax.f32 %v6686_v58, 0.0  ;;  %v6975_v27 = vmax.f32 %v6799_v33, 0.0 }
0x109f   :  { %v6977_v50 = vmax.f32 %v6688_v51, 0.0  ;;  %v6979_v54 = vmax.f32 %v6801_v18, 0.0  ;;  %7732 = vmatpush1.bf16.msra.mxu0 %v9395_v40  ;;  %v9404_v18 = vld [vmem:[%s13944_s12 + $0x1c0] ss:$8 sps:$4 sm:$0xff]  }
0x10a0   :  { %v6978_v4 = vmax.f32 %v6690_v34, 0.0  ;;  %v6980_v48 = vmax.f32 %v6803_v5, 0.0  ;;  %7733 = vmatprep.subr.bf16.mxu0 %v9400_v39 }
0x10a1   :  { %v7047_v16 = vpack.c.bf16 %v6977_v50, %v6972_v23  ;;  %v13627_v17 = vpack.c.bf16 %v6979_v54, %v6974_v26  ;;  %v9409_v23 = vld [vmem:[%s13944_s12 + $0x1d4] ss:$8 sps:$4 sm:$0xff]  }
0x10a2   :  { %v7048_v31 = vpack.c.bf16 %v6978_v4, %v6973_v57  ;;  %v13629_v35 = vpack.c.bf16 %v6980_v48, %v6975_v27  ;;  %v6693_v38 = vpop.f32.mrb[232].mxu1  ;;  %v6806_v59 = vpop.f32.mrb[168].mxu0 }
0x10a3   :  { %v6694_v44 = vadd.f32 %v6693_v38, %v13529_v53  ;;  %v6807_v10 = vadd.f32 %v6806_v59, %v13532_v12  ;;  %v6695_v63 = vpop.f32.mrb[233].mxu1  ;;  %v6808_v43 = vpop.f32.mrb[169].mxu0  ;;  %7734 = vmatpush1.bf16.msra.mxu0 %v9398_v2 }
0x10a4   :  { %v6696_v46 = vadd.f32 %v6695_v63, %v13536_v7  ;;  %v6809_v9 = vadd.f32 %v6808_v43, %v13539_v47  ;;  %v6697_v41 = vpop.f32.mrb[234].mxu1  ;;  %v6810_v62 = vpop.f32.mrb[170].mxu0  ;;  %7642 = vmatprep.mubr.bf16.mxu0 %v7048_v31  ;;  %7735 = vmatprep.subr.bf16.mxu0 %v9403_v55  ;;  %v9407_v31 = vld [vmem:[%s13944_s12 + $0x1d0] ss:$8 sps:$4 sm:$0xff]   ;;  %v9412_v63 = vld [vmem:[%s13944_s12 + $0x1e4] ss:$8 sps:$4 sm:$0xff]  }
0x10a5   :  { %v6698_v15 = vadd.f32 %v6697_v41, %v13529_v53  ;;  %v6811_v6 = vadd.f32 %v6810_v62, %v13532_v12  ;;  %v6699_v45 = vpop.f32.mrb[235].mxu1  ;;  %v6812_v40 = vpop.f32.mrb[171].mxu0  ;;  %7643 = vmatmul.mubr.bf16.gmra.mrb[196].mxu0 %v7047_v16  ;;  %v6982_v19 = vmax.f32 %v6694_v44, 0.0  ;;  %v6984_v25 = vmax.f32 %v6807_v10, 0.0 }
0x10a6   :  { %v6700_v58 = vadd.f32 %v6699_v45, %v13536_v7  ;;  %v6813_v33 = vadd.f32 %v6812_v40, %v13539_v47  ;;  %v6983_v21 = vmax.f32 %v6696_v46, 0.0  ;;  %v6985_v61 = vmax.f32 %v6809_v9, 0.0  ;;  %v9410_v40 = vld [vmem:[%s13944_s12 + $0x1e0] ss:$8 sps:$4 sm:$0xff]  }
0x10a7   :  { %v6987_v39 = vmax.f32 %v6698_v15, 0.0  ;;  %v6989_v51 = vmax.f32 %v6811_v6, 0.0  ;;  %7736 = vmatpush1.bf16.msra.mxu0 %v9401_v24 }
0x10a8   :  { %v6988_v34 = vmax.f32 %v6700_v58, 0.0  ;;  %v6990_v5 = vmax.f32 %v6813_v33, 0.0  ;;  %7737 = vmatprep.subr.bf16.mxu0 %v9406_v22 }
0x10a9   :  { %v7052_v26 = vpack.c.bf16 %v6987_v39, %v6982_v19  ;;  %v13651_v50 = vpack.c.bf16 %v6989_v51, %v6984_v25  ;;  %v9415_v39 = vld [vmem:[%s13944_s12 + $0x1f4] ss:$8 sps:$4 sm:$0xff]  }
0x10aa   :  { %v7053_v54 = vpack.c.bf16 %v6988_v34, %v6983_v21  ;;  %v13653_v2 = vpack.c.bf16 %v6990_v5, %v6985_v61  ;;  %v6703_v57 = vpop.f32.mrb[236].mxu1  ;;  %v6816_v27 = vpop.f32.mrb[172].mxu0 }
0x10ab   :  { %v6704_v4 = vadd.f32 %v6703_v57, %v13529_v53  ;;  %v6817_v48 = vadd.f32 %v6816_v27, %v13532_v12  ;;  %v6705_v55 = vpop.f32.mrb[237].mxu1  ;;  %v6818_v16 = vpop.f32.mrb[173].mxu0  ;;  %7738 = vmatpush1.bf16.msra.mxu0 %v9404_v18  ;;  %v9413_v27 = vld [vmem:[%s13944_s12 + $0x1f0] ss:$8 sps:$4 sm:$0xff]  }
0x10ac   :  { %v6706_v38 = vadd.f32 %v6705_v55, %v13536_v7  ;;  %v6819_v59 = vadd.f32 %v6818_v16, %v13539_v47  ;;  %v6707_v44 = vpop.f32.mrb[238].mxu1  ;;  %v6820_v10 = vpop.f32.mrb[174].mxu0  ;;  %7652 = vmatprep.mubr.bf16.mxu0 %v7053_v54  ;;  %7739 = vmatprep.subr.bf16.mxu0 %v9409_v23 }
0x10ad   :  { %v6708_v43 = vadd.f32 %v6707_v44, %v13529_v53  ;;  %v6821_v24 = vadd.f32 %v6820_v10, %v13532_v12  ;;  %v6709_v46 = vpop.f32.mrb[239].mxu1  ;;  %v6822_v9 = vpop.f32.mrb[175].mxu0  ;;  %7653 = vmatmul.mubr.bf16.gmra.mrb[200].mxu0 %v7052_v26  ;;  %v6992_v22 = vmax.f32 %v6704_v4, 0.0  ;;  %v6994_v15 = vmax.f32 %v6817_v48, 0.0 }
0x10ae   :  { %v6710_v41 = vadd.f32 %v6709_v46, %v13536_v7  ;;  %v6823_v62 = vadd.f32 %v6822_v9, %v13539_v47  ;;  %v6993_v58 = vmax.f32 %v6706_v38, 0.0  ;;  %v6995_v33 = vmax.f32 %v6819_v59, 0.0 }
0x10af   :  { %v6997_v6 = vmax.f32 %v6708_v43, 0.0  ;;  %v6999_v45 = vmax.f32 %v6821_v24, 0.0  ;;  %7740 = vmatpush1.bf16.msra.mxu0 %v9407_v31  ;;  %v9418_v31 = vld [vmem:[%s13944_s12 + $0x204] ss:$8 sps:$4 sm:$0xff]  }
0x10b0   :  { %v6998_v19 = vmax.f32 %v6710_v41, 0.0  ;;  %v7000_v25 = vmax.f32 %v6823_v62, 0.0  ;;  %7741 = vmatprep.subr.bf16.mxu0 %v9412_v63 }
0x10b1   :  { %v7057_v51 = vpack.c.bf16 %v6997_v6, %v6992_v22  ;;  %v13675_v18 = vpack.c.bf16 %v6999_v45, %v6994_v15 }
0x10b2   :  { %v7058_v21 = vpack.c.bf16 %v6998_v19, %v6993_v58  ;;  %v13677_v61 = vpack.c.bf16 %v7000_v25, %v6995_v33  ;;  %v6713_v34 = vpop.f32.mrb[240].mxu1  ;;  %v6826_v5 = vpop.f32.mrb[176].mxu0 }
0x10b3   :  { %v6714_v23 = vadd.f32 %v6713_v34, %v13529_v53  ;;  %v6827_v26 = vadd.f32 %v6826_v5, %v13532_v12  ;;  %v6715_v54 = vpop.f32.mrb[241].mxu1  ;;  %v6828_v57 = vpop.f32.mrb[177].mxu0  ;;  %7742 = vmatpush1.bf16.msra.mxu0 %v9410_v40 }
0x10b4   :  { %v6716_v4 = vadd.f32 %v6715_v54, %v13536_v7  ;;  %v6829_v48 = vadd.f32 %v6828_v57, %v13539_v47  ;;  %v6717_v55 = vpop.f32.mrb[242].mxu1  ;;  %v6830_v16 = vpop.f32.mrb[178].mxu0  ;;  %7662 = vmatprep.mubr.bf16.mxu0 %v7058_v21  ;;  %7743 = vmatprep.subr.bf16.mxu0 %v9415_v39 }
0x10b5   :  { %v6718_v38 = vadd.f32 %v6717_v55, %v13529_v53  ;;  %v6831_v59 = vadd.f32 %v6830_v16, %v13532_v12  ;;  %v6719_v44 = vpop.f32.mrb[243].mxu1  ;;  %v6832_v10 = vpop.f32.mrb[179].mxu0  ;;  %7663 = vmatmul.mubr.bf16.gmra.mrb[204].mxu0 %v7057_v51  ;;  %v7002_v24 = vmax.f32 %v6714_v23, 0.0  ;;  %v7004_v46 = vmax.f32 %v6827_v26, 0.0 }
0x10b6   :  { %v6720_v63 = vadd.f32 %v6719_v44, %v13536_v7  ;;  %v6833_v43 = vadd.f32 %v6832_v10, %v13539_v47  ;;  %v7003_v62 = vmax.f32 %v6716_v4, 0.0  ;;  %v7005_v22 = vmax.f32 %v6829_v48, 0.0 }
0x10b7   :  { %v7007_v9 = vmax.f32 %v6718_v38, 0.0  ;;  %v7009_v41 = vmax.f32 %v6831_v59, 0.0  ;;  %7744 = vmatpush1.bf16.msra.mxu0 %v9413_v27 }
0x10b8   :  { %v7008_v15 = vmax.f32 %v6720_v63, 0.0  ;;  %v7010_v6 = vmax.f32 %v6833_v43, 0.0  ;;  %7826 = vmatprep.subr.bf16.mxu0 %v9418_v31 }
0x10b9   :  { %v7062_v45 = vpack.c.bf16 %v7007_v9, %v7002_v24  ;;  %v13693_v40 = vpack.c.bf16 %v7009_v41, %v7004_v46 }
0x10ba   :  { %v7063_v58 = vpack.c.bf16 %v7008_v15, %v7003_v62  ;;  %v13695_v33 = vpack.c.bf16 %v7010_v6, %v7005_v22  ;;  %v6723_v19 = vpop.f32.mrb[244].mxu1  ;;  %v6836_v25 = vpop.f32.mrb[180].mxu0 }
0x10bb   :  { %v6724_v39 = vadd.f32 %v6723_v19, %v13529_v53  ;;  %v6837_v51 = vadd.f32 %v6836_v25, %v13532_v12  ;;  %v6725_v21 = vpop.f32.mrb[245].mxu1  ;;  %v6838_v34 = vpop.f32.mrb[181].mxu0 }
0x10bc   :  { %v6726_v5 = vadd.f32 %v6725_v21, %v13536_v7  ;;  %v6839_v23 = vadd.f32 %v6838_v34, %v13539_v47  ;;  %v6727_v26 = vpop.f32.mrb[246].mxu1  ;;  %v6840_v54 = vpop.f32.mrb[182].mxu0  ;;  %7672 = vmatprep.mubr.bf16.mxu0 %v7063_v58 }
0x10bd   :  { %v6728_v57 = vadd.f32 %v6727_v26, %v13529_v53  ;;  %v6841_v27 = vadd.f32 %v6840_v54, %v13532_v12  ;;  %v6729_v4 = vpop.f32.mrb[247].mxu1  ;;  %v6842_v48 = vpop.f32.mrb[183].mxu0  ;;  %7673 = vmatmul.mubr.bf16.gmra.mrb[208].mxu0 %v7062_v45  ;;  %v7012_v31 = vmax.f32 %v6724_v39, 0.0  ;;  %v7014_v38 = vmax.f32 %v6837_v51, 0.0 }
0x10be   :  { %v6730_v55 = vadd.f32 %v6729_v4, %v13536_v7  ;;  %v6843_v16 = vadd.f32 %v6842_v48, %v13539_v47  ;;  %v7013_v10 = vmax.f32 %v6726_v5, 0.0  ;;  %v7015_v63 = vmax.f32 %v6839_v23, 0.0 }
0x10bf   :  { %v7017_v59 = vmax.f32 %v6728_v57, 0.0  ;;  %v7019_v44 = vmax.f32 %v6841_v27, 0.0 }
0x10c0   :  { %v7018_v43 = vmax.f32 %v6730_v55, 0.0  ;;  %v7020_v24 = vmax.f32 %v6843_v16, 0.0 }
0x10c1   :  { %v7067_v46 = vpack.c.bf16 %v7017_v59, %v7012_v31  ;;  %v13705_v9 = vpack.c.bf16 %v7019_v44, %v7014_v38 }
0x10c2   :  { %v7068_v41 = vpack.c.bf16 %v7018_v43, %v7013_v10  ;;  %v13707_v62 = vpack.c.bf16 %v7020_v24, %v7015_v63 }
0x10c4   :  { %7682 = vmatprep.mubr.bf16.mxu0 %v7068_v41  ;;  %v6338_v41 = vsub.s32 4, %v14262_v28 }
0x10c5   :  { %7683 = vmatmul.mubr.bf16.gmra.mrb[212].mxu0 %v7067_v46 }
0x10d9   :  { %v6733_v22 = vpop.f32.mrb[248].mxu1  ;;  %v6846_v15 = vpop.f32.mrb[184].mxu0 }
0x10da   :  { %v6734_v6 = vadd.f32 %v6733_v22, %v13529_v53  ;;  %v6847_v45 = vadd.f32 %v6846_v15, %v13532_v12  ;;  %v6735_v58 = vpop.f32.mrb[249].mxu1  ;;  %v6848_v19 = vpop.f32.mrb[185].mxu0 }
0x10db   :  { %v6736_v25 = vadd.f32 %v6735_v58, %v13536_v7  ;;  %v6849_v39 = vadd.f32 %v6848_v19, %v13539_v47  ;;  %v6737_v51 = vpop.f32.mrb[250].mxu1  ;;  %v6850_v21 = vpop.f32.mrb[186].mxu0 }
0x10dc   :  { %v6738_v34 = vadd.f32 %v6737_v51, %v13529_v53  ;;  %v6851_v5 = vadd.f32 %v6850_v21, %v13532_v12  ;;  %v6739_v23 = vpop.f32.mrb[251].mxu1  ;;  %v6852_v26 = vpop.f32.mrb[187].mxu0  ;;  %v7022_v27 = vmax.f32 %v6734_v6, 0.0  ;;  %v7024_v4 = vmax.f32 %v6847_v45, 0.0 }
0x10dd   :  { %v6740_v54 = vadd.f32 %v6739_v23, %v13536_v7  ;;  %v6853_v57 = vadd.f32 %v6852_v26, %v13539_v47  ;;  %v7023_v16 = vmax.f32 %v6736_v25, 0.0  ;;  %v7025_v31 = vmax.f32 %v6849_v39, 0.0 }
0x10de   :  { %v7027_v48 = vmax.f32 %v6738_v34, 0.0  ;;  %v7029_v55 = vmax.f32 %v6851_v5, 0.0  ;;  %v13731_v26 = vrot.slane %v13524_v11, %v6338_v41 }
0x10df   :  { %v7028_v38 = vmax.f32 %v6740_v54, 0.0  ;;  %v7030_v59 = vmax.f32 %v6853_v57, 0.0 }
0x10e0   :  { %v7072_v44 = vpack.c.bf16 %v7027_v48, %v7022_v27  ;;  %v13717_v10 = vpack.c.bf16 %v7029_v55, %v7024_v4 }
0x10e1   :  { %v7073_v63 = vpack.c.bf16 %v7028_v38, %v7023_v16  ;;  %v13719_v43 = vpack.c.bf16 %v7030_v59, %v7025_v31 }
0x10e3   :  { %7692 = vmatprep.mubr.bf16.mxu0 %v7073_v63 }
0x10e4   :  { %7693 = vmatmul.mubr.bf16.gmra.mrb[216].mxu0 %v7072_v44 }
0x10e5   :  { %v6743_v24 = vpop.f32.mrb[252].mxu1  ;;  %v6856_v46 = vpop.f32.mrb[188].mxu0 }
0x10e6   :  { %v6744_v22 = vadd.f32 %v6743_v24, %v13529_v53  ;;  %v6857_v15 = vadd.f32 %v6856_v46, %v13532_v12  ;;  %v6745_v6 = vpop.f32.mrb[253].mxu1  ;;  %v6858_v45 = vpop.f32.mrb[189].mxu0 }
0x10e7   :  { %v6746_v58 = vadd.f32 %v6745_v6, %v13536_v7  ;;  %v6859_v19 = vadd.f32 %v6858_v45, %v13539_v47  ;;  %v6747_v25 = vpop.f32.mrb[254].mxu1  ;;  %v6860_v39 = vpop.f32.mrb[190].mxu0  ;;  %v9416_v6 = vld [vmem:[%s13944_s12 + $0x200] ss:$8 sps:$4 sm:$0xff]  }
0x10e8   :  { %v6748_v51 = vadd.f32 %v6747_v25, %v13529_v53  ;;  %v6861_v21 = vadd.f32 %v6860_v39, %v13532_v12  ;;  %v6749_v34 = vpop.f32.mrb[255].mxu1  ;;  %v6862_v5 = vpop.f32.mrb[191].mxu0  ;;  %v7032_v54 = vmax.f32 %v6744_v22, 0.0  ;;  %v7034_v57 = vmax.f32 %v6857_v15, 0.0 }
0x10e9   :  { %v6750_v28 = vadd.f32 %v6749_v34, %v13536_v7  ;;  %v6863_v23 = vadd.f32 %v6862_v5, %v13539_v47  ;;  %v7033_v48 = vmax.f32 %v6746_v58, 0.0  ;;  %v7035_v55 = vmax.f32 %v6859_v19, 0.0  ;;  %v9421_v19 = vld [vmem:[%s13944_s12 + $0x214] ss:$8 sps:$4 sm:$0xff]   ;;  %v9424_v5 = vld [vmem:[%s13944_s12 + $0x224] ss:$8 sps:$4 sm:$0xff]  }
0x10ea   :  { %v7037_v27 = vmax.f32 %v6748_v51, 0.0  ;;  %v7039_v4 = vmax.f32 %v6861_v21, 0.0  ;;  %v9419_v51 = vld [vmem:[%s13944_s12 + $0x210] ss:$8 sps:$4 sm:$0xff]  }
0x10eb   :  { %v7038_v16 = vmax.f32 %v6750_v28, 0.0  ;;  %v7040_v31 = vmax.f32 %v6863_v23, 0.0 }
0x10ec   :  { %v7077_v53 = vpack.c.bf16 %v7037_v27, %v7032_v54  ;;  %v13733_v38 = vpack.c.bf16 %v7039_v4, %v7034_v57  ;;  %v9427_v57 = vld [vmem:[%s13944_s12 + $0x234] ss:$8 sps:$4 sm:$0xff]  }
0x10ed   :  { %v7078_v12 = vpack.c.bf16 %v7038_v16, %v7033_v48  ;;  %v13735_v59 = vpack.c.bf16 %v7040_v31, %v7035_v55  ;;  %v6899_v7 = vpop.f32.mrb[0].mxu1  ;;  %v9425_v55 = vld [vmem:[%s13944_s12 + $0x230] ss:$8 sps:$4 sm:$0xff]  }
0x10ee   :  { %v6900_v47 = vadd.f32 %v6899_v7, %v13731_v26  ;;  %v6901_v44 = vpop.f32.mrb[1].mxu1 }
0x10ef   :  { %v6902_v11 = vpop.f32.mrb[2].mxu1  ;;  %7702 = vmatprep.mubr.bf16.mxu0 %v7078_v12  ;;  %v9433_v44 = vld [vmem:[%s13944_s12 + $0x254] ss:$8 sps:$4 sm:$0xff]  }
0x10f0   :  { %v6903_v63 = vadd.f32 %v6902_v11, %v13731_v26  ;;  %v6904_v24 = vpop.f32.mrb[3].mxu1  ;;  %7703 = vmatmul.mubr.bf16.gmra.mrb[220].mxu0 %v7077_v53  ;;  %v6966_v46 = vmax.f32 %v6900_v47, 0.0  ;;  %v9430_v53 = vld [vmem:[%s13944_s12 + $0x244] ss:$8 sps:$4 sm:$0xff]  }
0x10f1   :  { %7745 = vmatprep.mubr.bf16.mxu0 %v13551_v37 }
0x10f2   :  { %v6971_v41 = vmax.f32 %v6903_v63, 0.0 }
0x10f4   :  { %v13740_v22 = vpack.c.bf16 %v6971_v41, %v6966_v46  ;;  %v9431_v46 = vld [vmem:[%s13944_s12 + $0x250] ss:$8 sps:$4 sm:$0xff]  }
0x10f5   :  { %v6907_v15 = vpop.f32.mrb[4].mxu1 }
0x10f6   :  { %v6908_v45 = vadd.f32 %v6907_v15, %v13731_v26  ;;  %v6909_v58 = vpop.f32.mrb[5].mxu1 }
0x10f7   :  { %v6910_v25 = vpop.f32.mrb[6].mxu1 }
0x10f8   :  { %v6911_v39 = vadd.f32 %v6910_v25, %v13731_v26  ;;  %v6912_v37 = vpop.f32.mrb[7].mxu1  ;;  %7746 = vmatmul.mubr.bf16.vlgmr.msra.gmra.mrb[192].mxu0 %v13549_v3  ;;  %v6976_v21 = vmax.f32 %v6908_v45, 0.0  ;;  %v9422_v3 = vld [vmem:[%s13944_s12 + $0x220] ss:$8 sps:$4 sm:$0xff]   ;;  %v7160_v45 = vld [vmem:[%s13944_s12 + $0x270] sm:$0xff] }
0x10f9   :  { %7755 = vmatprep.mubr.bf16.mxu0 %v13629_v35  ;;  %7827 = vmatpush1.bf16.msra.mxu0 %v9416_v6  ;;  %v9436_v6 = vld [vmem:[%s13944_s12 + $0x264] ss:$8 sps:$4 sm:$0xff]   ;;  %v8355_v37 = vcombine.low %v7160_v45, %v7160_v45 }
0x10fa   :  { %v6981_v34 = vmax.f32 %v6911_v39, 0.0  ;;  %7828 = vmatprep.subr.bf16.mxu0 %v9421_v19  ;;  %v8356_v39 = vcombine.high %v7160_v45, %v7160_v45 }
0x10fc   :  { %v13758_v28 = vpack.c.bf16 %v6981_v34, %v6976_v21 }
0x10fd   :  { %v6915_v23 = vpop.f32.mrb[8].mxu1  ;;  %7829 = vmatpush1.bf16.msra.mxu0 %v9419_v51 }
0x10fe   :  { %v6916_v35 = vadd.f32 %v6915_v23, %v13731_v26  ;;  %v6917_v54 = vpop.f32.mrb[9].mxu1  ;;  %7830 = vmatprep.subr.bf16.mxu0 %v9424_v5 }
0x10ff   :  { %v6918_v27 = vpop.f32.mrb[10].mxu1 }
0x1100   :  { %v6919_v4 = vadd.f32 %v6918_v27, %v13731_v26  ;;  %v6920_v48 = vpop.f32.mrb[11].mxu1  ;;  %7756 = vmatmul.mubr.bf16.gmra.mrb[196].mxu0 %v13627_v17  ;;  %v6986_v16 = vmax.f32 %v6916_v35, 0.0  ;;  %v9428_v17 = vld [vmem:[%s13944_s12 + $0x240] ss:$8 sps:$4 sm:$0xff]  }
0x1101   :  { %7765 = vmatprep.mubr.bf16.mxu0 %v13653_v2  ;;  %7831 = vmatpush1.bf16.msra.mxu0 %v9422_v3  ;;  %v7595_v3 = vsel %vm7593_vm12, %v8355_v37, 0 }
0x1102   :  { %v6991_v31 = vmax.f32 %v6919_v4, 0.0  ;;  %7832 = vmatprep.subr.bf16.mxu0 %v9427_v57 }
0x1104   :  { %v13776_v12 = vpack.c.bf16 %v6991_v31, %v6986_v16 }
0x1105   :  { %v6923_v7 = vpop.f32.mrb[12].mxu1  ;;  %7833 = vmatpush1.bf16.msra.mxu0 %v9425_v55 }
0x1106   :  { %v6924_v2 = vadd.f32 %v6923_v7, %v13731_v26  ;;  %v6925_v47 = vpop.f32.mrb[13].mxu1  ;;  %7834 = vmatprep.subr.bf16.mxu0 %v9430_v53 }
0x1107   :  { %v6926_v11 = vpop.f32.mrb[14].mxu1 }
0x1108   :  { %v6927_v63 = vadd.f32 %v6926_v11, %v13731_v26  ;;  %v6928_v24 = vpop.f32.mrb[15].mxu1  ;;  %7766 = vmatmul.mubr.bf16.gmra.mrb[200].mxu0 %v13651_v50  ;;  %v6996_v41 = vmax.f32 %v6924_v2, 0.0 }
0x1109   :  { %7775 = vmatprep.mubr.bf16.mxu0 %v13677_v61  ;;  %7835 = vmatpush1.bf16.msra.mxu0 %v9428_v17  ;;  %v9434_v61 = vld [vmem:[%s13944_s12 + $0x260] ss:$8 sps:$4 sm:$0xff]  }
0x110a   :  { %v7001_v15 = vmax.f32 %v6927_v63, 0.0  ;;  %7836 = vmatprep.subr.bf16.mxu0 %v9433_v44 }
0x110c   :  { %v13797_v58 = vpack.c.bf16 %v7001_v15, %v6996_v41 }
0x110d   :  { %v6931_v50 = vpop.f32.mrb[16].mxu1  ;;  %7837 = vmatpush1.bf16.msra.mxu0 %v9431_v46 }
0x110e   :  { %v6932_v19 = vadd.f32 %v6931_v50, %v13731_v26  ;;  %v6933_v25 = vpop.f32.mrb[17].mxu1  ;;  %7838 = vmatprep.subr.bf16.mxu0 %v9436_v6 }
0x110f   :  { %v6934_v51 = vpop.f32.mrb[18].mxu1 }
0x1110   :  { %v6935_v21 = vadd.f32 %v6934_v51, %v13731_v26  ;;  %v6936_v34 = vpop.f32.mrb[19].mxu1  ;;  %7776 = vmatmul.mubr.bf16.gmra.mrb[204].mxu0 %v13675_v18  ;;  %v7006_v5 = vmax.f32 %v6932_v19, 0.0 }
0x1111   :  { %7785 = vmatprep.mubr.bf16.mxu0 %v13695_v33  ;;  %7839 = vmatpush1.bf16.msra.mxu0 %v9434_v61 }
0x1112   :  { %v7011_v23 = vmax.f32 %v6935_v21, 0.0  ;;  %8357 = vmatprep.subr.msk.bf16.mxu0 %vm7593_vm12, %v8356_v39 }
0x1114   :  { %v7066_v35 = vpack.c.bf16 %v7011_v23, %v7006_v5 }
0x1115   :  { %v6939_v54 = vpop.f32.mrb[20].mxu1  ;;  %7841 = vmatpush1.bf16.msra.mxu0 %v7595_v3 }
0x1116   :  { %v6940_v57 = vadd.f32 %v6939_v54, %v13731_v26  ;;  %v6941_v27 = vpop.f32.mrb[21].mxu1 }
0x1117   :  { %v6942_v4 = vpop.f32.mrb[22].mxu1 }
0x1118   :  { %v6943_v48 = vadd.f32 %v6942_v4, %v13731_v26  ;;  %v6944_v55 = vpop.f32.mrb[23].mxu1  ;;  %7786 = vmatmul.mubr.bf16.gmra.mrb[208].mxu0 %v13693_v40  ;;  %v7016_v18 = vmax.f32 %v6940_v57, 0.0 }
0x1119   :  { %7795 = vmatprep.mubr.bf16.mxu0 %v13707_v62 }
0x111a   :  { %v7021_v33 = vmax.f32 %v6943_v48, 0.0 }
0x111c   :  { %v7071_v16 = vpack.c.bf16 %v7021_v33, %v7016_v18 }
0x111d   :  { %v6947_v31 = vpop.f32.mrb[24].mxu1 }
0x111e   :  { %v6948_v53 = vadd.f32 %v6947_v31, %v13731_v26  ;;  %v6949_v7 = vpop.f32.mrb[25].mxu1 }
0x111f   :  { %v6950_v17 = vpop.f32.mrb[26].mxu1 }
0x1120   :  { %v6951_v2 = vadd.f32 %v6950_v17, %v13731_v26  ;;  %v6952_v47 = vpop.f32.mrb[27].mxu1  ;;  %7796 = vmatmul.mubr.bf16.gmra.mrb[212].mxu0 %v13705_v9  ;;  %v7026_v44 = vmax.f32 %v6948_v53, 0.0 }
0x1121   :  { %7805 = vmatprep.mubr.bf16.mxu0 %v13719_v43 }
0x1122   :  { %v7031_v11 = vmax.f32 %v6951_v2, 0.0 }
0x1124   :  { %v7076_v40 = vpack.c.bf16 %v7031_v11, %v7026_v44  ;;  %v14266_v11 = vld [vmem:[#allocation22_spill] sm:$0xff] }
0x1125   :  { %v6955_v63 = vpop.f32.mrb[28].mxu1 }
0x1126   :  { %v6956_v62 = vadd.f32 %v6955_v63, %v13731_v26  ;;  %v6957_v24 = vpop.f32.mrb[29].mxu1 }
0x1127   :  { %v6958_v46 = vpop.f32.mrb[30].mxu1 }
0x1128   :  { %v6959_v41 = vadd.f32 %v6958_v46, %v13731_v26  ;;  %v6960_v15 = vpop.f32.mrb[31].mxu1  ;;  %7806 = vmatmul.mubr.bf16.gmra.mrb[216].mxu0 %v13717_v10  ;;  %v7036_v6 = vmax.f32 %v6956_v62, 0.0  ;;  %v7161_v10 = vld [vmem:[%s13945_s13] sm:$0x3]  ;;  %s9882_s13 = smov [#allocation7]  }
0x1129   :  { %7815 = vmatprep.mubr.bf16.mxu0 %v13735_v59  ;;  %v13835_v43 = vrot.slane %v7161_v10, %v14239_v1  ;;  %v13838_v26 = vrot.slane %v7161_v10, %v14240_v52  ;;  %v14267_v15 = vld [vmem:[#allocation23_spill] sm:$0xff]  ;;  %v14268_v10 = vld [vmem:[#allocation37_spill] sm:$0xff]  ;;  %s8008_s22 = sshll.u32 %s9882_s13, 4  ;;  %s8009_s22 = int_to_ptr.vmem [resolvable:$true] %s8008_s22 }
0x112a   :  { %v7041_v45 = vmax.f32 %v6959_v41, 0.0  ;;  %s9841_s1 = scalar_lea.vmem %s8009_s22, 4096  ;;  %p9846_p3 = scmp.lt.s32.totalorder %s8009_s22, %s8009_s22 }
0x112b   :  { %p9842_p2 = scmp.ne.s32.totalorder %s8009_s22, %s9841_s1  ;;  %p9847_p4 = scmp.lt.s32.totalorder %s9841_s1, %s9841_s1 }
0x112c   :  { %v7081_v9 = vpack.c.bf16 %v7041_v45, %v7036_v6 }
0x112d   :  { %p9848_p5 = por %p9847_p4, %p9846_p3 }
0x112f   :  { %p9849_p6 = pnand %p9848_p5, %p9842_p2 }
0x1130   :  { %7816 = vmatmul.mubr.bf16.gmra.mrb[220].mxu0 %v13733_v38 }
0x1131   :  { %7858 = vmatprep.mubr.bf16.mxu0 %v14261_v56 }
0x1138   :  { %8358 = vmatmul.mubr.msk.bf16.vlgmr.msra.gmra.mrb[192].mxu0 %vm7568_vm13, %v13740_v22 }
0x1139   :  { %7868 = vmatprep.mubr.bf16.mxu0 %v14261_v56 }
0x1140   :  { %8359 = vmatmul.mubr.msk.bf16.gmra.mrb[196].mxu0 %vm7568_vm13, %v13758_v28 }
0x1141   :  { %7878 = vmatprep.mubr.bf16.mxu0 %v14261_v56 }
0x1148   :  { %8360 = vmatmul.mubr.msk.bf16.gmra.mrb[200].mxu0 %vm7568_vm13, %v13776_v12 }
0x1149   :  { %7888 = vmatprep.mubr.bf16.mxu0 %v14261_v56 }
0x1150   :  { %8361 = vmatmul.mubr.msk.bf16.gmra.mrb[204].mxu0 %vm7568_vm13, %v13797_v58 }
0x1151   :  { %7898 = vmatprep.mubr.bf16.mxu0 %v14261_v56 }
0x1158   :  { %8362 = vmatmul.mubr.msk.bf16.gmra.mrb[208].mxu0 %vm7568_vm13, %v7066_v35 }
0x1159   :  { %7908 = vmatprep.mubr.bf16.mxu0 %v14261_v56 }
0x1160   :  { %8363 = vmatmul.mubr.msk.bf16.gmra.mrb[212].mxu0 %vm7568_vm13, %v7071_v16 }
0x1161   :  { %7918 = vmatprep.mubr.bf16.mxu0 %v14261_v56 }
0x1168   :  { %8364 = vmatmul.mubr.msk.bf16.gmra.mrb[216].mxu0 %vm7568_vm13, %v7076_v40 }
0x1169   :  { %7928 = vmatprep.mubr.bf16.mxu0 %v14261_v56 }
0x1170   :  { %8365 = vmatmul.mubr.msk.bf16.gmra.mrb[220].mxu0 %vm7568_vm13, %v7081_v9 }
0x120b   :  { %v7860_v38 = vpop.f32.mrb[192].mxu0 }
0x120c   :  { %v8898_v59 = vadd.f32 %v7860_v38, %v13835_v43  ;;  %v7862_v22 = vpop.f32.mrb[193].mxu0 }
0x120d   :  { %v8899_v28 = vadd.f32 %v7862_v22, %v13838_v26  ;;  %v7864_v12 = vpop.f32.mrb[194].mxu0  ;;  %v14269_v22 = vld [vmem:[#allocation40_spill] sm:$0xff] }
0x120e   :  { %v7939_v56 = vadd.f32 %v8898_v59, %v12654_v32  ;;  %v8900_v58 = vadd.f32 %v7864_v12, %v13835_v43  ;;  %v7866_v50 = vpop.f32.mrb[195].mxu0  ;;  %v14270_v12 = vld [vmem:[#allocation20_spill] sm:$0xff] }
0x120f   :  { %v7940_v61 = vadd.f32 %v8899_v28, %v12648_v49  ;;  %v8901_v1 = vadd.f32 %v7866_v50, %v13838_v26 }
0x1210   :  { %7971 = vst [vmem:[#allocation7] sm:$0xff] %v7939_v56  ;;  %v7941_v52 = vadd.f32 %v8900_v58, %v12666_v42 }
0x1211   :  { %7972 = vst.msk [vmem:[#allocation7 + $0x8] sm:$0xff] %vm111_vm0, %v7940_v61  ;;  %v7942_v19 = vadd.f32 %v8901_v1, %v12659_v0 }
0x1212   :  { %7973 = vst [vmem:[#allocation7 + $0x10] sm:$0xff] %v7941_v52 }
0x1213   :  { %7974 = vst.msk [vmem:[#allocation7 + $0x18] sm:$0xff] %vm111_vm0, %v7942_v19  ;;  %v7870_v25 = vpop.f32.mrb[196].mxu0  ;;  %v14271_v19 = vld [vmem:[#allocation27_spill] sm:$0xff] }
0x1214   :  { %v8902_v32 = vadd.f32 %v7870_v25, %v13835_v43  ;;  %v7872_v39 = vpop.f32.mrb[197].mxu0 }
0x1215   :  { %v8903_v37 = vadd.f32 %v7872_v39, %v13838_v26  ;;  %v7874_v51 = vpop.f32.mrb[198].mxu0 }
0x1216   :  { %v7943_v49 = vadd.f32 %v8902_v32, %v12683_v20  ;;  %v8904_v21 = vadd.f32 %v7874_v51, %v13835_v43  ;;  %v7876_v34 = vpop.f32.mrb[199].mxu0 }
0x1217   :  { %v7944_v42 = vadd.f32 %v8903_v37, %v12677_v13  ;;  %v8905_v5 = vadd.f32 %v7876_v34, %v13838_v26  ;;  %v14272_v37 = vld [vmem:[#allocation39_spill] sm:$0xff] }
0x1218   :  { %7975 = vst [vmem:[#allocation7 + $0x20] sm:$0xff] %v7943_v49  ;;  %v7945_v0 = vadd.f32 %v8904_v21, %v12699_v60  ;;  %v14273_v21 = vld [vmem:[#allocation42_spill] sm:$0xff] }
0x1219   :  { %7976 = vst.msk [vmem:[#allocation7 + $0x28] sm:$0xff] %vm111_vm0, %v7944_v42  ;;  %v7946_v23 = vadd.f32 %v8905_v5, %v12689_v36  ;;  %v14274_v42 = vld [vmem:[#allocation25_spill] sm:$0xff] }
0x121a   :  { %7977 = vst [vmem:[#allocation7 + $0x30] sm:$0xff] %v7945_v0 }
0x121b   :  { %7978 = vst.msk [vmem:[#allocation7 + $0x38] sm:$0xff] %vm111_vm0, %v7946_v23  ;;  %v7880_v3 = vpop.f32.mrb[200].mxu0 }
0x121c   :  { %v8906_v20 = vadd.f32 %v7880_v3, %v13835_v43  ;;  %v7882_v35 = vpop.f32.mrb[201].mxu0 }
0x121d   :  { %v8907_v54 = vadd.f32 %v7882_v35, %v13838_v26  ;;  %v7884_v57 = vpop.f32.mrb[202].mxu0 }
0x121e   :  { %v7947_v13 = vadd.f32 %v8906_v20, %v12714_v8  ;;  %v8908_v27 = vadd.f32 %v7884_v57, %v13835_v43  ;;  %v7886_v4 = vpop.f32.mrb[203].mxu0 }
0x121f   :  { %v7948_v60 = vadd.f32 %v8907_v54, %v12708_v14  ;;  %v8909_v48 = vadd.f32 %v7886_v4, %v13838_v26  ;;  %v14263_v14 = vld [vmem:[#allocation13_spill] sm:$0xff]  ;;  %v14275_v54 = vld [vmem:[#allocation30_spill] sm:$0xff] }
0x1220   :  { %7979 = vst [vmem:[#allocation7 + $0x40] sm:$0xff] %v7947_v13  ;;  %v7949_v36 = vadd.f32 %v8908_v27, %v12726_v30  ;;  %v14264_v30 = vld [vmem:[#allocation18_spill] sm:$0xff]  ;;  %v14276_v4 = vld [vmem:[#allocation41_spill] sm:$0xff] }
0x1221   :  { %7980 = vst.msk [vmem:[#allocation7 + $0x48] sm:$0xff] %vm111_vm0, %v7948_v60  ;;  %v7950_v55 = vadd.f32 %v8909_v48, %v12719_v29  ;;  %v14265_v29 = vld [vmem:[#allocation38_spill] sm:$0xff] }
0x1222   :  { %7981 = vst [vmem:[#allocation7 + $0x50] sm:$0xff] %v7949_v36  ;;  %v14277_v36 = vld [vmem:[#allocation44_spill] sm:$0xff] }
0x1223   :  { %7982 = vst.msk [vmem:[#allocation7 + $0x58] sm:$0xff] %vm111_vm0, %v7950_v55  ;;  %v7890_v18 = vpop.f32.mrb[204].mxu0 }
0x1224   :  { %v8910_v8 = vadd.f32 %v7890_v18, %v13835_v43  ;;  %v7892_v33 = vpop.f32.mrb[205].mxu0  ;;  %v14278_v18 = vld [vmem:[#allocation29_spill] sm:$0xff] }
0x1225   :  { %v8911_v16 = vadd.f32 %v7892_v33, %v13838_v26  ;;  %v7894_v31 = vpop.f32.mrb[206].mxu0 }
0x1226   :  { %v7951_v53 = vadd.f32 %v8910_v8, %v14263_v14  ;;  %v8912_v7 = vadd.f32 %v7894_v31, %v13835_v43  ;;  %v7896_v17 = vpop.f32.mrb[207].mxu0 }
0x1227   :  { %v7952_v2 = vadd.f32 %v8911_v16, %v14264_v30  ;;  %v8913_v47 = vadd.f32 %v7896_v17, %v13838_v26 }
0x1228   :  { %7983 = vst [vmem:[#allocation7 + $0x60] sm:$0xff] %v7951_v53  ;;  %v7953_v44 = vadd.f32 %v8912_v7, %v14265_v29  ;;  %v14279_v7 = vld [vmem:[#allocation32_spill] sm:$0xff] }
0x1229   :  { %7984 = vst.msk [vmem:[#allocation7 + $0x68] sm:$0xff] %vm111_vm0, %v7952_v2  ;;  %v7954_v40 = vadd.f32 %v8913_v47, %v14266_v11  ;;  %v14280_v47 = vld [vmem:[#allocation43_spill] sm:$0xff]  ;;  %v14281_v11 = vld [vmem:[#allocation46_spill] sm:$0xff] }
0x122a   :  { %7985 = vst [vmem:[#allocation7 + $0x70] sm:$0xff] %v7953_v44 }
0x122b   :  { %7986 = vst.msk [vmem:[#allocation7 + $0x78] sm:$0xff] %vm111_vm0, %v7954_v40  ;;  %v7900_v63 = vpop.f32.mrb[208].mxu0 }
0x122c   :  { %v8914_v62 = vadd.f32 %v7900_v63, %v13835_v43  ;;  %v7902_v24 = vpop.f32.mrb[209].mxu0  ;;  %v14282_v63 = vld [vmem:[#allocation31_spill] sm:$0xff] }
0x122d   :  { %v8915_v46 = vadd.f32 %v7902_v24, %v13838_v26  ;;  %v7904_v41 = vpop.f32.mrb[210].mxu0 }
0x122e   :  { %v7955_v6 = vadd.f32 %v8914_v62, %v14267_v15  ;;  %v8916_v45 = vadd.f32 %v7904_v41, %v13835_v43  ;;  %v7906_v9 = vpop.f32.mrb[211].mxu0 }
0x122f   :  { %v7956_v38 = vadd.f32 %v8915_v46, %v14268_v10  ;;  %v8917_v59 = vadd.f32 %v7906_v9, %v13838_v26 }
0x1230   :  { %7987 = vst [vmem:[#allocation7 + $0x80] sm:$0xff] %v7955_v6  ;;  %v7957_v28 = vadd.f32 %v8916_v45, %v14269_v22 }
0x1231   :  { %7988 = vst.msk [vmem:[#allocation7 + $0x88] sm:$0xff] %vm111_vm0, %v7956_v38  ;;  %v7958_v56 = vadd.f32 %v8917_v59, %v14270_v12 }
0x1232   :  { %7989 = vst [vmem:[#allocation7 + $0x90] sm:$0xff] %v7957_v28 }
0x1233   :  { %7990 = vst.msk [vmem:[#allocation7 + $0x98] sm:$0xff] %vm111_vm0, %v7958_v56  ;;  %v7910_v58 = vpop.f32.mrb[212].mxu0 }
0x1234   :  { %v8918_v50 = vadd.f32 %v7910_v58, %v13835_v43  ;;  %v7912_v61 = vpop.f32.mrb[213].mxu0 }
0x1235   :  { %v8919_v1 = vadd.f32 %v7912_v61, %v13838_v26  ;;  %v7914_v52 = vpop.f32.mrb[214].mxu0 }
0x1236   :  { %v7959_v25 = vadd.f32 %v8918_v50, %v14271_v19  ;;  %v8920_v32 = vadd.f32 %v7914_v52, %v13835_v43  ;;  %v7916_v39 = vpop.f32.mrb[215].mxu0 }
0x1237   :  { %v7960_v51 = vadd.f32 %v8919_v1, %v14272_v37  ;;  %v8921_v49 = vadd.f32 %v7916_v39, %v13838_v26 }
0x1238   :  { %7991 = vst [vmem:[#allocation7 + $0xa0] sm:$0xff] %v7959_v25  ;;  %v7961_v34 = vadd.f32 %v8920_v32, %v14273_v21 }
0x1239   :  { %7992 = vst.msk [vmem:[#allocation7 + $0xa8] sm:$0xff] %vm111_vm0, %v7960_v51  ;;  %v7962_v5 = vadd.f32 %v8921_v49, %v14274_v42 }
0x123a   :  { %7993 = vst [vmem:[#allocation7 + $0xb0] sm:$0xff] %v7961_v34 }
0x123b   :  { %7994 = vst.msk [vmem:[#allocation7 + $0xb8] sm:$0xff] %vm111_vm0, %v7962_v5  ;;  %v7920_v0 = vpop.f32.mrb[216].mxu0 }
0x123c   :  { %v8922_v23 = vadd.f32 %v7920_v0, %v13835_v43  ;;  %v7922_v3 = vpop.f32.mrb[217].mxu0 }
0x123d   :  { %v8923_v20 = vadd.f32 %v7922_v3, %v13838_v26  ;;  %v7924_v35 = vpop.f32.mrb[218].mxu0 }
0x123e   :  { %v7963_v57 = vadd.f32 %v8922_v23, %v14275_v54  ;;  %v8924_v13 = vadd.f32 %v7924_v35, %v13835_v43  ;;  %v7926_v27 = vpop.f32.mrb[219].mxu0 }
0x123f   :  { %v7964_v60 = vadd.f32 %v8923_v20, %v14276_v4  ;;  %v8925_v48 = vadd.f32 %v7926_v27, %v13838_v26 }
0x1240   :  { %7995 = vst [vmem:[#allocation7 + $0xc0] sm:$0xff] %v7963_v57  ;;  %v7965_v55 = vadd.f32 %v8924_v13, %v14277_v36 }
0x1241   :  { %7996 = vst.msk [vmem:[#allocation7 + $0xc8] sm:$0xff] %vm111_vm0, %v7964_v60  ;;  %v7966_v8 = vadd.f32 %v8925_v48, %v14278_v18 }
0x1242   :  { %7997 = vst [vmem:[#allocation7 + $0xd0] sm:$0xff] %v7965_v55 }
0x1243   :  { %7998 = vst.msk [vmem:[#allocation7 + $0xd8] sm:$0xff] %vm111_vm0, %v7966_v8  ;;  %v7930_v33 = vpop.f32.mrb[220].mxu0 }
0x1244   :  { %v8926_v16 = vadd.f32 %v7930_v33, %v13835_v43  ;;  %v7932_v31 = vpop.f32.mrb[221].mxu0 }
0x1245   :  { %v8927_v14 = vadd.f32 %v7932_v31, %v13838_v26  ;;  %v7934_v53 = vpop.f32.mrb[222].mxu0 }
0x1246   :  { %v7967_v17 = vadd.f32 %v8926_v16, %v14279_v7  ;;  %v8928_v30 = vadd.f32 %v7934_v53, %v13835_v43  ;;  %v7936_v2 = vpop.f32.mrb[223].mxu0 }
0x1247   :  { %v7968_v29 = vadd.f32 %v8927_v14, %v14280_v47  ;;  %v8929_v44 = vadd.f32 %v7936_v2, %v13838_v26 }
0x1248   :  { %7999 = vst [vmem:[#allocation7 + $0xe0] sm:$0xff] %v7967_v17  ;;  %v7969_v40 = vadd.f32 %v8928_v30, %v14281_v11 }
0x1249   :  { %8000 = vst.msk [vmem:[#allocation7 + $0xe8] sm:$0xff] %vm111_vm0, %v7968_v29  ;;  %v7970_v62 = vadd.f32 %v8929_v44, %v14282_v63 }
0x124a   :  { %8001 = vst [vmem:[#allocation7 + $0xf0] sm:$0xff] %v7969_v40 }
0x124b   :  { %8002 = vst.msk [vmem:[#allocation7 + $0xf8] sm:$0xff] %vm111_vm0, %v7970_v62 }
0x124c   :  { %9852 = shalt.err (!%p9849_p6)
}
0x124d   :  { %s9853_s25 = scalar_lea.hbm %s13946_s14, 4096 }
0x124e   :  { %p9854_p7 = scmp.ne.s32.totalorder %s13946_s14, %s9853_s25  ;;  %p9857_p8 = scmp.lt.u32.totalorder %s9853_s25, %s13946_s14 }
0x1250   :  { %p9859_p9 = pnand %p9857_p8, %p9854_p7 }
0x1252   :  { %9862 = shalt.err (!%p9859_p9)
}
0x1253   :  { %s9883_s15 = smov 256   ;;  %s9884_s6 = smov 16  }
0x1254   :  { %8014 = dma.vmem_to_hbm [thread:$0]  %s8009_s22, 4096, %s13946_s14, [#allocation4], %s9883_s15, %s9883_s15, %s9884_s6  }
0x1255   :  { %9867 = dma.done.wait [#allocation4], 4096  }
0x1256   :  { %9868 = vsyncadd [#allocation4], 4294963200 }
0x1257   :  { %8018 = vsyncpa [#allocation3], 1 }
0x1258   :  { %8019 = vsyncpa [#allocation6], 1 }
0x1259   :  { %8020 = vsyncpa [#allocation4], 1 }

</bundles_post_ra>
